<compile_context>
chip_gen: v7x
topology: tpu7x:2x2x1
jax: 0.10.0
libtpu: 0.0.40
codegen_flags: <defaults>
</compile_context>

<pallas_src>
import numpy as np
import jax
import jax.numpy as jnp
from jax.experimental import pallas as pl
from jax.experimental.pallas import tpu as pltpu

MXU_DTYPE = jnp.bfloat16   # matmul-operand / scratch dtype (math stays f32)
_ROW0 = 1                  # interior row offset inside the padded VMEM scratch


def _round_up(x, m):
    return (x + m - 1) // m * m


def _scratch_dims(H, W):
    """Padded-tile geometry.

    Wp is a multiple of 16 so the bf16 (Hp, Wp, C) -> (Hp*Wp, C) reshape in the
    kernel is layout-preserving.  The interior column offset is kept small when
    W is small so garbage columns don't dominate the matmul M dimension.
    """
    col0 = 8 if W >= 64 else 1
    Hp = H + 3                              # 1 top zero row + bottom zeros/slack
    Wp = _round_up(W + col0 + 1, 16)
    return Hp, Wp, col0


def _vmem_limit_bytes():
    """~3/4 of physical VMEM (v7x: ~48 MiB, v5e/v6e: ~96 MiB); compiler default
    if the hardware query is unavailable."""
    try:
        cap = getattr(pltpu.get_tpu_info(), "vmem_capacity_bytes", None)
        if cap:
            return int(cap) * 3 // 4
    except Exception:
        pass
    return None


# ---------------------------------------------------------------------------
# Fused SRNet kernel
# ---------------------------------------------------------------------------
def _make_srnet_kernel(H, W, Hp, Wp, col0, nb):
    M = H * Wp   # matmul M dimension (columns >= W of each row are garbage)

    def conv3x3(xpad_ref, slab_ref, w):
        """3x3 same-padding conv of the padded scratch tile as a single
        im2col matmul (K = 9*Cin).  Returns (H, W, Cout) f32 (no bias)."""
        Cin = xpad_ref.shape[-1]
        xflat = xpad_ref[...].reshape(Hp * Wp, Cin)     # layout-free reshape
        for t in range(9):
            dy, dx = divmod(t, 3)
            start = (_ROW0 + dy - 1) * Wp + (col0 + dx - 1)
            slab_ref[:, t * Cin:(t + 1) * Cin] = xflat[start:start + M, :]
        acc = jnp.dot(slab_ref[...], w, preferred_element_type=jnp.float32)
        return acc.reshape(H, Wp, w.shape[-1])[:, :W, :]

    def kernel(x_ref, w_in_ref, b_in_ref, w_res_ref, b_res_ref,
               w_out_ref, b_out_ref, o_ref, xpad_ref, slab_ref):
        C = xpad_ref.shape[-1]
        dt = xpad_ref.dtype

        def set_interior(val):
            xpad_ref[_ROW0:_ROW0 + H, col0:col0 + W, :] = val.astype(dt)

        # Zero only the halo border strips (interior is fully overwritten
        # before every conv).  Re-zeroed each grid step -> safe under
        # megacore "parallel" sharding of the batch axis.
        xpad_ref[0:_ROW0, :, :] = jnp.zeros((_ROW0, Wp, C), dt)
        xpad_ref[_ROW0 + H:Hp, :, :] = jnp.zeros((Hp - _ROW0 - H, Wp, C), dt)
        xpad_ref[:, 0:col0, :] = jnp.zeros((Hp, col0, C), dt)
        xpad_ref[:, col0 + W:Wp, :] = jnp.zeros((Hp, Wp - col0 - W, C), dt)

        # conv_in + ReLU
        set_interior(x_ref[0])
        act = conv3x3(xpad_ref, slab_ref, w_in_ref[...]) + b_in_ref[0]
        act = jnp.maximum(act, 0.0)                       # f32 (H, W, C)

        # residual blocks: conv -> ReLU -> conv + identity (skip kept in f32)
        for i in range(nb):
            set_interior(act)
            t1 = conv3x3(xpad_ref, slab_ref, w_res_ref[i, 0]) + b_res_ref[i, 0]
            set_interior(jnp.maximum(t1, 0.0))
            act = act + conv3x3(xpad_ref, slab_ref, w_res_ref[i, 1]) \
                      + b_res_ref[i, 1]

        # PixelShuffle(r) + ReLU + conv_out folded into a sub-pixel conv on the
        # LR grid (ReLU applied to the conv input; lane-padded Cout).
        set_interior(jnp.maximum(act, 0.0))
        out = conv3x3(xpad_ref, slab_ref, w_out_ref[...]) + b_out_ref[0]
        o_ref[0] = out.astype(o_ref.dtype)

    return kernel


def _srnet_pallas(prep, x):
    """x: (N, H, W, nf) bf16 NHWC, channels already zero-padded to nf.
    Returns (N, H, W, cout_pad) f32 (sub-pixel phases on the LR grid)."""
    N, H, W, C = x.shape
    Hp, Wp, col0 = _scratch_dims(H, W)
    nb = prep["res_w"].shape[0]
    Cout = prep["conv_out_w"].shape[-1]
    kernel = _make_srnet_kernel(H, W, Hp, Wp, col0, nb)
    return pl.pallas_call(
        kernel,
        out_shape=jax.ShapeDtypeStruct((N, H, W, Cout), jnp.float32),
        grid_spec=pltpu.PrefetchScalarGridSpec(
            num_scalar_prefetch=0,
            grid=(N,),
            in_specs=[
                pl.BlockSpec((1, H, W, C), lambda n: (n, 0, 0, 0)),
                pl.BlockSpec((9 * C, C), lambda n: (0, 0)),
                pl.BlockSpec((1, 1, C), lambda n: (0, 0, 0)),
                pl.BlockSpec((nb, 2, 9 * C, C), lambda n: (0, 0, 0, 0)),
                pl.BlockSpec((nb, 2, 1, C), lambda n: (0, 0, 0, 0)),
                pl.BlockSpec((9 * C, Cout), lambda n: (0, 0)),
                pl.BlockSpec((1, 1, Cout), lambda n: (0, 0, 0)),
            ],
            out_specs=pl.BlockSpec((1, H, W, Cout), lambda n: (n, 0, 0, 0)),
            scratch_shapes=[
                pltpu.VMEM((Hp, Wp, C), MXU_DTYPE),      # padded activation tile
                pltpu.VMEM((H * Wp, 9 * C), MXU_DTYPE),  # im2col slab (K = 9*C)
            ],
        ),
        compiler_params=pltpu.CompilerParams(
            dimension_semantics=("parallel",),
            vmem_limit_bytes=_vmem_limit_bytes(),
        ),
    )(x, prep["conv_in_w"], prep["conv_in_b"], prep["res_w"], prep["res_b"],
      prep["conv_out_w"], prep["conv_out_b"])


# ---------------------------------------------------------------------------
# Parameters (PyTorch layout) + conversion to kernel-ready packed form
# ---------------------------------------------------------------------------
def init_params(key, in_nc=3, out_nc=3, nf=64, nb=2, scale=4):
    """Deterministic synthetic parameters in PyTorch layout (OIHW weights)."""
    def w_init(k, shape):
        return jax.random.normal(k, shape, jnp.float32) * 0.05
    cin0 = (scale * scale + 1) * in_nc
    keys = jax.random.split(key, 4 + 4 * nb)
    params = {
        "conv_in_w": w_init(keys[0], (nf, cin0, 3, 3)),
        "conv_in_b": w_init(keys[1], (nf,)),
        "conv_out_w": w_init(keys[2], (out_nc, nf // (scale * scale), 3, 3)),
        "conv_out_b": w_init(keys[3], (out_nc,)),
        "res": [],
    }
    for i in range(nb):
        k = keys[4 + 4 * i: 8 + 4 * i]
        params["res"].append(dict(
            w1=w_init(k[0], (nf, nf, 3, 3)), b1=w_init(k[1], (nf,)),
            w2=w_init(k[2], (nf, nf, 3, 3)), b2=w_init(k[3], (nf,))))
    return params


def _pack_conv3x3(w_oihw, cin_pad=None):
    """OIHW (O, I, 3, 3) -> im2col-packed (9*cin_pad, O); row index
    (ky*3 + kx)*cin_pad + i matches the in-kernel slab layout."""
    w = np.asarray(w_oihw, np.float32)
    O, I, _, _ = w.shape
    cin_pad = I if cin_pad is None else cin_pad
    whwio = np.transpose(w, (2, 3, 1, 0))                      # (3, 3, I, O)
    if cin_pad != I:
        whwio = np.pad(whwio, ((0, 0), (0, 0), (0, cin_pad - I), (0, 0)))
    return whwio.reshape(9 * cin_pad, O)


def _fold_conv_out_subpixel(w_oihw, bias, r):
    """Fold PixelShuffle(r) + ReLU + conv3x3 into an equivalent 3x3 conv on the
    pre-shuffle (LR) grid: Cin = c_hr*r*r, Cout = out_nc*r*r, where LR output
    channel (o, a, b) holds the HR output pixel of channel o at phase (a, b).
    Zero padding on the HR grid maps exactly to zero padding on the LR grid."""
    w = np.asarray(w_oihw, np.float32)        # (out_nc, c_hr, 3, 3)
    b = np.asarray(bias, np.float32)
    out_nc, c_hr, kh, kw = w.shape
    assert kh == 3 and kw == 3
    wf = np.zeros((3, 3, c_hr * r * r, out_nc * r * r), np.float32)
    bf = np.zeros((out_nc * r * r,), np.float32)
    for o in range(out_nc):
        for a in range(r):
            for bb in range(r):
                oc = (o * r + a) * r + bb
                bf[oc] = b[o]
                for c in range(c_hr):
                    for ky in range(3):
                        for kx in range(3):
                            uy, ux = a + ky - 1, bb + kx - 1
                            dy, pa = uy // r, uy % r
                            dx, pb = ux // r, ux % r
                            ic = (c * r + pa) * r + pb
                            wf[dy + 1, dx + 1, ic, oc] += w[o, c, ky, kx]
    return wf, bf


def prepare_params(params, in_nc=3, out_nc=3, nf=64, scale=4):
    """Kernel-ready params: im2col-packed bf16 weights, f32 biases, conv_in Cin
    zero-padded to nf, conv_out folded with PixelShuffle+ReLU and Cout padded
    to a lane-friendlier multiple of 64."""
    cin0 = (scale * scale + 1) * in_nc
    assert cin0 <= nf, "conv_in input channels are zero-padded up to nf"
    cout_pad = _round_up(out_nc * scale * scale, 64)

    w_in = _pack_conv3x3(params["conv_in_w"], cin_pad=nf)          # (9nf, nf)

    res_w = np.stack([np.stack([_pack_conv3x3(blk["w1"]),
                                _pack_conv3x3(blk["w2"])])
                      for blk in params["res"]])                   # (nb,2,9nf,nf)
    res_b = np.stack([np.stack([np.asarray(blk["b1"], np.float32).reshape(1, nf),
                                np.asarray(blk["b2"], np.float32).reshape(1, nf)])
                      for blk in params["res"]])                   # (nb,2,1,nf)

    wf, bf = _fold_conv_out_subpixel(params["conv_out_w"],
                                     params["conv_out_b"], scale)
    assert wf.shape[2] == nf
    wf = np.pad(wf, ((0, 0), (0, 0), (0, 0), (0, cout_pad - wf.shape[-1])))
    bf = np.pad(bf, (0, cout_pad - bf.shape[0]))
    w_out = wf.reshape(9 * nf, cout_pad)

    return {
        "scale": scale, "in_nc": in_nc, "out_nc": out_nc, "nf": nf,
        "cin": cin0, "cout_pad": cout_pad,
        "conv_in_w": jnp.asarray(w_in, MXU_DTYPE),
        "conv_in_b": jnp.asarray(params["conv_in_b"],
                                 jnp.float32).reshape(1, 1, nf),
        "res_w": jnp.asarray(res_w, MXU_DTYPE),
        "res_b": jnp.asarray(res_b, jnp.float32),
        "conv_out_w": jnp.asarray(w_out, MXU_DTYPE),
        "conv_out_b": jnp.asarray(bf, jnp.float32).reshape(1, 1, cout_pad),
    }


# ---------------------------------------------------------------------------
# SRNet forward (public wrapper: NCHW in, NCHW out, like the PyTorch module)
# ---------------------------------------------------------------------------
def srnet_forward(prep, lr_curr, hr_prev_tran):
    """lr_curr: (N, in_nc, H, W); hr_prev_tran: (N, scale^2*in_nc, H, W).
    Returns (N, out_nc, scale*H, scale*W) f32 NCHW."""
    r = prep["scale"]
    out_nc, nf, cin = prep["out_nc"], prep["nf"], prep["cin"]

    x = jnp.concatenate([lr_curr, hr_prev_tran], axis=1)     # NCHW concat (glue)
    x = jnp.transpose(x, (0, 2, 3, 1))                       # -> NHWC (glue)
    if nf > cin:
        x = jnp.pad(x, ((0, 0), (0, 0), (0, 0), (0, nf - cin)))
    x = x.astype(MXU_DTYPE)                                  # bf16 activation in

    out = _srnet_pallas(prep, x)                             # (N,H,W,cout_pad) f32

    # un-fold sub-pixel phases on the small LR grid:
    # (N, H, W, out_nc*r*r) -> (N, out_nc, r*H, r*W)            (glue)
    out = out[..., :out_nc * r * r]
    N, H, W, _ = out.shape
    out = out.reshape(N, H, W, out_nc, r, r)
    out = jnp.transpose(out, (0, 3, 1, 4, 2, 5))
    return out.reshape(N, out_nc, r * H, r * W)


# ---------------------------------------------------------------------------
# Pure-JAX f32 reference (straight port of the PyTorch module)
# ---------------------------------------------------------------------------
def _reference_forward(params, lr_curr, hr_prev_tran, scale=4):
    def conv(x, w, b):
        y = jax.lax.conv_general_dilated(
            x, w, window_strides=(1, 1), padding=((1, 1), (1, 1)),
            dimension_numbers=("NCHW", "OIHW", "NCHW"),
            precision=jax.lax.Precision.HIGHEST)
        return y + b.reshape(1, -1, 1, 1)

    x = jnp.concatenate([lr_curr, hr_prev_tran], axis=1)
    out = jax.nn.relu(conv(x, params["conv_in_w"], params["conv_in_b"]))
    for blk in params["res"]:
        t = jax.nn.relu(conv(out, blk["w1"], blk["b1"]))
        out = out + conv(t, blk["w2"], blk["b2"])
    # PixelShuffle(scale)
    N, C, H, W = out.shape
    r = scale
    out = out.reshape(N, C // (r * r), r, r, H, W)
    out = jnp.transpose(out, (0, 1, 4, 2, 5, 3)).reshape(
        N, C // (r * r), H * r, W * r)
    out = jax.nn.relu(out)
    return conv(out, params["conv_out_w"], params["conv_out_b"])


if __name__ == "__main__":
    key = jax.random.PRNGKey(0)
    kp, k1, k2 = jax.random.split(key, 3)

    N, in_nc, out_nc, H, W, scale = 2, 3, 3, 8, 8, 4
    nf, nb = 64, 2   # nf=64 required: conv_out expects 4 channels post-shuffle

    params = init_params(kp, in_nc=in_nc, out_nc=out_nc, nf=nf, nb=nb,
                         scale=scale)
    prep = prepare_params(params, in_nc=in_nc, out_nc=out_nc, nf=nf,
                          scale=scale)

    lr_curr = jax.random.normal(k1, (N, in_nc, H, W), jnp.float32)
    hr_prev_tran = jax.random.normal(
        k2, (N, scale * scale * in_nc, H, W), jnp.float32)

    fwd = jax.jit(lambda a, b: srnet_forward(prep, a, b))
    out = jax.block_until_ready(fwd(lr_curr, hr_prev_tran))

    assert out.shape == (N, out_nc, scale * H, scale * W), out.shape
    assert out.dtype == jnp.float32

    # loose numerical check vs. an f32 reference (bf16 MXU operands => ~1e-2)
    ref = _reference_forward(params, lr_curr, hr_prev_tran, scale=scale)
    err = float(jnp.max(jnp.abs(out - ref)))
    ref_scale = float(jnp.max(jnp.abs(ref)))
    assert err <= 5e-2 * ref_scale + 1e-2, (err, ref_scale)

    print("KERNEL_OK")
</pallas_src>

<mosaic_0001>
module attributes {stable_mosaic.version = 11 : i64} {
  func.func @kernel(%arg0: i32, %arg1: memref<1x8x8x64xbf16, #tpu.memory_space<vmem>>, %arg2: memref<576x64xbf16, #tpu.memory_space<vmem>>, %arg3: memref<1x1x64xf32, #tpu.memory_space<vmem>>, %arg4: memref<2x2x576x64xbf16, #tpu.memory_space<vmem>>, %arg5: memref<2x2x1x64xf32, #tpu.memory_space<vmem>>, %arg6: memref<576x64xbf16, #tpu.memory_space<vmem>>, %arg7: memref<1x1x64xf32, #tpu.memory_space<vmem>>, %arg8: memref<1x8x8x64xf32, #tpu.memory_space<vmem>>, %arg9: memref<11x16x64xbf16, #tpu.memory_space<vmem>>, %arg10: memref<128x576xbf16, #tpu.memory_space<vmem>>) attributes {dimension_semantics = [#tpu.dimension_semantics<parallel>], iteration_bounds = array<i64: 2>, scalar_prefetch = 0 : i64, scratch_operands = 2 : i64, tpu.core_type = #tpu.core_type<tc>, window_params = [{transform_indices = @transform_0, window_bounds = array<i64: 1, 8, 8, 64>}, {pipeline_mode = #tpu.pipeline_mode<synchronous>, transform_indices = @transform_1, window_bounds = array<i64: 576, 64>}, {pipeline_mode = #tpu.pipeline_mode<synchronous>, transform_indices = @transform_2, window_bounds = array<i64: 1, 1, 64>}, {pipeline_mode = #tpu.pipeline_mode<synchronous>, transform_indices = @transform_3, window_bounds = array<i64: 2, 2, 576, 64>}, {pipeline_mode = #tpu.pipeline_mode<synchronous>, transform_indices = @transform_4, window_bounds = array<i64: 2, 2, 1, 64>}, {pipeline_mode = #tpu.pipeline_mode<synchronous>, transform_indices = @transform_5, window_bounds = array<i64: 576, 64>}, {pipeline_mode = #tpu.pipeline_mode<synchronous>, transform_indices = @transform_6, window_bounds = array<i64: 1, 1, 64>}, {transform_indices = @transform_7, window_bounds = array<i64: 1, 8, 8, 64>}]} {
    %cst = arith.constant 0.000000e+00 : bf16
    %0 = vector.broadcast %cst : bf16 to vector<1x16x64xbf16>
    %c0 = arith.constant 0 : index
    %c0_0 = arith.constant 0 : index
    %c0_1 = arith.constant 0 : index
    %1 = vector.load %arg9[%c0, %c0_0, %c0_1] : memref<11x16x64xbf16, #tpu.memory_space<vmem>>, vector<1x16x64xbf16>
    tpu.vector_store %arg9[%c0, %c0_0, %c0_1], %0 {strides = array<i32>} : memref<11x16x64xbf16, #tpu.memory_space<vmem>>, vector<1x16x64xbf16>,
    %cst_2 = arith.constant 0.000000e+00 : bf16
    %2 = vector.broadcast %cst_2 : bf16 to vector<2x16x64xbf16>
    %c9 = arith.constant 9 : index
    %c0_3 = arith.constant 0 : index
    %c0_4 = arith.constant 0 : index
    %3 = vector.load %arg9[%c9, %c0_3, %c0_4] : memref<11x16x64xbf16, #tpu.memory_space<vmem>>, vector<2x16x64xbf16>
    tpu.vector_store %arg9[%c9, %c0_3, %c0_4], %2 {strides = array<i32>} : memref<11x16x64xbf16, #tpu.memory_space<vmem>>, vector<2x16x64xbf16>,
    %cst_5 = arith.constant 0.000000e+00 : bf16
    %4 = vector.broadcast %cst_5 : bf16 to vector<11x1x64xbf16>
    %c0_6 = arith.constant 0 : index
    %c0_7 = arith.constant 0 : index
    %c0_8 = arith.constant 0 : index
    %5 = vector.load %arg9[%c0_6, %c0_7, %c0_8] : memref<11x16x64xbf16, #tpu.memory_space<vmem>>, vector<11x1x64xbf16>
    tpu.vector_store %arg9[%c0_6, %c0_7, %c0_8], %4 {strides = array<i32>} : memref<11x16x64xbf16, #tpu.memory_space<vmem>>, vector<11x1x64xbf16>,
    %cst_9 = arith.constant 0.000000e+00 : bf16
    %6 = vector.broadcast %cst_9 : bf16 to vector<11x7x64xbf16>
    %c0_10 = arith.constant 0 : index
    %c9_11 = arith.constant 9 : index
    %c0_12 = arith.constant 0 : index
    %7 = vector.load %arg9[%c0_10, %c9_11, %c0_12] : memref<11x16x64xbf16, #tpu.memory_space<vmem>>, vector<11x7x64xbf16>
    tpu.vector_store %arg9[%c0_10, %c9_11, %c0_12], %6 {strides = array<i32>} : memref<11x16x64xbf16, #tpu.memory_space<vmem>>, vector<11x7x64xbf16>,
    %c0_13 = arith.constant 0 : index
    %c0_14 = arith.constant 0 : index
    %c0_15 = arith.constant 0 : index
    %c0_16 = arith.constant 0 : index
    %8 = vector.load %arg1[%c0_13, %c0_14, %c0_15, %c0_16] : memref<1x8x8x64xbf16, #tpu.memory_space<vmem>>, vector<1x8x8x64xbf16>
    %9 = vector.shape_cast %8 : vector<1x8x8x64xbf16> to vector<8x8x64xbf16>
    %c1 = arith.constant 1 : index
    %c1_17 = arith.constant 1 : index
    %c0_18 = arith.constant 0 : index
    %10 = vector.load %arg9[%c1, %c1_17, %c0_18] : memref<11x16x64xbf16, #tpu.memory_space<vmem>>, vector<8x8x64xbf16>
    tpu.vector_store %arg9[%c1, %c1_17, %c0_18], %9 {strides = array<i32>} : memref<11x16x64xbf16, #tpu.memory_space<vmem>>, vector<8x8x64xbf16>,
    %c0_19 = arith.constant 0 : index
    %c0_20 = arith.constant 0 : index
    %11 = vector.load %arg2[%c0_19, %c0_20] : memref<576x64xbf16, #tpu.memory_space<vmem>>, vector<576x64xbf16>
    %c0_21 = arith.constant 0 : index
    %c0_22 = arith.constant 0 : index
    %c0_23 = arith.constant 0 : index
    %12 = vector.load %arg9[%c0_21, %c0_22, %c0_23] : memref<11x16x64xbf16, #tpu.memory_space<vmem>>, vector<11x16x64xbf16>
    %13 = vector.shape_cast %12 : vector<11x16x64xbf16> to vector<176x64xbf16>
    %14 = vector.extract_strided_slice %13 {offsets = [0, 0], sizes = [128, 64], strides = [1, 1]} : vector<176x64xbf16> to vector<128x64xbf16>
    %c0_24 = arith.constant 0 : index
    %c0_25 = arith.constant 0 : index
    %15 = vector.load %arg10[%c0_24, %c0_25] : memref<128x576xbf16, #tpu.memory_space<vmem>>, vector<128x64xbf16>
    tpu.vector_store %arg10[%c0_24, %c0_25], %14 {strides = array<i32>} : memref<128x576xbf16, #tpu.memory_space<vmem>>, vector<128x64xbf16>,
    %16 = vector.extract_strided_slice %13 {offsets = [1, 0], sizes = [128, 64], strides = [1, 1]} : vector<176x64xbf16> to vector<128x64xbf16>
    %c0_26 = arith.constant 0 : index
    %c64 = arith.constant 64 : index
    %17 = vector.load %arg10[%c0_26, %c64] : memref<128x576xbf16, #tpu.memory_space<vmem>>, vector<128x64xbf16>
    tpu.vector_store %arg10[%c0_26, %c64], %16 {strides = array<i32>} : memref<128x576xbf16, #tpu.memory_space<vmem>>, vector<128x64xbf16>,
    %18 = vector.extract_strided_slice %13 {offsets = [2, 0], sizes = [128, 64], strides = [1, 1]} : vector<176x64xbf16> to vector<128x64xbf16>
    %c0_27 = arith.constant 0 : index
    %c128 = arith.constant 128 : index
    %19 = vector.load %arg10[%c0_27, %c128] : memref<128x576xbf16, #tpu.memory_space<vmem>>, vector<128x64xbf16>
    tpu.vector_store %arg10[%c0_27, %c128], %18 {strides = array<i32>} : memref<128x576xbf16, #tpu.memory_space<vmem>>, vector<128x64xbf16>,
    %20 = vector.extract_strided_slice %13 {offsets = [16, 0], sizes = [128, 64], strides = [1, 1]} : vector<176x64xbf16> to vector<128x64xbf16>
    %c0_28 = arith.constant 0 : index
    %c192 = arith.constant 192 : index
    %21 = vector.load %arg10[%c0_28, %c192] : memref<128x576xbf16, #tpu.memory_space<vmem>>, vector<128x64xbf16>
    tpu.vector_store %arg10[%c0_28, %c192], %20 {strides = array<i32>} : memref<128x576xbf16, #tpu.memory_space<vmem>>, vector<128x64xbf16>,
    %22 = vector.extract_strided_slice %13 {offsets = [17, 0], sizes = [128, 64], strides = [1, 1]} : vector<176x64xbf16> to vector<128x64xbf16>
    %c0_29 = arith.constant 0 : index
    %c256 = arith.constant 256 : index
    %23 = vector.load %arg10[%c0_29, %c256] : memref<128x576xbf16, #tpu.memory_space<vmem>>, vector<128x64xbf16>
    tpu.vector_store %arg10[%c0_29, %c256], %22 {strides = array<i32>} : memref<128x576xbf16, #tpu.memory_space<vmem>>, vector<128x64xbf16>,
    %24 = vector.extract_strided_slice %13 {offsets = [18, 0], sizes = [128, 64], strides = [1, 1]} : vector<176x64xbf16> to vector<128x64xbf16>
    %c0_30 = arith.constant 0 : index
    %c320 = arith.constant 320 : index
    %25 = vector.load %arg10[%c0_30, %c320] : memref<128x576xbf16, #tpu.memory_space<vmem>>, vector<128x64xbf16>
    tpu.vector_store %arg10[%c0_30, %c320], %24 {strides = array<i32>} : memref<128x576xbf16, #tpu.memory_space<vmem>>, vector<128x64xbf16>,
    %26 = vector.extract_strided_slice %13 {offsets = [32, 0], sizes = [128, 64], strides = [1, 1]} : vector<176x64xbf16> to vector<128x64xbf16>
    %c0_31 = arith.constant 0 : index
    %c384 = arith.constant 384 : index
    %27 = vector.load %arg10[%c0_31, %c384] : memref<128x576xbf16, #tpu.memory_space<vmem>>, vector<128x64xbf16>
    tpu.vector_store %arg10[%c0_31, %c384], %26 {strides = array<i32>} : memref<128x576xbf16, #tpu.memory_space<vmem>>, vector<128x64xbf16>,
    %28 = vector.extract_strided_slice %13 {offsets = [33, 0], sizes = [128, 64], strides = [1, 1]} : vector<176x64xbf16> to vector<128x64xbf16>
    %c0_32 = arith.constant 0 : index
    %c448 = arith.constant 448 : index
    %29 = vector.load %arg10[%c0_32, %c448] : memref<128x576xbf16, #tpu.memory_space<vmem>>, vector<128x64xbf16>
    tpu.vector_store %arg10[%c0_32, %c448], %28 {strides = array<i32>} : memref<128x576xbf16, #tpu.memory_space<vmem>>, vector<128x64xbf16>,
    %30 = vector.extract_strided_slice %13 {offsets = [34, 0], sizes = [128, 64], strides = [1, 1]} : vector<176x64xbf16> to vector<128x64xbf16>
    %c0_33 = arith.constant 0 : index
    %c512 = arith.constant 512 : index
    %31 = vector.load %arg10[%c0_33, %c512] : memref<128x576xbf16, #tpu.memory_space<vmem>>, vector<128x64xbf16>
    tpu.vector_store %arg10[%c0_33, %c512], %30 {strides = array<i32>} : memref<128x576xbf16, #tpu.memory_space<vmem>>, vector<128x64xbf16>,
    %c0_34 = arith.constant 0 : index
    %c0_35 = arith.constant 0 : index
    %32 = vector.load %arg10[%c0_34, %c0_35] : memref<128x576xbf16, #tpu.memory_space<vmem>>, vector<128x576xbf16>
    %cst_36 = arith.constant dense<0.000000e+00> : vector<128x64xf32>
    %33 = tpu.matmul %32, %11, %cst_36 {dimension_numbers = #tpu.dot_dimension_numbers<[1], [0], [0], [1], [0, 0, 1, 1], [], []>} : vector<128x576xbf16>, vector<576x64xbf16>, vector<128x64xf32> -> vector<128x64xf32>
    %34 = vector.shape_cast %33 : vector<128x64xf32> to vector<8x16x64xf32>
    %35 = vector.extract_strided_slice %34 {offsets = [0, 0, 0], sizes = [8, 8, 64], strides = [1, 1, 1]} : vector<8x16x64xf32> to vector<8x8x64xf32>
    %c0_37 = arith.constant 0 : index
    %c0_38 = arith.constant 0 : index
    %c0_39 = arith.constant 0 : index
    %36 = vector.load %arg3[%c0_37, %c0_38, %c0_39] : memref<1x1x64xf32, #tpu.memory_space<vmem>>, vector<1x1x64xf32>
    %37 = vector.shape_cast %36 : vector<1x1x64xf32> to vector<1x64xf32>
    %38 = vector.shape_cast %37 : vector<1x64xf32> to vector<1x1x64xf32>
    %39 = vector.broadcast %38 : vector<1x1x64xf32> to vector<8x8x64xf32>
    %40 = arith.addf %35, %39 : vector<8x8x64xf32>
    %cst_40 = arith.constant 0.000000e+00 : f32
    %41 = vector.broadcast %cst_40 : f32 to vector<8x8x64xf32>
    %42 = arith.maximumf %40, %41 : vector<8x8x64xf32>
    %43 = arith.truncf %42 : vector<8x8x64xf32> to vector<8x8x64xbf16>
    %c1_41 = arith.constant 1 : index
    %c1_42 = arith.constant 1 : index
    %c0_43 = arith.constant 0 : index
    %44 = vector.load %arg9[%c1_41, %c1_42, %c0_43] : memref<11x16x64xbf16, #tpu.memory_space<vmem>>, vector<8x8x64xbf16>
    tpu.vector_store %arg9[%c1_41, %c1_42, %c0_43], %43 {strides = array<i32>} : memref<11x16x64xbf16, #tpu.memory_space<vmem>>, vector<8x8x64xbf16>,
    %c0_44 = arith.constant 0 : index
    %c0_45 = arith.constant 0 : index
    %c0_46 = arith.constant 0 : index
    %c0_47 = arith.constant 0 : index
    %45 = vector.load %arg4[%c0_44, %c0_45, %c0_46, %c0_47] : memref<2x2x576x64xbf16, #tpu.memory_space<vmem>>, vector<1x1x576x64xbf16>
    %46 = vector.shape_cast %45 : vector<1x1x576x64xbf16> to vector<576x64xbf16>
    %c0_48 = arith.constant 0 : index
    %c0_49 = arith.constant 0 : index
    %c0_50 = arith.constant 0 : index
    %47 = vector.load %arg9[%c0_48, %c0_49, %c0_50] : memref<11x16x64xbf16, #tpu.memory_space<vmem>>, vector<11x16x64xbf16>
    %48 = vector.shape_cast %47 : vector<11x16x64xbf16> to vector<176x64xbf16>
    %49 = vector.extract_strided_slice %48 {offsets = [0, 0], sizes = [128, 64], strides = [1, 1]} : vector<176x64xbf16> to vector<128x64xbf16>
    %c0_51 = arith.constant 0 : index
    %c0_52 = arith.constant 0 : index
    %50 = vector.load %arg10[%c0_51, %c0_52] : memref<128x576xbf16, #tpu.memory_space<vmem>>, vector<128x64xbf16>
    tpu.vector_store %arg10[%c0_51, %c0_52], %49 {strides = array<i32>} : memref<128x576xbf16, #tpu.memory_space<vmem>>, vector<128x64xbf16>,
    %51 = vector.extract_strided_slice %48 {offsets = [1, 0], sizes = [128, 64], strides = [1, 1]} : vector<176x64xbf16> to vector<128x64xbf16>
    %c0_53 = arith.constant 0 : index
    %c64_54 = arith.constant 64 : index
    %52 = vector.load %arg10[%c0_53, %c64_54] : memref<128x576xbf16, #tpu.memory_space<vmem>>, vector<128x64xbf16>
    tpu.vector_store %arg10[%c0_53, %c64_54], %51 {strides = array<i32>} : memref<128x576xbf16, #tpu.memory_space<vmem>>, vector<128x64xbf16>,
    %53 = vector.extract_strided_slice %48 {offsets = [2, 0], sizes = [128, 64], strides = [1, 1]} : vector<176x64xbf16> to vector<128x64xbf16>
    %c0_55 = arith.constant 0 : index
    %c128_56 = arith.constant 128 : index
    %54 = vector.load %arg10[%c0_55, %c128_56] : memref<128x576xbf16, #tpu.memory_space<vmem>>, vector<128x64xbf16>
    tpu.vector_store %arg10[%c0_55, %c128_56], %53 {strides = array<i32>} : memref<128x576xbf16, #tpu.memory_space<vmem>>, vector<128x64xbf16>,
    %55 = vector.extract_strided_slice %48 {offsets = [16, 0], sizes = [128, 64], strides = [1, 1]} : vector<176x64xbf16> to vector<128x64xbf16>
    %c0_57 = arith.constant 0 : index
    %c192_58 = arith.constant 192 : index
    %56 = vector.load %arg10[%c0_57, %c192_58] : memref<128x576xbf16, #tpu.memory_space<vmem>>, vector<128x64xbf16>
    tpu.vector_store %arg10[%c0_57, %c192_58], %55 {strides = array<i32>} : memref<128x576xbf16, #tpu.memory_space<vmem>>, vector<128x64xbf16>,
    %57 = vector.extract_strided_slice %48 {offsets = [17, 0], sizes = [128, 64], strides = [1, 1]} : vector<176x64xbf16> to vector<128x64xbf16>
    %c0_59 = arith.constant 0 : index
    %c256_60 = arith.constant 256 : index
    %58 = vector.load %arg10[%c0_59, %c256_60] : memref<128x576xbf16, #tpu.memory_space<vmem>>, vector<128x64xbf16>
    tpu.vector_store %arg10[%c0_59, %c256_60], %57 {strides = array<i32>} : memref<128x576xbf16, #tpu.memory_space<vmem>>, vector<128x64xbf16>,
    %59 = vector.extract_strided_slice %48 {offsets = [18, 0], sizes = [128, 64], strides = [1, 1]} : vector<176x64xbf16> to vector<128x64xbf16>
    %c0_61 = arith.constant 0 : index
    %c320_62 = arith.constant 320 : index
    %60 = vector.load %arg10[%c0_61, %c320_62] : memref<128x576xbf16, #tpu.memory_space<vmem>>, vector<128x64xbf16>
    tpu.vector_store %arg10[%c0_61, %c320_62], %59 {strides = array<i32>} : memref<128x576xbf16, #tpu.memory_space<vmem>>, vector<128x64xbf16>,
    %61 = vector.extract_strided_slice %48 {offsets = [32, 0], sizes = [128, 64], strides = [1, 1]} : vector<176x64xbf16> to vector<128x64xbf16>
    %c0_63 = arith.constant 0 : index
    %c384_64 = arith.constant 384 : index
    %62 = vector.load %arg10[%c0_63, %c384_64] : memref<128x576xbf16, #tpu.memory_space<vmem>>, vector<128x64xbf16>
    tpu.vector_store %arg10[%c0_63, %c384_64], %61 {strides = array<i32>} : memref<128x576xbf16, #tpu.memory_space<vmem>>, vector<128x64xbf16>,
    %63 = vector.extract_strided_slice %48 {offsets = [33, 0], sizes = [128, 64], strides = [1, 1]} : vector<176x64xbf16> to vector<128x64xbf16>
    %c0_65 = arith.constant 0 : index
    %c448_66 = arith.constant 448 : index
    %64 = vector.load %arg10[%c0_65, %c448_66] : memref<128x576xbf16, #tpu.memory_space<vmem>>, vector<128x64xbf16>
    tpu.vector_store %arg10[%c0_65, %c448_66], %63 {strides = array<i32>} : memref<128x576xbf16, #tpu.memory_space<vmem>>, vector<128x64xbf16>,
    %65 = vector.extract_strided_slice %48 {offsets = [34, 0], sizes = [128, 64], strides = [1, 1]} : vector<176x64xbf16> to vector<128x64xbf16>
    %c0_67 = arith.constant 0 : index
    %c512_68 = arith.constant 512 : index
    %66 = vector.load %arg10[%c0_67, %c512_68] : memref<128x576xbf16, #tpu.memory_space<vmem>>, vector<128x64xbf16>
    tpu.vector_store %arg10[%c0_67, %c512_68], %65 {strides = array<i32>} : memref<128x576xbf16, #tpu.memory_space<vmem>>, vector<128x64xbf16>,
    %c0_69 = arith.constant 0 : index
    %c0_70 = arith.constant 0 : index
    %67 = vector.load %arg10[%c0_69, %c0_70] : memref<128x576xbf16, #tpu.memory_space<vmem>>, vector<128x576xbf16>
    %cst_71 = arith.constant dense<0.000000e+00> : vector<128x64xf32>
    %68 = tpu.matmul %67, %46, %cst_71 {dimension_numbers = #tpu.dot_dimension_numbers<[1], [0], [0], [1], [0, 0, 1, 1], [], []>} : vector<128x576xbf16>, vector<576x64xbf16>, vector<128x64xf32> -> vector<128x64xf32>
    %69 = vector.shape_cast %68 : vector<128x64xf32> to vector<8x16x64xf32>
    %70 = vector.extract_strided_slice %69 {offsets = [0, 0, 0], sizes = [8, 8, 64], strides = [1, 1, 1]} : vector<8x16x64xf32> to vector<8x8x64xf32>
    %c0_72 = arith.constant 0 : index
    %c0_73 = arith.constant 0 : index
    %c0_74 = arith.constant 0 : index
    %c0_75 = arith.constant 0 : index
    %71 = vector.load %arg5[%c0_72, %c0_73, %c0_74, %c0_75] : memref<2x2x1x64xf32, #tpu.memory_space<vmem>>, vector<1x1x1x64xf32>
    %72 = vector.shape_cast %71 : vector<1x1x1x64xf32> to vector<1x64xf32>
    %73 = vector.shape_cast %72 : vector<1x64xf32> to vector<1x1x64xf32>
    %74 = vector.broadcast %73 : vector<1x1x64xf32> to vector<8x8x64xf32>
    %75 = arith.addf %70, %74 : vector<8x8x64xf32>
    %cst_76 = arith.constant 0.000000e+00 : f32
    %76 = vector.broadcast %cst_76 : f32 to vector<8x8x64xf32>
    %77 = arith.maximumf %75, %76 : vector<8x8x64xf32>
    %78 = arith.truncf %77 : vector<8x8x64xf32> to vector<8x8x64xbf16>
    %c1_77 = arith.constant 1 : index
    %c1_78 = arith.constant 1 : index
    %c0_79 = arith.constant 0 : index
    %79 = vector.load %arg9[%c1_77, %c1_78, %c0_79] : memref<11x16x64xbf16, #tpu.memory_space<vmem>>, vector<8x8x64xbf16>
    tpu.vector_store %arg9[%c1_77, %c1_78, %c0_79], %78 {strides = array<i32>} : memref<11x16x64xbf16, #tpu.memory_space<vmem>>, vector<8x8x64xbf16>,
    %c0_80 = arith.constant 0 : index
    %c1_81 = arith.constant 1 : index
    %c0_82 = arith.constant 0 : index
    %c0_83 = arith.constant 0 : index
    %80 = vector.load %arg4[%c0_80, %c1_81, %c0_82, %c0_83] : memref<2x2x576x64xbf16, #tpu.memory_space<vmem>>, vector<1x1x576x64xbf16>
    %81 = vector.shape_cast %80 : vector<1x1x576x64xbf16> to vector<576x64xbf16>
    %c0_84 = arith.constant 0 : index
    %c0_85 = arith.constant 0 : index
    %c0_86 = arith.constant 0 : index
    %82 = vector.load %arg9[%c0_84, %c0_85, %c0_86] : memref<11x16x64xbf16, #tpu.memory_space<vmem>>, vector<11x16x64xbf16>
    %83 = vector.shape_cast %82 : vector<11x16x64xbf16> to vector<176x64xbf16>
    %84 = vector.extract_strided_slice %83 {offsets = [0, 0], sizes = [128, 64], strides = [1, 1]} : vector<176x64xbf16> to vector<128x64xbf16>
    %c0_87 = arith.constant 0 : index
    %c0_88 = arith.constant 0 : index
    %85 = vector.load %arg10[%c0_87, %c0_88] : memref<128x576xbf16, #tpu.memory_space<vmem>>, vector<128x64xbf16>
    tpu.vector_store %arg10[%c0_87, %c0_88], %84 {strides = array<i32>} : memref<128x576xbf16, #tpu.memory_space<vmem>>, vector<128x64xbf16>,
    %86 = vector.extract_strided_slice %83 {offsets = [1, 0], sizes = [128, 64], strides = [1, 1]} : vector<176x64xbf16> to vector<128x64xbf16>
    %c0_89 = arith.constant 0 : index
    %c64_90 = arith.constant 64 : index
    %87 = vector.load %arg10[%c0_89, %c64_90] : memref<128x576xbf16, #tpu.memory_space<vmem>>, vector<128x64xbf16>
    tpu.vector_store %arg10[%c0_89, %c64_90], %86 {strides = array<i32>} : memref<128x576xbf16, #tpu.memory_space<vmem>>, vector<128x64xbf16>,
    %88 = vector.extract_strided_slice %83 {offsets = [2, 0], sizes = [128, 64], strides = [1, 1]} : vector<176x64xbf16> to vector<128x64xbf16>
    %c0_91 = arith.constant 0 : index
    %c128_92 = arith.constant 128 : index
    %89 = vector.load %arg10[%c0_91, %c128_92] : memref<128x576xbf16, #tpu.memory_space<vmem>>, vector<128x64xbf16>
    tpu.vector_store %arg10[%c0_91, %c128_92], %88 {strides = array<i32>} : memref<128x576xbf16, #tpu.memory_space<vmem>>, vector<128x64xbf16>,
    %90 = vector.extract_strided_slice %83 {offsets = [16, 0], sizes = [128, 64], strides = [1, 1]} : vector<176x64xbf16> to vector<128x64xbf16>
    %c0_93 = arith.constant 0 : index
    %c192_94 = arith.constant 192 : index
    %91 = vector.load %arg10[%c0_93, %c192_94] : memref<128x576xbf16, #tpu.memory_space<vmem>>, vector<128x64xbf16>
    tpu.vector_store %arg10[%c0_93, %c192_94], %90 {strides = array<i32>} : memref<128x576xbf16, #tpu.memory_space<vmem>>, vector<128x64xbf16>,
    %92 = vector.extract_strided_slice %83 {offsets = [17, 0], sizes = [128, 64], strides = [1, 1]} : vector<176x64xbf16> to vector<128x64xbf16>
    %c0_95 = arith.constant 0 : index
    %c256_96 = arith.constant 256 : index
    %93 = vector.load %arg10[%c0_95, %c256_96] : memref<128x576xbf16, #tpu.memory_space<vmem>>, vector<128x64xbf16>
    tpu.vector_store %arg10[%c0_95, %c256_96], %92 {strides = array<i32>} : memref<128x576xbf16, #tpu.memory_space<vmem>>, vector<128x64xbf16>,
    %94 = vector.extract_strided_slice %83 {offsets = [18, 0], sizes = [128, 64], strides = [1, 1]} : vector<176x64xbf16> to vector<128x64xbf16>
    %c0_97 = arith.constant 0 : index
    %c320_98 = arith.constant 320 : index
    %95 = vector.load %arg10[%c0_97, %c320_98] : memref<128x576xbf16, #tpu.memory_space<vmem>>, vector<128x64xbf16>
    tpu.vector_store %arg10[%c0_97, %c320_98], %94 {strides = array<i32>} : memref<128x576xbf16, #tpu.memory_space<vmem>>, vector<128x64xbf16>,
    %96 = vector.extract_strided_slice %83 {offsets = [32, 0], sizes = [128, 64], strides = [1, 1]} : vector<176x64xbf16> to vector<128x64xbf16>
    %c0_99 = arith.constant 0 : index
    %c384_100 = arith.constant 384 : index
    %97 = vector.load %arg10[%c0_99, %c384_100] : memref<128x576xbf16, #tpu.memory_space<vmem>>, vector<128x64xbf16>
    tpu.vector_store %arg10[%c0_99, %c384_100], %96 {strides = array<i32>} : memref<128x576xbf16, #tpu.memory_space<vmem>>, vector<128x64xbf16>,
    %98 = vector.extract_strided_slice %83 {offsets = [33, 0], sizes = [128, 64], strides = [1, 1]} : vector<176x64xbf16> to vector<128x64xbf16>
    %c0_101 = arith.constant 0 : index
    %c448_102 = arith.constant 448 : index
    %99 = vector.load %arg10[%c0_101, %c448_102] : memref<128x576xbf16, #tpu.memory_space<vmem>>, vector<128x64xbf16>
    tpu.vector_store %arg10[%c0_101, %c448_102], %98 {strides = array<i32>} : memref<128x576xbf16, #tpu.memory_space<vmem>>, vector<128x64xbf16>,
    %100 = vector.extract_strided_slice %83 {offsets = [34, 0], sizes = [128, 64], strides = [1, 1]} : vector<176x64xbf16> to vector<128x64xbf16>
    %c0_103 = arith.constant 0 : index
    %c512_104 = arith.constant 512 : index
    %101 = vector.load %arg10[%c0_103, %c512_104] : memref<128x576xbf16, #tpu.memory_space<vmem>>, vector<128x64xbf16>
    tpu.vector_store %arg10[%c0_103, %c512_104], %100 {strides = array<i32>} : memref<128x576xbf16, #tpu.memory_space<vmem>>, vector<128x64xbf16>,
    %c0_105 = arith.constant 0 : index
    %c0_106 = arith.constant 0 : index
    %102 = vector.load %arg10[%c0_105, %c0_106] : memref<128x576xbf16, #tpu.memory_space<vmem>>, vector<128x576xbf16>
    %cst_107 = arith.constant dense<0.000000e+00> : vector<128x64xf32>
    %103 = tpu.matmul %102, %81, %cst_107 {dimension_numbers = #tpu.dot_dimension_numbers<[1], [0], [0], [1], [0, 0, 1, 1], [], []>} : vector<128x576xbf16>, vector<576x64xbf16>, vector<128x64xf32> -> vector<128x64xf32>
    %104 = vector.shape_cast %103 : vector<128x64xf32> to vector<8x16x64xf32>
    %105 = vector.extract_strided_slice %104 {offsets = [0, 0, 0], sizes = [8, 8, 64], strides = [1, 1, 1]} : vector<8x16x64xf32> to vector<8x8x64xf32>
    %106 = arith.addf %42, %105 : vector<8x8x64xf32>
    %c0_108 = arith.constant 0 : index
    %c1_109 = arith.constant 1 : index
    %c0_110 = arith.constant 0 : index
    %c0_111 = arith.constant 0 : index
    %107 = vector.load %arg5[%c0_108, %c1_109, %c0_110, %c0_111] : memref<2x2x1x64xf32, #tpu.memory_space<vmem>>, vector<1x1x1x64xf32>
    %108 = vector.shape_cast %107 : vector<1x1x1x64xf32> to vector<1x64xf32>
    %109 = vector.shape_cast %108 : vector<1x64xf32> to vector<1x1x64xf32>
    %110 = vector.broadcast %109 : vector<1x1x64xf32> to vector<8x8x64xf32>
    %111 = arith.addf %106, %110 : vector<8x8x64xf32>
    %112 = arith.truncf %111 : vector<8x8x64xf32> to vector<8x8x64xbf16>
    %c1_112 = arith.constant 1 : index
    %c1_113 = arith.constant 1 : index
    %c0_114 = arith.constant 0 : index
    %113 = vector.load %arg9[%c1_112, %c1_113, %c0_114] : memref<11x16x64xbf16, #tpu.memory_space<vmem>>, vector<8x8x64xbf16>
    tpu.vector_store %arg9[%c1_112, %c1_113, %c0_114], %112 {strides = array<i32>} : memref<11x16x64xbf16, #tpu.memory_space<vmem>>, vector<8x8x64xbf16>,
    %c1_115 = arith.constant 1 : index
    %c0_116 = arith.constant 0 : index
    %c0_117 = arith.constant 0 : index
    %c0_118 = arith.constant 0 : index
    %114 = vector.load %arg4[%c1_115, %c0_116, %c0_117, %c0_118] : memref<2x2x576x64xbf16, #tpu.memory_space<vmem>>, vector<1x1x576x64xbf16>
    %115 = vector.shape_cast %114 : vector<1x1x576x64xbf16> to vector<576x64xbf16>
    %c0_119 = arith.constant 0 : index
    %c0_120 = arith.constant 0 : index
    %c0_121 = arith.constant 0 : index
    %116 = vector.load %arg9[%c0_119, %c0_120, %c0_121] : memref<11x16x64xbf16, #tpu.memory_space<vmem>>, vector<11x16x64xbf16>
    %117 = vector.shape_cast %116 : vector<11x16x64xbf16> to vector<176x64xbf16>
    %118 = vector.extract_strided_slice %117 {offsets = [0, 0], sizes = [128, 64], strides = [1, 1]} : vector<176x64xbf16> to vector<128x64xbf16>
    %c0_122 = arith.constant 0 : index
    %c0_123 = arith.constant 0 : index
    %119 = vector.load %arg10[%c0_122, %c0_123] : memref<128x576xbf16, #tpu.memory_space<vmem>>, vector<128x64xbf16>
    tpu.vector_store %arg10[%c0_122, %c0_123], %118 {strides = array<i32>} : memref<128x576xbf16, #tpu.memory_space<vmem>>, vector<128x64xbf16>,
    %120 = vector.extract_strided_slice %117 {offsets = [1, 0], sizes = [128, 64], strides = [1, 1]} : vector<176x64xbf16> to vector<128x64xbf16>
    %c0_124 = arith.constant 0 : index
    %c64_125 = arith.constant 64 : index
    %121 = vector.load %arg10[%c0_124, %c64_125] : memref<128x576xbf16, #tpu.memory_space<vmem>>, vector<128x64xbf16>
    tpu.vector_store %arg10[%c0_124, %c64_125], %120 {strides = array<i32>} : memref<128x576xbf16, #tpu.memory_space<vmem>>, vector<128x64xbf16>,
    %122 = vector.extract_strided_slice %117 {offsets = [2, 0], sizes = [128, 64], strides = [1, 1]} : vector<176x64xbf16> to vector<128x64xbf16>
    %c0_126 = arith.constant 0 : index
    %c128_127 = arith.constant 128 : index
    %123 = vector.load %arg10[%c0_126, %c128_127] : memref<128x576xbf16, #tpu.memory_space<vmem>>, vector<128x64xbf16>
    tpu.vector_store %arg10[%c0_126, %c128_127], %122 {strides = array<i32>} : memref<128x576xbf16, #tpu.memory_space<vmem>>, vector<128x64xbf16>,
    %124 = vector.extract_strided_slice %117 {offsets = [16, 0], sizes = [128, 64], strides = [1, 1]} : vector<176x64xbf16> to vector<128x64xbf16>
    %c0_128 = arith.constant 0 : index
    %c192_129 = arith.constant 192 : index
    %125 = vector.load %arg10[%c0_128, %c192_129] : memref<128x576xbf16, #tpu.memory_space<vmem>>, vector<128x64xbf16>
    tpu.vector_store %arg10[%c0_128, %c192_129], %124 {strides = array<i32>} : memref<128x576xbf16, #tpu.memory_space<vmem>>, vector<128x64xbf16>,
    %126 = vector.extract_strided_slice %117 {offsets = [17, 0], sizes = [128, 64], strides = [1, 1]} : vector<176x64xbf16> to vector<128x64xbf16>
    %c0_130 = arith.constant 0 : index
    %c256_131 = arith.constant 256 : index
    %127 = vector.load %arg10[%c0_130, %c256_131] : memref<128x576xbf16, #tpu.memory_space<vmem>>, vector<128x64xbf16>
    tpu.vector_store %arg10[%c0_130, %c256_131], %126 {strides = array<i32>} : memref<128x576xbf16, #tpu.memory_space<vmem>>, vector<128x64xbf16>,
    %128 = vector.extract_strided_slice %117 {offsets = [18, 0], sizes = [128, 64], strides = [1, 1]} : vector<176x64xbf16> to vector<128x64xbf16>
    %c0_132 = arith.constant 0 : index
    %c320_133 = arith.constant 320 : index
    %129 = vector.load %arg10[%c0_132, %c320_133] : memref<128x576xbf16, #tpu.memory_space<vmem>>, vector<128x64xbf16>
    tpu.vector_store %arg10[%c0_132, %c320_133], %128 {strides = array<i32>} : memref<128x576xbf16, #tpu.memory_space<vmem>>, vector<128x64xbf16>,
    %130 = vector.extract_strided_slice %117 {offsets = [32, 0], sizes = [128, 64], strides = [1, 1]} : vector<176x64xbf16> to vector<128x64xbf16>
    %c0_134 = arith.constant 0 : index
    %c384_135 = arith.constant 384 : index
    %131 = vector.load %arg10[%c0_134, %c384_135] : memref<128x576xbf16, #tpu.memory_space<vmem>>, vector<128x64xbf16>
    tpu.vector_store %arg10[%c0_134, %c384_135], %130 {strides = array<i32>} : memref<128x576xbf16, #tpu.memory_space<vmem>>, vector<128x64xbf16>,
    %132 = vector.extract_strided_slice %117 {offsets = [33, 0], sizes = [128, 64], strides = [1, 1]} : vector<176x64xbf16> to vector<128x64xbf16>
    %c0_136 = arith.constant 0 : index
    %c448_137 = arith.constant 448 : index
    %133 = vector.load %arg10[%c0_136, %c448_137] : memref<128x576xbf16, #tpu.memory_space<vmem>>, vector<128x64xbf16>
    tpu.vector_store %arg10[%c0_136, %c448_137], %132 {strides = array<i32>} : memref<128x576xbf16, #tpu.memory_space<vmem>>, vector<128x64xbf16>,
    %134 = vector.extract_strided_slice %117 {offsets = [34, 0], sizes = [128, 64], strides = [1, 1]} : vector<176x64xbf16> to vector<128x64xbf16>
    %c0_138 = arith.constant 0 : index
    %c512_139 = arith.constant 512 : index
    %135 = vector.load %arg10[%c0_138, %c512_139] : memref<128x576xbf16, #tpu.memory_space<vmem>>, vector<128x64xbf16>
    tpu.vector_store %arg10[%c0_138, %c512_139], %134 {strides = array<i32>} : memref<128x576xbf16, #tpu.memory_space<vmem>>, vector<128x64xbf16>,
    %c0_140 = arith.constant 0 : index
    %c0_141 = arith.constant 0 : index
    %136 = vector.load %arg10[%c0_140, %c0_141] : memref<128x576xbf16, #tpu.memory_space<vmem>>, vector<128x576xbf16>
    %cst_142 = arith.constant dense<0.000000e+00> : vector<128x64xf32>
    %137 = tpu.matmul %136, %115, %cst_142 {dimension_numbers = #tpu.dot_dimension_numbers<[1], [0], [0], [1], [0, 0, 1, 1], [], []>} : vector<128x576xbf16>, vector<576x64xbf16>, vector<128x64xf32> -> vector<128x64xf32>
    %138 = vector.shape_cast %137 : vector<128x64xf32> to vector<8x16x64xf32>
    %139 = vector.extract_strided_slice %138 {offsets = [0, 0, 0], sizes = [8, 8, 64], strides = [1, 1, 1]} : vector<8x16x64xf32> to vector<8x8x64xf32>
    %c1_143 = arith.constant 1 : index
    %c0_144 = arith.constant 0 : index
    %c0_145 = arith.constant 0 : index
    %c0_146 = arith.constant 0 : index
    %140 = vector.load %arg5[%c1_143, %c0_144, %c0_145, %c0_146] : memref<2x2x1x64xf32, #tpu.memory_space<vmem>>, vector<1x1x1x64xf32>
    %141 = vector.shape_cast %140 : vector<1x1x1x64xf32> to vector<1x64xf32>
    %142 = vector.shape_cast %141 : vector<1x64xf32> to vector<1x1x64xf32>
    %143 = vector.broadcast %142 : vector<1x1x64xf32> to vector<8x8x64xf32>
    %144 = arith.addf %139, %143 : vector<8x8x64xf32>
    %cst_147 = arith.constant 0.000000e+00 : f32
    %145 = vector.broadcast %cst_147 : f32 to vector<8x8x64xf32>
    %146 = arith.maximumf %144, %145 : vector<8x8x64xf32>
    %147 = arith.truncf %146 : vector<8x8x64xf32> to vector<8x8x64xbf16>
    %c1_148 = arith.constant 1 : index
    %c1_149 = arith.constant 1 : index
    %c0_150 = arith.constant 0 : index
    %148 = vector.load %arg9[%c1_148, %c1_149, %c0_150] : memref<11x16x64xbf16, #tpu.memory_space<vmem>>, vector<8x8x64xbf16>
    tpu.vector_store %arg9[%c1_148, %c1_149, %c0_150], %147 {strides = array<i32>} : memref<11x16x64xbf16, #tpu.memory_space<vmem>>, vector<8x8x64xbf16>,
    %c1_151 = arith.constant 1 : index
    %c1_152 = arith.constant 1 : index
    %c0_153 = arith.constant 0 : index
    %c0_154 = arith.constant 0 : index
    %149 = vector.load %arg4[%c1_151, %c1_152, %c0_153, %c0_154] : memref<2x2x576x64xbf16, #tpu.memory_space<vmem>>, vector<1x1x576x64xbf16>
    %150 = vector.shape_cast %149 : vector<1x1x576x64xbf16> to vector<576x64xbf16>
    %c0_155 = arith.constant 0 : index
    %c0_156 = arith.constant 0 : index
    %c0_157 = arith.constant 0 : index
    %151 = vector.load %arg9[%c0_155, %c0_156, %c0_157] : memref<11x16x64xbf16, #tpu.memory_space<vmem>>, vector<11x16x64xbf16>
    %152 = vector.shape_cast %151 : vector<11x16x64xbf16> to vector<176x64xbf16>
    %153 = vector.extract_strided_slice %152 {offsets = [0, 0], sizes = [128, 64], strides = [1, 1]} : vector<176x64xbf16> to vector<128x64xbf16>
    %c0_158 = arith.constant 0 : index
    %c0_159 = arith.constant 0 : index
    %154 = vector.load %arg10[%c0_158, %c0_159] : memref<128x576xbf16, #tpu.memory_space<vmem>>, vector<128x64xbf16>
    tpu.vector_store %arg10[%c0_158, %c0_159], %153 {strides = array<i32>} : memref<128x576xbf16, #tpu.memory_space<vmem>>, vector<128x64xbf16>,
    %155 = vector.extract_strided_slice %152 {offsets = [1, 0], sizes = [128, 64], strides = [1, 1]} : vector<176x64xbf16> to vector<128x64xbf16>
    %c0_160 = arith.constant 0 : index
    %c64_161 = arith.constant 64 : index
    %156 = vector.load %arg10[%c0_160, %c64_161] : memref<128x576xbf16, #tpu.memory_space<vmem>>, vector<128x64xbf16>
    tpu.vector_store %arg10[%c0_160, %c64_161], %155 {strides = array<i32>} : memref<128x576xbf16, #tpu.memory_space<vmem>>, vector<128x64xbf16>,
    %157 = vector.extract_strided_slice %152 {offsets = [2, 0], sizes = [128, 64], strides = [1, 1]} : vector<176x64xbf16> to vector<128x64xbf16>
    %c0_162 = arith.constant 0 : index
    %c128_163 = arith.constant 128 : index
    %158 = vector.load %arg10[%c0_162, %c128_163] : memref<128x576xbf16, #tpu.memory_space<vmem>>, vector<128x64xbf16>
    tpu.vector_store %arg10[%c0_162, %c128_163], %157 {strides = array<i32>} : memref<128x576xbf16, #tpu.memory_space<vmem>>, vector<128x64xbf16>,
    %159 = vector.extract_strided_slice %152 {offsets = [16, 0], sizes = [128, 64], strides = [1, 1]} : vector<176x64xbf16> to vector<128x64xbf16>
    %c0_164 = arith.constant 0 : index
    %c192_165 = arith.constant 192 : index
    %160 = vector.load %arg10[%c0_164, %c192_165] : memref<128x576xbf16, #tpu.memory_space<vmem>>, vector<128x64xbf16>
    tpu.vector_store %arg10[%c0_164, %c192_165], %159 {strides = array<i32>} : memref<128x576xbf16, #tpu.memory_space<vmem>>, vector<128x64xbf16>,
    %161 = vector.extract_strided_slice %152 {offsets = [17, 0], sizes = [128, 64], strides = [1, 1]} : vector<176x64xbf16> to vector<128x64xbf16>
    %c0_166 = arith.constant 0 : index
    %c256_167 = arith.constant 256 : index
    %162 = vector.load %arg10[%c0_166, %c256_167] : memref<128x576xbf16, #tpu.memory_space<vmem>>, vector<128x64xbf16>
    tpu.vector_store %arg10[%c0_166, %c256_167], %161 {strides = array<i32>} : memref<128x576xbf16, #tpu.memory_space<vmem>>, vector<128x64xbf16>,
    %163 = vector.extract_strided_slice %152 {offsets = [18, 0], sizes = [128, 64], strides = [1, 1]} : vector<176x64xbf16> to vector<128x64xbf16>
    %c0_168 = arith.constant 0 : index
    %c320_169 = arith.constant 320 : index
    %164 = vector.load %arg10[%c0_168, %c320_169] : memref<128x576xbf16, #tpu.memory_space<vmem>>, vector<128x64xbf16>
    tpu.vector_store %arg10[%c0_168, %c320_169], %163 {strides = array<i32>} : memref<128x576xbf16, #tpu.memory_space<vmem>>, vector<128x64xbf16>,
    %165 = vector.extract_strided_slice %152 {offsets = [32, 0], sizes = [128, 64], strides = [1, 1]} : vector<176x64xbf16> to vector<128x64xbf16>
    %c0_170 = arith.constant 0 : index
    %c384_171 = arith.constant 384 : index
    %166 = vector.load %arg10[%c0_170, %c384_171] : memref<128x576xbf16, #tpu.memory_space<vmem>>, vector<128x64xbf16>
    tpu.vector_store %arg10[%c0_170, %c384_171], %165 {strides = array<i32>} : memref<128x576xbf16, #tpu.memory_space<vmem>>, vector<128x64xbf16>,
    %167 = vector.extract_strided_slice %152 {offsets = [33, 0], sizes = [128, 64], strides = [1, 1]} : vector<176x64xbf16> to vector<128x64xbf16>
    %c0_172 = arith.constant 0 : index
    %c448_173 = arith.constant 448 : index
    %168 = vector.load %arg10[%c0_172, %c448_173] : memref<128x576xbf16, #tpu.memory_space<vmem>>, vector<128x64xbf16>
    tpu.vector_store %arg10[%c0_172, %c448_173], %167 {strides = array<i32>} : memref<128x576xbf16, #tpu.memory_space<vmem>>, vector<128x64xbf16>,
    %169 = vector.extract_strided_slice %152 {offsets = [34, 0], sizes = [128, 64], strides = [1, 1]} : vector<176x64xbf16> to vector<128x64xbf16>
    %c0_174 = arith.constant 0 : index
    %c512_175 = arith.constant 512 : index
    %170 = vector.load %arg10[%c0_174, %c512_175] : memref<128x576xbf16, #tpu.memory_space<vmem>>, vector<128x64xbf16>
    tpu.vector_store %arg10[%c0_174, %c512_175], %169 {strides = array<i32>} : memref<128x576xbf16, #tpu.memory_space<vmem>>, vector<128x64xbf16>,
    %c0_176 = arith.constant 0 : index
    %c0_177 = arith.constant 0 : index
    %171 = vector.load %arg10[%c0_176, %c0_177] : memref<128x576xbf16, #tpu.memory_space<vmem>>, vector<128x576xbf16>
    %cst_178 = arith.constant dense<0.000000e+00> : vector<128x64xf32>
    %172 = tpu.matmul %171, %150, %cst_178 {dimension_numbers = #tpu.dot_dimension_numbers<[1], [0], [0], [1], [0, 0, 1, 1], [], []>} : vector<128x576xbf16>, vector<576x64xbf16>, vector<128x64xf32> -> vector<128x64xf32>
    %173 = vector.shape_cast %172 : vector<128x64xf32> to vector<8x16x64xf32>
    %174 = vector.extract_strided_slice %173 {offsets = [0, 0, 0], sizes = [8, 8, 64], strides = [1, 1, 1]} : vector<8x16x64xf32> to vector<8x8x64xf32>
    %175 = arith.addf %111, %174 : vector<8x8x64xf32>
    %c1_179 = arith.constant 1 : index
    %c1_180 = arith.constant 1 : index
    %c0_181 = arith.constant 0 : index
    %c0_182 = arith.constant 0 : index
    %176 = vector.load %arg5[%c1_179, %c1_180, %c0_181, %c0_182] : memref<2x2x1x64xf32, #tpu.memory_space<vmem>>, vector<1x1x1x64xf32>
    %177 = vector.shape_cast %176 : vector<1x1x1x64xf32> to vector<1x64xf32>
    %178 = vector.shape_cast %177 : vector<1x64xf32> to vector<1x1x64xf32>
    %179 = vector.broadcast %178 : vector<1x1x64xf32> to vector<8x8x64xf32>
    %180 = arith.addf %175, %179 : vector<8x8x64xf32>
    %cst_183 = arith.constant 0.000000e+00 : f32
    %181 = vector.broadcast %cst_183 : f32 to vector<8x8x64xf32>
    %182 = arith.maximumf %180, %181 : vector<8x8x64xf32>
    %183 = arith.truncf %182 : vector<8x8x64xf32> to vector<8x8x64xbf16>
    %c1_184 = arith.constant 1 : index
    %c1_185 = arith.constant 1 : index
    %c0_186 = arith.constant 0 : index
    %184 = vector.load %arg9[%c1_184, %c1_185, %c0_186] : memref<11x16x64xbf16, #tpu.memory_space<vmem>>, vector<8x8x64xbf16>
    tpu.vector_store %arg9[%c1_184, %c1_185, %c0_186], %183 {strides = array<i32>} : memref<11x16x64xbf16, #tpu.memory_space<vmem>>, vector<8x8x64xbf16>,
    %c0_187 = arith.constant 0 : index
    %c0_188 = arith.constant 0 : index
    %185 = vector.load %arg6[%c0_187, %c0_188] : memref<576x64xbf16, #tpu.memory_space<vmem>>, vector<576x64xbf16>
    %c0_189 = arith.constant 0 : index
    %c0_190 = arith.constant 0 : index
    %c0_191 = arith.constant 0 : index
    %186 = vector.load %arg9[%c0_189, %c0_190, %c0_191] : memref<11x16x64xbf16, #tpu.memory_space<vmem>>, vector<11x16x64xbf16>
    %187 = vector.shape_cast %186 : vector<11x16x64xbf16> to vector<176x64xbf16>
    %188 = vector.extract_strided_slice %187 {offsets = [0, 0], sizes = [128, 64], strides = [1, 1]} : vector<176x64xbf16> to vector<128x64xbf16>
    %c0_192 = arith.constant 0 : index
    %c0_193 = arith.constant 0 : index
    %189 = vector.load %arg10[%c0_192, %c0_193] : memref<128x576xbf16, #tpu.memory_space<vmem>>, vector<128x64xbf16>
    tpu.vector_store %arg10[%c0_192, %c0_193], %188 {strides = array<i32>} : memref<128x576xbf16, #tpu.memory_space<vmem>>, vector<128x64xbf16>,
    %190 = vector.extract_strided_slice %187 {offsets = [1, 0], sizes = [128, 64], strides = [1, 1]} : vector<176x64xbf16> to vector<128x64xbf16>
    %c0_194 = arith.constant 0 : index
    %c64_195 = arith.constant 64 : index
    %191 = vector.load %arg10[%c0_194, %c64_195] : memref<128x576xbf16, #tpu.memory_space<vmem>>, vector<128x64xbf16>
    tpu.vector_store %arg10[%c0_194, %c64_195], %190 {strides = array<i32>} : memref<128x576xbf16, #tpu.memory_space<vmem>>, vector<128x64xbf16>,
    %192 = vector.extract_strided_slice %187 {offsets = [2, 0], sizes = [128, 64], strides = [1, 1]} : vector<176x64xbf16> to vector<128x64xbf16>
    %c0_196 = arith.constant 0 : index
    %c128_197 = arith.constant 128 : index
    %193 = vector.load %arg10[%c0_196, %c128_197] : memref<128x576xbf16, #tpu.memory_space<vmem>>, vector<128x64xbf16>
    tpu.vector_store %arg10[%c0_196, %c128_197], %192 {strides = array<i32>} : memref<128x576xbf16, #tpu.memory_space<vmem>>, vector<128x64xbf16>,
    %194 = vector.extract_strided_slice %187 {offsets = [16, 0], sizes = [128, 64], strides = [1, 1]} : vector<176x64xbf16> to vector<128x64xbf16>
    %c0_198 = arith.constant 0 : index
    %c192_199 = arith.constant 192 : index
    %195 = vector.load %arg10[%c0_198, %c192_199] : memref<128x576xbf16, #tpu.memory_space<vmem>>, vector<128x64xbf16>
    tpu.vector_store %arg10[%c0_198, %c192_199], %194 {strides = array<i32>} : memref<128x576xbf16, #tpu.memory_space<vmem>>, vector<128x64xbf16>,
    %196 = vector.extract_strided_slice %187 {offsets = [17, 0], sizes = [128, 64], strides = [1, 1]} : vector<176x64xbf16> to vector<128x64xbf16>
    %c0_200 = arith.constant 0 : index
    %c256_201 = arith.constant 256 : index
    %197 = vector.load %arg10[%c0_200, %c256_201] : memref<128x576xbf16, #tpu.memory_space<vmem>>, vector<128x64xbf16>
    tpu.vector_store %arg10[%c0_200, %c256_201], %196 {strides = array<i32>} : memref<128x576xbf16, #tpu.memory_space<vmem>>, vector<128x64xbf16>,
    %198 = vector.extract_strided_slice %187 {offsets = [18, 0], sizes = [128, 64], strides = [1, 1]} : vector<176x64xbf16> to vector<128x64xbf16>
    %c0_202 = arith.constant 0 : index
    %c320_203 = arith.constant 320 : index
    %199 = vector.load %arg10[%c0_202, %c320_203] : memref<128x576xbf16, #tpu.memory_space<vmem>>, vector<128x64xbf16>
    tpu.vector_store %arg10[%c0_202, %c320_203], %198 {strides = array<i32>} : memref<128x576xbf16, #tpu.memory_space<vmem>>, vector<128x64xbf16>,
    %200 = vector.extract_strided_slice %187 {offsets = [32, 0], sizes = [128, 64], strides = [1, 1]} : vector<176x64xbf16> to vector<128x64xbf16>
    %c0_204 = arith.constant 0 : index
    %c384_205 = arith.constant 384 : index
    %201 = vector.load %arg10[%c0_204, %c384_205] : memref<128x576xbf16, #tpu.memory_space<vmem>>, vector<128x64xbf16>
    tpu.vector_store %arg10[%c0_204, %c384_205], %200 {strides = array<i32>} : memref<128x576xbf16, #tpu.memory_space<vmem>>, vector<128x64xbf16>,
    %202 = vector.extract_strided_slice %187 {offsets = [33, 0], sizes = [128, 64], strides = [1, 1]} : vector<176x64xbf16> to vector<128x64xbf16>
    %c0_206 = arith.constant 0 : index
    %c448_207 = arith.constant 448 : index
    %203 = vector.load %arg10[%c0_206, %c448_207] : memref<128x576xbf16, #tpu.memory_space<vmem>>, vector<128x64xbf16>
    tpu.vector_store %arg10[%c0_206, %c448_207], %202 {strides = array<i32>} : memref<128x576xbf16, #tpu.memory_space<vmem>>, vector<128x64xbf16>,
    %204 = vector.extract_strided_slice %187 {offsets = [34, 0], sizes = [128, 64], strides = [1, 1]} : vector<176x64xbf16> to vector<128x64xbf16>
    %c0_208 = arith.constant 0 : index
    %c512_209 = arith.constant 512 : index
    %205 = vector.load %arg10[%c0_208, %c512_209] : memref<128x576xbf16, #tpu.memory_space<vmem>>, vector<128x64xbf16>
    tpu.vector_store %arg10[%c0_208, %c512_209], %204 {strides = array<i32>} : memref<128x576xbf16, #tpu.memory_space<vmem>>, vector<128x64xbf16>,
    %c0_210 = arith.constant 0 : index
    %c0_211 = arith.constant 0 : index
    %206 = vector.load %arg10[%c0_210, %c0_211] : memref<128x576xbf16, #tpu.memory_space<vmem>>, vector<128x576xbf16>
    %cst_212 = arith.constant dense<0.000000e+00> : vector<128x64xf32>
    %207 = tpu.matmul %206, %185, %cst_212 {dimension_numbers = #tpu.dot_dimension_numbers<[1], [0], [0], [1], [0, 0, 1, 1], [], []>} : vector<128x576xbf16>, vector<576x64xbf16>, vector<128x64xf32> -> vector<128x64xf32>
    %208 = vector.shape_cast %207 : vector<128x64xf32> to vector<8x16x64xf32>
    %209 = vector.extract_strided_slice %208 {offsets = [0, 0, 0], sizes = [8, 8, 64], strides = [1, 1, 1]} : vector<8x16x64xf32> to vector<8x8x64xf32>
    %c0_213 = arith.constant 0 : index
    %c0_214 = arith.constant 0 : index
    %c0_215 = arith.constant 0 : index
    %210 = vector.load %arg7[%c0_213, %c0_214, %c0_215] : memref<1x1x64xf32, #tpu.memory_space<vmem>>, vector<1x1x64xf32>
    %211 = vector.shape_cast %210 : vector<1x1x64xf32> to vector<1x64xf32>
    %212 = vector.shape_cast %211 : vector<1x64xf32> to vector<1x1x64xf32>
    %213 = vector.broadcast %212 : vector<1x1x64xf32> to vector<8x8x64xf32>
    %214 = arith.addf %209, %213 : vector<8x8x64xf32>
    %c0_216 = arith.constant 0 : index
    %c0_217 = arith.constant 0 : index
    %c0_218 = arith.constant 0 : index
    %c0_219 = arith.constant 0 : index
    %215 = vector.load %arg8[%c0_216, %c0_217, %c0_218, %c0_219] : memref<1x8x8x64xf32, #tpu.memory_space<vmem>>, vector<1x8x8x64xf32>
    %216 = vector.shape_cast %215 : vector<1x8x8x64xf32> to vector<8x8x64xf32>
    %217 = vector.shape_cast %214 : vector<8x8x64xf32> to vector<1x8x8x64xf32>
    tpu.vector_store %arg8[%c0_216, %c0_217, %c0_218, %c0_219], %217 {strides = array<i32>} : memref<1x8x8x64xf32, #tpu.memory_space<vmem>>, vector<1x8x8x64xf32>,
    return
  }
  func.func @transform_0(%arg0: i32) -> (i32, i32, i32, i32) {
    %c0_i32 = arith.constant 0 : i32
    %c0_i32_0 = arith.constant 0 : i32
    %c0_i32_1 = arith.constant 0 : i32
    %c0_i32_2 = arith.constant 0 : i32
    return %arg0, %c0_i32, %c0_i32_0, %c0_i32_1 : i32, i32, i32, i32
  }
  func.func @transform_1(%arg0: i32) -> (i32, i32) {
    %c0_i32 = arith.constant 0 : i32
    %c0_i32_0 = arith.constant 0 : i32
    %c0_i32_1 = arith.constant 0 : i32
    return %c0_i32, %c0_i32_0 : i32, i32
  }
  func.func @transform_2(%arg0: i32) -> (i32, i32, i32) {
    %c0_i32 = arith.constant 0 : i32
    %c0_i32_0 = arith.constant 0 : i32
    %c0_i32_1 = arith.constant 0 : i32
    %c0_i32_2 = arith.constant 0 : i32
    return %c0_i32, %c0_i32_0, %c0_i32_1 : i32, i32, i32
  }
  func.func @transform_3(%arg0: i32) -> (i32, i32, i32, i32) {
    %c0_i32 = arith.constant 0 : i32
    %c0_i32_0 = arith.constant 0 : i32
    %c0_i32_1 = arith.constant 0 : i32
    %c0_i32_2 = arith.constant 0 : i32
    %c0_i32_3 = arith.constant 0 : i32
    return %c0_i32, %c0_i32_0, %c0_i32_1, %c0_i32_2 : i32, i32, i32, i32
  }
  func.func @transform_4(%arg0: i32) -> (i32, i32, i32, i32) {
    %c0_i32 = arith.constant 0 : i32
    %c0_i32_0 = arith.constant 0 : i32
    %c0_i32_1 = arith.constant 0 : i32
    %c0_i32_2 = arith.constant 0 : i32
    %c0_i32_3 = arith.constant 0 : i32
    return %c0_i32, %c0_i32_0, %c0_i32_1, %c0_i32_2 : i32, i32, i32, i32
  }
  func.func @transform_5(%arg0: i32) -> (i32, i32) {
    %c0_i32 = arith.constant 0 : i32
    %c0_i32_0 = arith.constant 0 : i32
    %c0_i32_1 = arith.constant 0 : i32
    return %c0_i32, %c0_i32_0 : i32, i32
  }
  func.func @transform_6(%arg0: i32) -> (i32, i32, i32) {
    %c0_i32 = arith.constant 0 : i32
    %c0_i32_0 = arith.constant 0 : i32
    %c0_i32_1 = arith.constant 0 : i32
    %c0_i32_2 = arith.constant 0 : i32
    return %c0_i32, %c0_i32_0, %c0_i32_1 : i32, i32, i32
  }
  func.func @transform_7(%arg0: i32) -> (i32, i32, i32, i32) {
    %c0_i32 = arith.constant 0 : i32
    %c0_i32_0 = arith.constant 0 : i32
    %c0_i32_1 = arith.constant 0 : i32
    %c0_i32_2 = arith.constant 0 : i32
    return %arg0, %c0_i32, %c0_i32_0, %c0_i32_1 : i32, i32, i32, i32
  }
}

</mosaic_0001>

<bundles_post_ra>
// kernel: _lambda_.1
= control target key start
LH: loop header
LB: loop body
LE: loop exit
PB: predicated region body
PF: predicated region fallthrough
CT: control target
= control target key end

     0   :  { %12 = vsyncpa [#allocation5], 0  ;;  %s8294_s24 = smov 0   ;;  %s10121_s0 = inlined_call_operand.vmem [shape: bf16[2,8,8,64], index: 0, kind: input, shape index: {}]   ;;  %s10122_s1 = inlined_call_operand.vmem [shape: bf16[576,64], index: 1, kind: input, shape index: {}]   ;;  %s10123_s2 = inlined_call_operand.vmem [shape: f32[1,1,64], index: 2, kind: input, shape index: {}]   ;;  %s10124_s3 = inlined_call_operand.hbm [shape: bf16[2,2,576,64], index: 3, kind: input, shape index: {}]   ;;  %s10125_s4 = inlined_call_operand.vmem [shape: f32[2,2,1,64], index: 4, kind: input, shape index: {}]   ;;  %s10126_s5 = inlined_call_operand.vmem [shape: bf16[576,64], index: 5, kind: input, shape index: {}]   ;;  %s10127_s6 = inlined_call_operand.vmem [shape: f32[1,1,64], index: 6, kind: input, shape index: {}]   ;;  %s10128_s7 = inlined_call_operand.vmem [shape: f32[2,8,8,64], index: 7, kind: output, shape index: {}]  }
   0x1 LB: > { %s8300_s25 = sadd.s32 4294967295, %s8247_s24   ;;  %p6684_p0 = scmp.ge.s32.totalorder %s8247_s24, 1  ;;  %s8247_s24 = sphi %s8294_s24, %s18_s24  }
   0x2   : > { %p201_p1 = scmp.lt.s32.totalorder %s8247_s24, 3  ;;  %s8249_s26 = smov [#allocation4]  }
   0x3   : > { %s219_s27 = sshll.u32 %s8249_s26, 4  ;;  %p10129_p3 = scmp.eq.s32.totalorder %s8300_s25, 0  ;;  %s220_s27 = int_to_ptr.vmem [resolvable:$true] %s219_s27 }
   0x4   : > { %p8304_p2 = pnand %p6684_p0, %p201_p1  ;;  %s8209_s9 = scalar_lea.hbm %s10124_s3, 18432 }
   0x5   : > { %p8210_p6 = scmp.ne.s32.totalorder %s10124_s3, %s8209_s9  ;;  %p8216_p10 = scmp.lt.u32.totalorder %s8209_s9, %s10124_s3 }
   0x6   : > { %s10131_s28 = scalar_select %p8304_p2, 1, 0 }
   0x7   : > { %p7966_p4 = pneg %p8304_p2 }
   0x9   : > { %p8313_p5 = pnand %p10129_p3, %p7966_p4 }
   0xb   : > { %p8211_p7 = pneg %p8313_p5 }
   0xd   : > { %p8212_p8 = pnand %p8211_p7, %p8210_p6 }
   0xf   : > { %p8213_p9 = pneg %p8212_p8 }
  0x11   : > { %p8218_p11 = pnand %p8216_p10, %p8213_p9 }
  0x13   : > { %8221 = shalt.err (!%p8218_p11)
}
  0x14   : > { %s8222_s14 = scalar_lea.vmem %s220_s27, 18432  ;;  %p8230_p1 = scmp.lt.s32.totalorder %s220_s27, %s220_s27 }
  0x15   : > { %p8223_p12 = scmp.ne.s32.totalorder %s220_s27, %s8222_s14  ;;  %p8231_p4 = scmp.lt.s32.totalorder %s8222_s14, %s8222_s14 }
  0x17   : > { %p8225_p13 = pnand %p8223_p12, %p8211_p7  ;;  %p8232_p3 = por %p8231_p4, %p8230_p1 }
  0x19   : > { %p8226_p0 = pneg %p8225_p13 }
  0x1b   : > { %p8233_p2 = pnand %p8232_p3, %p8226_p0 }
  0x1d   : > { %8236 = shalt.err (!%p8233_p2)
}
  0x1e   : > { %s8250_s15 = smov 64   ;;  %s8251_s16 = smov 4  }
  0x1f   : > { %7969 = dma.hbm_to_vmem [thread:$0]  (!%p8313_p5), %s10124_s3, 18432, %s220_s27, [#allocation5], %s8250_s15, %s8250_s15, %s8251_s16  }
  0x20   : > { %p10133_p6 = scmp.ne.s32.totalorder %s10131_s28, 0 }
  0x21   : > { %p10134_p8 = scmp.eq.s32.totalorder (!%p10133_p6), %s8300_s25, 0 }
  0x22   : > { %252 = sbr.rel (%p10133_p6) target bundleno = 2649 (0xa59), region = 48 }
  0x29   : > { %8242 = dma.done.wait (%p10134_p8), [#allocation5], 18432   ;;  %p10135_p7 = pmov %p10134_p8 }
  0x2a   : > { %p284_p2 = scmp.lt.s32.totalorder %s8300_s25, 1  ;;  %vm300_vm0 = vcmask 516096   ;;  %vm301_vm1 = vsmask.f32 256  ;;  %vm336_vm2 = vcmask 523268   ;;  %vm295_vm4 = vcmask 523264  }
  0x2b   : > { %8244 = vsyncadd (%p10135_p7), [#allocation5], 4294948864  ;;  %vm337_vm3 = vsmask.f32 7954  ;;  %v8252_v0 = vmov 0   ;;  %vm469_vm7 = vcmask 520192  }
  0x2c   : > { %s10143_s25 = smov (!%p284_p2, %s8300_s25), 1  ;;  %296 = vst.msk [vmem:[#allocation2] sm:$0xff] %vm295_vm4, %v8252_v0  ;;  %298 = vst.msk [vmem:[#allocation2 + $0x48] sm:$0xff] %vm295_vm4, %v8252_v0  ;;  %vm470_vm8 = vsmask.f32 4354  ;;  %v7993_v11 = vld [vmem:[%s10122_s1 + $0x40] sm:$0xff]  }
  0x2d   : > { %299 = vst.msk [vmem:[#allocation2 + $0x50] sm:$0xff] %vm295_vm4, %v8252_v0  ;;  %s6976_s19 = sshll.u32 %s10143_s25, 5  ;;  %vm8347_vm5 = vmand %vm300_vm0, %vm301_vm1  ;;  %v306_v3 = vld [vmem:[#allocation2 + $0x8] sm:$0x1]  ;;  %v342_v4 = vld [vmem:[#allocation2 + $0x8] sm:$0xf0]  ;;  %6978 = vmatprep.subr.bf16.mxu0 %v7993_v11 }
  0x2e   : > { %s8354_s22 = scalar_lea.vmem %s10121_s0, %s6976_s19  ;;  %vm8356_vm6 = vmand %vm336_vm2, %vm337_vm3  ;;  %v307_v5 = vsel %vm8347_vm5, 0, %v306_v3  ;;  %v309_v8 = vld [vmem:[#allocation2 + $0x10] sm:$0x1]  ;;  %v345_v10 = vld [vmem:[#allocation2 + $0x10] sm:$0xf0]  ;;  %vm698_vm11 = vcmask 1046528  }
  0x2f   : > { %v343_v6 = vsel %vm8356_vm6, 0, %v342_v4  ;;  %v7985_v7 = vld [vmem:[%s8354_s22] ss:$0 sps:$4 sm:$0xff]   ;;  %308 = vst [vmem:[#allocation2 + $0x8] sm:$0x1] %v307_v5  ;;  %v310_v9 = vsel %vm8347_vm5, 0, %v309_v8  ;;  %vm8385_vm9 = vmand %vm469_vm7, %vm470_vm8 }
  0x30   : > { %344 = vst [vmem:[#allocation2 + $0x8] sm:$0xf0] %v343_v6  ;;  %v405_v12 = vshrl.u32 %v7985_v7, 16  ;;  %v408_v13 = vshll.u32 %v7985_v7, 16  ;;  %311 = vst [vmem:[#allocation2 + $0x10] sm:$0x1] %v310_v9 }
  0x31   : > { %v346_v18 = vsel %vm8356_vm6, 0, %v345_v10  ;;  %v7986_v19 = vld [vmem:[%s8354_s22 + $0x4] ss:$0 sps:$4 sm:$0xff]   ;;  %v312_v22 = vld [vmem:[#allocation2 + $0x18] sm:$0x1]  ;;  %v7995_v24 = vld [vmem:[%s10122_s1 + $0x48] sm:$0xff]  }
  0x32   : > { %v7994_v20 = vld [vmem:[%s10122_s1] sm:$0xff]   ;;  %v407_v21 = vrot.slane %v405_v12, 7  ;;  %347 = vst [vmem:[#allocation2 + $0x10] sm:$0xf0] %v346_v18  ;;  %v348_v23 = vld [vmem:[#allocation2 + $0x18] sm:$0xf0] }
  0x33   : > { %v303_v14 = vld [vmem:[#allocation2] sm:$0x1]  ;;  %v339_v15 = vld [vmem:[#allocation2] sm:$0xf0]  ;;  %v412_v26 = vshrl.u32 %v7986_v19, 16  ;;  %v415_v27 = vshll.u32 %v7986_v19, 16  ;;  %6979 = vmatpush3.bf16.msra.mxu0 %v7994_v20 }
  0x34   : > { %v304_v16 = vsel %vm8347_vm5, 0, %v303_v14  ;;  %v340_v17 = vsel %vm8356_vm6, 0, %v339_v15  ;;  %v313_v28 = vsel %vm8347_vm5, 0, %v312_v22  ;;  %v349_v29 = vsel %vm8356_vm6, 0, %v348_v23  ;;  %v7987_v31 = vld [vmem:[%s8354_s22 + $0x8] ss:$0 sps:$4 sm:$0xff]   ;;  %6980 = vmatprep.subr.bf16.mxu0 %v7995_v24 }
  0x35   : > { %305 = vst [vmem:[#allocation2] sm:$0x1] %v304_v16  ;;  %341 = vst [vmem:[#allocation2] sm:$0xf0] %v340_v17  ;;  %v410_v30 = vor.u32 %v408_v13, %v407_v21  ;;  %v315_v32 = vld [vmem:[#allocation2 + $0x20] sm:$0x1] }
  0x36   : > { %314 = vst [vmem:[#allocation2 + $0x18] sm:$0x1] %v313_v28  ;;  %350 = vst [vmem:[#allocation2 + $0x18] sm:$0xf0] %v349_v29  ;;  %v351_v33 = vld [vmem:[#allocation2 + $0x20] sm:$0xf0] }
  0x37   : > { %v414_v34 = vrot.slane %v412_v26, 7  ;;  %v316_v35 = vsel %vm8347_vm5, 0, %v315_v32  ;;  %v352_v36 = vsel %vm8356_vm6, 0, %v351_v33  ;;  %v7996_v37 = vld [vmem:[%s10122_s1 + $0x8] sm:$0xff]   ;;  %v419_v39 = vshrl.u32 %v7987_v31, 16  ;;  %v7997_v16 = vld [vmem:[%s10122_s1 + $0x50] sm:$0xff]  }
  0x38   : > { %v472_v38 = vld [vmem:[#allocation2 + $0x8] sm:$0x1f]  ;;  %v422_v40 = vshll.u32 %v7987_v31, 16  ;;  %317 = vst [vmem:[#allocation2 + $0x20] sm:$0x1] %v316_v35  ;;  %6981 = vmatpush3.bf16.msra.mxu0 %v7996_v37  ;;  %s8253_s12 = smov 64  }
  0x39   : > { %353 = vst [vmem:[#allocation2 + $0x20] sm:$0xf0] %v352_v36  ;;  %v7988_v41 = vld [vmem:[%s8354_s22 + $0xc] ss:$0 sps:$4 sm:$0xff]   ;;  %v473_v42 = vsel %vm8385_vm9, %v410_v30, %v472_v38  ;;  %v417_v43 = vor.u32 %v415_v27, %v414_v34  ;;  %v318_v44 = vld [vmem:[#allocation2 + $0x28] sm:$0x1]  ;;  %6982 = vmatprep.subr.bf16.mxu0 %v7997_v16 }
  0x3a   : > { %v354_v45 = vld [vmem:[#allocation2 + $0x28] sm:$0xf0]  ;;  %474 = vst [vmem:[#allocation2 + $0x8] sm:$0x1f] %v473_v42  ;;  %v421_v46 = vrot.slane %v419_v39, 7  ;;  %v426_v47 = vshrl.u32 %v7988_v41, 16 }
  0x3b   : > { %v429_v48 = vshll.u32 %v7988_v41, 16  ;;  %v319_v49 = vsel %vm8347_vm5, 0, %v318_v44  ;;  %v7989_v50 = vld [vmem:[%s8354_s22 + $0x10] ss:$0 sps:$4 sm:$0xff]   ;;  %vm587_vm10 = vsmask.f32 7424 }
  0x3c   : > { %v8407_v51 = vld [vmem:[#allocation2] sm:$0xff]  ;;  %v475_v52 = vld [vmem:[#allocation2 + $0x10] sm:$0x1f]  ;;  %320 = vst [vmem:[#allocation2 + $0x28] sm:$0x1] %v319_v49  ;;  %v355_v53 = vsel %vm8356_vm6, 0, %v354_v45  ;;  %v424_v58 = vor.u32 %v422_v40, %v421_v46 }
  0x3d   : > { %v321_v54 = vld [vmem:[#allocation2 + $0x30] sm:$0x1]  ;;  %v589_v55 = vshrl.u32 %v8407_v51, 16  ;;  %v591_v56 = vshll.u32 %v8407_v51, 16  ;;  %579 = vst.msk [vmem:[#allocation3] sm:$0xff] %vm295_vm4, %v8407_v51  ;;  %v476_v57 = vsel %vm8385_vm9, %v417_v43, %v475_v52  ;;  %v428_v61 = vrot.slane %v426_v47, 7 }
  0x3e   : > { %356 = vst [vmem:[#allocation2 + $0x28] sm:$0xf0] %v355_v53  ;;  %v357_v59 = vld [vmem:[#allocation2 + $0x30] sm:$0xf0]  ;;  %477 = vst [vmem:[#allocation2 + $0x10] sm:$0x1f] %v476_v57 }
  0x3f   : > { %v478_v60 = vld [vmem:[#allocation2 + $0x18] sm:$0x1f]  ;;  %v433_v62 = vshrl.u32 %v7989_v50, 16  ;;  %v436_v63 = vshll.u32 %v7989_v50, 16  ;;  %v322_v0 = vsel %vm8347_vm5, 0, %v321_v54  ;;  %v593_v3 = vrot.slane %v591_v56, 1 }
  0x40   : > { %v479_v4 = vsel %vm8385_vm9, %v424_v58, %v478_v60  ;;  %323 = vst [vmem:[#allocation2 + $0x30] sm:$0x1] %v322_v0  ;;  %v358_v5 = vsel %vm8356_vm6, 0, %v357_v59  ;;  %v7990_v6 = vld [vmem:[%s8354_s22 + $0x14] ss:$0 sps:$4 sm:$0xff]   ;;  %v431_v8 = vor.u32 %v429_v48, %v428_v61  ;;  %v699_v23 = vrot.slane %v8407_v51, 1 }
  0x41   : > { %v324_v7 = vld [vmem:[#allocation2 + $0x38] sm:$0x1]  ;;  %480 = vst [vmem:[#allocation2 + $0x18] sm:$0x1f] %v479_v4  ;;  %v481_v9 = vld [vmem:[#allocation2 + $0x20] sm:$0x1f]  ;;  %v594_v18 = vor.u32 %v593_v3, %v589_v55 }
  0x42   : > { %v435_v10 = vrot.slane %v433_v62, 7  ;;  %359 = vst [vmem:[#allocation2 + $0x30] sm:$0xf0] %v358_v5  ;;  %v325_v11 = vsel %vm8347_vm5, 0, %v324_v7  ;;  %v360_v12 = vld [vmem:[#allocation2 + $0x38] sm:$0xf0]  ;;  %v482_v19 = vsel %vm8385_vm9, %v431_v8, %v481_v9 }
  0x43   : > { %v440_v13 = vshrl.u32 %v7990_v6, 16  ;;  %v443_v14 = vshll.u32 %v7990_v6, 16  ;;  %326 = vst [vmem:[#allocation2 + $0x38] sm:$0x1] %v325_v11  ;;  %v361_v15 = vsel %vm8356_vm6, 0, %v360_v12  ;;  %v8431_v17 = vld [vmem:[#allocation2 + $0x8] sm:$0xff] }
  0x44   : > { %v438_v20 = vor.u32 %v436_v63, %v435_v10  ;;  %362 = vst [vmem:[#allocation2 + $0x38] sm:$0xf0] %v361_v15  ;;  %v7991_v21 = vld [vmem:[%s8354_s22 + $0x18] ss:$0 sps:$4 sm:$0xff]   ;;  %v327_v22 = vld [vmem:[#allocation2 + $0x40] sm:$0x1]  ;;  %732 = vrot.lane.b32.xlu0 %v8431_v17, %s8253_s12 }
  0x45   : > { %v596_v24 = vshll.u32 %v8431_v17, 16  ;;  %580 = vst.msk [vmem:[#allocation3 + $0x28] sm:$0xff] %vm295_vm4, %v8431_v17  ;;  %v600_v26 = vshrl.u32 %v8431_v17, 16  ;;  %483 = vst [vmem:[#allocation2 + $0x20] sm:$0x1f] %v482_v19  ;;  %v442_v27 = vrot.slane %v440_v13, 7 }
  0x46   : > { %v328_v28 = vsel %vm8347_vm5, 0, %v327_v22  ;;  %v363_v29 = vld [vmem:[#allocation2 + $0x40] sm:$0xf0]  ;;  %v484_v30 = vld [vmem:[#allocation2 + $0x28] sm:$0x1f]  ;;  %v447_v31 = vshrl.u32 %v7991_v21, 16 }
  0x47   : > { %v450_v32 = vshll.u32 %v7991_v21, 16  ;;  %329 = vst [vmem:[#allocation2 + $0x40] sm:$0x1] %v328_v28  ;;  %v364_v33 = vsel %vm8356_vm6, 0, %v363_v29  ;;  %v700_v34 = vrot.slane %v8431_v17, 1  ;;  %v598_v35 = vrot.slane %v596_v24, 1 }
  0x48   : > { %v8448_v36 = vld [vmem:[#allocation2 + $0x10] sm:$0xff]  ;;  %v485_v37 = vsel %vm8385_vm9, %v438_v20, %v484_v30  ;;  %v445_v38 = vor.u32 %v443_v14, %v442_v27  ;;  %365 = vst [vmem:[#allocation2 + $0x40] sm:$0xf0] %v364_v33  ;;  %v7992_v39 = vld [vmem:[%s8354_s22 + $0x1c] ss:$0 sps:$4 sm:$0xff]   ;;  %v449_v42 = vrot.slane %v447_v31, 7 }
  0x49   : > { %734 = vrot.lane.b32.xlu1 %v8448_v36, %s8253_s12  ;;  %581 = vst.msk [vmem:[#allocation3 + $0x50] sm:$0xff] %vm295_vm4, %v8448_v36  ;;  %823 = vst.msk [vmem:[#allocation3 + $0x18] sm:$0xff] %vm295_vm4, %v8448_v36  ;;  %v604_v40 = vshll.u32 %v8448_v36, 16  ;;  %v608_v41 = vshrl.u32 %v8448_v36, 16  ;;  %v702_v43 = vrot.slane %v8448_v36, 1  ;;  %v599_v45 = vsel %vm587_vm10, %v594_v18, %v598_v35  ;;  %v8463_v46 = vld [vmem:[#allocation2 + $0x18] sm:$0xff] }
  0x4a   : > { %486 = vst [vmem:[#allocation2 + $0x28] sm:$0x1f] %v485_v37  ;;  %v330_v44 = vld [vmem:[#allocation2 + $0x48] sm:$0x1]  ;;  %v602_v47 = vor.u32 %v600_v26, %v598_v35  ;;  %v487_v48 = vld [vmem:[#allocation2 + $0x30] sm:$0x1f]  ;;  %656 = vrot.lane.b32.xlu0 %v599_v45, %s8253_s12  ;;  %v452_v59 = vor.u32 %v450_v32, %v449_v42  ;;  %v701_v37 = vsel %vm698_vm11, %v699_v23, %v700_v34 }
  0x4b   : > { %v454_v49 = vshrl.u32 %v7992_v39, 16  ;;  %v457_v50 = vshll.u32 %v7992_v39, 16  ;;  %v7998_v52 = vld [vmem:[%s10122_s1 + $0x10] sm:$0xff]   ;;  %582 = vst.msk [vmem:[#allocation3 + $0x78] sm:$0xff] %vm295_vm4, %v8463_v46  ;;  %824 = vst.msk [vmem:[#allocation3 + $0x40] sm:$0xff] %vm295_vm4, %v8463_v46  ;;  %v606_v53 = vrot.slane %v604_v40, 1  ;;  %v488_v56 = vsel %vm8385_vm9, %v445_v38, %v487_v48 }
  0x4c   : > { %v612_v54 = vshll.u32 %v8463_v46, 16  ;;  %v616_v55 = vshrl.u32 %v8463_v46, 16  ;;  %v366_v57 = vld [vmem:[#allocation2 + $0x48] sm:$0xf0]  ;;  %v7999_v58 = vld [vmem:[%s10122_s1 + $0x58] sm:$0xff]   ;;  %v8483_v62 = vsel %vm698_vm11, %v700_v34, %v702_v43  ;;  %v704_v63 = vrot.slane %v8463_v46, 1  ;;  %6983 = vmatpush3.bf16.msra.mxu0 %v7998_v52 }
  0x4d   : > { %489 = vst [vmem:[#allocation2 + $0x30] sm:$0x1f] %v488_v56  ;;  %v490_v60 = vld [vmem:[#allocation2 + $0x38] sm:$0x1f]  ;;  %v456_v61 = vrot.slane %v454_v49, 7  ;;  %v607_v3 = vsel %vm587_vm10, %v602_v47, %v606_v53  ;;  %v572_v4 = vld [vmem:[#allocation2 + $0x20] sm:$0xff]  ;;  %v610_v5 = vor.u32 %v608_v41, %v606_v53  ;;  %6984 = vmatprep.subr.bf16.mxu0 %v7999_v58 }
  0x4e   : > { %v333_v0 = vld [vmem:[#allocation2 + $0x50] sm:$0x1]  ;;  %v614_v6 = vrot.slane %v612_v54, 1  ;;  %725 = vst.msk [vmem:[#allocation3 + $0x30] sm:$0xff] %vm295_vm4, %v8483_v62  ;;  %v331_v7 = vsel %vm8347_vm5, 0, %v330_v44  ;;  %v8000_v9 = vld [vmem:[%s10122_s1 + $0x18] sm:$0xff]   ;;  %658 = vrot.lane.b32.xlu1 %v607_v3, %s8253_s12  ;;  %v491_v12 = vsel %vm8385_vm9, %v452_v59, %v490_v60  ;;  %736 = vrot.lane.b32.xlu0 %v8463_v46, %s8253_s12  ;;  %v8504_v18 = vsel %vm698_vm11, %v702_v43, %v704_v63 }
  0x4f   : > { %v369_v8 = vld [vmem:[#allocation2 + $0x50] sm:$0xf0]  ;;  %780 = vst.msk [vmem:[#allocation3 + $0x10] sm:$0xff] %vm295_vm4, %v607_v3  ;;  %583 = vst.msk [vmem:[#allocation3 + $0xa0] sm:$0xff] %vm295_vm4, %v572_v4  ;;  %v620_v10 = vshll.u32 %v572_v4, 16  ;;  %v624_v11 = vshrl.u32 %v572_v4, 16  ;;  %v459_v13 = vor.u32 %v457_v50, %v456_v61 }
  0x50   : > { %825 = vst.msk [vmem:[#allocation3 + $0x68] sm:$0xff] %vm295_vm4, %v572_v4  ;;  %332 = vst [vmem:[#allocation2 + $0x48] sm:$0x1] %v331_v7  ;;  %v615_v14 = vsel %vm587_vm10, %v610_v5, %v614_v6  ;;  %v618_v15 = vor.u32 %v616_v55, %v614_v6  ;;  %v493_v16 = vld [vmem:[#allocation2 + $0x40] sm:$0x1f]  ;;  %v706_v19 = vrot.slane %v572_v4, 1  ;;  %6985 = vmatpush3.bf16.msra.mxu0 %v8000_v9 }
  0x51   : > { %492 = vst [vmem:[#allocation2 + $0x38] sm:$0x1f] %v491_v12  ;;  %v8001_v20 = vld [vmem:[%s10122_s1 + $0x60] sm:$0xff]   ;;  %781 = vst.msk [vmem:[#allocation3 + $0x38] sm:$0xff] %vm295_vm4, %v615_v14  ;;  %v573_v21 = vld [vmem:[#allocation2 + $0x28] sm:$0xff]  ;;  %v622_v22 = vrot.slane %v620_v10, 1  ;;  %v494_v24 = vsel %vm8385_vm9, %v459_v13, %v493_v16 }
  0x52   : > { %726 = vst.msk [vmem:[#allocation3 + $0x58] sm:$0xff] %vm295_vm4, %v8504_v18  ;;  %858 = vst.msk [vmem:[#allocation3 + $0x20] sm:$0xff] %vm295_vm4, %v8504_v18  ;;  %v367_v26 = vsel %vm8356_vm6, 0, %v366_v57  ;;  %v334_v27 = vsel %vm8347_vm5, 0, %v333_v0  ;;  %v628_v28 = vshll.u32 %v573_v21, 16  ;;  %v632_v29 = vshrl.u32 %v573_v21, 16  ;;  %6986 = vmatprep.subr.bf16.mxu0 %v8001_v20  ;;  %660 = vrot.lane.b32.xlu1 %v615_v14, %s8253_s12 }
  0x53   : > { %584 = vst.msk [vmem:[#allocation3 + $0xc8] sm:$0xff] %vm295_vm4, %v573_v21  ;;  %826 = vst.msk [vmem:[#allocation3 + $0x90] sm:$0xff] %vm295_vm4, %v573_v21  ;;  %v8523_v30 = vsel %vm698_vm11, %v704_v63, %v706_v19  ;;  %v708_v31 = vrot.slane %v573_v21, 1  ;;  %v8002_v1 = vld [vmem:[%s10122_s1 + $0x20] sm:$0xff]   ;;  %v623_v32 = vsel %vm587_vm10, %v618_v15, %v622_v22  ;;  %v626_v33 = vor.u32 %v624_v11, %v622_v22  ;;  %v8003_v36 = vld [vmem:[%s10122_s1 + $0x68] sm:$0xff]   ;;  %s6977_s16 = sshll.u32 %s10143_s25, 6 }
  0x54   : > { %495 = vst [vmem:[#allocation2 + $0x40] sm:$0x1f] %v494_v24  ;;  %368 = vst [vmem:[#allocation2 + $0x48] sm:$0xf0] %v367_v26  ;;  %v370_v35 = vsel %vm8356_vm6, 0, %v369_v8  ;;  %738 = vrot.lane.b32.xlu0 %v572_v4, %s8253_s12  ;;  %v574_v38 = vld [vmem:[#allocation2 + $0x30] sm:$0xff]  ;;  %6987 = vmatpush3.bf16.msra.mxu0 %v8002_v1  ;;  %s10098_s21 = scalar_lea.vmem %s10128_s7, %s6977_s16 }
  0x55   : > { %335 = vst [vmem:[#allocation2 + $0x50] sm:$0x1] %v334_v27  ;;  %727 = vst.msk [vmem:[#allocation3 + $0x80] sm:$0xff] %vm295_vm4, %v8523_v30  ;;  %v630_v39 = vrot.slane %v628_v28, 1  ;;  %v8547_v40 = vsel %vm698_vm11, %v706_v19, %v708_v31  ;;  %v636_v2 = vshll.u32 %v574_v38, 16  ;;  %v640_v51 = vshrl.u32 %v574_v38, 16  ;;  %6988 = vmatprep.subr.bf16.mxu0 %v8003_v36 }
  0x56   : > { %859 = vst.msk [vmem:[#allocation3 + $0x48] sm:$0xff] %vm295_vm4, %v8523_v30  ;;  %782 = vst.msk [vmem:[#allocation3 + $0x60] sm:$0xff] %vm295_vm4, %v623_v32  ;;  %v710_v17 = vrot.slane %v574_v38, 1  ;;  %v8004_v23 = vld [vmem:[%s10122_s1 + $0x28] sm:$0xff]   ;;  %662 = vrot.lane.b32.xlu1 %v623_v32, %s8253_s12  ;;  %v8005_v48 = vld [vmem:[%s10122_s1 + $0x70] sm:$0xff]   ;;  %vm680_vm12 = vcmask 1048064  }
  0x57   : > { %371 = vst [vmem:[#allocation2 + $0x50] sm:$0xf0] %v370_v35  ;;  %724 = vst.msk [vmem:[#allocation3 + $0x8] sm:$0xff] %vm295_vm4, %v701_v37  ;;  %v631_v34 = vsel %vm587_vm10, %v626_v33, %v630_v39  ;;  %v634_v41 = vor.u32 %v632_v29, %v630_v39  ;;  %v638_v43 = vrot.slane %v636_v2, 1  ;;  %v8006_v58 = vld [vmem:[%s10122_s1 + $0x30] sm:$0xff]   ;;  %v8007_v63 = vld [vmem:[%s10122_s1 + $0x78] sm:$0xff]  }
  0x58   : > { %585 = vst.msk [vmem:[#allocation3 + $0xf0] sm:$0xff] %vm295_vm4, %v574_v38  ;;  %827 = vst.msk [vmem:[#allocation3 + $0xb8] sm:$0xff] %vm295_vm4, %v574_v38  ;;  %v575_v42 = vld [vmem:[#allocation2 + $0x38] sm:$0xff]  ;;  %v8563_v44 = vsel %vm698_vm11, %v708_v31, %v710_v17  ;;  %740 = vrot.lane.b32.xlu0 %v573_v21, %s8253_s12  ;;  %6989 = vmatpush3.bf16.msra.mxu0 %v8004_v23  ;;  %v8009_v15 = vld [vmem:[%s10122_s1 + $0xc0] sm:$0xff]  }
  0x59   : > { %728 = vst.msk [vmem:[#allocation3 + $0xa8] sm:$0xff] %vm295_vm4, %v8547_v40  ;;  %860 = vst.msk [vmem:[#allocation3 + $0x70] sm:$0xff] %vm295_vm4, %v8547_v40  ;;  %v644_v45 = vshll.u32 %v575_v42, 16  ;;  %v648_v46 = vshrl.u32 %v575_v42, 16  ;;  %v712_v47 = vrot.slane %v575_v42, 1  ;;  %v639_v49 = vsel %vm587_vm10, %v634_v41, %v638_v43  ;;  %6990 = vmatprep.subr.bf16.mxu0 %v8005_v48  ;;  %v8008_v12 = vld [vmem:[%s10122_s1 + $0x38] sm:$0xff]   ;;  %7042 = vmatprep.subr.bf16.mxu1 %v8009_v15 }
  0x5a   : > { %783 = vst.msk [vmem:[#allocation3 + $0x88] sm:$0xff] %vm295_vm4, %v631_v34  ;;  %586 = vst.msk [vmem:[#allocation3 + $0x118] sm:$0xff] %vm295_vm4, %v575_v42  ;;  %v642_v52 = vor.u32 %v640_v51, %v638_v43  ;;  %664 = vrot.lane.b32.xlu1 %v631_v34, %s8253_s12  ;;  %v8010_v16 = vld [vmem:[%s10122_s1 + $0x80] sm:$0xff]   ;;  %v8012_v20 = vld [vmem:[%s10122_s1 + $0xc8] sm:$0xff]  }
  0x5b   : > { %828 = vst.msk [vmem:[#allocation3 + $0xe0] sm:$0xff] %vm295_vm4, %v575_v42  ;;  %729 = vst.msk [vmem:[#allocation3 + $0xd0] sm:$0xff] %vm295_vm4, %v8563_v44  ;;  %v576_v50 = vld [vmem:[#allocation2 + $0x40] sm:$0xff]  ;;  %v8576_v53 = vld [vmem:[#allocation2 + $0x48] sm:$0xff]  ;;  %v646_v54 = vrot.slane %v644_v45, 1  ;;  %v8581_v56 = vsel %vm698_vm11, %v710_v17, %v712_v47  ;;  %7043 = vmatpush3.bf16.msra.mxu1 %v8010_v16 }
  0x5c   : > { %861 = vst.msk [vmem:[#allocation3 + $0x98] sm:$0xff] %vm295_vm4, %v8563_v44  ;;  %784 = vst.msk [vmem:[#allocation3 + $0xb0] sm:$0xff] %vm295_vm4, %v639_v49  ;;  %v652_v55 = vshll.u32 %v576_v50, 16  ;;  %v764_v57 = vshrl.u32 %v576_v50, 16  ;;  %v768_v59 = vshll.u32 %v8576_v53, 16  ;;  %v714_v60 = vrot.slane %v576_v50, 1  ;;  %742 = vrot.lane.b32.xlu0 %v574_v38, %s8253_s12  ;;  %6991 = vmatpush3.bf16.msra.mxu0 %v8006_v58 }
  0x5d   : > { %829 = vst.msk [vmem:[#allocation3 + $0x108] sm:$0xff] %vm295_vm4, %v576_v50  ;;  %830 = vst.msk [vmem:[#allocation3 + $0x130] sm:$0xff] %vm295_vm4, %v8576_v53  ;;  %v789_v61 = vrot.slane %v8576_v53, 1  ;;  %v647_v0 = vsel %vm587_vm10, %v642_v52, %v646_v54  ;;  %v650_v3 = vor.u32 %v648_v46, %v646_v54  ;;  %6992 = vmatprep.subr.bf16.mxu0 %v8007_v63  ;;  %v8631_v19 = vld [vmem:[%s10122_s1 + $0x100] sm:$0xff]   ;;  %v8013_v21 = vld [vmem:[%s10122_s1 + $0x88] sm:$0xff]   ;;  %7044 = vmatprep.subr.bf16.mxu1 %v8012_v20 }
  0x5e   : > { %730 = vst.msk [vmem:[#allocation3 + $0xf8] sm:$0xff] %vm295_vm4, %v8581_v56  ;;  %862 = vst.msk [vmem:[#allocation3 + $0xc0] sm:$0xff] %vm295_vm4, %v8581_v56  ;;  %v654_v4 = vrot.slane %v652_v55, 1  ;;  %v578_v5 = vld [vmem:[#allocation2 + $0x50] sm:$0xff]  ;;  %v770_v6 = vrot.slane %v768_v59, 1  ;;  %v715_v7 = vsel %vm698_vm11, %v712_v47, %v714_v60  ;;  %666 = vrot.lane.b32.xlu1 %v639_v49, %s8253_s12  ;;  %v8016_v26 = vld [vmem:[%s10122_s1 + $0xd8] sm:$0xff]  }
  0x5f   : > { %785 = vst.msk [vmem:[#allocation3 + $0xd8] sm:$0xff] %vm295_vm4, %v647_v0  ;;  %v854_v8 = vrot.slane %v578_v5, 1  ;;  %v8603_v9 = vsel %vm698_vm11, %v714_v60, %v789_v61  ;;  %731 = vst.msk [vmem:[#allocation3 + $0x120] sm:$0xff] %vm295_vm4, %v715_v7  ;;  %v8014_v22 = vld [vmem:[%s10122_s1 + $0xd0] sm:$0xff]   ;;  %7045 = vmatpush3.bf16.msra.mxu1 %v8013_v21  ;;  %v831_v27 = vshrl.u32 %v8576_v53, 16  ;;  %v835_v28 = vshll.u32 %v578_v5, 16 }
  0x60   : > { %v655_v10 = vsel %vm587_vm10, %v650_v3, %v654_v4  ;;  %v766_v11 = vor.u32 %v764_v57, %v654_v4  ;;  %863 = vst.msk [vmem:[#allocation3 + $0xe8] sm:$0xff] %vm295_vm4, %v715_v7  ;;  %864 = vst.msk [vmem:[#allocation3 + $0x110] sm:$0xff] %vm295_vm4, %v8603_v9  ;;  %744 = vrot.lane.b32.xlu0 %v575_v42, %s8253_s12  ;;  %6993 = vmatpush3.bf16.msra.mxu0 %v8008_v12  ;;  %v8015_v24 = vld [vmem:[%s10122_s1 + $0x90] sm:$0xff]   ;;  %v8018_v29 = vld [vmem:[%s10122_s1 + $0xe0] sm:$0xff]  }
  0x61   : > { %786 = vst.msk [vmem:[#allocation3 + $0x100] sm:$0xff] %vm295_vm4, %v655_v10  ;;  %v855_v13 = vsel %vm698_vm11, %v789_v61, %v854_v8  ;;  %7818 = vmatprep.subr.bf16.mxu0 %v8631_v19  ;;  %7046 = vmatprep.subr.bf16.mxu1 %v8014_v22  ;;  %v8019_v31 = vld [vmem:[%s10122_s1 + $0xa0] sm:$0xff]   ;;  %v8021_v1 = vld [vmem:[%s10122_s1 + $0xe8] sm:$0xff]   ;;  %v8023_v35 = vld [vmem:[%s10122_s1 + $0xf0] sm:$0xff]  }
  0x62   : > { %v771_v14 = vsel %vm587_vm10, %v766_v11, %v770_v6  ;;  %865 = vst.msk [vmem:[#allocation3 + $0x138] sm:$0xff] %vm295_vm4, %v855_v13  ;;  %668 = vrot.lane.b32.xlu1 %v647_v0, %s8253_s12  ;;  %v8022_v32 = vld [vmem:[%s10122_s1 + $0xa8] sm:$0xff]   ;;  %v8024_v36 = vld [vmem:[%s10122_s1 + $0xb0] sm:$0xff]   ;;  %v8025_v37 = vld [vmem:[%s10122_s1 + $0xf8] sm:$0xff]  }
  0x63   : > { %787 = vst.msk [vmem:[#allocation3 + $0x128] sm:$0xff] %vm295_vm4, %v771_v14  ;;  %7047 = vmatpush3.bf16.msra.mxu1 %v8015_v24  ;;  %v8026_v38 = vld [vmem:[%s10122_s1 + $0xb8] sm:$0xff]   ;;  %v8020_v34 = vld [vmem:[%s10122_s1 + $0x108] sm:$0xff]   ;;  %v8027_v46 = vld [vmem:[%s10122_s1 + $0x110] sm:$0xff]  }
  0x64   : > { %746 = vrot.lane.b32.xlu0 %v576_v50, %s8253_s12  ;;  %7048 = vmatprep.subr.bf16.mxu1 %v8016_v26  ;;  %v8028_v49 = vld [vmem:[%s10122_s1 + $0x118] sm:$0xff]  }
  0x66   : > { %670 = vrot.lane.b32.xlu1 %v655_v10, %s8253_s12 }
  0x68   : > { %791 = vrot.lane.b32.xlu0 %v8483_v62, %s8253_s12  ;;  %v8017_v62 = vld [vmem:[%s10122_s1 + $0x98] sm:$0xff]  }
  0x69   : > { %7049 = vmatpush3.bf16.msra.mxu1 %v8017_v62 }
  0x6a   : > { %793 = vrot.lane.b32.xlu1 %v8504_v18, %s8253_s12  ;;  %v833_v18 = vor.u32 %v831_v27, %v770_v6  ;;  %7050 = vmatprep.subr.bf16.mxu1 %v8018_v29 }
  0x6c   : > { %795 = vrot.lane.b32.xlu0 %v8523_v30, %s8253_s12  ;;  %v837_v30 = vrot.slane %v835_v28, 1 }
  0x6d   : > { %7051 = vmatpush3.bf16.msra.mxu1 %v8019_v31 }
  0x6e   : > { %797 = vrot.lane.b32.xlu1 %v8547_v40, %s8253_s12  ;;  %v838_v33 = vsel %vm587_vm10, %v833_v18, %v837_v30  ;;  %7052 = vmatprep.subr.bf16.mxu1 %v8021_v1  ;;  %v870_v30 = vld [vmem:[#allocation3 + $0x20] sm:$0xff] }
  0x70   : > { %799 = vrot.lane.b32.xlu0 %v8563_v44, %s8253_s12 }
  0x71   : > { %7053 = vmatpush3.bf16.msra.mxu1 %v8022_v32  ;;  %v875_v32 = vld [vmem:[#allocation3 + $0x48] sm:$0xff] }
  0x72   : > { %801 = vrot.lane.b32.xlu1 %v8581_v56, %s8253_s12  ;;  %7054 = vmatprep.subr.bf16.mxu1 %v8023_v35 }
  0x74   : > { %839 = vrot.lane.b32.xlu0 %v771_v14, %s8253_s12 }
  0x75   : > { %7055 = vmatpush3.bf16.msra.mxu1 %v8024_v36 }
  0x76   : > { %803 = vrot.lane.b32.xlu1 %v715_v7, %s8253_s12  ;;  %7056 = vmatprep.subr.bf16.mxu1 %v8025_v37  ;;  %v885_v37 = vld [vmem:[#allocation3 + $0x98] sm:$0xff] }
  0x78   : > { %841 = vrot.lane.b32.xlu0 %v838_v33, %s8253_s12  ;;  %v880_v33 = vld [vmem:[#allocation3 + $0x70] sm:$0xff] }
  0x79   : > { %7057 = vmatpush3.bf16.msra.mxu1 %v8026_v38  ;;  %v890_v38 = vld [vmem:[#allocation3 + $0xc0] sm:$0xff] }
  0x7a   : > { %805 = vrot.lane.b32.xlu1 %v8603_v9, %s8253_s12 }
  0xb6   : > { %v733_v39 = vpop.permute.xlu0 %732 }
  0xb7   : > { %756 = vst.msk [vmem:[#allocation3 + $0x8] sm:$0xff] %vm680_vm12, %v733_v39 }
  0xbb   : > { %v735_v40 = vpop.permute.xlu1 %734 }
  0xbc   : > { %757 = vst.msk [vmem:[#allocation3 + $0x30] sm:$0xff] %vm680_vm12, %v735_v40  ;;  %v657_v2 = vpop.permute.xlu0 %656 }
  0xbd   : > { %681 = vst.msk [vmem:[#allocation3] sm:$0xff] %vm680_vm12, %v657_v2  ;;  %v895_v2 = vld [vmem:[#allocation3 + $0xe8] sm:$0xff] }
  0xbe   : > { %v867_v51 = vld [vmem:[#allocation3 + $0x8] sm:$0xff] }
  0xbf   : > { %1178 = vmatprep.mubr.bf16.mxu0 %v867_v51  ;;  %v900_v51 = vld [vmem:[#allocation3 + $0x110] sm:$0xff] }
  0xc0   : > { %v659_v17 = vpop.permute.xlu1 %658  ;;  %v737_v23 = vpop.permute.xlu0 %736 }
  0xc1   : > { %682 = vst.msk [vmem:[#allocation3 + $0x28] sm:$0xff] %vm680_vm12, %v659_v17  ;;  %758 = vst.msk [vmem:[#allocation3 + $0x58] sm:$0xff] %vm680_vm12, %v737_v23  ;;  %v905_v23 = vld [vmem:[#allocation3 + $0x138] sm:$0xff] }
  0xc3   : > { %v872_v41 = vld [vmem:[#allocation3 + $0x30] sm:$0xff] }
  0xc4   : > { %v661_v42 = vpop.permute.xlu1 %660  ;;  %v866_v44 = vld [vmem:[#allocation3] sm:$0xff] }
  0xc5   : > { %683 = vst.msk [vmem:[#allocation3 + $0x50] sm:$0xff] %vm680_vm12, %v661_v42  ;;  %845 = vst.msk [vmem:[#allocation3 + $0x18] sm:$0xff] %vm680_vm12, %v661_v42  ;;  %1179 = vmatmul.mubr.bf16.vlgmr.msra.gmra.mrb[0].mxu0 %v866_v44 }
  0xc6   : > { %v739_v43 = vpop.permute.xlu0 %738  ;;  %7819 = vmatpush3.bf16.msra.mxu0 %v8631_v19  ;;  %1185 = vmatprep.mubr.bf16.mxu0 %v872_v41  ;;  %v8750_v41 = vld [vmem:[#allocation2 + $0x48] sm:$0xff] }
  0xc7   : > { %759 = vst.msk [vmem:[#allocation3 + $0x80] sm:$0xff] %vm680_vm12, %v739_v43  ;;  %7820 = vmatprep.subr.bf16.mxu0 %v8020_v34 }
  0xc8   : > { %v663_v45 = vpop.permute.xlu1 %662  ;;  %v871_v48 = vld [vmem:[#allocation3 + $0x28] sm:$0xff]  ;;  %v877_v52 = vld [vmem:[#allocation3 + $0x58] sm:$0xff] }
  0xc9   : > { %684 = vst.msk [vmem:[#allocation3 + $0x78] sm:$0xff] %vm680_vm12, %v663_v45  ;;  %846 = vst.msk [vmem:[#allocation3 + $0x40] sm:$0xff] %vm680_vm12, %v663_v45 }
  0xca   : > { %v741_v47 = vpop.permute.xlu0 %740  ;;  %7821 = vmatpush3.bf16.msra.mxu0 %v8020_v34  ;;  %v8746_v34 = vld [vmem:[#allocation2] sm:$0xff] }
  0xcb   : > { %760 = vst.msk [vmem:[#allocation3 + $0xa8] sm:$0xff] %vm680_vm12, %v741_v47  ;;  %7822 = vmatprep.subr.bf16.mxu0 %v8027_v46 }
  0xcc   : > { %v665_v50 = vpop.permute.xlu1 %664  ;;  %v869_v53 = vld [vmem:[#allocation3 + $0x18] sm:$0xff]  ;;  %v876_v57 = vld [vmem:[#allocation3 + $0x50] sm:$0xff]  ;;  %1615 = vst.msk [vmem:[#allocation3] sm:$0xff] %vm295_vm4, %v8746_v34 }
  0xcd   : > { %685 = vst.msk [vmem:[#allocation3 + $0xa0] sm:$0xff] %vm680_vm12, %v665_v50  ;;  %847 = vst.msk [vmem:[#allocation3 + $0x68] sm:$0xff] %vm680_vm12, %v665_v50  ;;  %1267 = vmatprep.mubr.bf16.mxu1 %v869_v53  ;;  %1186 = vmatmul.mubr.bf16.gmra.mrb[4].mxu0 %v871_v48  ;;  %v1801_v53 = vshll.u32 %v8750_v41, 16 }
  0xce   : > { %v743_v54 = vpop.permute.xlu0 %742  ;;  %1192 = vmatprep.mubr.bf16.mxu0 %v877_v52  ;;  %7823 = vmatpush3.bf16.msra.mxu0 %v8027_v46  ;;  %v882_v59 = vld [vmem:[#allocation3 + $0x80] sm:$0xff] }
  0xcf   : > { %761 = vst.msk [vmem:[#allocation3 + $0xd0] sm:$0xff] %vm680_vm12, %v743_v54  ;;  %7824 = vmatprep.subr.bf16.mxu0 %v8028_v49  ;;  %v8029_v54 = vld [vmem:[#allocation4 + $0x40] sm:$0xff]  }
  0xd0   : > { %v667_v55 = vpop.permute.xlu1 %666  ;;  %v881_v0 = vld [vmem:[#allocation3 + $0x78] sm:$0xff]  ;;  %v874_v6 = vld [vmem:[#allocation3 + $0x40] sm:$0xff]  ;;  %7118 = vmatprep.subr.bf16.mxu1 %v8029_v54 }
  0xd1   : > { %686 = vst.msk [vmem:[#allocation3 + $0xc8] sm:$0xff] %vm680_vm12, %v667_v55  ;;  %848 = vst.msk [vmem:[#allocation3 + $0x90] sm:$0xff] %vm680_vm12, %v667_v55  ;;  %v8030_v55 = vld [vmem:[#allocation4] sm:$0xff]  }
  0xd2   : > { %v745_v56 = vpop.permute.xlu0 %744  ;;  %7825 = vmatpush3.bf16.msra.mxu0 %v8028_v49  ;;  %v887_v4 = vld [vmem:[#allocation3 + $0xa8] sm:$0xff] }
  0xd3   : > { %762 = vst.msk [vmem:[#allocation3 + $0xf8] sm:$0xff] %vm680_vm12, %v745_v56  ;;  %v8031_v56 = vld [vmem:[#allocation4 + $0x48] sm:$0xff]  }
  0xd4   : > { %v669_v58 = vpop.permute.xlu1 %668  ;;  %v886_v9 = vld [vmem:[#allocation3 + $0xa0] sm:$0xff]  ;;  %v879_v15 = vld [vmem:[#allocation3 + $0x68] sm:$0xff] }
  0xd5   : > { %687 = vst.msk [vmem:[#allocation3 + $0xf0] sm:$0xff] %vm680_vm12, %v669_v58  ;;  %849 = vst.msk [vmem:[#allocation3 + $0xb8] sm:$0xff] %vm680_vm12, %v669_v58  ;;  %1193 = vmatmul.mubr.bf16.gmra.mrb[8].mxu0 %v876_v57  ;;  %v1864_v57 = vshrl.u32 %v8750_v41, 16  ;;  %v8758_v58 = vrot.slane %v1801_v53, 1 }
  0xd6   : > { %v747_v60 = vpop.permute.xlu0 %746  ;;  %1199 = vmatprep.mubr.bf16.mxu0 %v882_v59  ;;  %v892_v11 = vld [vmem:[#allocation3 + $0xd0] sm:$0xff] }
  0xd7   : > { %763 = vst.msk [vmem:[#allocation3 + $0x120] sm:$0xff] %vm680_vm12, %v747_v60  ;;  %v1614_v60 = vld [vmem:[#allocation2 + $0x50] sm:$0xff] }
  0xd8   : > { %v671_v61 = vpop.permute.xlu1 %670  ;;  %v891_v19 = vld [vmem:[#allocation3 + $0xc8] sm:$0xff]  ;;  %v884_v26 = vld [vmem:[#allocation3 + $0x90] sm:$0xff] }
  0xd9   : > { %688 = vst.msk [vmem:[#allocation3 + $0x118] sm:$0xff] %vm680_vm12, %v671_v61  ;;  %850 = vst.msk [vmem:[#allocation3 + $0xe0] sm:$0xff] %vm680_vm12, %v671_v61 }
  0xda   : > { %v792_v63 = vpop.permute.xlu0 %791  ;;  %v897_v21 = vld [vmem:[#allocation3 + $0xf8] sm:$0xff] }
  0xdb   : > { %815 = vst.msk [vmem:[#allocation3 + $0x10] sm:$0xff] %vm680_vm12, %v792_v63  ;;  %v1822_v63 = vrot.slane %v8750_v41, 1 }
  0xdc   : > { %v794_v3 = vpop.permute.xlu1 %793  ;;  %v896_v27 = vld [vmem:[#allocation3 + $0xf0] sm:$0xff]  ;;  %v889_v29 = vld [vmem:[#allocation3 + $0xb8] sm:$0xff] }
  0xdd   : > { %816 = vst.msk [vmem:[#allocation3 + $0x38] sm:$0xff] %vm680_vm12, %v794_v3  ;;  %1200 = vmatmul.mubr.bf16.gmra.mrb[12].mxu0 %v881_v0  ;;  %v8032_v0 = vld [vmem:[#allocation4 + $0x8] sm:$0xff]   ;;  %v1866_v3 = vor.u32 %v1864_v57, %v8758_v58 }
  0xde   : > { %v796_v5 = vpop.permute.xlu0 %795  ;;  %1206 = vmatprep.mubr.bf16.mxu0 %v887_v4  ;;  %v902_v28 = vld [vmem:[#allocation3 + $0x120] sm:$0xff]  ;;  %v1868_v4 = vshll.u32 %v1614_v60, 16 }
  0xdf   : > { %817 = vst.msk [vmem:[#allocation3 + $0x60] sm:$0xff] %vm680_vm12, %v796_v5  ;;  %v1887_v5 = vrot.slane %v1614_v60, 1 }
  0xe0   : > { %v798_v7 = vpop.permute.xlu1 %797  ;;  %v901_v18 = vld [vmem:[#allocation3 + $0x118] sm:$0xff]  ;;  %v894_v1 = vld [vmem:[#allocation3 + $0xe0] sm:$0xff] }
  0xe1   : > { %818 = vst.msk [vmem:[#allocation3 + $0x88] sm:$0xff] %vm680_vm12, %v798_v7 }
  0xe2   : > { %v868_v8 = vld [vmem:[#allocation3 + $0x10] sm:$0xff]  ;;  %v800_v10 = vpop.permute.xlu0 %799 }
  0xe3   : > { %1268 = vmatmul.mubr.bf16.vlgmr.msra.gmra.mrb[0].mxu1 %v868_v8  ;;  %819 = vst.msk [vmem:[#allocation3 + $0xb0] sm:$0xff] %vm680_vm12, %v800_v10  ;;  %v8033_v8 = vld [vmem:[#allocation4 + $0x50] sm:$0xff]   ;;  %v1870_v10 = vrot.slane %v1868_v4, 1 }
  0xe4   : > { %1274 = vmatprep.mubr.bf16.mxu1 %v874_v6  ;;  %v802_v12 = vpop.permute.xlu1 %801  ;;  %v873_v13 = vld [vmem:[#allocation3 + $0x38] sm:$0xff]  ;;  %7119 = vmatpush3.bf16.msra.mxu1 %v8030_v55 }
  0xe5   : > { %820 = vst.msk [vmem:[#allocation3 + $0xd8] sm:$0xff] %vm680_vm12, %v802_v12  ;;  %1207 = vmatmul.mubr.bf16.gmra.mrb[16].mxu0 %v886_v9  ;;  %7120 = vmatprep.subr.bf16.mxu1 %v8031_v56  ;;  %v8034_v12 = vld [vmem:[#allocation4 + $0x10] sm:$0xff]  }
  0xe6   : > { %v840_v14 = vpop.permute.xlu0 %839  ;;  %1213 = vmatprep.mubr.bf16.mxu0 %v892_v11  ;;  %v878_v24 = vld [vmem:[#allocation3 + $0x60] sm:$0xff]  ;;  %v1888_v11 = vsel %vm698_vm11, %v1822_v63, %v1887_v5 }
  0xe7   : > { %851 = vst.msk [vmem:[#allocation3 + $0x108] sm:$0xff] %vm680_vm12, %v840_v14  ;;  %v8035_v14 = vld [vmem:[#allocation4 + $0x58] sm:$0xff]  }
  0xe8   : > { %v804_v16 = vpop.permute.xlu1 %803  ;;  %v883_v62 = vld [vmem:[#allocation3 + $0x88] sm:$0xff]  ;;  %1898 = vst.msk [vmem:[#allocation3 + $0x138] sm:$0xff] %vm295_vm4, %v1888_v11  ;;  %7121 = vmatpush3.bf16.msra.mxu1 %v8032_v0 }
  0xe9   : > { %821 = vst.msk [vmem:[#allocation3 + $0x100] sm:$0xff] %vm680_vm12, %v804_v16  ;;  %7122 = vmatprep.subr.bf16.mxu1 %v8033_v8 }
  0xea   : > { %v842_v20 = vpop.permute.xlu0 %841  ;;  %v888_v31 = vld [vmem:[#allocation3 + $0xb0] sm:$0xff] }
  0xeb   : > { %1275 = vmatmul.mubr.bf16.gmra.mrb[4].mxu1 %v873_v13  ;;  %852 = vst.msk [vmem:[#allocation3 + $0x130] sm:$0xff] %vm680_vm12, %v842_v20  ;;  %v8767_v13 = vsel %vm587_vm10, %v1866_v3, %v1870_v10 }
  0xec   : > { %1281 = vmatprep.mubr.bf16.mxu1 %v879_v15  ;;  %v806_v22 = vpop.permute.xlu1 %805  ;;  %v893_v35 = vld [vmem:[#allocation3 + $0xd8] sm:$0xff]  ;;  %7123 = vmatpush3.bf16.msra.mxu1 %v8034_v12 }
  0xed   : > { %822 = vst.msk [vmem:[#allocation3 + $0x128] sm:$0xff] %vm680_vm12, %v806_v22  ;;  %1214 = vmatmul.mubr.bf16.gmra.mrb[20].mxu0 %v891_v19  ;;  %v8036_v19 = vld [vmem:[#allocation4 + $0x18] sm:$0xff]   ;;  %7124 = vmatprep.subr.bf16.mxu1 %v8035_v14  ;;  %v8037_v22 = vld [vmem:[#allocation4 + $0x60] sm:$0xff]  }
  0xee   : > { %1220 = vmatprep.mubr.bf16.mxu0 %v897_v21  ;;  %v899_v36 = vld [vmem:[#allocation3 + $0x108] sm:$0xff] }
  0xf0   : > { %v898_v39 = vld [vmem:[#allocation3 + $0x100] sm:$0xff]  ;;  %7125 = vmatpush3.bf16.msra.mxu1 %v8036_v19 }
  0xf1   : > { %7126 = vmatprep.subr.bf16.mxu1 %v8037_v22  ;;  %v8777_v22 = vld [vmem:[%s10123_s2] ss:$0 sm:$0xff] }
  0xf2   : > { %v904_v40 = vld [vmem:[#allocation3 + $0x130] sm:$0xff] }
  0xf3   : > { %1282 = vmatmul.mubr.bf16.gmra.mrb[8].mxu1 %v878_v24  ;;  %1863 = vst.msk [vmem:[#allocation3 + $0x130] sm:$0xff] %vm295_vm4, %v8750_v41 }
  0xf4   : > { %1288 = vmatprep.mubr.bf16.mxu1 %v884_v26  ;;  %v903_v17 = vld [vmem:[#allocation3 + $0x128] sm:$0xff] }
  0xf5   : > { %1221 = vmatmul.mubr.bf16.gmra.mrb[24].mxu0 %v896_v27 }
  0xf6   : > { %1227 = vmatprep.mubr.bf16.mxu0 %v902_v28  ;;  %v8038_v28 = vld [vmem:[#allocation4 + $0x20] sm:$0xff]  }
  0xf7   : > { %7127 = vmatpush3.bf16.msra.mxu1 %v8038_v28 }
  0xfb   : > { %1289 = vmatmul.mubr.bf16.gmra.mrb[12].mxu1 %v883_v62 }
  0xfc   : > { %1295 = vmatprep.mubr.bf16.mxu1 %v889_v29 }
  0xfd   : > { %1228 = vmatmul.mubr.bf16.gmra.mrb[28].mxu0 %v901_v18  ;;  %v8039_v18 = vld [vmem:[#allocation4 + $0x68] sm:$0xff]  }
  0xfe   : > { %7826 = vmatprep.mubr.msk.bf16.mxu0 %vm295_vm4, %v870_v30  ;;  %7128 = vmatprep.subr.bf16.mxu1 %v8039_v18 }
 0x103   : > { %1296 = vmatmul.mubr.bf16.gmra.mrb[16].mxu1 %v888_v31 }
 0x104   : > { %1302 = vmatprep.mubr.bf16.mxu1 %v894_v1 }
 0x105   : > { %7827 = vmatmul.mubr.msk.bf16.vlgmr.msra.gmra.mrb[32].mxu0 %vm295_vm4, %v875_v32 }
 0x106   : > { %7830 = vmatprep.mubr.msk.bf16.mxu0 %vm295_vm4, %v880_v33  ;;  %v8040_v33 = vld [vmem:[#allocation4 + $0x28] sm:$0xff]  }
 0x107   : > { %7129 = vmatpush3.bf16.msra.mxu1 %v8040_v33 }
 0x10b   : > { %1303 = vmatmul.mubr.bf16.gmra.mrb[20].mxu1 %v893_v35 }
 0x10c   : > { %1309 = vmatprep.mubr.bf16.mxu1 %v899_v36 }
 0x10d   : > { %7831 = vmatmul.mubr.msk.bf16.gmra.mrb[36].mxu0 %vm295_vm4, %v885_v37  ;;  %v8041_v37 = vld [vmem:[#allocation4 + $0x70] sm:$0xff]  }
 0x10e   : > { %7834 = vmatprep.mubr.msk.bf16.mxu0 %vm295_vm4, %v890_v38  ;;  %7130 = vmatprep.subr.bf16.mxu1 %v8041_v37 }
 0x113   : > { %1310 = vmatmul.mubr.bf16.gmra.mrb[24].mxu1 %v898_v39 }
 0x114   : > { %1316 = vmatprep.mubr.bf16.mxu1 %v904_v40 }
 0x115   : > { %7835 = vmatmul.mubr.msk.bf16.gmra.mrb[40].mxu0 %vm295_vm4, %v895_v2  ;;  %v8042_v2 = vld [vmem:[#allocation4 + $0x30] sm:$0xff]  }
 0x116   : > { %7838 = vmatprep.mubr.msk.bf16.mxu0 %vm295_vm4, %v900_v51  ;;  %7131 = vmatpush3.bf16.msra.mxu1 %v8042_v2 }
 0x11b   : > { %1317 = vmatmul.mubr.bf16.gmra.mrb[28].mxu1 %v903_v17 }
 0x11d   : > { %7839 = vmatmul.mubr.msk.bf16.gmra.mrb[44].mxu0 %vm295_vm4, %v905_v23 }
 0x198   : > { %v6994_v42 = vpop.f32.mrb[0].mxu0 }
 0x199   : > { %v6995_v43 = vpop.f32.mrb[1].mxu0 }
 0x19a   : > { %v6996_v44 = vadd.f32 %v6995_v43, %v6994_v42  ;;  %v6997_v45 = vpop.f32.mrb[2].mxu0 }
 0x19b   : > { %v6998_v46 = vpop.f32.mrb[3].mxu0 }
 0x1a0   : > { %v7000_v47 = vpop.f32.mrb[4].mxu0 }
 0x1a1   : > { %v7001_v48 = vpop.f32.mrb[5].mxu0 }
 0x1a2   : > { %v8754_v49 = vadd.f32 %v7001_v48, %v7000_v47  ;;  %v7003_v50 = vpop.f32.mrb[6].mxu0 }
 0x1a3   : > { %v7004_v52 = vpop.f32.mrb[7].mxu0 }
 0x1a8   : > { %v7006_v59 = vpop.f32.mrb[8].mxu0 }
 0x1a9   : > { %v7007_v61 = vpop.f32.mrb[9].mxu0 }
 0x1aa   : > { %v7008_v6 = vadd.f32 %v7007_v61, %v7006_v59  ;;  %v7009_v7 = vpop.f32.mrb[10].mxu0 }
 0x1ab   : > { %v7010_v9 = vpop.f32.mrb[11].mxu0 }
 0x1b0   : > { %v7012_v15 = vpop.f32.mrb[12].mxu0 }
 0x1b1   : > { %v7013_v16 = vpop.f32.mrb[13].mxu0 }
 0x1b2   : > { %v7014_v20 = vadd.f32 %v7013_v16, %v7012_v15  ;;  %v7015_v21 = vpop.f32.mrb[14].mxu0 }
 0x1b3   : > { %v7016_v24 = vpop.f32.mrb[15].mxu0 }
 0x1b6   : > { %v7058_v26 = vpop.f32.mrb[0].mxu1 }
 0x1b7   : > { %v7059_v27 = vpop.f32.mrb[1].mxu1 }
 0x1b8   : > { %v7060_v62 = vadd.f32 %v7059_v27, %v7058_v26  ;;  %v7061_v29 = vpop.f32.mrb[2].mxu1  ;;  %v7018_v31 = vpop.f32.mrb[16].mxu0 }
 0x1b9   : > { %v7062_v30 = vpop.f32.mrb[3].mxu1  ;;  %v7019_v32 = vpop.f32.mrb[17].mxu0 }
 0x1ba   : > { %v1270_v1 = vadd.f32 %v7060_v62, %v6996_v44  ;;  %v7020_v35 = vadd.f32 %v7019_v32, %v7018_v31  ;;  %v7021_v36 = vpop.f32.mrb[18].mxu0 }
 0x1bb   : > { %v7022_v38 = vpop.f32.mrb[19].mxu0 }
 0x1be   : > { %v7064_v39 = vpop.f32.mrb[4].mxu1 }
 0x1bf   : > { %v7065_v40 = vpop.f32.mrb[5].mxu1 }
 0x1c0   : > { %v7066_v51 = vadd.f32 %v7065_v40, %v7064_v39  ;;  %v7067_v17 = vpop.f32.mrb[6].mxu1  ;;  %v7024_v42 = vpop.f32.mrb[20].mxu0 }
 0x1c1   : > { %v7068_v23 = vpop.f32.mrb[7].mxu1  ;;  %v7025_v44 = vpop.f32.mrb[21].mxu0 }
 0x1c2   : > { %v1277_v43 = vadd.f32 %v7066_v51, %v8754_v49  ;;  %v7026_v45 = vadd.f32 %v7025_v44, %v7024_v42  ;;  %v7027_v46 = vpop.f32.mrb[22].mxu0 }
 0x1c3   : > { %v7028_v47 = vpop.f32.mrb[23].mxu0 }
 0x1c6   : > { %v7070_v48 = vpop.f32.mrb[8].mxu1 }
 0x1c7   : > { %v7071_v50 = vpop.f32.mrb[9].mxu1 }
 0x1c8   : > { %v7072_v52 = vadd.f32 %v7071_v50, %v7070_v48  ;;  %v7073_v53 = vpop.f32.mrb[10].mxu1  ;;  %v7030_v55 = vpop.f32.mrb[24].mxu0  ;;  %v1511_v50 = vld [vmem:[#allocation2 + $0x10] sm:$0x1f] }
 0x1c9   : > { %v7074_v54 = vpop.f32.mrb[11].mxu1  ;;  %v7031_v57 = vpop.f32.mrb[25].mxu0 }
 0x1ca   : > { %v1284_v56 = vadd.f32 %v7072_v52, %v7008_v6  ;;  %v8770_v59 = vadd.f32 %v7031_v57, %v7030_v55  ;;  %v7033_v60 = vpop.f32.mrb[26].mxu0 }
 0x1cb   : > { %v7034_v61 = vpop.f32.mrb[27].mxu0  ;;  %v1508_v60 = vld [vmem:[#allocation2 + $0x8] sm:$0x1f] }
 0x1ce   : > { %v7076_v0 = vpop.f32.mrb[12].mxu1 }
 0x1cf   : > { %v7077_v3 = vpop.f32.mrb[13].mxu1 }
 0x1d0   : > { %v7078_v49 = vadd.f32 %v7077_v3, %v7076_v0  ;;  %v7079_v4 = vpop.f32.mrb[14].mxu1  ;;  %v7036_v7 = vpop.f32.mrb[28].mxu0 }
 0x1d1   : > { %v7080_v5 = vpop.f32.mrb[15].mxu1  ;;  %v7037_v9 = vpop.f32.mrb[29].mxu0 }
 0x1d2   : > { %v1291_v8 = vadd.f32 %v7078_v49, %v7014_v20  ;;  %v8772_v10 = vadd.f32 %v7037_v9, %v7036_v7  ;;  %v7039_v11 = vpop.f32.mrb[30].mxu0 }
 0x1d3   : > { %v7040_v12 = vpop.f32.mrb[31].mxu0 }
 0x1d6   : > { %v7082_v14 = vpop.f32.mrb[16].mxu1 }
 0x1d7   : > { %v7083_v15 = vpop.f32.mrb[17].mxu1 }
 0x1d8   : > { %v7084_v6 = vadd.f32 %v7083_v15, %v7082_v14  ;;  %v7085_v16 = vpop.f32.mrb[18].mxu1  ;;  %v7828_v21 = vpop.f32.mrb[32].mxu0  ;;  %v1626_v14 = vshll.u32 %v8746_v34, 16  ;;  %v8043_v15 = vld [vmem:[#allocation4 + $0x78] sm:$0xff]  }
 0x1d9   : > { %v7086_v19 = vpop.f32.mrb[19].mxu1  ;;  %v1366_v26 = vadd.f32 %v7828_v21, %v1277_v43  ;;  %v1358_v27 = vpop.f32.mrb[33].mxu0  ;;  %v8044_v21 = vld [vmem:[#allocation4 + $0x38] sm:$0xff]   ;;  %7132 = vmatprep.subr.bf16.mxu1 %v8043_v15 }
 0x1da   : > { %v1298_v24 = vadd.f32 %v7084_v6, %v7020_v35  ;;  %v1359_v20 = vadd.f32 %v1358_v27, %v1270_v1  ;;  %v7829_v28 = vpop.f32.mrb[34].mxu0  ;;  %7133 = vmatpush3.bf16.msra.mxu1 %v8044_v21 }
 0x1db   : > { %v1421_v62 = vadd.f32 %v8777_v22, %v1366_v26  ;;  %v1361_v29 = vpop.f32.mrb[35].mxu0 }
 0x1dc   : > { %v1420_v18 = vadd.f32 %v8777_v22, %v1359_v20  ;;  %v1517_v29 = vld [vmem:[#allocation2 + $0x20] sm:$0x1f] }
 0x1dd   : > { %v8781_v31 = vmax.f32 %v1421_v62, 0.0 }
 0x1de   : > { %v7088_v30 = vpop.f32.mrb[20].mxu1  ;;  %v8783_v33 = vmax.f32 %v1420_v18, 0.0 }
 0x1df   : > { %v7089_v32 = vpop.f32.mrb[21].mxu1  ;;  %v1437_v35 = vpack.c.bf16 %v8781_v31, %v8781_v31 }
 0x1e0   : > { %v7090_v36 = vadd.f32 %v7089_v32, %v7088_v30  ;;  %v7091_v37 = vpop.f32.mrb[22].mxu1  ;;  %v1436_v1 = vpack.c.bf16 %v8783_v33, %v8783_v33  ;;  %v7832_v39 = vpop.f32.mrb[36].mxu0 }
 0x1e1   : > { %v7092_v38 = vpop.f32.mrb[23].mxu1  ;;  %v1452_v2 = vshrl.u32 %v1437_v35, 16  ;;  %v1380_v51 = vadd.f32 %v7832_v39, %v1291_v8  ;;  %v1372_v17 = vpop.f32.mrb[37].mxu0  ;;  %v1455_v46 = vshll.u32 %v1437_v35, 16 }
 0x1e2   : > { %v1305_v40 = vadd.f32 %v7090_v36, %v7026_v45  ;;  %v1445_v23 = vshrl.u32 %v1436_v1, 16  ;;  %v1373_v42 = vadd.f32 %v1372_v17, %v1284_v56  ;;  %v7833_v43 = vpop.f32.mrb[38].mxu0  ;;  %v1448_v53 = vshll.u32 %v1436_v1, 16  ;;  %v8045_v1 = vld [vmem:[#allocation4 + $0xc0] sm:$0xff]  }
 0x1e3   : > { %v1454_v44 = vrot.slane %v1452_v2, 7  ;;  %v1423_v47 = vadd.f32 %v8777_v22, %v1380_v51  ;;  %v1375_v48 = vpop.f32.mrb[39].mxu0  ;;  %v1628_v38 = vrot.slane %v1626_v14, 1  ;;  %v8046_v51 = vld [vmem:[#allocation4 + $0x80] sm:$0xff]   ;;  %7182 = vmatprep.subr.bf16.mxu0 %v8045_v1 }
 0x1e4   : > { %v1447_v52 = vrot.slane %v1445_v23, 7  ;;  %v1422_v54 = vadd.f32 %v8777_v22, %v1373_v42  ;;  %7183 = vmatpush3.bf16.msra.mxu0 %v8046_v51 }
 0x1e5   : > { %v1457_v57 = vor.u32 %v1455_v46, %v1454_v44  ;;  %v8791_v45 = vmax.f32 %v1423_v47, 0.0 }
 0x1e6   : > { %v7094_v55 = vpop.f32.mrb[24].mxu1  ;;  %v1450_v0 = vor.u32 %v1448_v53, %v1447_v52  ;;  %v8793_v3 = vmax.f32 %v1422_v54, 0.0 }
 0x1e7   : > { %v7095_v61 = vpop.f32.mrb[25].mxu1  ;;  %v1512_v4 = vsel %vm8385_vm9, %v1457_v57, %v1511_v50  ;;  %v1439_v5 = vpack.c.bf16 %v8791_v45, %v8791_v45 }
 0x1e8   : > { %v7096_v56 = vadd.f32 %v7095_v61, %v7094_v55  ;;  %v7097_v49 = vpop.f32.mrb[26].mxu1  ;;  %1513 = vst [vmem:[#allocation2 + $0x10] sm:$0x1f] %v1512_v4  ;;  %v1509_v8 = vsel %vm8385_vm9, %v1450_v0, %v1508_v60  ;;  %v1438_v9 = vpack.c.bf16 %v8793_v3, %v8793_v3  ;;  %v7836_v11 = vpop.f32.mrb[40].mxu0  ;;  %v8047_v60 = vld [vmem:[#allocation4 + $0xc8] sm:$0xff]   ;;  %v8831_v61 = vld [vmem:[#allocation4 + $0x100] sm:$0xff]  }
 0x1e9   : > { %v7098_v7 = vpop.f32.mrb[27].mxu1  ;;  %1510 = vst [vmem:[#allocation2 + $0x8] sm:$0x1f] %v1509_v8  ;;  %v1466_v6 = vshrl.u32 %v1439_v5, 16  ;;  %v1394_v16 = vadd.f32 %v7836_v11, %v1305_v40  ;;  %v1386_v19 = vpop.f32.mrb[41].mxu0  ;;  %v1469_v62 = vshll.u32 %v1439_v5, 16  ;;  %7184 = vmatprep.subr.bf16.mxu0 %v8047_v60  ;;  %7842 = vmatprep.subr.bf16.mxu1 %v8831_v61 }
 0x1ea   : > { %v8804_v12 = vadd.f32 %v7096_v56, %v8770_v59  ;;  %v1459_v26 = vshrl.u32 %v1438_v9, 16  ;;  %v1387_v27 = vadd.f32 %v1386_v19, %v1298_v24  ;;  %v7837_v20 = vpop.f32.mrb[42].mxu0  ;;  %v1624_v59 = vshrl.u32 %v8746_v34, 16  ;;  %v1514_v24 = vld [vmem:[#allocation2 + $0x18] sm:$0x1f]  ;;  %v8049_v5 = vld [vmem:[#allocation4 + $0x88] sm:$0xff]  }
 0x1eb   : > { %v1468_v28 = vrot.slane %v1466_v6, 7  ;;  %v1425_v18 = vadd.f32 %v8777_v22, %v1394_v16  ;;  %v1389_v30 = vpop.f32.mrb[43].mxu0  ;;  %v1462_v36 = vshll.u32 %v1438_v9, 16  ;;  %v1732_v4 = vrot.slane %v8746_v34, 1  ;;  %7185 = vmatpush3.bf16.msra.mxu0 %v8049_v5  ;;  %v8054_v5 = vld [vmem:[#allocation4 + $0xe0] sm:$0xff]  }
 0x1ec   : > { %v1461_v32 = vrot.slane %v1459_v26, 7  ;;  %v1424_v37 = vadd.f32 %v8777_v22, %v1387_v27  ;;  %v1629_v57 = vor.u32 %v1628_v38, %v1624_v59  ;;  %v1523_v26 = vld [vmem:[#allocation2 + $0x30] sm:$0x1f] }
 0x1ed   : > { %v1471_v39 = vor.u32 %v1469_v62, %v1468_v28  ;;  %v8810_v40 = vmax.f32 %v1425_v18, 0.0 }
 0x1ee   : > { %v7100_v35 = vpop.f32.mrb[28].mxu1  ;;  %v1464_v17 = vor.u32 %v1462_v36, %v1461_v32  ;;  %v8812_v23 = vmax.f32 %v1424_v37, 0.0  ;;  %v8051_v32 = vld [vmem:[#allocation4 + $0x90] sm:$0xff]  }
 0x1ef   : > { %v7101_v2 = vpop.f32.mrb[29].mxu1  ;;  %v1518_v44 = vsel %vm8385_vm9, %v1471_v39, %v1517_v29  ;;  %v1441_v46 = vpack.c.bf16 %v8810_v40, %v8810_v40  ;;  %v8818_v47 = vld [vmem:[#allocation2 + $0x10] sm:$0xff]  ;;  %v1520_v29 = vld [vmem:[#allocation2 + $0x28] sm:$0x1f] }
 0x1f0   : > { %v7102_v42 = vadd.f32 %v7101_v2, %v7100_v35  ;;  %v7103_v43 = vpop.f32.mrb[30].mxu1  ;;  %1519 = vst [vmem:[#allocation2 + $0x20] sm:$0x1f] %v1518_v44  ;;  %v1515_v50 = vsel %vm8385_vm9, %v1464_v17, %v1514_v24  ;;  %v1440_v52 = vpack.c.bf16 %v8812_v23, %v8812_v23  ;;  %v7840_v54 = vpop.f32.mrb[44].mxu0  ;;  %v8825_v55 = vld [vmem:[#allocation2 + $0x8] sm:$0xff]  ;;  %1617 = vst.msk [vmem:[#allocation3 + $0x50] sm:$0xff] %vm295_vm4, %v8818_v47 }
 0x1f1   : > { %v7104_v48 = vpop.f32.mrb[31].mxu1  ;;  %1856 = vst.msk [vmem:[#allocation3 + $0x18] sm:$0xff] %vm295_vm4, %v8818_v47  ;;  %1516 = vst [vmem:[#allocation2 + $0x18] sm:$0x1f] %v1515_v50  ;;  %v1480_v0 = vshrl.u32 %v1441_v46, 16  ;;  %v1400_v56 = vpop.f32.mrb[45].mxu0  ;;  %1765 = vrot.lane.b32.xlu0 %v8825_v55, %s8253_s12 }
 0x1f2   : > { %v1319_v53 = vadd.f32 %v7102_v42, %v8772_v10  ;;  %1616 = vst.msk [vmem:[#allocation3 + $0x28] sm:$0xff] %vm295_vm4, %v8825_v55  ;;  %v1631_v10 = vshll.u32 %v8825_v55, 16  ;;  %v1639_v49 = vshll.u32 %v8818_v47, 16  ;;  %v1483_v7 = vshll.u32 %v1441_v46, 16  ;;  %v7841_v14 = vpop.f32.mrb[46].mxu0  ;;  %v8052_v44 = vld [vmem:[#allocation4 + $0xd8] sm:$0xff]  }
 0x1f3   : > { %v1473_v8 = vshrl.u32 %v1440_v52, 16  ;;  %v1401_v11 = vadd.f32 %v1400_v56, %v8804_v12  ;;  %v1482_v15 = vrot.slane %v1480_v0, 7  ;;  %v1476_v6 = vshll.u32 %v1440_v52, 16  ;;  %v1403_v21 = vpop.f32.mrb[47].mxu0  ;;  %v8050_v12 = vld [vmem:[#allocation4 + $0xd0] sm:$0xff]   ;;  %v8053_v52 = vld [vmem:[#allocation4 + $0x98] sm:$0xff]  }
 0x1f4   : > { %v1408_v9 = vadd.f32 %v7840_v54, %v1319_v53  ;;  %v1633_v16 = vrot.slane %v1631_v10, 1  ;;  %v1635_v19 = vshrl.u32 %v8825_v55, 16  ;;  %v1733_v28 = vrot.slane %v8825_v55, 1  ;;  %7186 = vmatprep.subr.bf16.mxu0 %v8050_v12 }
 0x1f5   : > { %v1475_v27 = vrot.slane %v1473_v8, 7  ;;  %v1426_v20 = vadd.f32 %v8777_v22, %v1401_v11  ;;  %v1485_v62 = vor.u32 %v1483_v7, %v1482_v15  ;;  %1767 = vrot.lane.b32.xlu0 %v8818_v47, %s8253_s12  ;;  %v1641_v59 = vrot.slane %v1639_v49, 1  ;;  %7187 = vmatpush3.bf16.msra.mxu0 %v8051_v32  ;;  %v1529_v7 = vld [vmem:[#allocation2 + $0x40] sm:$0x1f]  ;;  %v1526_v8 = vld [vmem:[#allocation2 + $0x38] sm:$0x1f] }
 0x1f6   : > { %v1427_v34 = vadd.f32 %v8777_v22, %v1408_v9  ;;  %v1634_v18 = vsel %vm587_vm10, %v1629_v57, %v1633_v16  ;;  %v1637_v30 = vor.u32 %v1635_v19, %v1633_v16  ;;  %v1735_v22 = vrot.slane %v8818_v47, 1  ;;  %7188 = vmatprep.subr.bf16.mxu0 %v8052_v44  ;;  %v8058_v32 = vld [vmem:[#allocation4 + $0xa8] sm:$0xff]  }
 0x1f7   : > { %v1478_v36 = vor.u32 %v1476_v6, %v1475_v27  ;;  %v8851_v35 = vmax.f32 %v1426_v20, 0.0  ;;  %1691 = vrot.lane.b32.xlu1 %v1634_v18, %s8253_s12  ;;  %v1524_v38 = vsel %vm8385_vm9, %v1485_v62, %v1523_v26  ;;  %v8858_v39 = vld [vmem:[#allocation2 + $0x20] sm:$0xff]  ;;  %v1734_v24 = vsel %vm698_vm11, %v1732_v4, %v1733_v28  ;;  %v8055_v6 = vld [vmem:[#allocation4 + $0xa0] sm:$0xff]  }
 0x1f8   : > { %v8849_v37 = vmax.f32 %v1427_v34, 0.0  ;;  %v1642_v1 = vsel %vm587_vm10, %v1637_v30, %v1641_v59  ;;  %1525 = vst [vmem:[#allocation2 + $0x30] sm:$0x1f] %v1524_v38  ;;  %v1607_v42 = vld [vmem:[#allocation2 + $0x18] sm:$0xff]  ;;  %1619 = vst.msk [vmem:[#allocation3 + $0xa0] sm:$0xff] %vm295_vm4, %v8858_v39  ;;  %v1643_v43 = vshrl.u32 %v8818_v47, 16  ;;  %v8879_v50 = vsel %vm698_vm11, %v1733_v28, %v1735_v22 }
 0x1f9   : > { %v1521_v2 = vsel %vm8385_vm9, %v1478_v36, %v1520_v29  ;;  %v1442_v17 = vpack.c.bf16 %v8851_v35, %v8851_v35  ;;  %1813 = vst.msk [vmem:[#allocation3 + $0x10] sm:$0xff] %vm295_vm4, %v1642_v1  ;;  %1858 = vst.msk [vmem:[#allocation3 + $0x68] sm:$0xff] %vm295_vm4, %v8858_v39  ;;  %1769 = vrot.lane.b32.xlu0 %v1607_v42, %s8253_s12  ;;  %v1647_v46 = vshll.u32 %v1607_v42, 16  ;;  %v1655_v48 = vshll.u32 %v8858_v39, 16  ;;  %v8056_v62 = vld [vmem:[#allocation4 + $0xe8] sm:$0xff]  }
 0x1fa   : > { %v1443_v51 = vpack.c.bf16 %v8849_v37, %v8849_v37  ;;  %1757 = vst.msk [vmem:[#allocation3 + $0x8] sm:$0xff] %vm295_vm4, %v1734_v24  ;;  %1522 = vst [vmem:[#allocation2 + $0x28] sm:$0x1f] %v1521_v2  ;;  %v1645_v47 = vor.u32 %v1643_v43, %v1641_v59  ;;  %v1651_v57 = vshrl.u32 %v1607_v42, 16  ;;  %v1737_v60 = vrot.slane %v1607_v42, 1  ;;  %7189 = vmatpush3.bf16.msra.mxu0 %v8053_v52  ;;  %v8059_v24 = vld [vmem:[#allocation4 + $0xf0] sm:$0xff]  }
 0x1fb   : > { %1618 = vst.msk [vmem:[#allocation3 + $0x78] sm:$0xff] %vm295_vm4, %v1607_v42  ;;  %1857 = vst.msk [vmem:[#allocation3 + $0x40] sm:$0xff] %vm295_vm4, %v1607_v42  ;;  %v1487_v54 = vshrl.u32 %v1442_v17, 16  ;;  %1693 = vrot.lane.b32.xlu1 %v1642_v1, %s8253_s12  ;;  %v1649_v55 = vrot.slane %v1647_v46, 1  ;;  %v1739_v0 = vrot.slane %v8858_v39, 1  ;;  %v1490_v4 = vshll.u32 %v1442_v17, 16  ;;  %7190 = vmatprep.subr.bf16.mxu0 %v8054_v5 }
 0x1fc   : > { %v1494_v53 = vshrl.u32 %v1443_v51, 16  ;;  %1758 = vst.msk [vmem:[#allocation3 + $0x30] sm:$0xff] %vm295_vm4, %v8879_v50  ;;  %v1497_v10 = vshll.u32 %v1443_v51, 16  ;;  %v1657_v14 = vrot.slane %v1655_v48, 1  ;;  %v8898_v21 = vsel %vm698_vm11, %v1735_v22, %v1737_v60  ;;  %v8060_v42 = vld [vmem:[#allocation4 + $0xb0] sm:$0xff]   ;;  %v8061_v52 = vld [vmem:[#allocation4 + $0xf8] sm:$0xff]  }
 0x1fd   : > { %v1489_v49 = vrot.slane %v1487_v54, 7  ;;  %1771 = vrot.lane.b32.xlu0 %v8858_v39, %s8253_s12  ;;  %v1650_v9 = vsel %vm587_vm10, %v1645_v47, %v1649_v55  ;;  %v1653_v11 = vor.u32 %v1651_v57, %v1649_v55  ;;  %v8889_v15 = vsel %vm698_vm11, %v1737_v60, %v1739_v0  ;;  %1891 = vst.msk [vmem:[#allocation3 + $0x20] sm:$0xff] %vm295_vm4, %v8898_v21  ;;  %v8062_v47 = vld [vmem:[#allocation4 + $0xb8] sm:$0xff]  }
 0x1fe   : > { %v1496_v56 = vrot.slane %v1494_v53, 7  ;;  %1814 = vst.msk [vmem:[#allocation3 + $0x38] sm:$0xff] %vm295_vm4, %v1650_v9  ;;  %1892 = vst.msk [vmem:[#allocation3 + $0x48] sm:$0xff] %vm295_vm4, %v8889_v15  ;;  %7191 = vmatpush3.bf16.msra.mxu0 %v8055_v6  ;;  %v1659_v12 = vshrl.u32 %v8858_v39, 16 }
 0x1ff   : > { %v1492_v19 = vor.u32 %v1490_v4, %v1489_v49  ;;  %1695 = vrot.lane.b32.xlu1 %v1650_v9, %s8253_s12  ;;  %1760 = vst.msk [vmem:[#allocation3 + $0x80] sm:$0xff] %vm295_vm4, %v8889_v15  ;;  %v1658_v26 = vsel %vm587_vm10, %v1653_v11, %v1657_v14  ;;  %v8901_v27 = vld [vmem:[#allocation2 + $0x30] sm:$0xff]  ;;  %1759 = vst.msk [vmem:[#allocation3 + $0x58] sm:$0xff] %vm295_vm4, %v8898_v21  ;;  %7192 = vmatprep.subr.bf16.mxu0 %v8056_v62 }
 0x200   : > { %v1499_v16 = vor.u32 %v1497_v10, %v1496_v56  ;;  %1815 = vst.msk [vmem:[#allocation3 + $0x60] sm:$0xff] %vm295_vm4, %v1658_v26  ;;  %1621 = vst.msk [vmem:[#allocation3 + $0xf0] sm:$0xff] %vm295_vm4, %v8901_v27  ;;  %v1671_v18 = vshll.u32 %v8901_v27, 16  ;;  %v1743_v59 = vrot.slane %v8901_v27, 1  ;;  %v1661_v36 = vor.u32 %v1659_v12, %v1657_v14  ;;  %v8064_v62 = vld [vmem:[#allocation4 + $0x118] sm:$0xff]  }
 0x201   : > { %v1527_v20 = vsel %vm8385_vm9, %v1492_v19, %v1526_v8  ;;  %v1609_v28 = vld [vmem:[#allocation2 + $0x28] sm:$0xff]  ;;  %1860 = vst.msk [vmem:[#allocation3 + $0xb8] sm:$0xff] %vm295_vm4, %v8901_v27  ;;  %v1675_v48 = vshrl.u32 %v8901_v27, 16  ;;  %v8057_v19 = vld [vmem:[#allocation4 + $0x108] sm:$0xff]  }
 0x202   : > { %v1530_v34 = vsel %vm8385_vm9, %v1499_v16, %v1529_v7  ;;  %1528 = vst [vmem:[#allocation2 + $0x38] sm:$0x1f] %v1527_v20  ;;  %1773 = vrot.lane.b32.xlu0 %v1609_v28, %s8253_s12  ;;  %1620 = vst.msk [vmem:[#allocation3 + $0xc8] sm:$0xff] %vm295_vm4, %v1609_v28  ;;  %v1663_v29 = vshll.u32 %v1609_v28, 16  ;;  %v1741_v30 = vrot.slane %v1609_v28, 1  ;;  %v1667_v38 = vshrl.u32 %v1609_v28, 16  ;;  %7193 = vmatpush3.bf16.msra.mxu0 %v8058_v32 }
 0x203   : > { %1531 = vst [vmem:[#allocation2 + $0x40] sm:$0x1f] %v1530_v34  ;;  %1859 = vst.msk [vmem:[#allocation3 + $0x90] sm:$0xff] %vm295_vm4, %v1609_v28  ;;  %1697 = vrot.lane.b32.xlu1 %v1658_v26, %s8253_s12  ;;  %v1673_v17 = vrot.slane %v1671_v18, 1  ;;  %7194 = vmatprep.subr.bf16.mxu0 %v8059_v24  ;;  %v8063_v20 = vld [vmem:[#allocation4 + $0x110] sm:$0xff]  }
 0x204   : > { %v1665_v22 = vrot.slane %v1663_v29, 1  ;;  %v1744_v1 = vsel %vm698_vm11, %v1741_v30, %v1743_v59  ;;  %v1742_v39 = vsel %vm698_vm11, %v1739_v0, %v1741_v30 }
 0x205   : > { %1894 = vst.msk [vmem:[#allocation3 + $0x98] sm:$0xff] %vm295_vm4, %v1744_v1  ;;  %1762 = vst.msk [vmem:[#allocation3 + $0xd0] sm:$0xff] %vm295_vm4, %v1744_v1  ;;  %v1677_v55 = vor.u32 %v1675_v48, %v1673_v17 }
 0x206   : > { %1893 = vst.msk [vmem:[#allocation3 + $0x70] sm:$0xff] %vm295_vm4, %v1742_v39  ;;  %1761 = vst.msk [vmem:[#allocation3 + $0xa8] sm:$0xff] %vm295_vm4, %v1742_v39  ;;  %1775 = vrot.lane.b32.xlu0 %v8901_v27, %s8253_s12  ;;  %v1666_v2 = vsel %vm587_vm10, %v1661_v36, %v1665_v22  ;;  %v1669_v51 = vor.u32 %v1667_v38, %v1665_v22  ;;  %7195 = vmatpush3.bf16.msra.mxu0 %v8060_v42 }
 0x207   : > { %1699 = vrot.lane.b32.xlu1 %v1666_v2, %s8253_s12  ;;  %1816 = vst.msk [vmem:[#allocation3 + $0x88] sm:$0xff] %vm295_vm4, %v1666_v2  ;;  %7196 = vmatprep.subr.bf16.mxu0 %v8061_v52 }
 0x208   : > { %v1674_v43 = vsel %vm587_vm10, %v1669_v51, %v1673_v17 }
 0x209   : > { %v1611_v44 = vld [vmem:[#allocation2 + $0x38] sm:$0xff]  ;;  %1817 = vst.msk [vmem:[#allocation3 + $0xb0] sm:$0xff] %vm295_vm4, %v1674_v43 }
 0x20a   : > { %v1612_v46 = vld [vmem:[#allocation2 + $0x40] sm:$0xff]  ;;  %1777 = vrot.lane.b32.xlu0 %v1611_v44, %s8253_s12  ;;  %1622 = vst.msk [vmem:[#allocation3 + $0x118] sm:$0xff] %vm295_vm4, %v1611_v44  ;;  %1861 = vst.msk [vmem:[#allocation3 + $0xe0] sm:$0xff] %vm295_vm4, %v1611_v44  ;;  %v1679_v53 = vshll.u32 %v1611_v44, 16  ;;  %v1745_v57 = vrot.slane %v1611_v44, 1  ;;  %v1683_v56 = vshrl.u32 %v1611_v44, 16  ;;  %7197 = vmatpush3.bf16.msra.mxu0 %v8062_v47 }
 0x20b   : > { %1862 = vst.msk [vmem:[#allocation3 + $0x108] sm:$0xff] %vm295_vm4, %v1612_v46  ;;  %v1687_v54 = vshll.u32 %v1612_v46, 16  ;;  %1701 = vrot.lane.b32.xlu1 %v1674_v43, %s8253_s12  ;;  %v1747_v60 = vrot.slane %v1612_v46, 1  ;;  %v1797_v49 = vshrl.u32 %v1612_v46, 16 }
 0x20c   : > { %v1681_v0 = vrot.slane %v1679_v53, 1  ;;  %v1746_v4 = vsel %vm698_vm11, %v1743_v59, %v1745_v57 }
 0x20d   : > { %v1689_v10 = vrot.slane %v1687_v54, 1  ;;  %v1748_v5 = vsel %vm698_vm11, %v1745_v57, %v1747_v60  ;;  %v1823_v7 = vsel %vm698_vm11, %v1747_v60, %v1822_v63  ;;  %1895 = vst.msk [vmem:[#allocation3 + $0xc0] sm:$0xff] %vm295_vm4, %v1746_v4  ;;  %1763 = vst.msk [vmem:[#allocation3 + $0xf8] sm:$0xff] %vm295_vm4, %v1746_v4 }
 0x20e   : > { %1779 = vrot.lane.b32.xlu0 %v1612_v46, %s8253_s12  ;;  %v1682_v8 = vsel %vm587_vm10, %v1677_v55, %v1681_v0  ;;  %v1685_v9 = vor.u32 %v1683_v56, %v1681_v0  ;;  %1896 = vst.msk [vmem:[#allocation3 + $0xe8] sm:$0xff] %vm295_vm4, %v1748_v5  ;;  %1764 = vst.msk [vmem:[#allocation3 + $0x120] sm:$0xff] %vm295_vm4, %v1748_v5 }
 0x20f   : > { %v1799_v11 = vor.u32 %v1797_v49, %v1689_v10  ;;  %1897 = vst.msk [vmem:[#allocation3 + $0x110] sm:$0xff] %vm295_vm4, %v1823_v7  ;;  %1703 = vrot.lane.b32.xlu1 %v1682_v8, %s8253_s12  ;;  %1818 = vst.msk [vmem:[#allocation3 + $0xd8] sm:$0xff] %vm295_vm4, %v1682_v8 }
 0x210   : > { %v1690_v41 = vsel %vm587_vm10, %v1685_v9, %v1689_v10 }
 0x211   : > { %v1804_v63 = vsel %vm587_vm10, %v1799_v11, %v8758_v58  ;;  %1819 = vst.msk [vmem:[#allocation3 + $0x100] sm:$0xff] %vm295_vm4, %v1690_v41 }
 0x212   : > { %1820 = vst.msk [vmem:[#allocation3 + $0x128] sm:$0xff] %vm295_vm4, %v1804_v63  ;;  %1824 = vrot.lane.b32.xlu0 %v8879_v50, %s8253_s12 }
 0x213   : > { %1705 = vrot.lane.b32.xlu1 %v1690_v41, %s8253_s12 }
 0x216   : > { %1828 = vrot.lane.b32.xlu0 %v8889_v15, %s8253_s12 }
 0x217   : > { %1826 = vrot.lane.b32.xlu1 %v8898_v21, %s8253_s12 }
 0x21a   : > { %1832 = vrot.lane.b32.xlu0 %v1744_v1, %s8253_s12 }
 0x21b   : > { %1830 = vrot.lane.b32.xlu1 %v1742_v39, %s8253_s12 }
 0x21e   : > { %1872 = vrot.lane.b32.xlu0 %v1804_v63, %s8253_s12  ;;  %v1903_v63 = vld [vmem:[#allocation3 + $0x20] sm:$0xff] }
 0x21f   : > { %1834 = vrot.lane.b32.xlu1 %v1746_v4, %s8253_s12 }
 0x222   : > { %1874 = vrot.lane.b32.xlu0 %v8767_v13, %s8253_s12 }
 0x223   : > { %1836 = vrot.lane.b32.xlu1 %v1748_v5, %s8253_s12 }
 0x227   : > { %1838 = vrot.lane.b32.xlu1 %v1823_v7, %s8253_s12 }
 0x263   : > { %v1766_v58 = vpop.permute.xlu0 %1765 }
 0x264   : > { %1789 = vst.msk [vmem:[#allocation3 + $0x8] sm:$0xff] %vm680_vm12, %v1766_v58 }
 0x267   : > { %v1768_v50 = vpop.permute.xlu0 %1767 }
 0x268   : > { %1790 = vst.msk [vmem:[#allocation3 + $0x30] sm:$0xff] %vm680_vm12, %v1768_v50 }
 0x269   : > { %v1692_v14 = vpop.permute.xlu1 %1691 }
 0x26a   : > { %1715 = vst.msk [vmem:[#allocation3] sm:$0xff] %vm680_vm12, %v1692_v14  ;;  %v1908_v14 = vld [vmem:[#allocation3 + $0x48] sm:$0xff] }
 0x26b   : > { %v1770_v15 = vpop.permute.xlu0 %1769  ;;  %v1900_v6 = vld [vmem:[#allocation3 + $0x8] sm:$0xff] }
 0x26c   : > { %1791 = vst.msk [vmem:[#allocation3 + $0x58] sm:$0xff] %vm680_vm12, %v1770_v15  ;;  %2211 = vmatprep.mubr.bf16.mxu1 %v1900_v6  ;;  %v1913_v15 = vld [vmem:[#allocation3 + $0x70] sm:$0xff] }
 0x26d   : > { %v1694_v16 = vpop.permute.xlu1 %1693 }
 0x26e   : > { %1716 = vst.msk [vmem:[#allocation3 + $0x28] sm:$0xff] %vm680_vm12, %v1694_v16 }
 0x26f   : > { %v1772_v13 = vpop.permute.xlu0 %1771  ;;  %v1905_v27 = vld [vmem:[#allocation3 + $0x30] sm:$0xff] }
 0x270   : > { %1792 = vst.msk [vmem:[#allocation3 + $0x80] sm:$0xff] %vm680_vm12, %v1772_v13  ;;  %v1918_v13 = vld [vmem:[#allocation3 + $0x98] sm:$0xff] }
 0x271   : > { %v1696_v21 = vpop.permute.xlu1 %1695  ;;  %v1899_v26 = vld [vmem:[#allocation3] sm:$0xff] }
 0x272   : > { %1717 = vst.msk [vmem:[#allocation3 + $0x50] sm:$0xff] %vm680_vm12, %v1696_v21  ;;  %1878 = vst.msk [vmem:[#allocation3 + $0x18] sm:$0xff] %vm680_vm12, %v1696_v21  ;;  %2212 = vmatmul.mubr.bf16.vlgmr.msra.gmra.mrb[32].mxu1 %v1899_v26 }
 0x273   : > { %7843 = vmatpush3.bf16.msra.mxu1 %v8831_v61  ;;  %2218 = vmatprep.mubr.bf16.mxu1 %v1905_v27  ;;  %v1910_v30 = vld [vmem:[#allocation3 + $0x58] sm:$0xff]  ;;  %v1928_v27 = vld [vmem:[#allocation3 + $0xe8] sm:$0xff] }
 0x274   : > { %v1774_v34 = vpop.permute.xlu0 %1773  ;;  %7844 = vmatprep.subr.bf16.mxu1 %v8057_v19 }
 0x275   : > { %1793 = vst.msk [vmem:[#allocation3 + $0xa8] sm:$0xff] %vm680_vm12, %v1774_v34  ;;  %v1698_v28 = vpop.permute.xlu1 %1697  ;;  %v1904_v18 = vld [vmem:[#allocation3 + $0x28] sm:$0xff]  ;;  %v1933_v34 = vld [vmem:[#allocation3 + $0x110] sm:$0xff] }
 0x276   : > { %1718 = vst.msk [vmem:[#allocation3 + $0x78] sm:$0xff] %vm680_vm12, %v1698_v28  ;;  %1879 = vst.msk [vmem:[#allocation3 + $0x40] sm:$0xff] %vm680_vm12, %v1698_v28  ;;  %v1938_v28 = vld [vmem:[#allocation3 + $0x138] sm:$0xff] }
 0x277   : > { %7845 = vmatpush3.bf16.msra.mxu1 %v8057_v19  ;;  %v1915_v1 = vld [vmem:[#allocation3 + $0x80] sm:$0xff] }
 0x278   : > { %v1776_v12 = vpop.permute.xlu0 %1775  ;;  %7846 = vmatprep.subr.bf16.mxu1 %v8063_v20  ;;  %v1923_v19 = vld [vmem:[#allocation3 + $0xc0] sm:$0xff] }
 0x279   : > { %1794 = vst.msk [vmem:[#allocation3 + $0xd0] sm:$0xff] %vm680_vm12, %v1776_v12  ;;  %v1700_v29 = vpop.permute.xlu1 %1699  ;;  %v1902_v61 = vld [vmem:[#allocation3 + $0x18] sm:$0xff]  ;;  %v1909_v38 = vld [vmem:[#allocation3 + $0x50] sm:$0xff]  ;;  %v9017_v12 = vld [vmem:[#allocation2] sm:$0xff] }
 0x27a   : > { %1719 = vst.msk [vmem:[#allocation3 + $0xa0] sm:$0xff] %vm680_vm12, %v1700_v29  ;;  %1880 = vst.msk [vmem:[#allocation3 + $0x68] sm:$0xff] %vm680_vm12, %v1700_v29  ;;  %2219 = vmatmul.mubr.bf16.gmra.mrb[36].mxu1 %v1904_v18  ;;  %2300 = vmatprep.mubr.bf16.mxu0 %v1902_v61 }
 0x27b   : > { %2225 = vmatprep.mubr.bf16.mxu1 %v1910_v30  ;;  %7847 = vmatpush3.bf16.msra.mxu1 %v8063_v20  ;;  %2649 = vst.msk [vmem:[#allocation3] sm:$0xff] %vm295_vm4, %v9017_v12 }
 0x27c   : > { %v1778_v59 = vpop.permute.xlu0 %1777  ;;  %7848 = vmatprep.subr.bf16.mxu1 %v8064_v62  ;;  %v1920_v42 = vld [vmem:[#allocation3 + $0xa8] sm:$0xff] }
 0x27d   : > { %1795 = vst.msk [vmem:[#allocation3 + $0xf8] sm:$0xff] %vm680_vm12, %v1778_v59  ;;  %v1702_v32 = vpop.permute.xlu1 %1701  ;;  %v1914_v17 = vld [vmem:[#allocation3 + $0x78] sm:$0xff]  ;;  %v1907_v48 = vld [vmem:[#allocation3 + $0x40] sm:$0xff] }
 0x27e   : > { %1720 = vst.msk [vmem:[#allocation3 + $0xc8] sm:$0xff] %vm680_vm12, %v1702_v32  ;;  %1881 = vst.msk [vmem:[#allocation3 + $0x90] sm:$0xff] %vm680_vm12, %v1702_v32 }
 0x27f   : > { %7849 = vmatpush3.bf16.msra.mxu1 %v8064_v62  ;;  %v9021_v62 = vld [vmem:[#allocation2 + $0x48] sm:$0xff] }
 0x280   : > { %v1780_v36 = vpop.permute.xlu0 %1779  ;;  %v1925_v47 = vld [vmem:[#allocation3 + $0xd0] sm:$0xff] }
 0x281   : > { %1796 = vst.msk [vmem:[#allocation3 + $0x120] sm:$0xff] %vm680_vm12, %v1780_v36  ;;  %v1704_v22 = vpop.permute.xlu1 %1703  ;;  %v1919_v54 = vld [vmem:[#allocation3 + $0xa0] sm:$0xff]  ;;  %v1912_v0 = vld [vmem:[#allocation3 + $0x68] sm:$0xff] }
 0x282   : > { %1721 = vst.msk [vmem:[#allocation3 + $0xf0] sm:$0xff] %vm680_vm12, %v1704_v22  ;;  %1882 = vst.msk [vmem:[#allocation3 + $0xb8] sm:$0xff] %vm680_vm12, %v1704_v22  ;;  %2226 = vmatmul.mubr.bf16.gmra.mrb[40].mxu1 %v1909_v38 }
 0x283   : > { %2232 = vmatprep.mubr.bf16.mxu1 %v1915_v1 }
 0x284   : > { %v1825_v39 = vpop.permute.xlu0 %1824  ;;  %v1930_v49 = vld [vmem:[#allocation3 + $0xf8] sm:$0xff] }
 0x285   : > { %1848 = vst.msk [vmem:[#allocation3 + $0x10] sm:$0xff] %vm680_vm12, %v1825_v39  ;;  %v1706_v24 = vpop.permute.xlu1 %1705  ;;  %v1924_v10 = vld [vmem:[#allocation3 + $0xc8] sm:$0xff]  ;;  %v1917_v5 = vld [vmem:[#allocation3 + $0x90] sm:$0xff]  ;;  %v2835_v39 = vshll.u32 %v9021_v62, 16 }
 0x286   : > { %1722 = vst.msk [vmem:[#allocation3 + $0x118] sm:$0xff] %vm680_vm12, %v1706_v24  ;;  %1883 = vst.msk [vmem:[#allocation3 + $0xe0] sm:$0xff] %vm680_vm12, %v1706_v24  ;;  %v8065_v24 = vld [vmem:[#allocation4 + $0x160] sm:$0xff]  }
 0x287   : > { %7258 = vmatprep.subr.bf16.mxu0 %v8065_v24 }
 0x288   : > { %v1829_v2 = vpop.permute.xlu0 %1828  ;;  %v1935_v8 = vld [vmem:[#allocation3 + $0x120] sm:$0xff] }
 0x289   : > { %1850 = vst.msk [vmem:[#allocation3 + $0x60] sm:$0xff] %vm680_vm12, %v1829_v2  ;;  %v1827_v51 = vpop.permute.xlu1 %1826  ;;  %v1929_v7 = vld [vmem:[#allocation3 + $0xf0] sm:$0xff]  ;;  %v1922_v11 = vld [vmem:[#allocation3 + $0xb8] sm:$0xff]  ;;  %v8066_v2 = vld [vmem:[#allocation4 + $0x120] sm:$0xff]  }
 0x28a   : > { %1849 = vst.msk [vmem:[#allocation3 + $0x38] sm:$0xff] %vm680_vm12, %v1827_v51  ;;  %2233 = vmatmul.mubr.bf16.gmra.mrb[44].mxu1 %v1914_v17  ;;  %v8067_v51 = vld [vmem:[#allocation4 + $0x168] sm:$0xff]   ;;  %v2898_v17 = vshrl.u32 %v9021_v62, 16 }
 0x28b   : > { %2239 = vmatprep.mubr.bf16.mxu1 %v1920_v42  ;;  %v9029_v42 = vrot.slane %v2835_v39, 1 }
 0x28c   : > { %v1833_v43 = vpop.permute.xlu0 %1832  ;;  %v1901_v44 = vld [vmem:[#allocation3 + $0x10] sm:$0xff] }
 0x28d   : > { %1852 = vst.msk [vmem:[#allocation3 + $0xb0] sm:$0xff] %vm680_vm12, %v1833_v43  ;;  %2301 = vmatmul.mubr.bf16.vlgmr.msra.gmra.mrb[48].mxu0 %v1901_v44  ;;  %v1831_v46 = vpop.permute.xlu1 %1830  ;;  %v1934_v41 = vld [vmem:[#allocation3 + $0x118] sm:$0xff]  ;;  %v1927_v50 = vld [vmem:[#allocation3 + $0xe0] sm:$0xff] }
 0x28e   : > { %1851 = vst.msk [vmem:[#allocation3 + $0x88] sm:$0xff] %vm680_vm12, %v1831_v46  ;;  %2307 = vmatprep.mubr.bf16.mxu0 %v1907_v48  ;;  %v2648_v44 = vld [vmem:[#allocation2 + $0x50] sm:$0xff]  ;;  %v2856_v48 = vrot.slane %v9021_v62, 1  ;;  %7259 = vmatpush3.bf16.msra.mxu0 %v8066_v2 }
 0x28f   : > { %7260 = vmatprep.subr.bf16.mxu0 %v8067_v51 }
 0x290   : > { %v1873_v52 = vpop.permute.xlu0 %1872  ;;  %v1911_v4 = vld [vmem:[#allocation3 + $0x60] sm:$0xff] }
 0x291   : > { %1884 = vst.msk [vmem:[#allocation3 + $0x108] sm:$0xff] %vm680_vm12, %v1873_v52  ;;  %v1835_v53 = vpop.permute.xlu1 %1834  ;;  %v1906_v55 = vld [vmem:[#allocation3 + $0x38] sm:$0xff]  ;;  %v8068_v52 = vld [vmem:[#allocation4 + $0x128] sm:$0xff]  }
 0x292   : > { %1853 = vst.msk [vmem:[#allocation3 + $0xd8] sm:$0xff] %vm680_vm12, %v1835_v53  ;;  %2240 = vmatmul.mubr.bf16.gmra.mrb[48].mxu1 %v1919_v54  ;;  %v2900_v53 = vor.u32 %v2898_v17, %v9029_v42  ;;  %v2902_v54 = vshll.u32 %v2648_v44, 16  ;;  %7261 = vmatpush3.bf16.msra.mxu0 %v8068_v52 }
 0x293   : > { %2246 = vmatprep.mubr.bf16.mxu1 %v1925_v47  ;;  %v2921_v47 = vrot.slane %v2648_v44, 1 }
 0x294   : > { %v1875_v57 = vpop.permute.xlu0 %1874  ;;  %v1921_v58 = vld [vmem:[#allocation3 + $0xb0] sm:$0xff] }
 0x295   : > { %2308 = vmatmul.mubr.bf16.gmra.mrb[52].mxu0 %v1906_v55  ;;  %v1837_v60 = vpop.permute.xlu1 %1836  ;;  %1885 = vst.msk [vmem:[#allocation3 + $0x130] sm:$0xff] %vm680_vm12, %v1875_v57  ;;  %v1916_v9 = vld [vmem:[#allocation3 + $0x88] sm:$0xff] }
 0x296   : > { %1854 = vst.msk [vmem:[#allocation3 + $0x100] sm:$0xff] %vm680_vm12, %v1837_v60  ;;  %2314 = vmatprep.mubr.bf16.mxu0 %v1912_v0  ;;  %v8069_v60 = vld [vmem:[#allocation4 + $0x170] sm:$0xff]  }
 0x297   : > { %7262 = vmatprep.subr.bf16.mxu0 %v8069_v60 }
 0x298   : > { %v1932_v16 = vld [vmem:[#allocation3 + $0x108] sm:$0xff] }
 0x299   : > { %v1839_v56 = vpop.permute.xlu1 %1838  ;;  %v1926_v6 = vld [vmem:[#allocation3 + $0xd8] sm:$0xff] }
 0x29a   : > { %1855 = vst.msk [vmem:[#allocation3 + $0x128] sm:$0xff] %vm680_vm12, %v1839_v56  ;;  %2247 = vmatmul.mubr.bf16.gmra.mrb[52].mxu1 %v1924_v10  ;;  %v2904_v56 = vrot.slane %v2902_v54, 1  ;;  %v2922_v10 = vsel %vm698_vm11, %v2856_v48, %v2921_v47 }
 0x29b   : > { %2253 = vmatprep.mubr.bf16.mxu1 %v1930_v49  ;;  %2932 = vst.msk [vmem:[#allocation3 + $0x138] sm:$0xff] %vm295_vm4, %v2922_v10  ;;  %v8070_v49 = vld [vmem:[#allocation4 + $0x130] sm:$0xff]  }
 0x29c   : > { %v1937_v21 = vld [vmem:[#allocation3 + $0x130] sm:$0xff]  ;;  %7263 = vmatpush3.bf16.msra.mxu0 %v8070_v49 }
 0x29d   : > { %2315 = vmatmul.mubr.bf16.gmra.mrb[56].mxu0 %v1911_v4  ;;  %v1931_v26 = vld [vmem:[#allocation3 + $0x100] sm:$0xff]  ;;  %2897 = vst.msk [vmem:[#allocation3 + $0x130] sm:$0xff] %vm295_vm4, %v9021_v62  ;;  %v9038_v4 = vsel %vm587_vm10, %v2900_v53, %v2904_v56 }
 0x29e   : > { %2321 = vmatprep.mubr.bf16.mxu0 %v1917_v5  ;;  %v8071_v5 = vld [vmem:[#allocation4 + $0x178] sm:$0xff]  }
 0x29f   : > { %7264 = vmatprep.subr.bf16.mxu0 %v8071_v5 }
 0x2a1   : > { %v1936_v20 = vld [vmem:[#allocation3 + $0x128] sm:$0xff] }
 0x2a2   : > { %2254 = vmatmul.mubr.bf16.gmra.mrb[56].mxu1 %v1929_v7 }
 0x2a3   : > { %2260 = vmatprep.mubr.bf16.mxu1 %v1935_v8 }
 0x2a5   : > { %2322 = vmatmul.mubr.bf16.gmra.mrb[60].mxu0 %v1916_v9  ;;  %v8072_v9 = vld [vmem:[#allocation4 + $0x138] sm:$0xff]  }
 0x2a6   : > { %2328 = vmatprep.mubr.bf16.mxu0 %v1922_v11  ;;  %7265 = vmatpush3.bf16.msra.mxu0 %v8072_v9 }
 0x2aa   : > { %2261 = vmatmul.mubr.bf16.gmra.mrb[60].mxu1 %v1934_v41 }
 0x2ab   : > { %7850 = vmatprep.mubr.msk.bf16.mxu1 %vm295_vm4, %v1903_v63  ;;  %v8073_v63 = vld [vmem:[#allocation4 + $0x180] sm:$0xff]  }
 0x2ac   : > { %7266 = vmatprep.subr.bf16.mxu0 %v8073_v63 }
 0x2ad   : > { %2329 = vmatmul.mubr.bf16.gmra.mrb[64].mxu0 %v1921_v58 }
 0x2ae   : > { %2335 = vmatprep.mubr.bf16.mxu0 %v1927_v50 }
 0x2b2   : > { %7851 = vmatmul.mubr.msk.bf16.vlgmr.msra.gmra.mrb[64].mxu1 %vm295_vm4, %v1908_v14 }
 0x2b3   : > { %7854 = vmatprep.mubr.msk.bf16.mxu1 %vm295_vm4, %v1913_v15 }
 0x2b5   : > { %2336 = vmatmul.mubr.bf16.gmra.mrb[68].mxu0 %v1926_v6 }
 0x2b6   : > { %2342 = vmatprep.mubr.bf16.mxu0 %v1932_v16  ;;  %v8074_v16 = vld [vmem:[#allocation4 + $0x140] sm:$0xff]  }
 0x2b7   : > { %7267 = vmatpush3.bf16.msra.mxu0 %v8074_v16 }
 0x2ba   : > { %7855 = vmatmul.mubr.msk.bf16.gmra.mrb[68].mxu1 %vm295_vm4, %v1918_v13 }
 0x2bb   : > { %7858 = vmatprep.mubr.msk.bf16.mxu1 %vm295_vm4, %v1923_v19  ;;  %v8075_v19 = vld [vmem:[#allocation4 + $0x188] sm:$0xff]  }
 0x2bc   : > { %7268 = vmatprep.subr.bf16.mxu0 %v8075_v19 }
 0x2bd   : > { %2343 = vmatmul.mubr.bf16.gmra.mrb[72].mxu0 %v1931_v26 }
 0x2be   : > { %2349 = vmatprep.mubr.bf16.mxu0 %v1937_v21 }
 0x2c2   : > { %7859 = vmatmul.mubr.msk.bf16.gmra.mrb[72].mxu1 %vm295_vm4, %v1928_v27 }
 0x2c3   : > { %7862 = vmatprep.mubr.msk.bf16.mxu1 %vm295_vm4, %v1933_v34  ;;  %v8076_v34 = vld [vmem:[#allocation4 + $0x148] sm:$0xff]  }
 0x2c4   : > { %7269 = vmatpush3.bf16.msra.mxu0 %v8076_v34 }
 0x2c5   : > { %2350 = vmatmul.mubr.bf16.gmra.mrb[76].mxu0 %v1936_v20 }
 0x2ca   : > { %7863 = vmatmul.mubr.msk.bf16.gmra.mrb[76].mxu1 %vm295_vm4, %v1938_v28 }
 0x345   : > { %v7134_v29 = vpop.f32.mrb[32].mxu1 }
 0x346   : > { %v7135_v18 = vpop.f32.mrb[33].mxu1 }
 0x347   : > { %v7136_v61 = vadd.f32 %v7135_v18, %v7134_v29  ;;  %v7137_v30 = vpop.f32.mrb[34].mxu1  ;;  %v8077_v29 = vld [vmem:[#allocation4 + $0x190] sm:$0xff]  }
 0x348   : > { %v7138_v59 = vpop.f32.mrb[35].mxu1  ;;  %7270 = vmatprep.subr.bf16.mxu0 %v8077_v29 }
 0x34d   : > { %v7140_v32 = vpop.f32.mrb[36].mxu1 }
 0x34e   : > { %v7141_v36 = vpop.f32.mrb[37].mxu1 }
 0x34f   : > { %v9025_v22 = vadd.f32 %v7141_v36, %v7140_v32  ;;  %v7143_v38 = vpop.f32.mrb[38].mxu1 }
 0x350   : > { %v7144_v1 = vpop.f32.mrb[39].mxu1  ;;  %v8078_v38 = vld [vmem:[#allocation4 + $0x150] sm:$0xff]  }
 0x351   : > { %7271 = vmatpush3.bf16.msra.mxu0 %v8078_v38 }
 0x355   : > { %v7146_v43 = vpop.f32.mrb[40].mxu1 }
 0x356   : > { %v7147_v46 = vpop.f32.mrb[41].mxu1 }
 0x357   : > { %v7148_v55 = vadd.f32 %v7147_v46, %v7146_v43  ;;  %v7149_v57 = vpop.f32.mrb[42].mxu1 }
 0x358   : > { %v7150_v0 = vpop.f32.mrb[43].mxu1 }
 0x35d   : > { %v7152_v7 = vpop.f32.mrb[44].mxu1 }
 0x35e   : > { %v7153_v8 = vpop.f32.mrb[45].mxu1 }
 0x35f   : > { %v7154_v11 = vadd.f32 %v7153_v8, %v7152_v7  ;;  %v7155_v41 = vpop.f32.mrb[46].mxu1 }
 0x360   : > { %v7156_v58 = vpop.f32.mrb[47].mxu1  ;;  %v7198_v50 = vpop.f32.mrb[48].mxu0 }
 0x361   : > { %v7199_v14 = vpop.f32.mrb[49].mxu0 }
 0x362   : > { %v7200_v15 = vadd.f32 %v7199_v14, %v7198_v50  ;;  %v7201_v6 = vpop.f32.mrb[50].mxu0 }
 0x363   : > { %v7202_v13 = vpop.f32.mrb[51].mxu0 }
 0x364   : > { %v2303_v21 = vadd.f32 %v7200_v15, %v7136_v61 }
 0x365   : > { %v7158_v26 = vpop.f32.mrb[48].mxu1 }
 0x366   : > { %v7159_v27 = vpop.f32.mrb[49].mxu1 }
 0x367   : > { %v7160_v20 = vadd.f32 %v7159_v27, %v7158_v26  ;;  %v7161_v28 = vpop.f32.mrb[50].mxu1  ;;  %v9048_v26 = vld [vmem:[%s10125_s4] ss:$0 sm:$0xff] }
 0x368   : > { %v7162_v18 = vpop.f32.mrb[51].mxu1  ;;  %v7204_v30 = vpop.f32.mrb[52].mxu0 }
 0x369   : > { %v7205_v59 = vpop.f32.mrb[53].mxu0 }
 0x36a   : > { %v7206_v32 = vadd.f32 %v7205_v59, %v7204_v30  ;;  %v7207_v36 = vpop.f32.mrb[54].mxu0 }
 0x36b   : > { %v7208_v1 = vpop.f32.mrb[55].mxu0 }
 0x36c   : > { %v2310_v39 = vadd.f32 %v7206_v32, %v9025_v22 }
 0x36d   : > { %v7164_v61 = vpop.f32.mrb[52].mxu1 }
 0x36e   : > { %v7165_v24 = vpop.f32.mrb[53].mxu1 }
 0x36f   : > { %v7166_v2 = vadd.f32 %v7165_v24, %v7164_v61  ;;  %v7167_v51 = vpop.f32.mrb[54].mxu1 }
 0x370   : > { %v7168_v17 = vpop.f32.mrb[55].mxu1  ;;  %v7210_v43 = vpop.f32.mrb[56].mxu0 }
 0x371   : > { %v7211_v44 = vpop.f32.mrb[57].mxu0 }
 0x372   : > { %v7212_v46 = vadd.f32 %v7211_v44, %v7210_v43  ;;  %v7213_v52 = vpop.f32.mrb[58].mxu0 }
 0x373   : > { %v7214_v53 = vpop.f32.mrb[59].mxu0 }
 0x374   : > { %v2317_v54 = vadd.f32 %v7212_v46, %v7148_v55 }
 0x375   : > { %v7170_v47 = vpop.f32.mrb[56].mxu1 }
 0x376   : > { %v7171_v57 = vpop.f32.mrb[57].mxu1 }
 0x377   : > { %v9041_v60 = vadd.f32 %v7171_v57, %v7170_v47  ;;  %v7173_v0 = vpop.f32.mrb[58].mxu1 }
 0x378   : > { %v7174_v56 = vpop.f32.mrb[59].mxu1  ;;  %v7216_v10 = vpop.f32.mrb[60].mxu0 }
 0x379   : > { %v7217_v22 = vpop.f32.mrb[61].mxu0 }
 0x37a   : > { %v7218_v49 = vadd.f32 %v7217_v22, %v7216_v10  ;;  %v7219_v5 = vpop.f32.mrb[62].mxu0 }
 0x37b   : > { %v7220_v7 = vpop.f32.mrb[63].mxu0 }
 0x37c   : > { %v2324_v8 = vadd.f32 %v7218_v49, %v7154_v11 }
 0x37d   : > { %v7176_v9 = vpop.f32.mrb[60].mxu1 }
 0x37e   : > { %v7177_v41 = vpop.f32.mrb[61].mxu1 }
 0x37f   : > { %v9043_v63 = vadd.f32 %v7177_v41, %v7176_v9  ;;  %v7179_v58 = vpop.f32.mrb[62].mxu1 }
 0x380   : > { %v7180_v50 = vpop.f32.mrb[63].mxu1  ;;  %v7222_v14 = vpop.f32.mrb[64].mxu0 }
 0x381   : > { %v7223_v55 = vpop.f32.mrb[65].mxu0 }
 0x382   : > { %v7224_v15 = vadd.f32 %v7223_v55, %v7222_v14  ;;  %v7225_v6 = vpop.f32.mrb[66].mxu0 }
 0x383   : > { %v7226_v16 = vpop.f32.mrb[67].mxu0 }
 0x384   : > { %v2331_v13 = vadd.f32 %v7224_v15, %v7160_v20  ;;  %v2541_v15 = vld [vmem:[#allocation2 + $0x8] sm:$0x1f] }
 0x385   : > { %v7852_v19 = vpop.f32.mrb[64].mxu1 }
 0x386   : > { %v2399_v27 = vadd.f32 %v7852_v19, %v2310_v39  ;;  %v2391_v11 = vpop.f32.mrb[65].mxu1 }
 0x387   : > { %v2392_v34 = vadd.f32 %v2391_v11, %v2303_v21  ;;  %v7853_v28 = vpop.f32.mrb[66].mxu1 }
 0x388   : > { %v2454_v29 = vadd.f32 %v9048_v26, %v2399_v27  ;;  %v7228_v18 = vpop.f32.mrb[68].mxu0  ;;  %v2394_v30 = vpop.f32.mrb[67].mxu1  ;;  %v8079_v28 = vld [vmem:[#allocation4 + $0x198] sm:$0xff]  }
 0x389   : > { %v2453_v59 = vadd.f32 %v9048_v26, %v2392_v34  ;;  %v7229_v32 = vpop.f32.mrb[69].mxu0  ;;  %v2660_v34 = vshll.u32 %v9017_v12, 16  ;;  %7272 = vmatprep.subr.bf16.mxu0 %v8079_v28 }
 0x38a   : > { %v2462_v36 = vmax.f32 %v2454_v29, 0.0  ;;  %v7230_v38 = vadd.f32 %v7229_v32, %v7228_v18  ;;  %v7231_v20 = vpop.f32.mrb[70].mxu0 }
 0x38b   : > { %v2461_v1 = vmax.f32 %v2453_v59, 0.0  ;;  %v7232_v61 = vpop.f32.mrb[71].mxu0  ;;  %v8080_v59 = vld [vmem:[#allocation4 + $0x158] sm:$0xff]  }
 0x38c   : > { %v2470_v24 = vpack.c.bf16 %v2462_v36, %v2462_v36  ;;  %v2338_v51 = vadd.f32 %v7230_v38, %v7166_v2  ;;  %7273 = vmatpush3.bf16.msra.mxu0 %v8080_v59 }
 0x38d   : > { %v2469_v17 = vpack.c.bf16 %v2461_v1, %v2461_v1  ;;  %v7856_v43 = vpop.f32.mrb[68].mxu1 }
 0x38e   : > { %v2485_v39 = vshrl.u32 %v2470_v24, 16  ;;  %v2413_v44 = vadd.f32 %v7856_v43, %v2324_v8  ;;  %v2405_v21 = vpop.f32.mrb[69].mxu1  ;;  %v2488_v57 = vshll.u32 %v2470_v24, 16  ;;  %v2544_v8 = vld [vmem:[#allocation2 + $0x10] sm:$0x1f] }
 0x38f   : > { %v2478_v46 = vshrl.u32 %v2469_v17, 16  ;;  %v2406_v52 = vadd.f32 %v2405_v21, %v2317_v54  ;;  %v7857_v53 = vpop.f32.mrb[70].mxu1  ;;  %v2481_v49 = vshll.u32 %v2469_v17, 16  ;;  %v2658_v17 = vshrl.u32 %v9017_v12, 16 }
 0x390   : > { %v2487_v47 = vrot.slane %v2485_v39, 7  ;;  %v2456_v0 = vadd.f32 %v9048_v26, %v2413_v44  ;;  %v7234_v56 = vpop.f32.mrb[72].mxu0  ;;  %v2408_v10 = vpop.f32.mrb[71].mxu1  ;;  %v2662_v21 = vrot.slane %v2660_v34, 1  ;;  %v8085_v34 = vld [vmem:[#allocation4 + $0x1a8] sm:$0xff]  }
 0x391   : > { %v2480_v22 = vrot.slane %v2478_v46, 7  ;;  %v2455_v5 = vadd.f32 %v9048_v26, %v2406_v52  ;;  %v7235_v7 = vpop.f32.mrb[73].mxu0  ;;  %v8081_v46 = vld [vmem:[#allocation4 + $0x1e0] sm:$0xff]  }
 0x392   : > { %v2490_v2 = vor.u32 %v2488_v57, %v2487_v47  ;;  %v2464_v9 = vmax.f32 %v2456_v0, 0.0  ;;  %v7236_v41 = vadd.f32 %v7235_v7, %v7234_v56  ;;  %v7237_v58 = vpop.f32.mrb[74].mxu0  ;;  %v8082_v57 = vld [vmem:[#allocation4 + $0x1a0] sm:$0xff]   ;;  %v2550_v0 = vld [vmem:[#allocation2 + $0x20] sm:$0x1f]  ;;  %7322 = vmatprep.subr.bf16.mxu1 %v8081_v46 }
 0x393   : > { %v2483_v50 = vor.u32 %v2481_v49, %v2480_v22  ;;  %v2463_v14 = vmax.f32 %v2455_v5, 0.0  ;;  %v7238_v54 = vpop.f32.mrb[75].mxu0  ;;  %v2547_v5 = vld [vmem:[#allocation2 + $0x18] sm:$0x1f]  ;;  %7323 = vmatpush3.bf16.msra.mxu1 %v8082_v57  ;;  %v2556_v46 = vld [vmem:[#allocation2 + $0x30] sm:$0x1f] }
 0x394   : > { %v2545_v55 = vsel %vm8385_vm9, %v2490_v2, %v2544_v8  ;;  %v2472_v6 = vpack.c.bf16 %v2464_v9, %v2464_v9  ;;  %v9057_v16 = vadd.f32 %v7236_v41, %v9041_v60  ;;  %v2766_v41 = vrot.slane %v9017_v12, 1 }
 0x395   : > { %2546 = vst [vmem:[#allocation2 + $0x10] sm:$0x1f] %v2545_v55  ;;  %v2542_v19 = vsel %vm8385_vm9, %v2483_v50, %v2541_v15  ;;  %v2471_v27 = vpack.c.bf16 %v2463_v14, %v2463_v14  ;;  %v7860_v11 = vpop.f32.mrb[72].mxu1  ;;  %v2663_v54 = vor.u32 %v2662_v21, %v2658_v17  ;;  %v8083_v55 = vld [vmem:[#allocation4 + $0x1e8] sm:$0xff]   ;;  %v9078_v15 = vld [vmem:[#allocation4 + $0x220] sm:$0xff]   ;;  %v8087_v21 = vld [vmem:[#allocation4 + $0x1b0] sm:$0xff]  }
 0x396   : > { %2543 = vst [vmem:[#allocation2 + $0x8] sm:$0x1f] %v2542_v19  ;;  %v2499_v29 = vshrl.u32 %v2472_v6, 16  ;;  %v2427_v18 = vadd.f32 %v7860_v11, %v2338_v51  ;;  %v2419_v30 = vpop.f32.mrb[73].mxu1  ;;  %v2502_v20 = vshll.u32 %v2472_v6, 16  ;;  %7324 = vmatprep.subr.bf16.mxu1 %v8083_v55  ;;  %7866 = vmatprep.subr.bf16.mxu0 %v9078_v15 }
 0x397   : > { %v2492_v32 = vshrl.u32 %v2471_v27, 16  ;;  %v2420_v36 = vadd.f32 %v2419_v30, %v2331_v13  ;;  %v7861_v38 = vpop.f32.mrb[74].mxu1  ;;  %v2495_v39 = vshll.u32 %v2471_v27, 16  ;;  %7325 = vmatpush3.bf16.msra.mxu1 %v8085_v34 }
 0x398   : > { %v2501_v60 = vrot.slane %v2499_v29, 7  ;;  %v2458_v1 = vadd.f32 %v9048_v26, %v2427_v18  ;;  %v7240_v61 = vpop.f32.mrb[76].mxu0  ;;  %v2422_v24 = vpop.f32.mrb[75].mxu1 }
 0x399   : > { %v2494_v43 = vrot.slane %v2492_v32, 7  ;;  %v2457_v44 = vadd.f32 %v9048_v26, %v2420_v36  ;;  %v7241_v51 = vpop.f32.mrb[77].mxu0 }
 0x39a   : > { %v2504_v52 = vor.u32 %v2502_v20, %v2501_v60  ;;  %v2466_v13 = vmax.f32 %v2458_v1, 0.0  ;;  %v7242_v53 = vadd.f32 %v7241_v51, %v7240_v61  ;;  %v7243_v47 = vpop.f32.mrb[78].mxu0 }
 0x39b   : > { %v2497_v56 = vor.u32 %v2495_v39, %v2494_v43  ;;  %v2465_v10 = vmax.f32 %v2457_v44, 0.0  ;;  %v7244_v22 = vpop.f32.mrb[79].mxu0  ;;  %v8086_v43 = vld [vmem:[#allocation4 + $0x1f0] sm:$0xff]  }
 0x39c   : > { %v2551_v49 = vsel %vm8385_vm9, %v2504_v52, %v2550_v0  ;;  %v2474_v7 = vpack.c.bf16 %v2466_v13, %v2466_v13  ;;  %v2352_v2 = vadd.f32 %v7242_v53, %v9043_v63  ;;  %v9068_v9 = vld [vmem:[#allocation2 + $0x10] sm:$0xff]  ;;  %7326 = vmatprep.subr.bf16.mxu1 %v8086_v43  ;;  %v2553_v47 = vld [vmem:[#allocation2 + $0x28] sm:$0x1f] }
 0x39d   : > { %2552 = vst [vmem:[#allocation2 + $0x20] sm:$0x1f] %v2551_v49  ;;  %v2548_v58 = vsel %vm8385_vm9, %v2497_v56, %v2547_v5  ;;  %v2473_v8 = vpack.c.bf16 %v2465_v10, %v2465_v10  ;;  %v7864_v50 = vpop.f32.mrb[76].mxu1  ;;  %v2639_v14 = vld [vmem:[#allocation2 + $0x8] sm:$0xff]  ;;  %2651 = vst.msk [vmem:[#allocation3 + $0x50] sm:$0xff] %vm295_vm4, %v9068_v9  ;;  %v2673_v63 = vshll.u32 %v9068_v9, 16  ;;  %7327 = vmatpush3.bf16.msra.mxu1 %v8087_v21 }
 0x39e   : > { %2890 = vst.msk [vmem:[#allocation3 + $0x18] sm:$0xff] %vm295_vm4, %v9068_v9  ;;  %2549 = vst [vmem:[#allocation2 + $0x18] sm:$0x1f] %v2548_v58  ;;  %v2513_v12 = vshrl.u32 %v2474_v7, 16  ;;  %v2516_v6 = vshll.u32 %v2474_v7, 16  ;;  %v2441_v19 = vadd.f32 %v7864_v50, %v2352_v2  ;;  %v2433_v27 = vpop.f32.mrb[77].mxu1  ;;  %2799 = vrot.lane.b32.xlu0 %v2639_v14, %s8253_s12 }
 0x39f   : > { %2650 = vst.msk [vmem:[#allocation3 + $0x28] sm:$0xff] %vm295_vm4, %v2639_v14  ;;  %v2665_v11 = vshll.u32 %v2639_v14, 16  ;;  %v2506_v28 = vshrl.u32 %v2473_v8, 16  ;;  %v2509_v29 = vshll.u32 %v2473_v8, 16  ;;  %v2434_v18 = vadd.f32 %v2433_v27, %v9057_v16  ;;  %v7865_v59 = vpop.f32.mrb[78].mxu1  ;;  %v8089_v50 = vld [vmem:[#allocation4 + $0x1b8] sm:$0xff]  }
 0x3a0   : > { %v2669_v30 = vshrl.u32 %v2639_v14, 16  ;;  %v2515_v32 = vrot.slane %v2513_v12, 7  ;;  %v2460_v36 = vadd.f32 %v9048_v26, %v2441_v19  ;;  %v2675_v60 = vrot.slane %v2673_v63, 1  ;;  %v2436_v20 = vpop.f32.mrb[79].mxu1 }
 0x3a1   : > { %v2667_v38 = vrot.slane %v2665_v11, 1  ;;  %v2508_v1 = vrot.slane %v2506_v28, 7  ;;  %v2459_v61 = vadd.f32 %v9048_v26, %v2434_v18  ;;  %v2767_v24 = vrot.slane %v2639_v14, 1 }
 0x3a2   : > { %v2769_v17 = vrot.slane %v9068_v9, 1  ;;  %v2518_v16 = vor.u32 %v2516_v6, %v2515_v32  ;;  %v2468_v39 = vmax.f32 %v2460_v36, 0.0  ;;  %2801 = vrot.lane.b32.xlu0 %v9068_v9, %s8253_s12  ;;  %v2677_v7 = vshrl.u32 %v9068_v9, 16  ;;  %v8091_v36 = vld [vmem:[#allocation4 + $0x1c0] sm:$0xff]  }
 0x3a3   : > { %v2668_v44 = vsel %vm587_vm10, %v2663_v54, %v2667_v38  ;;  %v2671_v51 = vor.u32 %v2669_v30, %v2667_v38  ;;  %v2511_v52 = vor.u32 %v2509_v29, %v2508_v1  ;;  %v2467_v13 = vmax.f32 %v2459_v61, 0.0  ;;  %v8090_v29 = vld [vmem:[#allocation4 + $0x200] sm:$0xff]   ;;  %v2562_v38 = vld [vmem:[#allocation2 + $0x40] sm:$0x1f] }
 0x3a4   : > { %2725 = vrot.lane.b32.xlu1 %v2668_v44, %s8253_s12  ;;  %v2768_v26 = vsel %vm698_vm11, %v2766_v41, %v2767_v24  ;;  %v2557_v53 = vsel %vm8385_vm9, %v2518_v16, %v2556_v46  ;;  %v2476_v57 = vpack.c.bf16 %v2468_v39, %v2468_v39  ;;  %v9095_v56 = vld [vmem:[#allocation2 + $0x20] sm:$0xff]  ;;  %v9098_v10 = vsel %vm698_vm11, %v2767_v24, %v2769_v17  ;;  %v8088_v41 = vld [vmem:[#allocation4 + $0x1f8] sm:$0xff]   ;;  %v2559_v1 = vld [vmem:[#allocation2 + $0x38] sm:$0x1f] }
 0x3a5   : > { %v2676_v0 = vsel %vm587_vm10, %v2671_v51, %v2675_v60  ;;  %2791 = vst.msk [vmem:[#allocation3 + $0x8] sm:$0xff] %vm295_vm4, %v2768_v26  ;;  %2558 = vst [vmem:[#allocation2 + $0x30] sm:$0x1f] %v2557_v53  ;;  %v2554_v22 = vsel %vm8385_vm9, %v2511_v52, %v2553_v47  ;;  %v2475_v49 = vpack.c.bf16 %v2467_v13, %v2467_v13  ;;  %v2641_v5 = vld [vmem:[#allocation2 + $0x18] sm:$0xff]  ;;  %v2689_v2 = vshll.u32 %v9095_v56, 16  ;;  %v8092_v44 = vld [vmem:[#allocation4 + $0x208] sm:$0xff]  }
 0x3a6   : > { %2847 = vst.msk [vmem:[#allocation3 + $0x10] sm:$0xff] %vm295_vm4, %v2676_v0  ;;  %2653 = vst.msk [vmem:[#allocation3 + $0xa0] sm:$0xff] %vm295_vm4, %v9095_v56  ;;  %v2527_v58 = vshrl.u32 %v2476_v57, 16  ;;  %2803 = vrot.lane.b32.xlu0 %v2641_v5, %s8253_s12  ;;  %v2681_v8 = vshll.u32 %v2641_v5, 16  ;;  %v2530_v14 = vshll.u32 %v2476_v57, 16  ;;  %v2679_v9 = vor.u32 %v2677_v7, %v2675_v60  ;;  %7328 = vmatprep.subr.bf16.mxu1 %v8088_v41  ;;  %v8094_v52 = vld [vmem:[#allocation4 + $0x1c8] sm:$0xff]  }
 0x3a7   : > { %2892 = vst.msk [vmem:[#allocation3 + $0x68] sm:$0xff] %vm295_vm4, %v9095_v56  ;;  %2792 = vst.msk [vmem:[#allocation3 + $0x30] sm:$0xff] %vm295_vm4, %v9098_v10  ;;  %v2520_v54 = vshrl.u32 %v2475_v49, 16  ;;  %v2771_v63 = vrot.slane %v2641_v5, 1  ;;  %v2685_v6 = vshrl.u32 %v2641_v5, 16  ;;  %v2773_v19 = vrot.slane %v9095_v56, 1  ;;  %7329 = vmatpush3.bf16.msra.mxu1 %v8089_v50 }
 0x3a8   : > { %2555 = vst [vmem:[#allocation2 + $0x28] sm:$0x1f] %v2554_v22  ;;  %2652 = vst.msk [vmem:[#allocation3 + $0x78] sm:$0xff] %vm295_vm4, %v2641_v5  ;;  %2727 = vrot.lane.b32.xlu1 %v2676_v0, %s8253_s12  ;;  %v2529_v55 = vrot.slane %v2527_v58, 7  ;;  %v2683_v12 = vrot.slane %v2681_v8, 1  ;;  %v2523_v11 = vshll.u32 %v2475_v49, 16  ;;  %7330 = vmatprep.subr.bf16.mxu1 %v8090_v29 }
 0x3a9   : > { %2891 = vst.msk [vmem:[#allocation3 + $0x40] sm:$0xff] %vm295_vm4, %v2641_v5  ;;  %v2522_v27 = vrot.slane %v2520_v54, 7  ;;  %v2691_v34 = vrot.slane %v2689_v2, 1  ;;  %v9118_v28 = vsel %vm698_vm11, %v2769_v17, %v2771_v63  ;;  %v9124_v32 = vsel %vm698_vm11, %v2771_v63, %v2773_v19  ;;  %v8095_v0 = vld [vmem:[#allocation4 + $0x210] sm:$0xff]   ;;  %v8098_v63 = vld [vmem:[#allocation4 + $0x1d8] sm:$0xff]  }
 0x3aa   : > { %v2532_v18 = vor.u32 %v2530_v14, %v2529_v55  ;;  %2805 = vrot.lane.b32.xlu0 %v9095_v56, %s8253_s12  ;;  %v2684_v30 = vsel %vm587_vm10, %v2679_v9, %v2683_v12  ;;  %v2687_v59 = vor.u32 %v2685_v6, %v2683_v12  ;;  %2925 = vst.msk [vmem:[#allocation3 + $0x20] sm:$0xff] %vm295_vm4, %v9118_v28  ;;  %2793 = vst.msk [vmem:[#allocation3 + $0x58] sm:$0xff] %vm295_vm4, %v9118_v28  ;;  %v8096_v5 = vld [vmem:[#allocation4 + $0x1d0] sm:$0xff]   ;;  %v8097_v14 = vld [vmem:[#allocation4 + $0x218] sm:$0xff]  }
 0x3ab   : > { %v2525_v60 = vor.u32 %v2523_v11, %v2522_v27  ;;  %2848 = vst.msk [vmem:[#allocation3 + $0x38] sm:$0xff] %vm295_vm4, %v2684_v30  ;;  %2926 = vst.msk [vmem:[#allocation3 + $0x48] sm:$0xff] %vm295_vm4, %v9124_v32  ;;  %7331 = vmatpush3.bf16.msra.mxu1 %v8091_v36  ;;  %v2693_v16 = vshrl.u32 %v9095_v56, 16 }
 0x3ac   : > { %2729 = vrot.lane.b32.xlu1 %v2684_v30, %s8253_s12  ;;  %2794 = vst.msk [vmem:[#allocation3 + $0x80] sm:$0xff] %vm295_vm4, %v9124_v32  ;;  %v2563_v20 = vsel %vm8385_vm9, %v2532_v18, %v2562_v38  ;;  %v2692_v61 = vsel %vm587_vm10, %v2687_v59, %v2691_v34  ;;  %v9139_v24 = vld [vmem:[#allocation2 + $0x30] sm:$0xff]  ;;  %7332 = vmatprep.subr.bf16.mxu1 %v8092_v44 }
 0x3ad   : > { %2564 = vst [vmem:[#allocation2 + $0x40] sm:$0x1f] %v2563_v20  ;;  %v2560_v17 = vsel %vm8385_vm9, %v2525_v60, %v2559_v1  ;;  %2849 = vst.msk [vmem:[#allocation3 + $0x60] sm:$0xff] %vm295_vm4, %v2692_v61  ;;  %v2777_v39 = vrot.slane %v9139_v24, 1  ;;  %v2705_v21 = vshll.u32 %v9139_v24, 16  ;;  %v2695_v13 = vor.u32 %v2693_v16, %v2691_v34  ;;  %v8093_v60 = vld [vmem:[#allocation4 + $0x228] sm:$0xff]  }
 0x3ae   : > { %2655 = vst.msk [vmem:[#allocation3 + $0xf0] sm:$0xff] %vm295_vm4, %v9139_v24  ;;  %2894 = vst.msk [vmem:[#allocation3 + $0xb8] sm:$0xff] %vm295_vm4, %v9139_v24  ;;  %v2709_v58 = vshrl.u32 %v9139_v24, 16 }
 0x3af   : > { %v2643_v43 = vld [vmem:[#allocation2 + $0x28] sm:$0xff]  ;;  %2561 = vst [vmem:[#allocation2 + $0x38] sm:$0x1f] %v2560_v17  ;;  %7333 = vmatpush3.bf16.msra.mxu1 %v8094_v52  ;;  %v2707_v49 = vrot.slane %v2705_v21, 1 }
 0x3b0   : > { %2807 = vrot.lane.b32.xlu0 %v2643_v43, %s8253_s12  ;;  %2654 = vst.msk [vmem:[#allocation3 + $0xc8] sm:$0xff] %vm295_vm4, %v2643_v43  ;;  %2893 = vst.msk [vmem:[#allocation3 + $0x90] sm:$0xff] %vm295_vm4, %v2643_v43  ;;  %v2697_v51 = vshll.u32 %v2643_v43, 16  ;;  %v2775_v46 = vrot.slane %v2643_v43, 1  ;;  %2731 = vrot.lane.b32.xlu1 %v2692_v61, %s8253_s12  ;;  %v2701_v53 = vshrl.u32 %v2643_v43, 16  ;;  %v8099_v17 = vld [vmem:[#allocation4 + $0x230] sm:$0xff]  }
 0x3b1   : > { %7334 = vmatprep.subr.bf16.mxu1 %v8095_v0  ;;  %v2711_v55 = vor.u32 %v2709_v58, %v2707_v49 }
 0x3b2   : > { %v2699_v26 = vrot.slane %v2697_v51, 1  ;;  %v2778_v47 = vsel %vm698_vm11, %v2775_v46, %v2777_v39  ;;  %v2776_v57 = vsel %vm698_vm11, %v2773_v19, %v2775_v46 }
 0x3b3   : > { %2928 = vst.msk [vmem:[#allocation3 + $0x98] sm:$0xff] %vm295_vm4, %v2778_v47  ;;  %2796 = vst.msk [vmem:[#allocation3 + $0xd0] sm:$0xff] %vm295_vm4, %v2778_v47  ;;  %7335 = vmatpush3.bf16.msra.mxu1 %v8096_v5 }
 0x3b4   : > { %2927 = vst.msk [vmem:[#allocation3 + $0x70] sm:$0xff] %vm295_vm4, %v2776_v57  ;;  %2795 = vst.msk [vmem:[#allocation3 + $0xa8] sm:$0xff] %vm295_vm4, %v2776_v57  ;;  %2809 = vrot.lane.b32.xlu0 %v9139_v24, %s8253_s12  ;;  %v2700_v56 = vsel %vm587_vm10, %v2695_v13, %v2699_v26  ;;  %v2703_v22 = vor.u32 %v2701_v53, %v2699_v26  ;;  %v2646_v2 = vld [vmem:[#allocation2 + $0x40] sm:$0xff]  ;;  %7336 = vmatprep.subr.bf16.mxu1 %v8097_v14 }
 0x3b5   : > { %2733 = vrot.lane.b32.xlu1 %v2700_v56, %s8253_s12  ;;  %2850 = vst.msk [vmem:[#allocation3 + $0x88] sm:$0xff] %vm295_vm4, %v2700_v56  ;;  %2896 = vst.msk [vmem:[#allocation3 + $0x108] sm:$0xff] %vm295_vm4, %v2646_v2  ;;  %v2721_v8 = vshll.u32 %v2646_v2, 16  ;;  %v2781_v50 = vrot.slane %v2646_v2, 1  ;;  %v2831_v6 = vshrl.u32 %v2646_v2, 16 }
 0x3b6   : > { %v2708_v7 = vsel %vm587_vm10, %v2703_v22, %v2707_v49  ;;  %v2645_v41 = vld [vmem:[#allocation2 + $0x38] sm:$0xff] }
 0x3b7   : > { %2851 = vst.msk [vmem:[#allocation3 + $0xb0] sm:$0xff] %vm295_vm4, %v2708_v7  ;;  %2656 = vst.msk [vmem:[#allocation3 + $0x118] sm:$0xff] %vm295_vm4, %v2645_v41  ;;  %v2713_v54 = vshll.u32 %v2645_v41, 16  ;;  %v2779_v9 = vrot.slane %v2645_v41, 1  ;;  %v2723_v12 = vrot.slane %v2721_v8, 1  ;;  %v2857_v19 = vsel %vm698_vm11, %v2781_v50, %v2856_v48  ;;  %7337 = vmatpush3.bf16.msra.mxu1 %v8098_v63 }
 0x3b8   : > { %2811 = vrot.lane.b32.xlu0 %v2645_v41, %s8253_s12  ;;  %2895 = vst.msk [vmem:[#allocation3 + $0xe0] sm:$0xff] %vm295_vm4, %v2645_v41  ;;  %v2717_v11 = vshrl.u32 %v2645_v41, 16  ;;  %2931 = vst.msk [vmem:[#allocation3 + $0x110] sm:$0xff] %vm295_vm4, %v2857_v19 }
 0x3b9   : > { %2735 = vrot.lane.b32.xlu1 %v2708_v7, %s8253_s12  ;;  %v2715_v27 = vrot.slane %v2713_v54, 1  ;;  %v2780_v34 = vsel %vm698_vm11, %v2777_v39, %v2779_v9  ;;  %v2782_v29 = vsel %vm698_vm11, %v2779_v9, %v2781_v50  ;;  %v2833_v18 = vor.u32 %v2831_v6, %v2723_v12  ;;  %v8100_v39 = vld [vmem:[#allocation4 + $0x238] sm:$0xff]  }
 0x3ba   : > { %2929 = vst.msk [vmem:[#allocation3 + $0xc0] sm:$0xff] %vm295_vm4, %v2780_v34  ;;  %2797 = vst.msk [vmem:[#allocation3 + $0xf8] sm:$0xff] %vm295_vm4, %v2780_v34 }
 0x3bb   : > { %2930 = vst.msk [vmem:[#allocation3 + $0xe8] sm:$0xff] %vm295_vm4, %v2782_v29  ;;  %2798 = vst.msk [vmem:[#allocation3 + $0x120] sm:$0xff] %vm295_vm4, %v2782_v29  ;;  %v2716_v62 = vsel %vm587_vm10, %v2711_v55, %v2715_v27  ;;  %v2719_v48 = vor.u32 %v2717_v11, %v2715_v27  ;;  %v2838_v30 = vsel %vm587_vm10, %v2833_v18, %v9029_v42 }
 0x3bc   : > { %2813 = vrot.lane.b32.xlu0 %v2646_v2, %s8253_s12  ;;  %2852 = vst.msk [vmem:[#allocation3 + $0xd8] sm:$0xff] %vm295_vm4, %v2716_v62  ;;  %2854 = vst.msk [vmem:[#allocation3 + $0x128] sm:$0xff] %vm295_vm4, %v2838_v30 }
 0x3bd   : > { %2737 = vrot.lane.b32.xlu1 %v2716_v62, %s8253_s12  ;;  %v2724_v59 = vsel %vm587_vm10, %v2719_v48, %v2723_v12 }
 0x3be   : > { %2853 = vst.msk [vmem:[#allocation3 + $0x100] sm:$0xff] %vm295_vm4, %v2724_v59 }
 0x3c0   : > { %2858 = vrot.lane.b32.xlu0 %v9098_v10, %s8253_s12 }
 0x3c1   : > { %2739 = vrot.lane.b32.xlu1 %v2724_v59, %s8253_s12  ;;  %v2937_v59 = vld [vmem:[#allocation3 + $0x20] sm:$0xff] }
 0x3c4   : > { %2862 = vrot.lane.b32.xlu0 %v9124_v32, %s8253_s12 }
 0x3c5   : > { %2860 = vrot.lane.b32.xlu1 %v9118_v28, %s8253_s12 }
 0x3c8   : > { %2866 = vrot.lane.b32.xlu0 %v2778_v47, %s8253_s12 }
 0x3c9   : > { %2864 = vrot.lane.b32.xlu1 %v2776_v57, %s8253_s12 }
 0x3cc   : > { %2906 = vrot.lane.b32.xlu0 %v2838_v30, %s8253_s12 }
 0x3cd   : > { %2868 = vrot.lane.b32.xlu1 %v2780_v34, %s8253_s12 }
 0x3d0   : > { %2908 = vrot.lane.b32.xlu0 %v9038_v4, %s8253_s12 }
 0x3d1   : > { %2870 = vrot.lane.b32.xlu1 %v2782_v29, %s8253_s12 }
 0x3d5   : > { %2872 = vrot.lane.b32.xlu1 %v2857_v19, %s8253_s12 }
 0x410   : > { %v2800_v42 = vpop.permute.xlu0 %2799 }
 0x411   : > { %2823 = vst.msk [vmem:[#allocation3 + $0x8] sm:$0xff] %vm680_vm12, %v2800_v42 }
 0x414   : > { %v2802_v10 = vpop.permute.xlu0 %2801 }
 0x415   : > { %2824 = vst.msk [vmem:[#allocation3 + $0x30] sm:$0xff] %vm680_vm12, %v2802_v10 }
 0x416   : > { %v2726_v28 = vpop.permute.xlu1 %2725 }
 0x417   : > { %2749 = vst.msk [vmem:[#allocation3] sm:$0xff] %vm680_vm12, %v2726_v28  ;;  %v2942_v28 = vld [vmem:[#allocation3 + $0x48] sm:$0xff] }
 0x418   : > { %v2804_v32 = vpop.permute.xlu0 %2803  ;;  %v2934_v36 = vld [vmem:[#allocation3 + $0x8] sm:$0xff] }
 0x419   : > { %2825 = vst.msk [vmem:[#allocation3 + $0x58] sm:$0xff] %vm680_vm12, %v2804_v32  ;;  %3245 = vmatprep.mubr.bf16.mxu0 %v2934_v36  ;;  %v2947_v32 = vld [vmem:[#allocation3 + $0x70] sm:$0xff] }
 0x41a   : > { %v2728_v38 = vpop.permute.xlu1 %2727 }
 0x41b   : > { %2750 = vst.msk [vmem:[#allocation3 + $0x28] sm:$0xff] %vm680_vm12, %v2728_v38 }
 0x41c   : > { %v2806_v4 = vpop.permute.xlu0 %2805  ;;  %v2939_v61 = vld [vmem:[#allocation3 + $0x30] sm:$0xff] }
 0x41d   : > { %2826 = vst.msk [vmem:[#allocation3 + $0x80] sm:$0xff] %vm680_vm12, %v2806_v4  ;;  %v2952_v4 = vld [vmem:[#allocation3 + $0x98] sm:$0xff] }
 0x41e   : > { %v2730_v20 = vpop.permute.xlu1 %2729  ;;  %v2933_v1 = vld [vmem:[#allocation3] sm:$0xff] }
 0x41f   : > { %2751 = vst.msk [vmem:[#allocation3 + $0x50] sm:$0xff] %vm680_vm12, %v2730_v20  ;;  %2912 = vst.msk [vmem:[#allocation3 + $0x18] sm:$0xff] %vm680_vm12, %v2730_v20  ;;  %3246 = vmatmul.mubr.bf16.vlgmr.msra.gmra.mrb[80].mxu0 %v2933_v1 }
 0x420   : > { %7867 = vmatpush3.bf16.msra.mxu0 %v9078_v15  ;;  %3252 = vmatprep.mubr.bf16.mxu0 %v2939_v61  ;;  %v2944_v21 = vld [vmem:[#allocation3 + $0x58] sm:$0xff]  ;;  %v2962_v61 = vld [vmem:[#allocation3 + $0xe8] sm:$0xff] }
 0x421   : > { %7868 = vmatprep.subr.bf16.mxu0 %v8093_v60 }
 0x422   : > { %v2808_v24 = vpop.permute.xlu0 %2807  ;;  %v2732_v43 = vpop.permute.xlu1 %2731  ;;  %v2938_v51 = vld [vmem:[#allocation3 + $0x28] sm:$0xff] }
 0x423   : > { %2827 = vst.msk [vmem:[#allocation3 + $0xa8] sm:$0xff] %vm680_vm12, %v2808_v24  ;;  %2752 = vst.msk [vmem:[#allocation3 + $0x78] sm:$0xff] %vm680_vm12, %v2732_v43  ;;  %v2967_v24 = vld [vmem:[#allocation3 + $0x110] sm:$0xff] }
 0x424   : > { %2913 = vst.msk [vmem:[#allocation3 + $0x40] sm:$0xff] %vm680_vm12, %v2732_v43  ;;  %7869 = vmatpush3.bf16.msra.mxu0 %v8093_v60  ;;  %v2949_v47 = vld [vmem:[#allocation3 + $0x80] sm:$0xff]  ;;  %v2972_v43 = vld [vmem:[#allocation3 + $0x138] sm:$0xff] }
 0x425   : > { %7870 = vmatprep.subr.bf16.mxu0 %v8099_v17  ;;  %v2957_v60 = vld [vmem:[#allocation3 + $0xc0] sm:$0xff] }
 0x426   : > { %v2810_v16 = vpop.permute.xlu0 %2809  ;;  %v2936_v15 = vld [vmem:[#allocation3 + $0x18] sm:$0xff]  ;;  %v2943_v53 = vld [vmem:[#allocation3 + $0x50] sm:$0xff] }
 0x427   : > { %2828 = vst.msk [vmem:[#allocation3 + $0xd0] sm:$0xff] %vm680_vm12, %v2810_v16  ;;  %v2734_v44 = vpop.permute.xlu1 %2733  ;;  %3253 = vmatmul.mubr.bf16.gmra.mrb[84].mxu0 %v2938_v51  ;;  %3334 = vmatprep.mubr.bf16.mxu1 %v2936_v15  ;;  %v9249_v16 = vld [vmem:[#allocation2] sm:$0xff] }
 0x428   : > { %2753 = vst.msk [vmem:[#allocation3 + $0xa0] sm:$0xff] %vm680_vm12, %v2734_v44  ;;  %2914 = vst.msk [vmem:[#allocation3 + $0x68] sm:$0xff] %vm680_vm12, %v2734_v44  ;;  %3259 = vmatprep.mubr.bf16.mxu0 %v2944_v21  ;;  %7871 = vmatpush3.bf16.msra.mxu0 %v8099_v17 }
 0x429   : > { %7872 = vmatprep.subr.bf16.mxu0 %v8100_v39  ;;  %3684 = vst.msk [vmem:[#allocation3] sm:$0xff] %vm295_vm4, %v9249_v16 }
 0x42a   : > { %v2812_v46 = vpop.permute.xlu0 %2811  ;;  %v2948_v49 = vld [vmem:[#allocation3 + $0x78] sm:$0xff]  ;;  %v2954_v5 = vld [vmem:[#allocation3 + $0xa8] sm:$0xff] }
 0x42b   : > { %2829 = vst.msk [vmem:[#allocation3 + $0xf8] sm:$0xff] %vm680_vm12, %v2812_v46  ;;  %v2736_v52 = vpop.permute.xlu1 %2735  ;;  %v2941_v58 = vld [vmem:[#allocation3 + $0x40] sm:$0xff] }
 0x42c   : > { %2754 = vst.msk [vmem:[#allocation3 + $0xc8] sm:$0xff] %vm680_vm12, %v2736_v52  ;;  %2915 = vst.msk [vmem:[#allocation3 + $0x90] sm:$0xff] %vm680_vm12, %v2736_v52  ;;  %7873 = vmatpush3.bf16.msra.mxu0 %v8100_v39  ;;  %v9253_v39 = vld [vmem:[#allocation2 + $0x48] sm:$0xff] }
 0x42e   : > { %v2814_v13 = vpop.permute.xlu0 %2813  ;;  %v2959_v54 = vld [vmem:[#allocation3 + $0xd0] sm:$0xff] }
 0x42f   : > { %2830 = vst.msk [vmem:[#allocation3 + $0x120] sm:$0xff] %vm680_vm12, %v2814_v13  ;;  %v2738_v26 = vpop.permute.xlu1 %2737  ;;  %3260 = vmatmul.mubr.bf16.gmra.mrb[88].mxu0 %v2943_v53  ;;  %v2953_v14 = vld [vmem:[#allocation3 + $0xa0] sm:$0xff]  ;;  %v2946_v12 = vld [vmem:[#allocation3 + $0x68] sm:$0xff] }
 0x430   : > { %2755 = vst.msk [vmem:[#allocation3 + $0xf0] sm:$0xff] %vm680_vm12, %v2738_v26  ;;  %2916 = vst.msk [vmem:[#allocation3 + $0xb8] sm:$0xff] %vm680_vm12, %v2738_v26  ;;  %3266 = vmatprep.mubr.bf16.mxu0 %v2949_v47 }
 0x432   : > { %v2859_v57 = vpop.permute.xlu0 %2858  ;;  %v2964_v27 = vld [vmem:[#allocation3 + $0xf8] sm:$0xff] }
 0x433   : > { %2882 = vst.msk [vmem:[#allocation3 + $0x10] sm:$0xff] %vm680_vm12, %v2859_v57  ;;  %v2740_v0 = vpop.permute.xlu1 %2739  ;;  %v2958_v19 = vld [vmem:[#allocation3 + $0xc8] sm:$0xff]  ;;  %v2951_v34 = vld [vmem:[#allocation3 + $0x90] sm:$0xff]  ;;  %v3870_v57 = vshll.u32 %v9253_v39, 16 }
 0x434   : > { %2756 = vst.msk [vmem:[#allocation3 + $0x118] sm:$0xff] %vm680_vm12, %v2740_v0  ;;  %2917 = vst.msk [vmem:[#allocation3 + $0xe0] sm:$0xff] %vm680_vm12, %v2740_v0  ;;  %v8101_v0 = vld [vmem:[#allocation4 + $0x280] sm:$0xff]  }
 0x435   : > { %7398 = vmatprep.subr.bf16.mxu1 %v8101_v0 }
 0x436   : > { %v2863_v56 = vpop.permute.xlu0 %2862  ;;  %v2969_v18 = vld [vmem:[#allocation3 + $0x120] sm:$0xff] }
 0x437   : > { %2884 = vst.msk [vmem:[#allocation3 + $0x60] sm:$0xff] %vm680_vm12, %v2863_v56  ;;  %v2861_v22 = vpop.permute.xlu1 %2860  ;;  %3267 = vmatmul.mubr.bf16.gmra.mrb[92].mxu0 %v2948_v49  ;;  %v2963_v29 = vld [vmem:[#allocation3 + $0xf0] sm:$0xff]  ;;  %v2956_v48 = vld [vmem:[#allocation3 + $0xb8] sm:$0xff]  ;;  %v8102_v56 = vld [vmem:[#allocation4 + $0x240] sm:$0xff]   ;;  %v3933_v49 = vshrl.u32 %v9253_v39, 16 }
 0x438   : > { %2883 = vst.msk [vmem:[#allocation3 + $0x38] sm:$0xff] %vm680_vm12, %v2861_v22  ;;  %3273 = vmatprep.mubr.bf16.mxu0 %v2954_v5  ;;  %v8103_v22 = vld [vmem:[#allocation4 + $0x288] sm:$0xff]   ;;  %v9261_v5 = vrot.slane %v3870_v57, 1 }
 0x43a   : > { %v2867_v7 = vpop.permute.xlu0 %2866  ;;  %v2935_v2 = vld [vmem:[#allocation3 + $0x10] sm:$0xff] }
 0x43b   : > { %2886 = vst.msk [vmem:[#allocation3 + $0xb0] sm:$0xff] %vm680_vm12, %v2867_v7  ;;  %v2865_v41 = vpop.permute.xlu1 %2864  ;;  %3335 = vmatmul.mubr.bf16.vlgmr.msra.gmra.mrb[80].mxu1 %v2935_v2  ;;  %v2968_v30 = vld [vmem:[#allocation3 + $0x118] sm:$0xff]  ;;  %v2961_v10 = vld [vmem:[#allocation3 + $0xe0] sm:$0xff] }
 0x43c   : > { %2885 = vst.msk [vmem:[#allocation3 + $0x88] sm:$0xff] %vm680_vm12, %v2865_v41  ;;  %3341 = vmatprep.mubr.bf16.mxu1 %v2941_v58  ;;  %v3683_v2 = vld [vmem:[#allocation2 + $0x50] sm:$0xff]  ;;  %v3891_v58 = vrot.slane %v9253_v39, 1  ;;  %7399 = vmatpush3.bf16.msra.mxu1 %v8102_v56 }
 0x43d   : > { %7400 = vmatprep.subr.bf16.mxu1 %v8103_v22 }
 0x43e   : > { %v2907_v8 = vpop.permute.xlu0 %2906  ;;  %v2945_v11 = vld [vmem:[#allocation3 + $0x60] sm:$0xff] }
 0x43f   : > { %2918 = vst.msk [vmem:[#allocation3 + $0x108] sm:$0xff] %vm680_vm12, %v2907_v8  ;;  %v2869_v50 = vpop.permute.xlu1 %2868  ;;  %3274 = vmatmul.mubr.bf16.gmra.mrb[96].mxu0 %v2953_v14  ;;  %v2940_v9 = vld [vmem:[#allocation3 + $0x38] sm:$0xff]  ;;  %v8104_v8 = vld [vmem:[#allocation4 + $0x248] sm:$0xff]   ;;  %v3937_v14 = vshll.u32 %v3683_v2, 16 }
 0x440   : > { %2887 = vst.msk [vmem:[#allocation3 + $0xd8] sm:$0xff] %vm680_vm12, %v2869_v50  ;;  %3280 = vmatprep.mubr.bf16.mxu0 %v2959_v54  ;;  %v3935_v50 = vor.u32 %v3933_v49, %v9261_v5  ;;  %v3956_v54 = vrot.slane %v3683_v2, 1  ;;  %7401 = vmatpush3.bf16.msra.mxu1 %v8104_v8 }
 0x442   : > { %v2909_v63 = vpop.permute.xlu0 %2908  ;;  %v2955_v42 = vld [vmem:[#allocation3 + $0xb0] sm:$0xff] }
 0x443   : > { %v2871_v55 = vpop.permute.xlu1 %2870  ;;  %3342 = vmatmul.mubr.bf16.gmra.mrb[84].mxu1 %v2940_v9  ;;  %2919 = vst.msk [vmem:[#allocation3 + $0x130] sm:$0xff] %vm680_vm12, %v2909_v63  ;;  %v2950_v62 = vld [vmem:[#allocation3 + $0x88] sm:$0xff] }
 0x444   : > { %2888 = vst.msk [vmem:[#allocation3 + $0x100] sm:$0xff] %vm680_vm12, %v2871_v55  ;;  %3348 = vmatprep.mubr.bf16.mxu1 %v2946_v12  ;;  %v8105_v55 = vld [vmem:[#allocation4 + $0x290] sm:$0xff]  }
 0x445   : > { %7402 = vmatprep.subr.bf16.mxu1 %v8105_v55 }
 0x446   : > { %v2966_v38 = vld [vmem:[#allocation3 + $0x108] sm:$0xff] }
 0x447   : > { %v2873_v6 = vpop.permute.xlu1 %2872  ;;  %3281 = vmatmul.mubr.bf16.gmra.mrb[100].mxu0 %v2958_v19  ;;  %v2960_v36 = vld [vmem:[#allocation3 + $0xd8] sm:$0xff]  ;;  %v3957_v19 = vsel %vm698_vm11, %v3891_v58, %v3956_v54 }
 0x448   : > { %2889 = vst.msk [vmem:[#allocation3 + $0x128] sm:$0xff] %vm680_vm12, %v2873_v6  ;;  %3287 = vmatprep.mubr.bf16.mxu0 %v2964_v27  ;;  %v3939_v6 = vrot.slane %v3937_v14, 1  ;;  %v8106_v27 = vld [vmem:[#allocation4 + $0x250] sm:$0xff]  }
 0x449   : > { %3967 = vst.msk [vmem:[#allocation3 + $0x138] sm:$0xff] %vm295_vm4, %v3957_v19  ;;  %7403 = vmatpush3.bf16.msra.mxu1 %v8106_v27 }
 0x44a   : > { %v2971_v20 = vld [vmem:[#allocation3 + $0x130] sm:$0xff] }
 0x44b   : > { %3349 = vmatmul.mubr.bf16.gmra.mrb[88].mxu1 %v2945_v11  ;;  %v2965_v1 = vld [vmem:[#allocation3 + $0x100] sm:$0xff]  ;;  %3932 = vst.msk [vmem:[#allocation3 + $0x130] sm:$0xff] %vm295_vm4, %v9253_v39  ;;  %v9270_v11 = vsel %vm587_vm10, %v3935_v50, %v3939_v6 }
 0x44c   : > { %3355 = vmatprep.mubr.bf16.mxu1 %v2951_v34  ;;  %v8107_v34 = vld [vmem:[#allocation4 + $0x298] sm:$0xff]  }
 0x44d   : > { %7404 = vmatprep.subr.bf16.mxu1 %v8107_v34 }
 0x44f   : > { %3288 = vmatmul.mubr.bf16.gmra.mrb[104].mxu0 %v2963_v29  ;;  %v2970_v17 = vld [vmem:[#allocation3 + $0x128] sm:$0xff] }
 0x450   : > { %3294 = vmatprep.mubr.bf16.mxu0 %v2969_v18 }
 0x453   : > { %3356 = vmatmul.mubr.bf16.gmra.mrb[92].mxu1 %v2950_v62  ;;  %v8108_v62 = vld [vmem:[#allocation4 + $0x258] sm:$0xff]  }
 0x454   : > { %3362 = vmatprep.mubr.bf16.mxu1 %v2956_v48  ;;  %7405 = vmatpush3.bf16.msra.mxu1 %v8108_v62 }
 0x457   : > { %3295 = vmatmul.mubr.bf16.gmra.mrb[108].mxu0 %v2968_v30 }
 0x458   : > { %7874 = vmatprep.mubr.msk.bf16.mxu0 %vm295_vm4, %v2937_v59  ;;  %v8109_v59 = vld [vmem:[#allocation4 + $0x2a0] sm:$0xff]  }
 0x459   : > { %7406 = vmatprep.subr.bf16.mxu1 %v8109_v59 }
 0x45b   : > { %3363 = vmatmul.mubr.bf16.gmra.mrb[96].mxu1 %v2955_v42 }
 0x45c   : > { %3369 = vmatprep.mubr.bf16.mxu1 %v2961_v10 }
 0x45f   : > { %7875 = vmatmul.mubr.msk.bf16.vlgmr.msra.gmra.mrb[112].mxu0 %vm295_vm4, %v2942_v28 }
 0x460   : > { %7878 = vmatprep.mubr.msk.bf16.mxu0 %vm295_vm4, %v2947_v32 }
 0x463   : > { %3370 = vmatmul.mubr.bf16.gmra.mrb[100].mxu1 %v2960_v36 }
 0x464   : > { %3376 = vmatprep.mubr.bf16.mxu1 %v2966_v38  ;;  %v8110_v38 = vld [vmem:[#allocation4 + $0x260] sm:$0xff]  }
 0x465   : > { %7407 = vmatpush3.bf16.msra.mxu1 %v8110_v38 }
 0x467   : > { %7879 = vmatmul.mubr.msk.bf16.gmra.mrb[116].mxu0 %vm295_vm4, %v2952_v4 }
 0x468   : > { %7882 = vmatprep.mubr.msk.bf16.mxu0 %vm295_vm4, %v2957_v60  ;;  %v8111_v60 = vld [vmem:[#allocation4 + $0x2a8] sm:$0xff]  }
 0x469   : > { %7408 = vmatprep.subr.bf16.mxu1 %v8111_v60 }
 0x46b   : > { %3377 = vmatmul.mubr.bf16.gmra.mrb[104].mxu1 %v2965_v1 }
 0x46c   : > { %3383 = vmatprep.mubr.bf16.mxu1 %v2971_v20 }
 0x46f   : > { %7883 = vmatmul.mubr.msk.bf16.gmra.mrb[120].mxu0 %vm295_vm4, %v2962_v61 }
 0x470   : > { %7886 = vmatprep.mubr.msk.bf16.mxu0 %vm295_vm4, %v2967_v24  ;;  %v8112_v24 = vld [vmem:[#allocation4 + $0x268] sm:$0xff]  }
 0x471   : > { %7409 = vmatpush3.bf16.msra.mxu1 %v8112_v24  ;;  %v9280_v24 = vld [vmem:[%s10125_s4 + $0x1] ss:$0 sm:$0xff] }
 0x473   : > { %3384 = vmatmul.mubr.bf16.gmra.mrb[108].mxu1 %v2970_v17 }
 0x477   : > { %7887 = vmatmul.mubr.msk.bf16.gmra.mrb[124].mxu0 %vm295_vm4, %v2972_v43 }
 0x4f2   : > { %v7274_v44 = vpop.f32.mrb[80].mxu0 }
 0x4f3   : > { %v7275_v51 = vpop.f32.mrb[81].mxu0 }
 0x4f4   : > { %v7276_v15 = vadd.f32 %v7275_v51, %v7274_v44  ;;  %v7277_v21 = vpop.f32.mrb[82].mxu0  ;;  %v8113_v44 = vld [vmem:[#allocation4 + $0x2b0] sm:$0xff]  }
 0x4f5   : > { %v7278_v46 = vpop.f32.mrb[83].mxu0  ;;  %7410 = vmatprep.subr.bf16.mxu1 %v8113_v44 }
 0x4fa   : > { %v7280_v52 = vpop.f32.mrb[84].mxu0 }
 0x4fb   : > { %v7281_v13 = vpop.f32.mrb[85].mxu0 }
 0x4fc   : > { %v9257_v26 = vadd.f32 %v7281_v13, %v7280_v52  ;;  %v7283_v53 = vpop.f32.mrb[86].mxu0 }
 0x4fd   : > { %v7284_v47 = vpop.f32.mrb[87].mxu0  ;;  %v8114_v53 = vld [vmem:[#allocation4 + $0x270] sm:$0xff]  }
 0x4fe   : > { %7411 = vmatpush3.bf16.msra.mxu1 %v8114_v53 }
 0x502   : > { %v7286_v7 = vpop.f32.mrb[88].mxu0 }
 0x503   : > { %v7287_v41 = vpop.f32.mrb[89].mxu0 }
 0x504   : > { %v7288_v9 = vadd.f32 %v7287_v41, %v7286_v7  ;;  %v7289_v63 = vpop.f32.mrb[90].mxu0 }
 0x505   : > { %v7290_v12 = vpop.f32.mrb[91].mxu0 }
 0x50a   : > { %v7292_v29 = vpop.f32.mrb[92].mxu0 }
 0x50b   : > { %v7293_v18 = vpop.f32.mrb[93].mxu0 }
 0x50c   : > { %v7294_v48 = vadd.f32 %v7293_v18, %v7292_v29  ;;  %v7295_v30 = vpop.f32.mrb[94].mxu0 }
 0x50d   : > { %v7296_v42 = vpop.f32.mrb[95].mxu0 }
 0x50e   : > { %v7338_v10 = vpop.f32.mrb[80].mxu1 }
 0x50f   : > { %v7339_v28 = vpop.f32.mrb[81].mxu1 }
 0x510   : > { %v7340_v32 = vadd.f32 %v7339_v28, %v7338_v10  ;;  %v7341_v36 = vpop.f32.mrb[82].mxu1 }
 0x511   : > { %v7342_v4 = vpop.f32.mrb[83].mxu1 }
 0x512   : > { %v3337_v20 = vadd.f32 %v7340_v32, %v7276_v15  ;;  %v7298_v1 = vpop.f32.mrb[96].mxu0 }
 0x513   : > { %v7299_v61 = vpop.f32.mrb[97].mxu0 }
 0x514   : > { %v7300_v17 = vadd.f32 %v7299_v61, %v7298_v1  ;;  %v7301_v43 = vpop.f32.mrb[98].mxu0 }
 0x515   : > { %v7302_v51 = vpop.f32.mrb[99].mxu0 }
 0x516   : > { %v7344_v21 = vpop.f32.mrb[84].mxu1 }
 0x517   : > { %v7345_v46 = vpop.f32.mrb[85].mxu1 }
 0x518   : > { %v7346_v52 = vadd.f32 %v7345_v46, %v7344_v21  ;;  %v7347_v13 = vpop.f32.mrb[86].mxu1 }
 0x519   : > { %v7348_v47 = vpop.f32.mrb[87].mxu1 }
 0x51a   : > { %v3344_v57 = vadd.f32 %v7346_v52, %v9257_v26  ;;  %v7304_v15 = vpop.f32.mrb[100].mxu0 }
 0x51b   : > { %v7305_v0 = vpop.f32.mrb[101].mxu0 }
 0x51c   : > { %v7306_v56 = vadd.f32 %v7305_v0, %v7304_v15  ;;  %v7307_v22 = vpop.f32.mrb[102].mxu0 }
 0x51d   : > { %v7308_v49 = vpop.f32.mrb[103].mxu0 }
 0x51e   : > { %v7350_v7 = vpop.f32.mrb[88].mxu1 }
 0x51f   : > { %v7351_v2 = vpop.f32.mrb[89].mxu1 }
 0x520   : > { %v7352_v41 = vadd.f32 %v7351_v2, %v7350_v7  ;;  %v7353_v8 = vpop.f32.mrb[90].mxu1 }
 0x521   : > { %v7354_v50 = vpop.f32.mrb[91].mxu1 }
 0x522   : > { %v3351_v14 = vadd.f32 %v7352_v41, %v7288_v9  ;;  %v7310_v54 = vpop.f32.mrb[104].mxu0 }
 0x523   : > { %v7311_v63 = vpop.f32.mrb[105].mxu0 }
 0x524   : > { %v9273_v55 = vadd.f32 %v7311_v63, %v7310_v54  ;;  %v7313_v12 = vpop.f32.mrb[106].mxu0 }
 0x525   : > { %v7314_v6 = vpop.f32.mrb[107].mxu0 }
 0x526   : > { %v7356_v19 = vpop.f32.mrb[92].mxu1 }
 0x527   : > { %v7357_v26 = vpop.f32.mrb[93].mxu1 }
 0x528   : > { %v7358_v27 = vadd.f32 %v7357_v26, %v7356_v19  ;;  %v7359_v34 = vpop.f32.mrb[94].mxu1 }
 0x529   : > { %v7360_v29 = vpop.f32.mrb[95].mxu1 }
 0x52a   : > { %v3358_v18 = vadd.f32 %v7358_v27, %v7294_v48  ;;  %v7316_v62 = vpop.f32.mrb[108].mxu0 }
 0x52b   : > { %v7317_v30 = vpop.f32.mrb[109].mxu0 }
 0x52c   : > { %v9275_v59 = vadd.f32 %v7317_v30, %v7316_v62  ;;  %v7319_v42 = vpop.f32.mrb[110].mxu0  ;;  %v3579_v62 = vld [vmem:[#allocation2 + $0x10] sm:$0x1f] }
 0x52d   : > { %v7320_v10 = vpop.f32.mrb[111].mxu0 }
 0x52e   : > { %v7362_v28 = vpop.f32.mrb[96].mxu1  ;;  %v3576_v10 = vld [vmem:[#allocation2 + $0x8] sm:$0x1f] }
 0x52f   : > { %v7363_v9 = vpop.f32.mrb[97].mxu1 }
 0x530   : > { %v7364_v32 = vadd.f32 %v7363_v9, %v7362_v28  ;;  %v7365_v36 = vpop.f32.mrb[98].mxu1 }
 0x531   : > { %v7366_v38 = vpop.f32.mrb[99].mxu1 }
 0x532   : > { %v3365_v4 = vadd.f32 %v7364_v32, %v7300_v17  ;;  %v7876_v60 = vpop.f32.mrb[112].mxu0  ;;  %v3695_v38 = vshll.u32 %v9249_v16, 16 }
 0x533   : > { %v3433_v1 = vadd.f32 %v7876_v60, %v3344_v57  ;;  %v3425_v61 = vpop.f32.mrb[113].mxu0  ;;  %v8115_v60 = vld [vmem:[#allocation4 + $0x2b8] sm:$0xff]  }
 0x534   : > { %v3426_v48 = vadd.f32 %v3425_v61, %v3337_v20  ;;  %v7877_v43 = vpop.f32.mrb[114].mxu0  ;;  %7412 = vmatprep.subr.bf16.mxu1 %v8115_v60 }
 0x535   : > { %v3481_v44 = vadd.f32 %v3433_v1, %v8781_v31  ;;  %v3428_v21 = vpop.f32.mrb[115].mxu0  ;;  %v8116_v43 = vld [vmem:[#allocation4 + $0x278] sm:$0xff]  }
 0x536   : > { %v7368_v51 = vpop.f32.mrb[100].mxu1  ;;  %v3480_v46 = vadd.f32 %v3426_v48, %v8783_v33  ;;  %7413 = vmatpush3.bf16.msra.mxu1 %v8116_v43 }
 0x537   : > { %v7369_v52 = vpop.f32.mrb[101].mxu1  ;;  %v9285_v13 = vadd.f32 %v9280_v24, %v3481_v44 }
 0x538   : > { %v7370_v17 = vadd.f32 %v7369_v52, %v7368_v51  ;;  %v7371_v53 = vpop.f32.mrb[102].mxu1  ;;  %v9288_v47 = vadd.f32 %v9280_v24, %v3480_v46 }
 0x539   : > { %v7372_v57 = vpop.f32.mrb[103].mxu1  ;;  %v3505_v20 = vpack.c.bf16 %v9285_v13, %v9285_v13 }
 0x53a   : > { %v3372_v15 = vadd.f32 %v7370_v17, %v7306_v56  ;;  %v3504_v31 = vpack.c.bf16 %v9288_v47, %v9288_v47  ;;  %v7880_v0 = vpop.f32.mrb[116].mxu0  ;;  %v3693_v57 = vshrl.u32 %v9249_v16, 16 }
 0x53b   : > { %v3520_v22 = vshrl.u32 %v3505_v20, 16  ;;  %v3447_v33 = vadd.f32 %v7880_v0, %v3358_v18  ;;  %v3439_v49 = vpop.f32.mrb[117].mxu0  ;;  %v3523_v50 = vshll.u32 %v3505_v20, 16 }
 0x53c   : > { %v3513_v7 = vshrl.u32 %v3504_v31, 16  ;;  %v3440_v2 = vadd.f32 %v3439_v49, %v3351_v14  ;;  %v7881_v41 = vpop.f32.mrb[118].mxu0  ;;  %v3516_v19 = vshll.u32 %v3504_v31, 16 }
 0x53d   : > { %v3522_v8 = vrot.slane %v3520_v22, 7  ;;  %v3483_v54 = vadd.f32 %v3447_v33, %v8791_v45  ;;  %v3442_v12 = vpop.f32.mrb[119].mxu0  ;;  %v3697_v22 = vrot.slane %v3695_v38, 1  ;;  %v8117_v33 = vld [vmem:[#allocation4 + $0x300] sm:$0xff]  }
 0x53e   : > { %v7374_v63 = vpop.f32.mrb[104].mxu1  ;;  %v3515_v6 = vrot.slane %v3513_v7, 7  ;;  %v3482_v56 = vadd.f32 %v3440_v2, %v8793_v3  ;;  %v8118_v41 = vld [vmem:[#allocation4 + $0x2c0] sm:$0xff]   ;;  %7462 = vmatprep.subr.bf16.mxu0 %v8117_v33 }
 0x53f   : > { %v7375_v26 = vpop.f32.mrb[105].mxu1  ;;  %v3525_v27 = vor.u32 %v3523_v50, %v3522_v8  ;;  %v9297_v34 = vadd.f32 %v9280_v24, %v3483_v54  ;;  %7463 = vmatpush3.bf16.msra.mxu0 %v8118_v41 }
 0x540   : > { %v7376_v29 = vadd.f32 %v7375_v26, %v7374_v63  ;;  %v7377_v18 = vpop.f32.mrb[106].mxu1  ;;  %v3518_v14 = vor.u32 %v3516_v19, %v3515_v6  ;;  %v9300_v30 = vadd.f32 %v9280_v24, %v3482_v56  ;;  %v3582_v63 = vld [vmem:[#allocation2 + $0x18] sm:$0x1f]  ;;  %v3801_v56 = vrot.slane %v9249_v16, 1  ;;  %v8119_v16 = vld [vmem:[#allocation4 + $0x308] sm:$0xff]  }
 0x541   : > { %v7378_v42 = vpop.f32.mrb[107].mxu1  ;;  %v3580_v45 = vsel %vm8385_vm9, %v3525_v27, %v3579_v62  ;;  %v3507_v3 = vpack.c.bf16 %v9297_v34, %v9297_v34  ;;  %7464 = vmatprep.subr.bf16.mxu0 %v8119_v16 }
 0x542   : > { %v9307_v28 = vadd.f32 %v7376_v29, %v9273_v55  ;;  %3581 = vst [vmem:[#allocation2 + $0x10] sm:$0x1f] %v3580_v45  ;;  %v3577_v9 = vsel %vm8385_vm9, %v3518_v14, %v3576_v10  ;;  %v3506_v32 = vpack.c.bf16 %v9300_v30, %v9300_v30  ;;  %v7884_v36 = vpop.f32.mrb[120].mxu0  ;;  %v9340_v14 = vld [vmem:[#allocation4 + $0x340] sm:$0xff]  }
 0x543   : > { %3578 = vst [vmem:[#allocation2 + $0x8] sm:$0x1f] %v3577_v9  ;;  %v3534_v1 = vshrl.u32 %v3507_v3, 16  ;;  %v3461_v61 = vadd.f32 %v7884_v36, %v3372_v15  ;;  %v3453_v48 = vpop.f32.mrb[121].mxu0  ;;  %v3537_v46 = vshll.u32 %v3507_v3, 16  ;;  %7890 = vmatprep.subr.bf16.mxu1 %v9340_v14 }
 0x544   : > { %v3527_v44 = vshrl.u32 %v3506_v32, 16  ;;  %v3454_v51 = vadd.f32 %v3453_v48, %v3365_v4  ;;  %v7885_v55 = vpop.f32.mrb[122].mxu0  ;;  %v3530_v31 = vshll.u32 %v3506_v32, 16  ;;  %v8121_v32 = vld [vmem:[#allocation4 + $0x2c8] sm:$0xff]  }
 0x545   : > { %v3536_v21 = vrot.slane %v3534_v1, 7  ;;  %v3485_v52 = vadd.f32 %v3461_v61, %v8810_v40  ;;  %v3456_v53 = vpop.f32.mrb[123].mxu0  ;;  %v3585_v40 = vld [vmem:[#allocation2 + $0x20] sm:$0x1f]  ;;  %7465 = vmatpush3.bf16.msra.mxu0 %v8121_v32  ;;  %v8126_v32 = vld [vmem:[#allocation4 + $0x320] sm:$0xff]  }
 0x546   : > { %v7380_v17 = vpop.f32.mrb[108].mxu1  ;;  %v3529_v20 = vrot.slane %v3527_v44, 7  ;;  %v3484_v0 = vadd.f32 %v3454_v51, %v8812_v23  ;;  %v8122_v53 = vld [vmem:[#allocation4 + $0x310] sm:$0xff]  }
 0x547   : > { %v7381_v15 = vpop.f32.mrb[109].mxu1  ;;  %v3539_v49 = vor.u32 %v3537_v46, %v3536_v21  ;;  %v9318_v4 = vadd.f32 %v9280_v24, %v3485_v52  ;;  %7466 = vmatprep.subr.bf16.mxu0 %v8122_v53 }
 0x548   : > { %v7382_v7 = vadd.f32 %v7381_v15, %v7380_v17  ;;  %v7383_v2 = vpop.f32.mrb[110].mxu1  ;;  %v3532_v8 = vor.u32 %v3530_v31, %v3529_v20  ;;  %v9321_v50 = vadd.f32 %v9280_v24, %v3484_v0  ;;  %v8123_v31 = vld [vmem:[#allocation4 + $0x2d0] sm:$0xff]   ;;  %v3591_v0 = vld [vmem:[#allocation2 + $0x30] sm:$0x1f] }
 0x549   : > { %v7384_v54 = vpop.f32.mrb[111].mxu1  ;;  %v3586_v23 = vsel %vm8385_vm9, %v3539_v49, %v3585_v40  ;;  %v3509_v12 = vpack.c.bf16 %v9318_v4, %v9318_v4  ;;  %v9328_v19 = vld [vmem:[#allocation2 + $0x10] sm:$0xff]  ;;  %v3588_v49 = vld [vmem:[#allocation2 + $0x28] sm:$0x1f]  ;;  %7467 = vmatpush3.bf16.msra.mxu0 %v8123_v31 }
 0x54a   : > { %v3386_v6 = vadd.f32 %v7382_v7, %v9275_v59  ;;  %3587 = vst [vmem:[#allocation2 + $0x20] sm:$0x1f] %v3586_v23  ;;  %v3583_v26 = vsel %vm8385_vm9, %v3532_v8, %v3582_v63  ;;  %v3508_v27 = vpack.c.bf16 %v9321_v50, %v9321_v50  ;;  %v7888_v29 = vpop.f32.mrb[124].mxu0  ;;  %v3674_v18 = vld [vmem:[#allocation2 + $0x8] sm:$0xff]  ;;  %3686 = vst.msk [vmem:[#allocation3 + $0x50] sm:$0xff] %vm295_vm4, %v9328_v19  ;;  %v3708_v62 = vshll.u32 %v9328_v19, 16 }
 0x54b   : > { %3925 = vst.msk [vmem:[#allocation3 + $0x18] sm:$0xff] %vm295_vm4, %v9328_v19  ;;  %v3698_v59 = vor.u32 %v3697_v22, %v3693_v57  ;;  %3584 = vst [vmem:[#allocation2 + $0x18] sm:$0x1f] %v3583_v26  ;;  %v3548_v42 = vshrl.u32 %v3509_v12, 16  ;;  %v3551_v45 = vshll.u32 %v3509_v12, 16  ;;  %v3467_v3 = vpop.f32.mrb[125].mxu0  ;;  %3834 = vrot.lane.b32.xlu0 %v3674_v18, %s8253_s12 }
 0x54c   : > { %v3475_v10 = vadd.f32 %v7888_v29, %v3386_v6  ;;  %3685 = vst.msk [vmem:[#allocation3 + $0x28] sm:$0xff] %vm295_vm4, %v3674_v18  ;;  %v3700_v9 = vshll.u32 %v3674_v18, 16  ;;  %v3541_v36 = vshrl.u32 %v3508_v27, 16  ;;  %v3544_v38 = vshll.u32 %v3508_v27, 16  ;;  %v7889_v61 = vpop.f32.mrb[126].mxu0  ;;  %v8124_v12 = vld [vmem:[#allocation4 + $0x318] sm:$0xff]  }
 0x54d   : > { %v3468_v60 = vadd.f32 %v3467_v3, %v9307_v28  ;;  %v3704_v1 = vshrl.u32 %v3674_v18, 16  ;;  %v3550_v48 = vrot.slane %v3548_v42, 7  ;;  %v3710_v51 = vrot.slane %v3708_v62, 1  ;;  %v3470_v55 = vpop.f32.mrb[127].mxu0  ;;  %v8125_v26 = vld [vmem:[#allocation4 + $0x2d8] sm:$0xff]   ;;  %7468 = vmatprep.subr.bf16.mxu0 %v8124_v12  ;;  %v8127_v61 = vld [vmem:[#allocation4 + $0x2e0] sm:$0xff]  }
 0x54e   : > { %v3487_v43 = vadd.f32 %v3475_v10, %v8849_v37  ;;  %v3702_v44 = vrot.slane %v3700_v9, 1  ;;  %v3543_v21 = vrot.slane %v3541_v36, 7  ;;  %v3802_v52 = vrot.slane %v3674_v18, 1  ;;  %7469 = vmatpush3.bf16.msra.mxu0 %v8125_v26 }
 0x54f   : > { %v3486_v46 = vadd.f32 %v3468_v60, %v8851_v35  ;;  %v3804_v17 = vrot.slane %v9328_v19, 1  ;;  %v3553_v28 = vor.u32 %v3551_v45, %v3550_v48  ;;  %3836 = vrot.lane.b32.xlu0 %v9328_v19, %s8253_s12  ;;  %v3712_v23 = vshrl.u32 %v9328_v19, 16  ;;  %v3597_v48 = vld [vmem:[#allocation2 + $0x40] sm:$0x1f]  ;;  %7470 = vmatprep.subr.bf16.mxu0 %v8126_v32 }
 0x550   : > { %v9350_v57 = vadd.f32 %v9280_v24, %v3487_v43  ;;  %v3703_v37 = vsel %vm587_vm10, %v3698_v59, %v3702_v44  ;;  %v3706_v20 = vor.u32 %v3704_v1, %v3702_v44  ;;  %v3546_v15 = vor.u32 %v3544_v38, %v3543_v21 }
 0x551   : > { %v9356_v22 = vadd.f32 %v9280_v24, %v3486_v46  ;;  %3760 = vrot.lane.b32.xlu1 %v3703_v37, %s8253_s12  ;;  %v3803_v35 = vsel %vm698_vm11, %v3801_v56, %v3802_v52  ;;  %v3592_v33 = vsel %vm8385_vm9, %v3553_v28, %v3591_v0  ;;  %v9365_v41 = vld [vmem:[#allocation2 + $0x20] sm:$0xff]  ;;  %v9368_v40 = vsel %vm698_vm11, %v3802_v52, %v3804_v17 }
 0x552   : > { %v3511_v7 = vpack.c.bf16 %v9350_v57, %v9350_v57  ;;  %v3711_v2 = vsel %vm587_vm10, %v3706_v20, %v3710_v51  ;;  %3826 = vst.msk [vmem:[#allocation3 + $0x8] sm:$0xff] %vm295_vm4, %v3803_v35  ;;  %3593 = vst [vmem:[#allocation2 + $0x30] sm:$0x1f] %v3592_v33  ;;  %v3589_v24 = vsel %vm8385_vm9, %v3546_v15, %v3588_v49  ;;  %v3676_v54 = vld [vmem:[#allocation2 + $0x18] sm:$0xff]  ;;  %v3724_v63 = vshll.u32 %v9365_v41, 16  ;;  %v8128_v28 = vld [vmem:[#allocation4 + $0x328] sm:$0xff]  }
 0x553   : > { %v3510_v8 = vpack.c.bf16 %v9356_v22, %v9356_v22  ;;  %3882 = vst.msk [vmem:[#allocation3 + $0x10] sm:$0xff] %vm295_vm4, %v3711_v2  ;;  %3688 = vst.msk [vmem:[#allocation3 + $0xa0] sm:$0xff] %vm295_vm4, %v9365_v41  ;;  %3838 = vrot.lane.b32.xlu0 %v3676_v54, %s8253_s12  ;;  %v3716_v56 = vshll.u32 %v3676_v54, 16  ;;  %v3714_v19 = vor.u32 %v3712_v23, %v3710_v51  ;;  %v3806_v18 = vrot.slane %v3676_v54, 1  ;;  %v3594_v51 = vld [vmem:[#allocation2 + $0x38] sm:$0x1f] }
 0x554   : > { %3927 = vst.msk [vmem:[#allocation3 + $0x68] sm:$0xff] %vm295_vm4, %v9365_v41  ;;  %3827 = vst.msk [vmem:[#allocation3 + $0x30] sm:$0xff] %vm295_vm4, %v9368_v40  ;;  %v3562_v6 = vshrl.u32 %v3511_v7, 16  ;;  %v3565_v27 = vshll.u32 %v3511_v7, 16  ;;  %v3720_v16 = vshrl.u32 %v3676_v54, 16  ;;  %v3808_v42 = vrot.slane %v9365_v41, 1  ;;  %7471 = vmatpush3.bf16.msra.mxu0 %v8127_v61 }
 0x555   : > { %3590 = vst [vmem:[#allocation2 + $0x28] sm:$0x1f] %v3589_v24  ;;  %3687 = vst.msk [vmem:[#allocation3 + $0x78] sm:$0xff] %vm295_vm4, %v3676_v54  ;;  %v3555_v29 = vshrl.u32 %v3510_v8, 16  ;;  %3762 = vrot.lane.b32.xlu1 %v3711_v2, %s8253_s12  ;;  %v3718_v62 = vrot.slane %v3716_v56, 1  ;;  %v3558_v10 = vshll.u32 %v3510_v8, 16  ;;  %v9390_v9 = vsel %vm698_vm11, %v3804_v17, %v3806_v18  ;;  %7472 = vmatprep.subr.bf16.mxu0 %v8128_v28 }
 0x556   : > { %3926 = vst.msk [vmem:[#allocation3 + $0x40] sm:$0xff] %vm295_vm4, %v3676_v54  ;;  %v3564_v59 = vrot.slane %v3562_v6, 7  ;;  %v3726_v3 = vrot.slane %v3724_v63, 1  ;;  %v9396_v1 = vsel %vm698_vm11, %v3806_v18, %v3808_v42  ;;  %3960 = vst.msk [vmem:[#allocation3 + $0x20] sm:$0xff] %vm295_vm4, %v9390_v9  ;;  %v3728_v17 = vshrl.u32 %v9365_v41, 16  ;;  %v8130_v0 = vld [vmem:[#allocation4 + $0x2e8] sm:$0xff]  }
 0x557   : > { %v3557_v45 = vrot.slane %v3555_v29, 7  ;;  %3840 = vrot.lane.b32.xlu0 %v9365_v41, %s8253_s12  ;;  %v3719_v38 = vsel %vm587_vm10, %v3714_v19, %v3718_v62  ;;  %v3722_v60 = vor.u32 %v3720_v16, %v3718_v62  ;;  %3828 = vst.msk [vmem:[#allocation3 + $0x58] sm:$0xff] %vm295_vm4, %v9390_v9  ;;  %3961 = vst.msk [vmem:[#allocation3 + $0x48] sm:$0xff] %vm295_vm4, %v9396_v1  ;;  %v8131_v2 = vld [vmem:[#allocation4 + $0x330] sm:$0xff]   ;;  %v8134_v18 = vld [vmem:[#allocation4 + $0x2f8] sm:$0xff]  }
 0x558   : > { %v3567_v36 = vor.u32 %v3565_v27, %v3564_v59  ;;  %3883 = vst.msk [vmem:[#allocation3 + $0x38] sm:$0xff] %vm295_vm4, %v3719_v38  ;;  %3829 = vst.msk [vmem:[#allocation3 + $0x80] sm:$0xff] %vm295_vm4, %v9396_v1  ;;  %v3730_v15 = vor.u32 %v3728_v17, %v3726_v3  ;;  %7473 = vmatpush3.bf16.msra.mxu0 %v8130_v0  ;;  %v8132_v54 = vld [vmem:[#allocation4 + $0x2f0] sm:$0xff]   ;;  %v8133_v27 = vld [vmem:[#allocation4 + $0x338] sm:$0xff]  }
 0x559   : > { %v3560_v43 = vor.u32 %v3558_v10, %v3557_v45  ;;  %3764 = vrot.lane.b32.xlu1 %v3719_v38, %s8253_s12  ;;  %v3727_v55 = vsel %vm587_vm10, %v3722_v60, %v3726_v3  ;;  %v9411_v21 = vld [vmem:[#allocation2 + $0x30] sm:$0xff]  ;;  %7474 = vmatprep.subr.bf16.mxu0 %v8131_v2 }
 0x55a   : > { %v3598_v44 = vsel %vm8385_vm9, %v3567_v36, %v3597_v48  ;;  %3884 = vst.msk [vmem:[#allocation3 + $0x60] sm:$0xff] %vm295_vm4, %v3727_v55  ;;  %3690 = vst.msk [vmem:[#allocation3 + $0xf0] sm:$0xff] %vm295_vm4, %v9411_v21  ;;  %v3812_v53 = vrot.slane %v9411_v21, 1  ;;  %v3740_v20 = vshll.u32 %v9411_v21, 16  ;;  %v3744_v6 = vshrl.u32 %v9411_v21, 16 }
 0x55b   : > { %3599 = vst [vmem:[#allocation2 + $0x40] sm:$0x1f] %v3598_v44  ;;  %v3595_v46 = vsel %vm8385_vm9, %v3560_v43, %v3594_v51  ;;  %3929 = vst.msk [vmem:[#allocation3 + $0xb8] sm:$0xff] %vm295_vm4, %v9411_v21  ;;  %v8129_v43 = vld [vmem:[#allocation4 + $0x348] sm:$0xff]  }
 0x55c   : > { %v3678_v52 = vld [vmem:[#allocation2 + $0x28] sm:$0xff]  ;;  %3596 = vst [vmem:[#allocation2 + $0x38] sm:$0x1f] %v3595_v46  ;;  %v3742_v8 = vrot.slane %v3740_v20, 1  ;;  %7475 = vmatpush3.bf16.msra.mxu0 %v8132_v54 }
 0x55d   : > { %3842 = vrot.lane.b32.xlu0 %v3678_v52, %s8253_s12  ;;  %3689 = vst.msk [vmem:[#allocation3 + $0xc8] sm:$0xff] %vm295_vm4, %v3678_v52  ;;  %3928 = vst.msk [vmem:[#allocation3 + $0x90] sm:$0xff] %vm295_vm4, %v3678_v52  ;;  %v3732_v37 = vshll.u32 %v3678_v52, 16  ;;  %v3810_v31 = vrot.slane %v3678_v52, 1  ;;  %3766 = vrot.lane.b32.xlu1 %v3727_v55, %s8253_s12  ;;  %v3736_v33 = vshrl.u32 %v3678_v52, 16  ;;  %v8135_v46 = vld [vmem:[#allocation4 + $0x350] sm:$0xff]  }
 0x55e   : > { %v3746_v59 = vor.u32 %v3744_v6, %v3742_v8  ;;  %7476 = vmatprep.subr.bf16.mxu0 %v8133_v27 }
 0x55f   : > { %v3734_v35 = vrot.slane %v3732_v37, 1  ;;  %v3813_v49 = vsel %vm698_vm11, %v3810_v31, %v3812_v53  ;;  %v3811_v7 = vsel %vm698_vm11, %v3808_v42, %v3810_v31 }
 0x560   : > { %3963 = vst.msk [vmem:[#allocation3 + $0x98] sm:$0xff] %vm295_vm4, %v3813_v49  ;;  %3831 = vst.msk [vmem:[#allocation3 + $0xd0] sm:$0xff] %vm295_vm4, %v3813_v49  ;;  %7477 = vmatpush3.bf16.msra.mxu0 %v8134_v18 }
 0x561   : > { %3962 = vst.msk [vmem:[#allocation3 + $0x70] sm:$0xff] %vm295_vm4, %v3811_v7  ;;  %3830 = vst.msk [vmem:[#allocation3 + $0xa8] sm:$0xff] %vm295_vm4, %v3811_v7  ;;  %3844 = vrot.lane.b32.xlu0 %v9411_v21, %s8253_s12  ;;  %v3735_v41 = vsel %vm587_vm10, %v3730_v15, %v3734_v35  ;;  %v3738_v24 = vor.u32 %v3736_v33, %v3734_v35 }
 0x562   : > { %3768 = vrot.lane.b32.xlu1 %v3735_v41, %s8253_s12  ;;  %3885 = vst.msk [vmem:[#allocation3 + $0x88] sm:$0xff] %vm295_vm4, %v3735_v41  ;;  %v3681_v63 = vld [vmem:[#allocation2 + $0x40] sm:$0xff] }
 0x563   : > { %v3743_v23 = vsel %vm587_vm10, %v3738_v24, %v3742_v8  ;;  %v3680_v12 = vld [vmem:[#allocation2 + $0x38] sm:$0xff]  ;;  %3931 = vst.msk [vmem:[#allocation3 + $0x108] sm:$0xff] %vm295_vm4, %v3681_v63  ;;  %v3756_v56 = vshll.u32 %v3681_v63, 16  ;;  %v3816_v26 = vrot.slane %v3681_v63, 1  ;;  %v3866_v16 = vshrl.u32 %v3681_v63, 16 }
 0x564   : > { %3886 = vst.msk [vmem:[#allocation3 + $0xb0] sm:$0xff] %vm295_vm4, %v3743_v23  ;;  %3691 = vst.msk [vmem:[#allocation3 + $0x118] sm:$0xff] %vm295_vm4, %v3680_v12  ;;  %v3748_v29 = vshll.u32 %v3680_v12, 16  ;;  %v3814_v19 = vrot.slane %v3680_v12, 1  ;;  %v3752_v10 = vshrl.u32 %v3680_v12, 16 }
 0x565   : > { %3846 = vrot.lane.b32.xlu0 %v3680_v12, %s8253_s12  ;;  %3930 = vst.msk [vmem:[#allocation3 + $0xe0] sm:$0xff] %vm295_vm4, %v3680_v12  ;;  %v3758_v62 = vrot.slane %v3756_v56, 1  ;;  %v3892_v42 = vsel %vm698_vm11, %v3816_v26, %v3891_v58 }
 0x566   : > { %3770 = vrot.lane.b32.xlu1 %v3743_v23, %s8253_s12  ;;  %v3750_v45 = vrot.slane %v3748_v29, 1  ;;  %v3815_v3 = vsel %vm698_vm11, %v3812_v53, %v3814_v19  ;;  %v3817_v32 = vsel %vm698_vm11, %v3814_v19, %v3816_v26  ;;  %3966 = vst.msk [vmem:[#allocation3 + $0x110] sm:$0xff] %vm295_vm4, %v3892_v42  ;;  %v8136_v53 = vld [vmem:[#allocation4 + $0x358] sm:$0xff]  }
 0x567   : > { %v3868_v36 = vor.u32 %v3866_v16, %v3758_v62  ;;  %3964 = vst.msk [vmem:[#allocation3 + $0xc0] sm:$0xff] %vm295_vm4, %v3815_v3  ;;  %3832 = vst.msk [vmem:[#allocation3 + $0xf8] sm:$0xff] %vm295_vm4, %v3815_v3 }
 0x568   : > { %3965 = vst.msk [vmem:[#allocation3 + $0xe8] sm:$0xff] %vm295_vm4, %v3817_v32  ;;  %3833 = vst.msk [vmem:[#allocation3 + $0x120] sm:$0xff] %vm295_vm4, %v3817_v32  ;;  %v3751_v39 = vsel %vm587_vm10, %v3746_v59, %v3750_v45  ;;  %v3754_v58 = vor.u32 %v3752_v10, %v3750_v45 }
 0x569   : > { %3848 = vrot.lane.b32.xlu0 %v3681_v63, %s8253_s12  ;;  %3887 = vst.msk [vmem:[#allocation3 + $0xd8] sm:$0xff] %vm295_vm4, %v3751_v39  ;;  %v3873_v38 = vsel %vm587_vm10, %v3868_v36, %v9261_v5 }
 0x56a   : > { %3772 = vrot.lane.b32.xlu1 %v3751_v39, %s8253_s12  ;;  %v3759_v60 = vsel %vm587_vm10, %v3754_v58, %v3758_v62  ;;  %3889 = vst.msk [vmem:[#allocation3 + $0x128] sm:$0xff] %vm295_vm4, %v3873_v38 }
 0x56b   : > { %3888 = vst.msk [vmem:[#allocation3 + $0x100] sm:$0xff] %vm295_vm4, %v3759_v60 }
 0x56d   : > { %3893 = vrot.lane.b32.xlu0 %v9368_v40, %s8253_s12 }
 0x56e   : > { %3774 = vrot.lane.b32.xlu1 %v3759_v60, %s8253_s12  ;;  %v3972_v60 = vld [vmem:[#allocation3 + $0x20] sm:$0xff] }
 0x571   : > { %3897 = vrot.lane.b32.xlu0 %v9396_v1, %s8253_s12 }
 0x572   : > { %3895 = vrot.lane.b32.xlu1 %v9390_v9, %s8253_s12 }
 0x575   : > { %3901 = vrot.lane.b32.xlu0 %v3813_v49, %s8253_s12 }
 0x576   : > { %3899 = vrot.lane.b32.xlu1 %v3811_v7, %s8253_s12 }
 0x579   : > { %3941 = vrot.lane.b32.xlu0 %v3873_v38, %s8253_s12 }
 0x57a   : > { %3903 = vrot.lane.b32.xlu1 %v3815_v3, %s8253_s12 }
 0x57d   : > { %3943 = vrot.lane.b32.xlu0 %v9270_v11, %s8253_s12 }
 0x57e   : > { %3905 = vrot.lane.b32.xlu1 %v3817_v32, %s8253_s12 }
 0x582   : > { %3907 = vrot.lane.b32.xlu1 %v3892_v42, %s8253_s12 }
 0x5bd   : > { %v3835_v5 = vpop.permute.xlu0 %3834 }
 0x5be   : > { %3858 = vst.msk [vmem:[#allocation3 + $0x8] sm:$0xff] %vm680_vm12, %v3835_v5 }
 0x5c1   : > { %v3837_v40 = vpop.permute.xlu0 %3836 }
 0x5c2   : > { %3859 = vst.msk [vmem:[#allocation3 + $0x30] sm:$0xff] %vm680_vm12, %v3837_v40 }
 0x5c3   : > { %v3761_v9 = vpop.permute.xlu1 %3760 }
 0x5c4   : > { %3784 = vst.msk [vmem:[#allocation3] sm:$0xff] %vm680_vm12, %v3761_v9  ;;  %v3977_v9 = vld [vmem:[#allocation3 + $0x48] sm:$0xff] }
 0x5c5   : > { %v3839_v1 = vpop.permute.xlu0 %3838  ;;  %v3969_v61 = vld [vmem:[#allocation3 + $0x8] sm:$0xff] }
 0x5c6   : > { %3860 = vst.msk [vmem:[#allocation3 + $0x58] sm:$0xff] %vm680_vm12, %v3839_v1  ;;  %4280 = vmatprep.mubr.bf16.mxu1 %v3969_v61  ;;  %v3982_v1 = vld [vmem:[#allocation3 + $0x70] sm:$0xff] }
 0x5c7   : > { %v3763_v48 = vpop.permute.xlu1 %3762 }
 0x5c8   : > { %3785 = vst.msk [vmem:[#allocation3 + $0x28] sm:$0xff] %vm680_vm12, %v3763_v48 }
 0x5c9   : > { %v3841_v11 = vpop.permute.xlu0 %3840  ;;  %v3974_v55 = vld [vmem:[#allocation3 + $0x30] sm:$0xff] }
 0x5ca   : > { %3861 = vst.msk [vmem:[#allocation3 + $0x80] sm:$0xff] %vm680_vm12, %v3841_v11  ;;  %v3987_v11 = vld [vmem:[#allocation3 + $0x98] sm:$0xff] }
 0x5cb   : > { %v3765_v44 = vpop.permute.xlu1 %3764  ;;  %v3968_v51 = vld [vmem:[#allocation3] sm:$0xff] }
 0x5cc   : > { %3786 = vst.msk [vmem:[#allocation3 + $0x50] sm:$0xff] %vm680_vm12, %v3765_v44  ;;  %3947 = vst.msk [vmem:[#allocation3 + $0x18] sm:$0xff] %vm680_vm12, %v3765_v44  ;;  %4281 = vmatmul.mubr.bf16.vlgmr.msra.gmra.mrb[112].mxu1 %v3968_v51 }
 0x5cd   : > { %7891 = vmatpush3.bf16.msra.mxu1 %v9340_v14  ;;  %4287 = vmatprep.mubr.bf16.mxu1 %v3974_v55  ;;  %v3979_v20 = vld [vmem:[#allocation3 + $0x58] sm:$0xff]  ;;  %v3997_v55 = vld [vmem:[#allocation3 + $0xe8] sm:$0xff] }
 0x5ce   : > { %7892 = vmatprep.subr.bf16.mxu1 %v8129_v43 }
 0x5cf   : > { %v3843_v21 = vpop.permute.xlu0 %3842  ;;  %v3767_v52 = vpop.permute.xlu1 %3766  ;;  %v3973_v37 = vld [vmem:[#allocation3 + $0x28] sm:$0xff] }
 0x5d0   : > { %3862 = vst.msk [vmem:[#allocation3 + $0xa8] sm:$0xff] %vm680_vm12, %v3843_v21  ;;  %3787 = vst.msk [vmem:[#allocation3 + $0x78] sm:$0xff] %vm680_vm12, %v3767_v52  ;;  %v4002_v21 = vld [vmem:[#allocation3 + $0x110] sm:$0xff] }
 0x5d1   : > { %3948 = vst.msk [vmem:[#allocation3 + $0x40] sm:$0xff] %vm680_vm12, %v3767_v52  ;;  %7893 = vmatpush3.bf16.msra.mxu1 %v8129_v43  ;;  %v3984_v49 = vld [vmem:[#allocation3 + $0x80] sm:$0xff]  ;;  %v4007_v52 = vld [vmem:[#allocation3 + $0x138] sm:$0xff] }
 0x5d2   : > { %7894 = vmatprep.subr.bf16.mxu1 %v8135_v46  ;;  %v3992_v43 = vld [vmem:[#allocation3 + $0xc0] sm:$0xff] }
 0x5d3   : > { %v3845_v17 = vpop.permute.xlu0 %3844  ;;  %v3971_v14 = vld [vmem:[#allocation3 + $0x18] sm:$0xff]  ;;  %v3978_v33 = vld [vmem:[#allocation3 + $0x50] sm:$0xff] }
 0x5d4   : > { %3863 = vst.msk [vmem:[#allocation3 + $0xd0] sm:$0xff] %vm680_vm12, %v3845_v17  ;;  %v3769_v28 = vpop.permute.xlu1 %3768  ;;  %4288 = vmatmul.mubr.bf16.gmra.mrb[116].mxu1 %v3973_v37  ;;  %4369 = vmatprep.mubr.bf16.mxu0 %v3971_v14  ;;  %v9521_v17 = vld [vmem:[#allocation2] sm:$0xff] }
 0x5d5   : > { %3788 = vst.msk [vmem:[#allocation3 + $0xa0] sm:$0xff] %vm680_vm12, %v3769_v28  ;;  %3949 = vst.msk [vmem:[#allocation3 + $0x68] sm:$0xff] %vm680_vm12, %v3769_v28  ;;  %4294 = vmatprep.mubr.bf16.mxu1 %v3979_v20  ;;  %7895 = vmatpush3.bf16.msra.mxu1 %v8135_v46 }
 0x5d6   : > { %7896 = vmatprep.subr.bf16.mxu1 %v8136_v53  ;;  %4719 = vst.msk [vmem:[#allocation3] sm:$0xff] %vm295_vm4, %v9521_v17 }
 0x5d7   : > { %v3847_v31 = vpop.permute.xlu0 %3846  ;;  %v3983_v8 = vld [vmem:[#allocation3 + $0x78] sm:$0xff]  ;;  %v3989_v54 = vld [vmem:[#allocation3 + $0xa8] sm:$0xff] }
 0x5d8   : > { %3864 = vst.msk [vmem:[#allocation3 + $0xf8] sm:$0xff] %vm680_vm12, %v3847_v31  ;;  %v3771_v0 = vpop.permute.xlu1 %3770  ;;  %v3976_v6 = vld [vmem:[#allocation3 + $0x40] sm:$0xff] }
 0x5d9   : > { %3789 = vst.msk [vmem:[#allocation3 + $0xc8] sm:$0xff] %vm680_vm12, %v3771_v0  ;;  %3950 = vst.msk [vmem:[#allocation3 + $0x90] sm:$0xff] %vm680_vm12, %v3771_v0  ;;  %7897 = vmatpush3.bf16.msra.mxu1 %v8136_v53  ;;  %v9525_v53 = vld [vmem:[#allocation2 + $0x48] sm:$0xff] }
 0x5db   : > { %v3849_v15 = vpop.permute.xlu0 %3848  ;;  %v3994_v29 = vld [vmem:[#allocation3 + $0xd0] sm:$0xff] }
 0x5dc   : > { %3865 = vst.msk [vmem:[#allocation3 + $0x120] sm:$0xff] %vm680_vm12, %v3849_v15  ;;  %v3773_v35 = vpop.permute.xlu1 %3772  ;;  %4295 = vmatmul.mubr.bf16.gmra.mrb[120].mxu1 %v3978_v33  ;;  %v3988_v27 = vld [vmem:[#allocation3 + $0xa0] sm:$0xff]  ;;  %v3981_v62 = vld [vmem:[#allocation3 + $0x68] sm:$0xff] }
 0x5dd   : > { %3790 = vst.msk [vmem:[#allocation3 + $0xf0] sm:$0xff] %vm680_vm12, %v3773_v35  ;;  %3951 = vst.msk [vmem:[#allocation3 + $0xb8] sm:$0xff] %vm680_vm12, %v3773_v35  ;;  %4301 = vmatprep.mubr.bf16.mxu1 %v3984_v49 }
 0x5df   : > { %v3894_v7 = vpop.permute.xlu0 %3893  ;;  %v3999_v45 = vld [vmem:[#allocation3 + $0xf8] sm:$0xff] }
 0x5e0   : > { %3917 = vst.msk [vmem:[#allocation3 + $0x10] sm:$0xff] %vm680_vm12, %v3894_v7  ;;  %v3775_v2 = vpop.permute.xlu1 %3774  ;;  %v3993_v42 = vld [vmem:[#allocation3 + $0xc8] sm:$0xff]  ;;  %v3986_v3 = vld [vmem:[#allocation3 + $0x90] sm:$0xff]  ;;  %v4905_v7 = vshll.u32 %v9525_v53, 16 }
 0x5e1   : > { %3791 = vst.msk [vmem:[#allocation3 + $0x118] sm:$0xff] %vm680_vm12, %v3775_v2  ;;  %3952 = vst.msk [vmem:[#allocation3 + $0xe0] sm:$0xff] %vm680_vm12, %v3775_v2  ;;  %v8137_v2 = vld [vmem:[#allocation4 + $0x3a0] sm:$0xff]  }
 0x5e2   : > { %7538 = vmatprep.subr.bf16.mxu0 %v8137_v2 }
 0x5e3   : > { %v3898_v41 = vpop.permute.xlu0 %3897  ;;  %v4004_v36 = vld [vmem:[#allocation3 + $0x120] sm:$0xff] }
 0x5e4   : > { %3919 = vst.msk [vmem:[#allocation3 + $0x60] sm:$0xff] %vm680_vm12, %v3898_v41  ;;  %v3896_v24 = vpop.permute.xlu1 %3895  ;;  %4302 = vmatmul.mubr.bf16.gmra.mrb[124].mxu1 %v3983_v8  ;;  %v3998_v32 = vld [vmem:[#allocation3 + $0xf0] sm:$0xff]  ;;  %v3991_v58 = vld [vmem:[#allocation3 + $0xb8] sm:$0xff]  ;;  %v8138_v41 = vld [vmem:[#allocation4 + $0x360] sm:$0xff]   ;;  %v4968_v8 = vshrl.u32 %v9525_v53, 16 }
 0x5e5   : > { %3918 = vst.msk [vmem:[#allocation3 + $0x38] sm:$0xff] %vm680_vm12, %v3896_v24  ;;  %4308 = vmatprep.mubr.bf16.mxu1 %v3989_v54  ;;  %v8139_v24 = vld [vmem:[#allocation4 + $0x3a8] sm:$0xff]   ;;  %v9533_v54 = vrot.slane %v4905_v7, 1 }
 0x5e7   : > { %v3902_v23 = vpop.permute.xlu0 %3901  ;;  %v3970_v63 = vld [vmem:[#allocation3 + $0x10] sm:$0xff] }
 0x5e8   : > { %3921 = vst.msk [vmem:[#allocation3 + $0xb0] sm:$0xff] %vm680_vm12, %v3902_v23  ;;  %4370 = vmatmul.mubr.bf16.vlgmr.msra.gmra.mrb[128].mxu0 %v3970_v63  ;;  %v3900_v12 = vpop.permute.xlu1 %3899  ;;  %v4003_v38 = vld [vmem:[#allocation3 + $0x118] sm:$0xff]  ;;  %v3996_v40 = vld [vmem:[#allocation3 + $0xe0] sm:$0xff] }
 0x5e9   : > { %3920 = vst.msk [vmem:[#allocation3 + $0x88] sm:$0xff] %vm680_vm12, %v3900_v12  ;;  %4376 = vmatprep.mubr.bf16.mxu0 %v3976_v6  ;;  %v4718_v63 = vld [vmem:[#allocation2 + $0x50] sm:$0xff]  ;;  %v4926_v6 = vrot.slane %v9525_v53, 1  ;;  %7539 = vmatpush3.bf16.msra.mxu0 %v8138_v41 }
 0x5ea   : > { %7540 = vmatprep.subr.bf16.mxu0 %v8139_v24 }
 0x5eb   : > { %v3942_v56 = vpop.permute.xlu0 %3941  ;;  %v3980_v10 = vld [vmem:[#allocation3 + $0x60] sm:$0xff] }
 0x5ec   : > { %3953 = vst.msk [vmem:[#allocation3 + $0x108] sm:$0xff] %vm680_vm12, %v3942_v56  ;;  %v3904_v26 = vpop.permute.xlu1 %3903  ;;  %4309 = vmatmul.mubr.bf16.gmra.mrb[128].mxu1 %v3988_v27  ;;  %v3975_v19 = vld [vmem:[#allocation3 + $0x38] sm:$0xff]  ;;  %v8140_v56 = vld [vmem:[#allocation4 + $0x368] sm:$0xff]   ;;  %v4972_v27 = vshll.u32 %v4718_v63, 16 }
 0x5ed   : > { %3922 = vst.msk [vmem:[#allocation3 + $0xd8] sm:$0xff] %vm680_vm12, %v3904_v26  ;;  %4315 = vmatprep.mubr.bf16.mxu1 %v3994_v29  ;;  %v4970_v26 = vor.u32 %v4968_v8, %v9533_v54  ;;  %v4991_v29 = vrot.slane %v4718_v63, 1  ;;  %7541 = vmatpush3.bf16.msra.mxu0 %v8140_v56 }
 0x5ef   : > { %v3944_v18 = vpop.permute.xlu0 %3943  ;;  %v3990_v5 = vld [vmem:[#allocation3 + $0xb0] sm:$0xff] }
 0x5f0   : > { %v3906_v59 = vpop.permute.xlu1 %3905  ;;  %4377 = vmatmul.mubr.bf16.gmra.mrb[132].mxu0 %v3975_v19  ;;  %3954 = vst.msk [vmem:[#allocation3 + $0x130] sm:$0xff] %vm680_vm12, %v3944_v18  ;;  %v3985_v39 = vld [vmem:[#allocation3 + $0x88] sm:$0xff] }
 0x5f1   : > { %3923 = vst.msk [vmem:[#allocation3 + $0x100] sm:$0xff] %vm680_vm12, %v3906_v59  ;;  %4383 = vmatprep.mubr.bf16.mxu0 %v3981_v62  ;;  %v8141_v59 = vld [vmem:[#allocation4 + $0x3b0] sm:$0xff]  }
 0x5f2   : > { %7542 = vmatprep.subr.bf16.mxu0 %v8141_v59 }
 0x5f3   : > { %v4001_v48 = vld [vmem:[#allocation3 + $0x108] sm:$0xff] }
 0x5f4   : > { %v3908_v16 = vpop.permute.xlu1 %3907  ;;  %4316 = vmatmul.mubr.bf16.gmra.mrb[132].mxu1 %v3993_v42  ;;  %v3995_v61 = vld [vmem:[#allocation3 + $0xd8] sm:$0xff]  ;;  %v4992_v42 = vsel %vm698_vm11, %v4926_v6, %v4991_v29 }
 0x5f5   : > { %3924 = vst.msk [vmem:[#allocation3 + $0x128] sm:$0xff] %vm680_vm12, %v3908_v16  ;;  %4322 = vmatprep.mubr.bf16.mxu1 %v3999_v45  ;;  %v4974_v16 = vrot.slane %v4972_v27, 1  ;;  %v8142_v45 = vld [vmem:[#allocation4 + $0x370] sm:$0xff]  }
 0x5f6   : > { %5002 = vst.msk [vmem:[#allocation3 + $0x138] sm:$0xff] %vm295_vm4, %v4992_v42  ;;  %7543 = vmatpush3.bf16.msra.mxu0 %v8142_v45 }
 0x5f7   : > { %v4006_v44 = vld [vmem:[#allocation3 + $0x130] sm:$0xff] }
 0x5f8   : > { %4384 = vmatmul.mubr.bf16.gmra.mrb[136].mxu0 %v3980_v10  ;;  %v4000_v51 = vld [vmem:[#allocation3 + $0x100] sm:$0xff]  ;;  %4967 = vst.msk [vmem:[#allocation3 + $0x130] sm:$0xff] %vm295_vm4, %v9525_v53  ;;  %v9542_v10 = vsel %vm587_vm10, %v4970_v26, %v4974_v16 }
 0x5f9   : > { %4390 = vmatprep.mubr.bf16.mxu0 %v3986_v3  ;;  %v8143_v3 = vld [vmem:[#allocation4 + $0x3b8] sm:$0xff]  }
 0x5fa   : > { %7544 = vmatprep.subr.bf16.mxu0 %v8143_v3 }
 0x5fc   : > { %4323 = vmatmul.mubr.bf16.gmra.mrb[136].mxu1 %v3998_v32  ;;  %v4005_v46 = vld [vmem:[#allocation3 + $0x128] sm:$0xff] }
 0x5fd   : > { %4329 = vmatprep.mubr.bf16.mxu1 %v4004_v36 }
 0x600   : > { %4391 = vmatmul.mubr.bf16.gmra.mrb[140].mxu0 %v3985_v39  ;;  %v8144_v39 = vld [vmem:[#allocation4 + $0x378] sm:$0xff]  }
 0x601   : > { %4397 = vmatprep.mubr.bf16.mxu0 %v3991_v58  ;;  %7545 = vmatpush3.bf16.msra.mxu0 %v8144_v39 }
 0x604   : > { %4330 = vmatmul.mubr.bf16.gmra.mrb[140].mxu1 %v4003_v38 }
 0x605   : > { %7898 = vmatprep.mubr.msk.bf16.mxu1 %vm295_vm4, %v3972_v60  ;;  %v8145_v60 = vld [vmem:[#allocation4 + $0x3c0] sm:$0xff]  }
 0x606   : > { %7546 = vmatprep.subr.bf16.mxu0 %v8145_v60 }
 0x608   : > { %4398 = vmatmul.mubr.bf16.gmra.mrb[144].mxu0 %v3990_v5 }
 0x609   : > { %4404 = vmatprep.mubr.bf16.mxu0 %v3996_v40 }
 0x60c   : > { %7899 = vmatmul.mubr.msk.bf16.vlgmr.msra.gmra.mrb[144].mxu1 %vm295_vm4, %v3977_v9 }
 0x60d   : > { %7902 = vmatprep.mubr.msk.bf16.mxu1 %vm295_vm4, %v3982_v1 }
 0x610   : > { %4405 = vmatmul.mubr.bf16.gmra.mrb[148].mxu0 %v3995_v61 }
 0x611   : > { %4411 = vmatprep.mubr.bf16.mxu0 %v4001_v48  ;;  %v8146_v48 = vld [vmem:[#allocation4 + $0x380] sm:$0xff]  }
 0x612   : > { %7547 = vmatpush3.bf16.msra.mxu0 %v8146_v48 }
 0x614   : > { %7903 = vmatmul.mubr.msk.bf16.gmra.mrb[148].mxu1 %vm295_vm4, %v3987_v11 }
 0x615   : > { %7906 = vmatprep.mubr.msk.bf16.mxu1 %vm295_vm4, %v3992_v43  ;;  %v8147_v43 = vld [vmem:[#allocation4 + $0x3c8] sm:$0xff]  }
 0x616   : > { %7548 = vmatprep.subr.bf16.mxu0 %v8147_v43 }
 0x618   : > { %4412 = vmatmul.mubr.bf16.gmra.mrb[152].mxu0 %v4000_v51 }
 0x619   : > { %4418 = vmatprep.mubr.bf16.mxu0 %v4006_v44 }
 0x61c   : > { %7907 = vmatmul.mubr.msk.bf16.gmra.mrb[152].mxu1 %vm295_vm4, %v3997_v55 }
 0x61d   : > { %7910 = vmatprep.mubr.msk.bf16.mxu1 %vm295_vm4, %v4002_v21  ;;  %v8148_v21 = vld [vmem:[#allocation4 + $0x388] sm:$0xff]  }
 0x61e   : > { %7549 = vmatpush3.bf16.msra.mxu0 %v8148_v21 }
 0x620   : > { %4419 = vmatmul.mubr.bf16.gmra.mrb[156].mxu0 %v4005_v46 }
 0x624   : > { %7911 = vmatmul.mubr.msk.bf16.gmra.mrb[156].mxu1 %vm295_vm4, %v4007_v52 }
 0x69f   : > { %v7414_v28 = vpop.f32.mrb[112].mxu1 }
 0x6a0   : > { %v7415_v37 = vpop.f32.mrb[113].mxu1 }
 0x6a1   : > { %v7416_v14 = vadd.f32 %v7415_v37, %v7414_v28  ;;  %v7417_v20 = vpop.f32.mrb[114].mxu1  ;;  %v8149_v28 = vld [vmem:[#allocation4 + $0x3d0] sm:$0xff]  }
 0x6a2   : > { %v7418_v31 = vpop.f32.mrb[115].mxu1  ;;  %7550 = vmatprep.subr.bf16.mxu0 %v8149_v28 }
 0x6a7   : > { %v7420_v0 = vpop.f32.mrb[116].mxu1 }
 0x6a8   : > { %v7421_v15 = vpop.f32.mrb[117].mxu1 }
 0x6a9   : > { %v9529_v35 = vadd.f32 %v7421_v15, %v7420_v0  ;;  %v7423_v33 = vpop.f32.mrb[118].mxu1 }
 0x6aa   : > { %v7424_v49 = vpop.f32.mrb[119].mxu1  ;;  %v8150_v33 = vld [vmem:[#allocation4 + $0x390] sm:$0xff]  }
 0x6ab   : > { %7551 = vmatpush3.bf16.msra.mxu0 %v8150_v33 }
 0x6af   : > { %v7426_v23 = vpop.f32.mrb[120].mxu1 }
 0x6b0   : > { %v7427_v12 = vpop.f32.mrb[121].mxu1 }
 0x6b1   : > { %v7428_v19 = vadd.f32 %v7427_v12, %v7426_v23  ;;  %v7429_v18 = vpop.f32.mrb[122].mxu1 }
 0x6b2   : > { %v7430_v62 = vpop.f32.mrb[123].mxu1 }
 0x6b7   : > { %v7432_v32 = vpop.f32.mrb[124].mxu1 }
 0x6b8   : > { %v7433_v36 = vpop.f32.mrb[125].mxu1 }
 0x6b9   : > { %v7434_v58 = vadd.f32 %v7433_v36, %v7432_v32  ;;  %v7435_v38 = vpop.f32.mrb[126].mxu1 }
 0x6ba   : > { %v7436_v5 = vpop.f32.mrb[127].mxu1 }
 0x6bb   : > { %v7478_v40 = vpop.f32.mrb[128].mxu0 }
 0x6bc   : > { %v7479_v9 = vpop.f32.mrb[129].mxu0 }
 0x6bd   : > { %v7480_v1 = vadd.f32 %v7479_v9, %v7478_v40  ;;  %v7481_v61 = vpop.f32.mrb[130].mxu0 }
 0x6be   : > { %v7482_v11 = vpop.f32.mrb[131].mxu0 }
 0x6bf   : > { %v4372_v44 = vadd.f32 %v7480_v1, %v7416_v14  ;;  %v7438_v51 = vpop.f32.mrb[128].mxu1 }
 0x6c0   : > { %v7439_v55 = vpop.f32.mrb[129].mxu1 }
 0x6c1   : > { %v7440_v46 = vadd.f32 %v7439_v55, %v7438_v51  ;;  %v7441_v52 = vpop.f32.mrb[130].mxu1  ;;  %v9552_v51 = vld [vmem:[%s10125_s4 + $0x2] ss:$0 sm:$0xff] }
 0x6c2   : > { %v7442_v37 = vpop.f32.mrb[131].mxu1 }
 0x6c3   : > { %v7484_v20 = vpop.f32.mrb[132].mxu0 }
 0x6c4   : > { %v7485_v31 = vpop.f32.mrb[133].mxu0 }
 0x6c5   : > { %v7486_v0 = vadd.f32 %v7485_v31, %v7484_v20  ;;  %v7487_v15 = vpop.f32.mrb[134].mxu0 }
 0x6c6   : > { %v7488_v49 = vpop.f32.mrb[135].mxu0 }
 0x6c7   : > { %v4379_v7 = vadd.f32 %v7486_v0, %v9529_v35  ;;  %v7444_v14 = vpop.f32.mrb[132].mxu1 }
 0x6c8   : > { %v7445_v2 = vpop.f32.mrb[133].mxu1 }
 0x6c9   : > { %v7446_v41 = vadd.f32 %v7445_v2, %v7444_v14  ;;  %v7447_v24 = vpop.f32.mrb[134].mxu1 }
 0x6ca   : > { %v7448_v8 = vpop.f32.mrb[135].mxu1 }
 0x6cb   : > { %v7490_v23 = vpop.f32.mrb[136].mxu0 }
 0x6cc   : > { %v7491_v63 = vpop.f32.mrb[137].mxu0 }
 0x6cd   : > { %v7492_v12 = vadd.f32 %v7491_v63, %v7490_v23  ;;  %v7493_v56 = vpop.f32.mrb[138].mxu0 }
 0x6ce   : > { %v7494_v26 = vpop.f32.mrb[139].mxu0 }
 0x6cf   : > { %v4386_v27 = vadd.f32 %v7492_v12, %v7428_v19  ;;  %v7450_v29 = vpop.f32.mrb[136].mxu1 }
 0x6d0   : > { %v7451_v18 = vpop.f32.mrb[137].mxu1 }
 0x6d1   : > { %v9545_v59 = vadd.f32 %v7451_v18, %v7450_v29  ;;  %v7453_v62 = vpop.f32.mrb[138].mxu1 }
 0x6d2   : > { %v7454_v16 = vpop.f32.mrb[139].mxu1 }
 0x6d3   : > { %v7496_v42 = vpop.f32.mrb[140].mxu0 }
 0x6d4   : > { %v7497_v35 = vpop.f32.mrb[141].mxu0 }
 0x6d5   : > { %v7498_v45 = vadd.f32 %v7497_v35, %v7496_v42  ;;  %v7499_v3 = vpop.f32.mrb[142].mxu0 }
 0x6d6   : > { %v7500_v32 = vpop.f32.mrb[143].mxu0 }
 0x6d7   : > { %v4393_v36 = vadd.f32 %v7498_v45, %v7434_v58  ;;  %v7456_v39 = vpop.f32.mrb[140].mxu1 }
 0x6d8   : > { %v7457_v38 = vpop.f32.mrb[141].mxu1 }
 0x6d9   : > { %v9547_v60 = vadd.f32 %v7457_v38, %v7456_v39  ;;  %v7459_v5 = vpop.f32.mrb[142].mxu1 }
 0x6da   : > { %v7460_v40 = vpop.f32.mrb[143].mxu1 }
 0x6db   : > { %v7502_v9 = vpop.f32.mrb[144].mxu0 }
 0x6dc   : > { %v7503_v19 = vpop.f32.mrb[145].mxu0 }
 0x6dd   : > { %v7504_v1 = vadd.f32 %v7503_v19, %v7502_v9  ;;  %v7505_v61 = vpop.f32.mrb[146].mxu0 }
 0x6de   : > { %v7506_v48 = vpop.f32.mrb[147].mxu0 }
 0x6df   : > { %v4400_v11 = vadd.f32 %v7504_v1, %v7440_v46  ;;  %v7900_v43 = vpop.f32.mrb[144].mxu1  ;;  %v4611_v1 = vld [vmem:[#allocation2 + $0x8] sm:$0x1f] }
 0x6e0   : > { %v4468_v55 = vadd.f32 %v7900_v43, %v4379_v7  ;;  %v4460_v58 = vpop.f32.mrb[145].mxu1 }
 0x6e1   : > { %v4461_v21 = vadd.f32 %v4460_v58, %v4372_v44  ;;  %v7901_v52 = vpop.f32.mrb[146].mxu1 }
 0x6e2   : > { %v4524_v28 = vadd.f32 %v9552_v51, %v4468_v55  ;;  %v4463_v20 = vpop.f32.mrb[147].mxu1  ;;  %v8151_v52 = vld [vmem:[#allocation4 + $0x3d8] sm:$0xff]  }
 0x6e3   : > { %v7508_v37 = vpop.f32.mrb[148].mxu0  ;;  %v4523_v31 = vadd.f32 %v9552_v51, %v4461_v21  ;;  %v4730_v21 = vshll.u32 %v9521_v17, 16  ;;  %7552 = vmatprep.subr.bf16.mxu0 %v8151_v52 }
 0x6e4   : > { %v7509_v0 = vpop.f32.mrb[149].mxu0  ;;  %v4532_v15 = vmax.f32 %v4524_v28, 0.0 }
 0x6e5   : > { %v7510_v33 = vadd.f32 %v7509_v0, %v7508_v37  ;;  %v7511_v46 = vpop.f32.mrb[150].mxu0  ;;  %v4531_v49 = vmax.f32 %v4523_v31, 0.0  ;;  %v8152_v31 = vld [vmem:[#allocation4 + $0x398] sm:$0xff]  }
 0x6e6   : > { %v7512_v14 = vpop.f32.mrb[151].mxu0  ;;  %v4540_v2 = vpack.c.bf16 %v4532_v15, %v4532_v15  ;;  %7553 = vmatpush3.bf16.msra.mxu0 %v8152_v31 }
 0x6e7   : > { %v4407_v24 = vadd.f32 %v7510_v33, %v7446_v41  ;;  %v4539_v8 = vpack.c.bf16 %v4531_v49, %v4531_v49  ;;  %v7904_v23 = vpop.f32.mrb[148].mxu1 }
 0x6e8   : > { %v4555_v7 = vshrl.u32 %v4540_v2, 16  ;;  %v4482_v63 = vadd.f32 %v7904_v23, %v4393_v36  ;;  %v4474_v44 = vpop.f32.mrb[149].mxu1  ;;  %v4558_v18 = vshll.u32 %v4540_v2, 16  ;;  %v4614_v36 = vld [vmem:[#allocation2 + $0x10] sm:$0x1f] }
 0x6e9   : > { %v4548_v12 = vshrl.u32 %v4539_v8, 16  ;;  %v4475_v56 = vadd.f32 %v4474_v44, %v4386_v27  ;;  %v7905_v26 = vpop.f32.mrb[150].mxu1  ;;  %v4551_v45 = vshll.u32 %v4539_v8, 16  ;;  %v4728_v8 = vshrl.u32 %v9521_v17, 16 }
 0x6ea   : > { %v4557_v29 = vrot.slane %v4555_v7, 7  ;;  %v4526_v62 = vadd.f32 %v9552_v51, %v4482_v63  ;;  %v4477_v42 = vpop.f32.mrb[151].mxu1  ;;  %v4732_v44 = vrot.slane %v4730_v21, 1  ;;  %v8157_v21 = vld [vmem:[#allocation4 + $0x3e8] sm:$0xff]  }
 0x6eb   : > { %v7514_v16 = vpop.f32.mrb[152].mxu0  ;;  %v4550_v35 = vrot.slane %v4548_v12, 7  ;;  %v4525_v3 = vadd.f32 %v9552_v51, %v4475_v56  ;;  %v8153_v12 = vld [vmem:[#allocation4 + $0x420] sm:$0xff]  }
 0x6ec   : > { %v7515_v32 = vpop.f32.mrb[153].mxu0  ;;  %v4560_v41 = vor.u32 %v4558_v18, %v4557_v29  ;;  %v4534_v39 = vmax.f32 %v4526_v62, 0.0  ;;  %v8154_v18 = vld [vmem:[#allocation4 + $0x3e0] sm:$0xff]   ;;  %v4620_v62 = vld [vmem:[#allocation2 + $0x20] sm:$0x1f]  ;;  %7602 = vmatprep.subr.bf16.mxu1 %v8153_v12 }
 0x6ed   : > { %v7516_v38 = vadd.f32 %v7515_v32, %v7514_v16  ;;  %v7517_v5 = vpop.f32.mrb[154].mxu0  ;;  %v4553_v40 = vor.u32 %v4551_v45, %v4550_v35  ;;  %v4533_v9 = vmax.f32 %v4525_v3, 0.0  ;;  %v4617_v3 = vld [vmem:[#allocation2 + $0x18] sm:$0x1f]  ;;  %7603 = vmatpush3.bf16.msra.mxu1 %v8154_v18  ;;  %v4626_v12 = vld [vmem:[#allocation2 + $0x30] sm:$0x1f] }
 0x6ee   : > { %v7518_v27 = vpop.f32.mrb[155].mxu0  ;;  %v4615_v19 = vsel %vm8385_vm9, %v4560_v41, %v4614_v36  ;;  %v4542_v61 = vpack.c.bf16 %v4534_v39, %v4534_v39 }
 0x6ef   : > { %v9561_v48 = vadd.f32 %v7516_v38, %v9545_v59  ;;  %4616 = vst [vmem:[#allocation2 + $0x10] sm:$0x1f] %v4615_v19  ;;  %v4612_v43 = vsel %vm8385_vm9, %v4553_v40, %v4611_v1  ;;  %v4541_v55 = vpack.c.bf16 %v4533_v9, %v4533_v9  ;;  %v7908_v58 = vpop.f32.mrb[152].mxu1  ;;  %v4836_v38 = vrot.slane %v9521_v17, 1  ;;  %v8155_v19 = vld [vmem:[#allocation4 + $0x428] sm:$0xff]   ;;  %v9582_v1 = vld [vmem:[#allocation4 + $0x460] sm:$0xff]  }
 0x6f0   : > { %4613 = vst [vmem:[#allocation2 + $0x8] sm:$0x1f] %v4612_v43  ;;  %v4569_v28 = vshrl.u32 %v4542_v61, 16  ;;  %v4496_v37 = vadd.f32 %v7908_v58, %v4407_v24  ;;  %v4488_v20 = vpop.f32.mrb[153].mxu1  ;;  %v4572_v46 = vshll.u32 %v4542_v61, 16  ;;  %v4733_v27 = vor.u32 %v4732_v44, %v4728_v8  ;;  %7604 = vmatprep.subr.bf16.mxu1 %v8155_v19  ;;  %7914 = vmatprep.subr.bf16.mxu0 %v9582_v1  ;;  %v8159_v44 = vld [vmem:[#allocation4 + $0x3f0] sm:$0xff]  }
 0x6f1   : > { %v4562_v0 = vshrl.u32 %v4541_v55, 16  ;;  %v4489_v15 = vadd.f32 %v4488_v20, %v4400_v11  ;;  %v7909_v33 = vpop.f32.mrb[154].mxu1  ;;  %v4565_v7 = vshll.u32 %v4541_v55, 16  ;;  %7605 = vmatpush3.bf16.msra.mxu1 %v8157_v21 }
 0x6f2   : > { %v4571_v59 = vrot.slane %v4569_v28, 7  ;;  %v4528_v49 = vadd.f32 %v9552_v51, %v4496_v37  ;;  %v4491_v2 = vpop.f32.mrb[155].mxu1 }
 0x6f3   : > { %v7520_v14 = vpop.f32.mrb[156].mxu0  ;;  %v4564_v23 = vrot.slane %v4562_v0, 7  ;;  %v4527_v63 = vadd.f32 %v9552_v51, %v4489_v15 }
 0x6f4   : > { %v7521_v24 = vpop.f32.mrb[157].mxu0  ;;  %v4574_v56 = vor.u32 %v4572_v46, %v4571_v59  ;;  %v4536_v11 = vmax.f32 %v4528_v49, 0.0 }
 0x6f5   : > { %v7522_v26 = vadd.f32 %v7521_v24, %v7520_v14  ;;  %v7523_v29 = vpop.f32.mrb[158].mxu0  ;;  %v4567_v16 = vor.u32 %v4565_v7, %v4564_v23  ;;  %v4535_v42 = vmax.f32 %v4527_v63, 0.0  ;;  %v8158_v23 = vld [vmem:[#allocation4 + $0x430] sm:$0xff]  }
 0x6f6   : > { %v7524_v35 = vpop.f32.mrb[159].mxu0  ;;  %v4621_v45 = vsel %vm8385_vm9, %v4574_v56, %v4620_v62  ;;  %v4544_v32 = vpack.c.bf16 %v4536_v11, %v4536_v11  ;;  %v9572_v39 = vld [vmem:[#allocation2 + $0x10] sm:$0xff]  ;;  %7606 = vmatprep.subr.bf16.mxu1 %v8158_v23  ;;  %v4623_v29 = vld [vmem:[#allocation2 + $0x28] sm:$0x1f] }
 0x6f7   : > { %v4421_v41 = vadd.f32 %v7522_v26, %v9547_v60  ;;  %4622 = vst [vmem:[#allocation2 + $0x20] sm:$0x1f] %v4621_v45  ;;  %v4618_v5 = vsel %vm8385_vm9, %v4567_v16, %v4617_v3  ;;  %v4543_v36 = vpack.c.bf16 %v4535_v42, %v4535_v42  ;;  %v7912_v40 = vpop.f32.mrb[156].mxu1  ;;  %v4709_v9 = vld [vmem:[#allocation2 + $0x8] sm:$0xff]  ;;  %4721 = vst.msk [vmem:[#allocation3 + $0x50] sm:$0xff] %vm295_vm4, %v9572_v39  ;;  %v4743_v60 = vshll.u32 %v9572_v39, 16 }
 0x6f8   : > { %4960 = vst.msk [vmem:[#allocation3 + $0x18] sm:$0xff] %vm295_vm4, %v9572_v39  ;;  %4619 = vst [vmem:[#allocation2 + $0x18] sm:$0x1f] %v4618_v5  ;;  %v4583_v17 = vshrl.u32 %v4544_v32, 16  ;;  %v4586_v61 = vshll.u32 %v4544_v32, 16  ;;  %v4502_v55 = vpop.f32.mrb[157].mxu1  ;;  %4869 = vrot.lane.b32.xlu0 %v4709_v9, %s8253_s12  ;;  %7607 = vmatpush3.bf16.msra.mxu1 %v8159_v44 }
 0x6f9   : > { %v4510_v43 = vadd.f32 %v7912_v40, %v4421_v41  ;;  %4720 = vst.msk [vmem:[#allocation3 + $0x28] sm:$0xff] %vm295_vm4, %v4709_v9  ;;  %v4735_v58 = vshll.u32 %v4709_v9, 16  ;;  %v4576_v52 = vshrl.u32 %v4543_v36, 16  ;;  %v4579_v28 = vshll.u32 %v4543_v36, 16  ;;  %v7913_v31 = vpop.f32.mrb[158].mxu1  ;;  %v8161_v40 = vld [vmem:[#allocation4 + $0x3f8] sm:$0xff]  }
 0x6fa   : > { %v4503_v37 = vadd.f32 %v4502_v55, %v9561_v48  ;;  %v4739_v20 = vshrl.u32 %v4709_v9, 16  ;;  %v4585_v0 = vrot.slane %v4583_v17, 7  ;;  %v4745_v59 = vrot.slane %v4743_v60, 1  ;;  %v4505_v46 = vpop.f32.mrb[159].mxu1 }
 0x6fb   : > { %v4530_v15 = vadd.f32 %v9552_v51, %v4510_v43  ;;  %v4737_v33 = vrot.slane %v4735_v58, 1  ;;  %v4578_v49 = vrot.slane %v4576_v52, 7  ;;  %v4837_v2 = vrot.slane %v4709_v9, 1 }
 0x6fc   : > { %v4529_v14 = vadd.f32 %v9552_v51, %v4503_v37  ;;  %v4839_v8 = vrot.slane %v9572_v39, 1  ;;  %v4588_v48 = vor.u32 %v4586_v61, %v4585_v0  ;;  %4871 = vrot.lane.b32.xlu0 %v9572_v39, %s8253_s12  ;;  %v4747_v32 = vshrl.u32 %v9572_v39, 16 }
 0x6fd   : > { %v4538_v7 = vmax.f32 %v4530_v15, 0.0  ;;  %v4738_v63 = vsel %vm587_vm10, %v4733_v27, %v4737_v33  ;;  %v4741_v24 = vor.u32 %v4739_v20, %v4737_v33  ;;  %v4581_v56 = vor.u32 %v4579_v28, %v4578_v49  ;;  %v8162_v28 = vld [vmem:[#allocation4 + $0x440] sm:$0xff]   ;;  %v4632_v33 = vld [vmem:[#allocation2 + $0x40] sm:$0x1f] }
 0x6fe   : > { %v4537_v11 = vmax.f32 %v4529_v14, 0.0  ;;  %4795 = vrot.lane.b32.xlu1 %v4738_v63, %s8253_s12  ;;  %v4838_v51 = vsel %vm698_vm11, %v4836_v38, %v4837_v2  ;;  %v4627_v26 = vsel %vm8385_vm9, %v4588_v48, %v4626_v12  ;;  %v9599_v16 = vld [vmem:[#allocation2 + $0x20] sm:$0xff]  ;;  %v9602_v42 = vsel %vm698_vm11, %v4837_v2, %v4839_v8  ;;  %v8160_v38 = vld [vmem:[#allocation4 + $0x438] sm:$0xff]   ;;  %v8163_v15 = vld [vmem:[#allocation4 + $0x400] sm:$0xff]  }
 0x6ff   : > { %v4546_v18 = vpack.c.bf16 %v4538_v7, %v4538_v7  ;;  %v4746_v62 = vsel %vm587_vm10, %v4741_v24, %v4745_v59  ;;  %4861 = vst.msk [vmem:[#allocation3 + $0x8] sm:$0xff] %vm295_vm4, %v4838_v51  ;;  %4628 = vst [vmem:[#allocation2 + $0x30] sm:$0x1f] %v4627_v26  ;;  %v4624_v35 = vsel %vm8385_vm9, %v4581_v56, %v4623_v29  ;;  %v4711_v3 = vld [vmem:[#allocation2 + $0x18] sm:$0xff]  ;;  %v4759_v41 = vshll.u32 %v9599_v16, 16  ;;  %v8164_v63 = vld [vmem:[#allocation4 + $0x448] sm:$0xff]  }
 0x700   : > { %v4545_v45 = vpack.c.bf16 %v4537_v11, %v4537_v11  ;;  %4917 = vst.msk [vmem:[#allocation3 + $0x10] sm:$0xff] %vm295_vm4, %v4746_v62  ;;  %4723 = vst.msk [vmem:[#allocation3 + $0xa0] sm:$0xff] %vm295_vm4, %v9599_v16  ;;  %4873 = vrot.lane.b32.xlu0 %v4711_v3, %s8253_s12  ;;  %v4751_v36 = vshll.u32 %v4711_v3, 16  ;;  %v4749_v39 = vor.u32 %v4747_v32, %v4745_v59  ;;  %v4841_v60 = vrot.slane %v4711_v3, 1  ;;  %v4629_v49 = vld [vmem:[#allocation2 + $0x38] sm:$0x1f] }
 0x701   : > { %4962 = vst.msk [vmem:[#allocation3 + $0x68] sm:$0xff] %vm295_vm4, %v9599_v16  ;;  %4862 = vst.msk [vmem:[#allocation3 + $0x30] sm:$0xff] %vm295_vm4, %v9602_v42  ;;  %v4597_v5 = vshrl.u32 %v4546_v18, 16  ;;  %v4600_v9 = vshll.u32 %v4546_v18, 16  ;;  %7608 = vmatprep.subr.bf16.mxu1 %v8160_v38  ;;  %v4755_v61 = vshrl.u32 %v4711_v3, 16  ;;  %v4843_v43 = vrot.slane %v9599_v16, 1 }
 0x702   : > { %4625 = vst [vmem:[#allocation2 + $0x28] sm:$0x1f] %v4624_v35  ;;  %4722 = vst.msk [vmem:[#allocation3 + $0x78] sm:$0xff] %vm295_vm4, %v4711_v3  ;;  %v4590_v27 = vshrl.u32 %v4545_v45, 16  ;;  %4797 = vrot.lane.b32.xlu1 %v4746_v62, %s8253_s12  ;;  %v4753_v17 = vrot.slane %v4751_v36, 1  ;;  %7609 = vmatpush3.bf16.msra.mxu1 %v8161_v40  ;;  %v4593_v58 = vshll.u32 %v4545_v45, 16  ;;  %v9622_v52 = vsel %vm698_vm11, %v4839_v8, %v4841_v60 }
 0x703   : > { %4961 = vst.msk [vmem:[#allocation3 + $0x40] sm:$0xff] %vm295_vm4, %v4711_v3  ;;  %v4599_v19 = vrot.slane %v4597_v5, 7  ;;  %v4761_v21 = vrot.slane %v4759_v41, 1  ;;  %v9628_v0 = vsel %vm698_vm11, %v4841_v60, %v4843_v43  ;;  %4995 = vst.msk [vmem:[#allocation3 + $0x20] sm:$0xff] %vm295_vm4, %v9622_v52  ;;  %7610 = vmatprep.subr.bf16.mxu1 %v8162_v28  ;;  %v4763_v48 = vshrl.u32 %v9599_v16, 16  ;;  %v8166_v56 = vld [vmem:[#allocation4 + $0x408] sm:$0xff]  }
 0x704   : > { %v4592_v55 = vrot.slane %v4590_v27, 7  ;;  %4875 = vrot.lane.b32.xlu0 %v9599_v16, %s8253_s12  ;;  %v4754_v20 = vsel %vm587_vm10, %v4749_v39, %v4753_v17  ;;  %v4757_v31 = vor.u32 %v4755_v61, %v4753_v17  ;;  %4863 = vst.msk [vmem:[#allocation3 + $0x58] sm:$0xff] %vm295_vm4, %v9622_v52  ;;  %4996 = vst.msk [vmem:[#allocation3 + $0x48] sm:$0xff] %vm295_vm4, %v9628_v0  ;;  %v8167_v62 = vld [vmem:[#allocation4 + $0x450] sm:$0xff]   ;;  %v8170_v60 = vld [vmem:[#allocation4 + $0x418] sm:$0xff]  }
 0x705   : > { %v4602_v37 = vor.u32 %v4600_v9, %v4599_v19  ;;  %4918 = vst.msk [vmem:[#allocation3 + $0x38] sm:$0xff] %vm295_vm4, %v4754_v20  ;;  %4864 = vst.msk [vmem:[#allocation3 + $0x80] sm:$0xff] %vm295_vm4, %v9628_v0  ;;  %v4765_v11 = vor.u32 %v4763_v48, %v4761_v21  ;;  %v8168_v3 = vld [vmem:[#allocation4 + $0x410] sm:$0xff]   ;;  %v8169_v9 = vld [vmem:[#allocation4 + $0x458] sm:$0xff]  }
 0x706   : > { %v4595_v59 = vor.u32 %v4593_v58, %v4592_v55  ;;  %4799 = vrot.lane.b32.xlu1 %v4754_v20, %s8253_s12  ;;  %v4762_v14 = vsel %vm587_vm10, %v4757_v31, %v4761_v21  ;;  %v9643_v2 = vld [vmem:[#allocation2 + $0x30] sm:$0xff]  ;;  %7611 = vmatpush3.bf16.msra.mxu1 %v8163_v15 }
 0x707   : > { %v4633_v46 = vsel %vm8385_vm9, %v4602_v37, %v4632_v33  ;;  %4919 = vst.msk [vmem:[#allocation3 + $0x60] sm:$0xff] %vm295_vm4, %v4762_v14  ;;  %4725 = vst.msk [vmem:[#allocation3 + $0xf0] sm:$0xff] %vm295_vm4, %v9643_v2  ;;  %v4847_v7 = vrot.slane %v9643_v2, 1  ;;  %v4775_v44 = vshll.u32 %v9643_v2, 16  ;;  %7612 = vmatprep.subr.bf16.mxu1 %v8164_v63  ;;  %v4779_v5 = vshrl.u32 %v9643_v2, 16 }
 0x708   : > { %4634 = vst [vmem:[#allocation2 + $0x40] sm:$0x1f] %v4633_v46  ;;  %v4630_v8 = vsel %vm8385_vm9, %v4595_v59, %v4629_v49  ;;  %4964 = vst.msk [vmem:[#allocation3 + $0xb8] sm:$0xff] %vm295_vm4, %v9643_v2  ;;  %v8165_v59 = vld [vmem:[#allocation4 + $0x468] sm:$0xff]  }
 0x709   : > { %v4713_v23 = vld [vmem:[#allocation2 + $0x28] sm:$0xff]  ;;  %4631 = vst [vmem:[#allocation2 + $0x38] sm:$0x1f] %v4630_v8  ;;  %v4777_v45 = vrot.slane %v4775_v44, 1 }
 0x70a   : > { %4877 = vrot.lane.b32.xlu0 %v4713_v23, %s8253_s12  ;;  %4724 = vst.msk [vmem:[#allocation3 + $0xc8] sm:$0xff] %vm295_vm4, %v4713_v23  ;;  %4963 = vst.msk [vmem:[#allocation3 + $0x90] sm:$0xff] %vm295_vm4, %v4713_v23  ;;  %v4767_v24 = vshll.u32 %v4713_v23, 16  ;;  %v4845_v12 = vrot.slane %v4713_v23, 1  ;;  %4801 = vrot.lane.b32.xlu1 %v4762_v14, %s8253_s12  ;;  %v4771_v26 = vshrl.u32 %v4713_v23, 16  ;;  %v8171_v8 = vld [vmem:[#allocation4 + $0x470] sm:$0xff]  }
 0x70b   : > { %7613 = vmatpush3.bf16.msra.mxu1 %v8166_v56  ;;  %v4781_v19 = vor.u32 %v4779_v5, %v4777_v45 }
 0x70c   : > { %v4769_v51 = vrot.slane %v4767_v24, 1  ;;  %v4848_v29 = vsel %vm698_vm11, %v4845_v12, %v4847_v7  ;;  %v4846_v18 = vsel %vm698_vm11, %v4843_v43, %v4845_v12  ;;  %7614 = vmatprep.subr.bf16.mxu1 %v8167_v62 }
 0x70d   : > { %4998 = vst.msk [vmem:[#allocation3 + $0x98] sm:$0xff] %vm295_vm4, %v4848_v29  ;;  %4866 = vst.msk [vmem:[#allocation3 + $0xd0] sm:$0xff] %vm295_vm4, %v4848_v29 }
 0x70e   : > { %4997 = vst.msk [vmem:[#allocation3 + $0x70] sm:$0xff] %vm295_vm4, %v4846_v18  ;;  %4865 = vst.msk [vmem:[#allocation3 + $0xa8] sm:$0xff] %vm295_vm4, %v4846_v18  ;;  %4879 = vrot.lane.b32.xlu0 %v9643_v2, %s8253_s12  ;;  %v4770_v16 = vsel %vm587_vm10, %v4765_v11, %v4769_v51  ;;  %v4773_v35 = vor.u32 %v4771_v26, %v4769_v51 }
 0x70f   : > { %4803 = vrot.lane.b32.xlu1 %v4770_v16, %s8253_s12  ;;  %4920 = vst.msk [vmem:[#allocation3 + $0x88] sm:$0xff] %vm295_vm4, %v4770_v16  ;;  %v4716_v41 = vld [vmem:[#allocation2 + $0x40] sm:$0xff]  ;;  %7615 = vmatpush3.bf16.msra.mxu1 %v8168_v3 }
 0x710   : > { %v4778_v32 = vsel %vm587_vm10, %v4773_v35, %v4777_v45  ;;  %v4715_v38 = vld [vmem:[#allocation2 + $0x38] sm:$0xff]  ;;  %4966 = vst.msk [vmem:[#allocation3 + $0x108] sm:$0xff] %vm295_vm4, %v4716_v41  ;;  %v4791_v36 = vshll.u32 %v4716_v41, 16  ;;  %v4851_v40 = vrot.slane %v4716_v41, 1  ;;  %v4901_v61 = vshrl.u32 %v4716_v41, 16  ;;  %7616 = vmatprep.subr.bf16.mxu1 %v8169_v9 }
 0x711   : > { %4921 = vst.msk [vmem:[#allocation3 + $0xb0] sm:$0xff] %vm295_vm4, %v4778_v32  ;;  %4726 = vst.msk [vmem:[#allocation3 + $0x118] sm:$0xff] %vm295_vm4, %v4715_v38  ;;  %v4783_v27 = vshll.u32 %v4715_v38, 16  ;;  %v4849_v39 = vrot.slane %v4715_v38, 1  ;;  %v4787_v58 = vshrl.u32 %v4715_v38, 16 }
 0x712   : > { %4881 = vrot.lane.b32.xlu0 %v4715_v38, %s8253_s12  ;;  %4965 = vst.msk [vmem:[#allocation3 + $0xe0] sm:$0xff] %vm295_vm4, %v4715_v38  ;;  %v4793_v17 = vrot.slane %v4791_v36, 1  ;;  %v4927_v43 = vsel %vm698_vm11, %v4851_v40, %v4926_v6 }
 0x713   : > { %4805 = vrot.lane.b32.xlu1 %v4778_v32, %s8253_s12  ;;  %v4785_v55 = vrot.slane %v4783_v27, 1  ;;  %v4850_v21 = vsel %vm698_vm11, %v4847_v7, %v4849_v39  ;;  %v4852_v28 = vsel %vm698_vm11, %v4849_v39, %v4851_v40  ;;  %5001 = vst.msk [vmem:[#allocation3 + $0x110] sm:$0xff] %vm295_vm4, %v4927_v43  ;;  %7617 = vmatpush3.bf16.msra.mxu1 %v8170_v60  ;;  %v8172_v7 = vld [vmem:[#allocation4 + $0x478] sm:$0xff]  }
 0x714   : > { %v4903_v37 = vor.u32 %v4901_v61, %v4793_v17  ;;  %4999 = vst.msk [vmem:[#allocation3 + $0xc0] sm:$0xff] %vm295_vm4, %v4850_v21  ;;  %4867 = vst.msk [vmem:[#allocation3 + $0xf8] sm:$0xff] %vm295_vm4, %v4850_v21 }
 0x715   : > { %5000 = vst.msk [vmem:[#allocation3 + $0xe8] sm:$0xff] %vm295_vm4, %v4852_v28  ;;  %4868 = vst.msk [vmem:[#allocation3 + $0x120] sm:$0xff] %vm295_vm4, %v4852_v28  ;;  %v4786_v53 = vsel %vm587_vm10, %v4781_v19, %v4785_v55  ;;  %v4789_v6 = vor.u32 %v4787_v58, %v4785_v55 }
 0x716   : > { %4883 = vrot.lane.b32.xlu0 %v4716_v41, %s8253_s12  ;;  %4922 = vst.msk [vmem:[#allocation3 + $0xd8] sm:$0xff] %vm295_vm4, %v4786_v53  ;;  %v4908_v20 = vsel %vm587_vm10, %v4903_v37, %v9533_v54 }
 0x717   : > { %4807 = vrot.lane.b32.xlu1 %v4786_v53, %s8253_s12  ;;  %v4794_v31 = vsel %vm587_vm10, %v4789_v6, %v4793_v17  ;;  %4924 = vst.msk [vmem:[#allocation3 + $0x128] sm:$0xff] %vm295_vm4, %v4908_v20 }
 0x718   : > { %4923 = vst.msk [vmem:[#allocation3 + $0x100] sm:$0xff] %vm295_vm4, %v4794_v31 }
 0x71a   : > { %4928 = vrot.lane.b32.xlu0 %v9602_v42, %s8253_s12 }
 0x71b   : > { %4809 = vrot.lane.b32.xlu1 %v4794_v31, %s8253_s12  ;;  %v5007_v31 = vld [vmem:[#allocation3 + $0x20] sm:$0xff] }
 0x71e   : > { %4932 = vrot.lane.b32.xlu0 %v9628_v0, %s8253_s12 }
 0x71f   : > { %4930 = vrot.lane.b32.xlu1 %v9622_v52, %s8253_s12 }
 0x722   : > { %4936 = vrot.lane.b32.xlu0 %v4848_v29, %s8253_s12 }
 0x723   : > { %4934 = vrot.lane.b32.xlu1 %v4846_v18, %s8253_s12 }
 0x726   : > { %4976 = vrot.lane.b32.xlu0 %v4908_v20, %s8253_s12 }
 0x727   : > { %4938 = vrot.lane.b32.xlu1 %v4850_v21, %s8253_s12 }
 0x72a   : > { %4978 = vrot.lane.b32.xlu0 %v9542_v10, %s8253_s12 }
 0x72b   : > { %4940 = vrot.lane.b32.xlu1 %v4852_v28, %s8253_s12 }
 0x72f   : > { %4942 = vrot.lane.b32.xlu1 %v4927_v43, %s8253_s12 }
 0x76a   : > { %v4870_v54 = vpop.permute.xlu0 %4869 }
 0x76b   : > { %4893 = vst.msk [vmem:[#allocation3 + $0x8] sm:$0xff] %vm680_vm12, %v4870_v54 }
 0x76e   : > { %v4872_v42 = vpop.permute.xlu0 %4871 }
 0x76f   : > { %4894 = vst.msk [vmem:[#allocation3 + $0x30] sm:$0xff] %vm680_vm12, %v4872_v42 }
 0x770   : > { %v4796_v52 = vpop.permute.xlu1 %4795 }
 0x771   : > { %4819 = vst.msk [vmem:[#allocation3] sm:$0xff] %vm680_vm12, %v4796_v52  ;;  %v5012_v52 = vld [vmem:[#allocation3 + $0x48] sm:$0xff] }
 0x772   : > { %v4874_v0 = vpop.permute.xlu0 %4873  ;;  %v5004_v15 = vld [vmem:[#allocation3 + $0x8] sm:$0xff] }
 0x773   : > { %4895 = vst.msk [vmem:[#allocation3 + $0x58] sm:$0xff] %vm680_vm12, %v4874_v0  ;;  %5315 = vmatprep.mubr.bf16.mxu0 %v5004_v15  ;;  %v5017_v0 = vld [vmem:[#allocation3 + $0x70] sm:$0xff] }
 0x774   : > { %v4798_v33 = vpop.permute.xlu1 %4797 }
 0x775   : > { %4820 = vst.msk [vmem:[#allocation3 + $0x28] sm:$0xff] %vm680_vm12, %v4798_v33 }
 0x776   : > { %v4876_v10 = vpop.permute.xlu0 %4875  ;;  %v5009_v14 = vld [vmem:[#allocation3 + $0x30] sm:$0xff] }
 0x777   : > { %4896 = vst.msk [vmem:[#allocation3 + $0x80] sm:$0xff] %vm680_vm12, %v4876_v10  ;;  %v5022_v10 = vld [vmem:[#allocation3 + $0x98] sm:$0xff] }
 0x778   : > { %v4800_v46 = vpop.permute.xlu1 %4799  ;;  %v5003_v49 = vld [vmem:[#allocation3] sm:$0xff] }
 0x779   : > { %4821 = vst.msk [vmem:[#allocation3 + $0x50] sm:$0xff] %vm680_vm12, %v4800_v46  ;;  %4982 = vst.msk [vmem:[#allocation3 + $0x18] sm:$0xff] %vm680_vm12, %v4800_v46  ;;  %5316 = vmatmul.mubr.bf16.vlgmr.msra.gmra.mrb[160].mxu0 %v5003_v49 }
 0x77a   : > { %7915 = vmatpush3.bf16.msra.mxu0 %v9582_v1  ;;  %5322 = vmatprep.mubr.bf16.mxu0 %v5009_v14  ;;  %v5014_v44 = vld [vmem:[#allocation3 + $0x58] sm:$0xff]  ;;  %v5032_v14 = vld [vmem:[#allocation3 + $0xe8] sm:$0xff] }
 0x77b   : > { %7916 = vmatprep.subr.bf16.mxu0 %v8165_v59 }
 0x77c   : > { %v4878_v2 = vpop.permute.xlu0 %4877  ;;  %v4802_v23 = vpop.permute.xlu1 %4801  ;;  %v5008_v24 = vld [vmem:[#allocation3 + $0x28] sm:$0xff] }
 0x77d   : > { %4897 = vst.msk [vmem:[#allocation3 + $0xa8] sm:$0xff] %vm680_vm12, %v4878_v2  ;;  %4822 = vst.msk [vmem:[#allocation3 + $0x78] sm:$0xff] %vm680_vm12, %v4802_v23  ;;  %v5037_v2 = vld [vmem:[#allocation3 + $0x110] sm:$0xff] }
 0x77e   : > { %4983 = vst.msk [vmem:[#allocation3 + $0x40] sm:$0xff] %vm680_vm12, %v4802_v23  ;;  %7917 = vmatpush3.bf16.msra.mxu0 %v8165_v59  ;;  %v5019_v29 = vld [vmem:[#allocation3 + $0x80] sm:$0xff]  ;;  %v5042_v23 = vld [vmem:[#allocation3 + $0x138] sm:$0xff] }
 0x77f   : > { %7918 = vmatprep.subr.bf16.mxu0 %v8171_v8  ;;  %v5027_v59 = vld [vmem:[#allocation3 + $0xc0] sm:$0xff] }
 0x780   : > { %v4880_v48 = vpop.permute.xlu0 %4879  ;;  %v5006_v1 = vld [vmem:[#allocation3 + $0x18] sm:$0xff]  ;;  %v5013_v26 = vld [vmem:[#allocation3 + $0x50] sm:$0xff] }
 0x781   : > { %4898 = vst.msk [vmem:[#allocation3 + $0xd0] sm:$0xff] %vm680_vm12, %v4880_v48  ;;  %v4804_v63 = vpop.permute.xlu1 %4803  ;;  %5323 = vmatmul.mubr.bf16.gmra.mrb[164].mxu0 %v5008_v24  ;;  %5404 = vmatprep.mubr.bf16.mxu1 %v5006_v1  ;;  %v9753_v48 = vld [vmem:[#allocation2] sm:$0xff] }
 0x782   : > { %4823 = vst.msk [vmem:[#allocation3 + $0xa0] sm:$0xff] %vm680_vm12, %v4804_v63  ;;  %4984 = vst.msk [vmem:[#allocation3 + $0x68] sm:$0xff] %vm680_vm12, %v4804_v63  ;;  %5329 = vmatprep.mubr.bf16.mxu0 %v5014_v44  ;;  %7919 = vmatpush3.bf16.msra.mxu0 %v8171_v8 }
 0x783   : > { %7920 = vmatprep.subr.bf16.mxu0 %v8172_v7  ;;  %5761 = vst.msk [vmem:[#allocation3] sm:$0xff] %vm295_vm4, %v9753_v48 }
 0x784   : > { %v4882_v12 = vpop.permute.xlu0 %4881  ;;  %v5018_v45 = vld [vmem:[#allocation3 + $0x78] sm:$0xff]  ;;  %v5024_v3 = vld [vmem:[#allocation3 + $0xa8] sm:$0xff] }
 0x785   : > { %4899 = vst.msk [vmem:[#allocation3 + $0xf8] sm:$0xff] %vm680_vm12, %v4882_v12  ;;  %v4806_v56 = vpop.permute.xlu1 %4805  ;;  %v5011_v5 = vld [vmem:[#allocation3 + $0x40] sm:$0xff] }
 0x786   : > { %4824 = vst.msk [vmem:[#allocation3 + $0xc8] sm:$0xff] %vm680_vm12, %v4806_v56  ;;  %4985 = vst.msk [vmem:[#allocation3 + $0x90] sm:$0xff] %vm680_vm12, %v4806_v56  ;;  %7921 = vmatpush3.bf16.msra.mxu0 %v8172_v7  ;;  %v9757_v7 = vld [vmem:[#allocation2 + $0x48] sm:$0xff] }
 0x788   : > { %v4884_v11 = vpop.permute.xlu0 %4883  ;;  %v5029_v27 = vld [vmem:[#allocation3 + $0xd0] sm:$0xff] }
 0x789   : > { %4900 = vst.msk [vmem:[#allocation3 + $0x120] sm:$0xff] %vm680_vm12, %v4884_v11  ;;  %v4808_v51 = vpop.permute.xlu1 %4807  ;;  %5330 = vmatmul.mubr.bf16.gmra.mrb[168].mxu0 %v5013_v26  ;;  %v5023_v9 = vld [vmem:[#allocation3 + $0xa0] sm:$0xff]  ;;  %v5016_v17 = vld [vmem:[#allocation3 + $0x68] sm:$0xff] }
 0x78a   : > { %4825 = vst.msk [vmem:[#allocation3 + $0xf0] sm:$0xff] %vm680_vm12, %v4808_v51  ;;  %4986 = vst.msk [vmem:[#allocation3 + $0xb8] sm:$0xff] %vm680_vm12, %v4808_v51  ;;  %5336 = vmatprep.mubr.bf16.mxu0 %v5019_v29 }
 0x78c   : > { %v4929_v18 = vpop.permute.xlu0 %4928  ;;  %v5034_v55 = vld [vmem:[#allocation3 + $0xf8] sm:$0xff] }
 0x78d   : > { %4952 = vst.msk [vmem:[#allocation3 + $0x10] sm:$0xff] %vm680_vm12, %v4929_v18  ;;  %v4810_v62 = vpop.permute.xlu1 %4809  ;;  %v5028_v43 = vld [vmem:[#allocation3 + $0xc8] sm:$0xff]  ;;  %v5021_v21 = vld [vmem:[#allocation3 + $0x90] sm:$0xff]  ;;  %v5947_v18 = vshll.u32 %v9757_v7, 16 }
 0x78e   : > { %4826 = vst.msk [vmem:[#allocation3 + $0x118] sm:$0xff] %vm680_vm12, %v4810_v62  ;;  %4987 = vst.msk [vmem:[#allocation3 + $0xe0] sm:$0xff] %vm680_vm12, %v4810_v62 }
 0x790   : > { %v4933_v16 = vpop.permute.xlu0 %4932  ;;  %v5039_v37 = vld [vmem:[#allocation3 + $0x120] sm:$0xff] }
 0x791   : > { %4954 = vst.msk [vmem:[#allocation3 + $0x60] sm:$0xff] %vm680_vm12, %v4933_v16  ;;  %v4931_v35 = vpop.permute.xlu1 %4930  ;;  %5337 = vmatmul.mubr.bf16.gmra.mrb[172].mxu0 %v5018_v45  ;;  %v5033_v28 = vld [vmem:[#allocation3 + $0xf0] sm:$0xff]  ;;  %v5026_v6 = vld [vmem:[#allocation3 + $0xb8] sm:$0xff]  ;;  %v9764_v16 = vrot.slane %v5947_v18, 1  ;;  %v8174_v45 = vld [vmem:[%s10126_s5] sm:$0xff]  }
 0x792   : > { %4953 = vst.msk [vmem:[#allocation3 + $0x38] sm:$0xff] %vm680_vm12, %v4931_v35  ;;  %5343 = vmatprep.mubr.bf16.mxu0 %v5024_v3  ;;  %v8173_v35 = vld [vmem:[%s10126_s5 + $0x40] sm:$0xff]   ;;  %v8175_v3 = vld [vmem:[%s10126_s5 + $0x48] sm:$0xff]  }
 0x793   : > { %7678 = vmatprep.subr.bf16.mxu1 %v8173_v35 }
 0x794   : > { %v4937_v32 = vpop.permute.xlu0 %4936  ;;  %v5005_v41 = vld [vmem:[#allocation3 + $0x10] sm:$0xff] }
 0x795   : > { %4956 = vst.msk [vmem:[#allocation3 + $0xb0] sm:$0xff] %vm680_vm12, %v4937_v32  ;;  %5405 = vmatmul.mubr.bf16.vlgmr.msra.gmra.mrb[160].mxu1 %v5005_v41  ;;  %v4935_v38 = vpop.permute.xlu1 %4934  ;;  %v5038_v20 = vld [vmem:[#allocation3 + $0x118] sm:$0xff]  ;;  %v5031_v42 = vld [vmem:[#allocation3 + $0xe0] sm:$0xff]  ;;  %v6010_v32 = vshrl.u32 %v9757_v7, 16 }
 0x796   : > { %4955 = vst.msk [vmem:[#allocation3 + $0x88] sm:$0xff] %vm680_vm12, %v4935_v38  ;;  %5411 = vmatprep.mubr.bf16.mxu1 %v5011_v5  ;;  %v5968_v38 = vrot.slane %v9757_v7, 1  ;;  %v5760_v5 = vld [vmem:[#allocation2 + $0x50] sm:$0xff]  ;;  %7679 = vmatpush3.bf16.msra.mxu1 %v8174_v45 }
 0x797   : > { %7680 = vmatprep.subr.bf16.mxu1 %v8175_v3  ;;  %v8189_v45 = vld [vmem:[%s10126_s5 + $0x30] sm:$0xff]  }
 0x798   : > { %v4977_v36 = vpop.permute.xlu0 %4976  ;;  %v5015_v58 = vld [vmem:[#allocation3 + $0x60] sm:$0xff] }
 0x799   : > { %4988 = vst.msk [vmem:[#allocation3 + $0x108] sm:$0xff] %vm680_vm12, %v4977_v36  ;;  %v4939_v40 = vpop.permute.xlu1 %4938  ;;  %5344 = vmatmul.mubr.bf16.gmra.mrb[176].mxu0 %v5023_v9  ;;  %v5010_v39 = vld [vmem:[#allocation3 + $0x38] sm:$0xff]  ;;  %v6012_v9 = vor.u32 %v6010_v32, %v9764_v16 }
 0x79a   : > { %4957 = vst.msk [vmem:[#allocation3 + $0xd8] sm:$0xff] %vm680_vm12, %v4939_v40  ;;  %5350 = vmatprep.mubr.bf16.mxu0 %v5029_v27  ;;  %v6014_v27 = vshll.u32 %v5760_v5, 16 }
 0x79c   : > { %v4979_v60 = vpop.permute.xlu0 %4978  ;;  %v5025_v54 = vld [vmem:[#allocation3 + $0xb0] sm:$0xff] }
 0x79d   : > { %5412 = vmatmul.mubr.bf16.gmra.mrb[164].mxu1 %v5010_v39  ;;  %v4941_v19 = vpop.permute.xlu1 %4940  ;;  %4989 = vst.msk [vmem:[#allocation3 + $0x130] sm:$0xff] %vm680_vm12, %v4979_v60  ;;  %v5020_v53 = vld [vmem:[#allocation3 + $0x88] sm:$0xff]  ;;  %v6033_v39 = vrot.slane %v5760_v5, 1 }
 0x79e   : > { %4958 = vst.msk [vmem:[#allocation3 + $0x100] sm:$0xff] %vm680_vm12, %v4941_v19  ;;  %5418 = vmatprep.mubr.bf16.mxu1 %v5016_v17  ;;  %v8176_v19 = vld [vmem:[%s10126_s5 + $0x8] sm:$0xff]   ;;  %v6016_v17 = vrot.slane %v6014_v27, 1 }
 0x79f   : > { %7681 = vmatpush3.bf16.msra.mxu1 %v8176_v19 }
 0x7a0   : > { %v5036_v33 = vld [vmem:[#allocation3 + $0x108] sm:$0xff] }
 0x7a1   : > { %v4943_v61 = vpop.permute.xlu1 %4942  ;;  %5351 = vmatmul.mubr.bf16.gmra.mrb[180].mxu0 %v5028_v43  ;;  %v5030_v15 = vld [vmem:[#allocation3 + $0xd8] sm:$0xff] }
 0x7a2   : > { %4959 = vst.msk [vmem:[#allocation3 + $0x128] sm:$0xff] %vm680_vm12, %v4943_v61  ;;  %5357 = vmatprep.mubr.bf16.mxu0 %v5034_v55  ;;  %v6034_v61 = vsel %vm698_vm11, %v5968_v38, %v6033_v39  ;;  %v8177_v43 = vld [vmem:[%s10126_s5 + $0x50] sm:$0xff]   ;;  %v8185_v55 = vld [vmem:[%s10126_s5 + $0xc0] sm:$0xff]  }
 0x7a3   : > { %6044 = vst.msk [vmem:[#allocation3 + $0x138] sm:$0xff] %vm295_vm4, %v6034_v61  ;;  %7742 = vmatprep.subr.bf16.mxu0 %v8185_v55  ;;  %7682 = vmatprep.subr.bf16.mxu1 %v8177_v43 }
 0x7a4   : > { %v5041_v46 = vld [vmem:[#allocation3 + $0x130] sm:$0xff] }
 0x7a5   : > { %5419 = vmatmul.mubr.bf16.gmra.mrb[168].mxu1 %v5015_v58  ;;  %v5035_v49 = vld [vmem:[#allocation3 + $0x100] sm:$0xff]  ;;  %6009 = vst.msk [vmem:[#allocation3 + $0x130] sm:$0xff] %vm295_vm4, %v9757_v7  ;;  %v8186_v58 = vld [vmem:[%s10126_s5 + $0x80] sm:$0xff]  }
 0x7a6   : > { %5425 = vmatprep.mubr.bf16.mxu1 %v5021_v21  ;;  %v8188_v21 = vld [vmem:[%s10126_s5 + $0xc8] sm:$0xff]  }
 0x7a9   : > { %5358 = vmatmul.mubr.bf16.gmra.mrb[184].mxu0 %v5033_v28  ;;  %v5040_v8 = vld [vmem:[#allocation3 + $0x128] sm:$0xff]  ;;  %v9800_v28 = vsel %vm587_vm10, %v6012_v9, %v6016_v17 }
 0x7aa   : > { %5364 = vmatprep.mubr.bf16.mxu0 %v5039_v37  ;;  %v8178_v37 = vld [vmem:[%s10126_s5 + $0x10] sm:$0xff]  }
 0x7ab   : > { %7683 = vmatpush3.bf16.msra.mxu1 %v8178_v37 }
 0x7ad   : > { %5426 = vmatmul.mubr.bf16.gmra.mrb[172].mxu1 %v5020_v53  ;;  %v8190_v53 = vld [vmem:[%s10126_s5 + $0x88] sm:$0xff]  }
 0x7ae   : > { %5432 = vmatprep.mubr.bf16.mxu1 %v5026_v6 }
 0x7b1   : > { %5365 = vmatmul.mubr.bf16.gmra.mrb[188].mxu0 %v5038_v20  ;;  %v8179_v20 = vld [vmem:[%s10126_s5 + $0x58] sm:$0xff]  }
 0x7b2   : > { %7922 = vmatprep.mubr.msk.bf16.mxu0 %vm295_vm4, %v5007_v31  ;;  %7684 = vmatprep.subr.bf16.mxu1 %v8179_v20 }
 0x7b5   : > { %5433 = vmatmul.mubr.bf16.gmra.mrb[176].mxu1 %v5025_v54 }
 0x7b6   : > { %5439 = vmatprep.mubr.bf16.mxu1 %v5031_v42 }
 0x7b9   : > { %7923 = vmatmul.mubr.msk.bf16.vlgmr.msra.gmra.mrb[192].mxu0 %vm295_vm4, %v5012_v52 }
 0x7ba   : > { %7926 = vmatprep.mubr.msk.bf16.mxu0 %vm295_vm4, %v5017_v0  ;;  %7743 = vmatpush3.bf16.msra.mxu0 %v8186_v58 }
 0x7bb   : > { %7744 = vmatprep.subr.bf16.mxu0 %v8188_v21 }
 0x7bd   : > { %5440 = vmatmul.mubr.bf16.gmra.mrb[180].mxu1 %v5030_v15  ;;  %v8180_v15 = vld [vmem:[%s10126_s5 + $0x18] sm:$0xff]  }
 0x7be   : > { %5446 = vmatprep.mubr.bf16.mxu1 %v5036_v33  ;;  %7745 = vmatpush3.bf16.msra.mxu0 %v8190_v53 }
 0x7bf   : > { %7685 = vmatpush3.bf16.msra.mxu1 %v8180_v15 }
 0x7c1   : > { %7927 = vmatmul.mubr.msk.bf16.gmra.mrb[196].mxu0 %vm295_vm4, %v5022_v10  ;;  %v8181_v10 = vld [vmem:[%s10126_s5 + $0x60] sm:$0xff]  }
 0x7c2   : > { %7930 = vmatprep.mubr.msk.bf16.mxu0 %vm295_vm4, %v5027_v59  ;;  %7686 = vmatprep.subr.bf16.mxu1 %v8181_v10 }
 0x7c5   : > { %5447 = vmatmul.mubr.bf16.gmra.mrb[184].mxu1 %v5035_v49 }
 0x7c6   : > { %5453 = vmatprep.mubr.bf16.mxu1 %v5041_v46 }
 0x7c9   : > { %7931 = vmatmul.mubr.msk.bf16.gmra.mrb[200].mxu0 %vm295_vm4, %v5032_v14 }
 0x7ca   : > { %7934 = vmatprep.mubr.msk.bf16.mxu0 %vm295_vm4, %v5037_v2  ;;  %v8182_v2 = vld [vmem:[%s10126_s5 + $0x20] sm:$0xff]  }
 0x7cb   : > { %7687 = vmatpush3.bf16.msra.mxu1 %v8182_v2 }
 0x7cd   : > { %5454 = vmatmul.mubr.bf16.gmra.mrb[188].mxu1 %v5040_v8 }
 0x7d1   : > { %7935 = vmatmul.mubr.msk.bf16.gmra.mrb[204].mxu0 %vm295_vm4, %v5042_v23  ;;  %v8183_v23 = vld [vmem:[%s10126_s5 + $0x68] sm:$0xff]  }
 0x7d2   : > { %7688 = vmatprep.subr.bf16.mxu1 %v8183_v23 }
 0x84c   : > { %v7554_v63 = vpop.f32.mrb[160].mxu0 }
 0x84d   : > { %v7555_v24 = vpop.f32.mrb[161].mxu0 }
 0x84e   : > { %v7556_v1 = vadd.f32 %v7555_v24, %v7554_v63  ;;  %v7557_v44 = vpop.f32.mrb[162].mxu0 }
 0x84f   : > { %v7558_v12 = vpop.f32.mrb[163].mxu0 }
 0x854   : > { %v7560_v56 = vpop.f32.mrb[164].mxu0 }
 0x855   : > { %v7561_v11 = vpop.f32.mrb[165].mxu0 }
 0x856   : > { %v9761_v51 = vadd.f32 %v7561_v11, %v7560_v56  ;;  %v7563_v26 = vpop.f32.mrb[166].mxu0 }
 0x857   : > { %v7564_v29 = vpop.f32.mrb[167].mxu0  ;;  %v8187_v26 = vld [vmem:[%s10126_s5 + $0x70] sm:$0xff]  }
 0x85c   : > { %v7566_v62 = vpop.f32.mrb[168].mxu0 }
 0x85d   : > { %v7567_v41 = vpop.f32.mrb[169].mxu0 }
 0x85e   : > { %v9777_v36 = vadd.f32 %v7567_v41, %v7566_v62  ;;  %v7569_v40 = vpop.f32.mrb[170].mxu0 }
 0x85f   : > { %v7570_v60 = vpop.f32.mrb[171].mxu0 }
 0x864   : > { %v7572_v6 = vpop.f32.mrb[172].mxu0 }
 0x865   : > { %v7573_v31 = vpop.f32.mrb[173].mxu0 }
 0x866   : > { %v7574_v54 = vadd.f32 %v7573_v31, %v7572_v6  ;;  %v7575_v42 = vpop.f32.mrb[174].mxu0 }
 0x867   : > { %v7576_v52 = vpop.f32.mrb[175].mxu0 }
 0x868   : > { %v7618_v0 = vpop.f32.mrb[160].mxu1 }
 0x869   : > { %v7619_v33 = vpop.f32.mrb[161].mxu1 }
 0x86a   : > { %v7620_v59 = vadd.f32 %v7619_v33, %v7618_v0  ;;  %v7621_v46 = vpop.f32.mrb[162].mxu1 }
 0x86b   : > { %v7622_v49 = vpop.f32.mrb[163].mxu1 }
 0x86c   : > { %v5407_v14 = vadd.f32 %v7620_v59, %v7556_v1  ;;  %v7578_v8 = vpop.f32.mrb[176].mxu0  ;;  %v8184_v1 = vld [vmem:[%s10126_s5 + $0x28] sm:$0xff]  }
 0x86d   : > { %v7579_v63 = vpop.f32.mrb[177].mxu0  ;;  %7689 = vmatpush3.bf16.msra.mxu1 %v8184_v1 }
 0x86e   : > { %v7580_v24 = vadd.f32 %v7579_v63, %v7578_v8  ;;  %v7581_v44 = vpop.f32.mrb[178].mxu0  ;;  %7690 = vmatprep.subr.bf16.mxu1 %v8187_v26 }
 0x86f   : > { %v7582_v12 = vpop.f32.mrb[179].mxu0  ;;  %v9841_v44 = vld [vmem:[%s10125_s4 + $0x3] ss:$0 sm:$0xff] }
 0x870   : > { %v7624_v56 = vpop.f32.mrb[164].mxu1 }
 0x871   : > { %v7625_v11 = vpop.f32.mrb[165].mxu1  ;;  %7691 = vmatpush3.bf16.msra.mxu1 %v8189_v45 }
 0x872   : > { %v7626_v29 = vadd.f32 %v7625_v11, %v7624_v56  ;;  %v7627_v18 = vpop.f32.mrb[166].mxu1 }
 0x873   : > { %v7628_v62 = vpop.f32.mrb[167].mxu1 }
 0x874   : > { %v5414_v35 = vadd.f32 %v7626_v29, %v9761_v51  ;;  %v7584_v3 = vpop.f32.mrb[180].mxu0 }
 0x875   : > { %v7585_v32 = vpop.f32.mrb[181].mxu0 }
 0x876   : > { %v7586_v41 = vadd.f32 %v7585_v32, %v7584_v3  ;;  %v7587_v5 = vpop.f32.mrb[182].mxu0 }
 0x877   : > { %v7588_v40 = vpop.f32.mrb[183].mxu0 }
 0x878   : > { %v7630_v9 = vpop.f32.mrb[168].mxu1 }
 0x879   : > { %v7631_v27 = vpop.f32.mrb[169].mxu1 }
 0x87a   : > { %v7632_v39 = vadd.f32 %v7631_v27, %v7630_v9  ;;  %v7633_v60 = vpop.f32.mrb[170].mxu1 }
 0x87b   : > { %v7634_v19 = vpop.f32.mrb[171].mxu1 }
 0x87c   : > { %v5421_v17 = vadd.f32 %v7632_v39, %v9777_v36  ;;  %v7590_v51 = vpop.f32.mrb[184].mxu0 }
 0x87d   : > { %v7591_v61 = vpop.f32.mrb[185].mxu0 }
 0x87e   : > { %v9834_v43 = vadd.f32 %v7591_v61, %v7590_v51  ;;  %v7593_v55 = vpop.f32.mrb[186].mxu0 }
 0x87f   : > { %v7594_v58 = vpop.f32.mrb[187].mxu0 }
 0x880   : > { %v7636_v21 = vpop.f32.mrb[172].mxu1 }
 0x881   : > { %v7637_v37 = vpop.f32.mrb[173].mxu1 }
 0x882   : > { %v7638_v53 = vadd.f32 %v7637_v37, %v7636_v21  ;;  %v7639_v6 = vpop.f32.mrb[174].mxu1 }
 0x883   : > { %v7640_v20 = vpop.f32.mrb[175].mxu1 }
 0x884   : > { %v5428_v31 = vadd.f32 %v7638_v53, %v7574_v54  ;;  %v7596_v42 = vpop.f32.mrb[188].mxu0 }
 0x885   : > { %v7597_v52 = vpop.f32.mrb[189].mxu0 }
 0x886   : > { %v9836_v0 = vadd.f32 %v7597_v52, %v7596_v42  ;;  %v7599_v15 = vpop.f32.mrb[190].mxu0 }
 0x887   : > { %v7600_v33 = vpop.f32.mrb[191].mxu0 }
 0x888   : > { %v7642_v10 = vpop.f32.mrb[176].mxu1 }
 0x889   : > { %v7643_v36 = vpop.f32.mrb[177].mxu1 }
 0x88a   : > { %v7644_v59 = vadd.f32 %v7643_v36, %v7642_v10  ;;  %v7645_v46 = vpop.f32.mrb[178].mxu1  ;;  %v5657_v36 = vld [vmem:[#allocation2 + $0x10] sm:$0x1f] }
 0x88b   : > { %v7646_v49 = vpop.f32.mrb[179].mxu1 }
 0x88c   : > { %v5435_v2 = vadd.f32 %v7644_v59, %v7580_v24  ;;  %v7924_v8 = vpop.f32.mrb[192].mxu0 }
 0x88d   : > { %v5503_v23 = vadd.f32 %v7924_v8, %v5414_v35  ;;  %v5495_v63 = vpop.f32.mrb[193].mxu0 }
 0x88e   : > { %v5496_v54 = vadd.f32 %v5495_v63, %v5407_v14  ;;  %v7925_v12 = vpop.f32.mrb[194].mxu0 }
 0x88f   : > { %v5551_v56 = vadd.f32 %v5503_v23, %v9285_v13  ;;  %v5498_v11 = vpop.f32.mrb[195].mxu0  ;;  %v5654_v23 = vld [vmem:[#allocation2 + $0x8] sm:$0x1f] }
 0x890   : > { %v7648_v1 = vpop.f32.mrb[180].mxu1  ;;  %v5550_v26 = vadd.f32 %v5496_v54, %v9288_v47 }
 0x891   : > { %v7649_v29 = vpop.f32.mrb[181].mxu1  ;;  %v5567_v18 = vadd.f32 %v9841_v44, %v5551_v56 }
 0x892   : > { %v7650_v24 = vadd.f32 %v7649_v29, %v7648_v1  ;;  %v7651_v62 = vpop.f32.mrb[182].mxu1  ;;  %v5566_v35 = vadd.f32 %v9841_v44, %v5550_v26  ;;  %v8193_v26 = vld [vmem:[%s10126_s5 + $0x78] sm:$0xff]  }
 0x893   : > { %v7652_v45 = vpop.f32.mrb[183].mxu1  ;;  %v5575_v3 = vmax.f32 %v5567_v18, 0.0  ;;  %v8194_v29 = vld [vmem:[%s10126_s5 + $0xd8] sm:$0xff]   ;;  %7692 = vmatprep.subr.bf16.mxu1 %v8193_v26 }
 0x894   : > { %v5442_v32 = vadd.f32 %v7650_v24, %v7586_v41  ;;  %v5574_v5 = vmax.f32 %v5566_v35, 0.0  ;;  %v7928_v40 = vpop.f32.mrb[196].mxu0  ;;  %v5772_v45 = vshll.u32 %v9753_v48, 16 }
 0x895   : > { %v5583_v14 = vpack.c.bf16 %v5575_v3, %v5575_v3  ;;  %v5517_v9 = vadd.f32 %v7928_v40, %v5428_v31  ;;  %v5509_v27 = vpop.f32.mrb[197].mxu0  ;;  %v8196_v3 = vld [vmem:[%s10126_s5 + $0x98] sm:$0xff]  }
 0x896   : > { %v5582_v13 = vpack.c.bf16 %v5574_v5, %v5574_v5  ;;  %v5510_v39 = vadd.f32 %v5509_v27, %v5421_v17  ;;  %v7929_v60 = vpop.f32.mrb[198].mxu0 }
 0x897   : > { %v5598_v19 = vshrl.u32 %v5583_v14, 16  ;;  %v5553_v47 = vadd.f32 %v5517_v9, %v9297_v34  ;;  %v5512_v61 = vpop.f32.mrb[199].mxu0  ;;  %v5601_v53 = vshll.u32 %v5583_v14, 16  ;;  %v8191_v34 = vld [vmem:[%s10126_s5 + $0xd0] sm:$0xff]  }
 0x898   : > { %v7654_v51 = vpop.f32.mrb[184].mxu1  ;;  %v5591_v55 = vshrl.u32 %v5582_v13, 16  ;;  %v5552_v58 = vadd.f32 %v5510_v39, %v9300_v30  ;;  %v5594_v42 = vshll.u32 %v5582_v13, 16  ;;  %v8192_v30 = vld [vmem:[%s10126_s5 + $0x90] sm:$0xff]   ;;  %7746 = vmatprep.subr.bf16.mxu0 %v8191_v34 }
 0x899   : > { %v7655_v21 = vpop.f32.mrb[185].mxu1  ;;  %v5600_v37 = vrot.slane %v5598_v19, 7  ;;  %v5569_v41 = vadd.f32 %v9841_v44, %v5553_v47  ;;  %7747 = vmatpush3.bf16.msra.mxu0 %v8192_v30 }
 0x89a   : > { %v7656_v6 = vadd.f32 %v7655_v21, %v7654_v51  ;;  %v7657_v20 = vpop.f32.mrb[186].mxu1  ;;  %v5593_v31 = vrot.slane %v5591_v55, 7  ;;  %v5568_v17 = vadd.f32 %v9841_v44, %v5552_v58  ;;  %7748 = vmatprep.subr.bf16.mxu0 %v8194_v29  ;;  %v5770_v51 = vshrl.u32 %v9753_v48, 16 }
 0x89b   : > { %v7658_v52 = vpop.f32.mrb[187].mxu1  ;;  %v5603_v15 = vor.u32 %v5601_v53, %v5600_v37  ;;  %v5577_v33 = vmax.f32 %v5569_v41, 0.0  ;;  %v5774_v21 = vrot.slane %v5772_v45, 1  ;;  %v8198_v37 = vld [vmem:[%s10126_s5 + $0xa0] sm:$0xff]  }
 0x89c   : > { %v9858_v10 = vadd.f32 %v7656_v6, %v9834_v43  ;;  %v5596_v59 = vor.u32 %v5594_v42, %v5593_v31  ;;  %v5576_v46 = vmax.f32 %v5568_v17, 0.0  ;;  %v7932_v49 = vpop.f32.mrb[200].mxu0  ;;  %v5663_v53 = vld [vmem:[#allocation2 + $0x20] sm:$0x1f]  ;;  %v5660_v42 = vld [vmem:[#allocation2 + $0x18] sm:$0x1f] }
 0x89d   : > { %v5658_v8 = vsel %vm8385_vm9, %v5603_v15, %v5657_v36  ;;  %v5585_v63 = vpack.c.bf16 %v5577_v33, %v5577_v33  ;;  %v5531_v54 = vadd.f32 %v7932_v49, %v5442_v32  ;;  %v5523_v12 = vpop.f32.mrb[201].mxu0  ;;  %7749 = vmatpush3.bf16.msra.mxu0 %v8196_v3  ;;  %v8202_v3 = vld [vmem:[%s10126_s5 + $0xf0] sm:$0xff]  }
 0x89e   : > { %5659 = vst [vmem:[#allocation2 + $0x10] sm:$0x1f] %v5658_v8  ;;  %v5655_v56 = vsel %vm8385_vm9, %v5596_v59, %v5654_v23  ;;  %v5584_v1 = vpack.c.bf16 %v5576_v46, %v5576_v46  ;;  %v5524_v43 = vadd.f32 %v5523_v12, %v5435_v2  ;;  %v7933_v11 = vpop.f32.mrb[202].mxu0  ;;  %v8195_v2 = vld [vmem:[%s10126_s5 + $0x38] sm:$0xff]   ;;  %v9908_v8 = vld [vmem:[%s10126_s5 + $0x100] sm:$0xff]  }
 0x89f   : > { %5656 = vst [vmem:[#allocation2 + $0x8] sm:$0x1f] %v5655_v56  ;;  %v5612_v18 = vshrl.u32 %v5585_v63, 16  ;;  %v5555_v24 = vadd.f32 %v5531_v54, %v9318_v4  ;;  %v5526_v35 = vpop.f32.mrb[203].mxu0  ;;  %v5615_v4 = vshll.u32 %v5585_v63, 16  ;;  %7693 = vmatpush3.bf16.msra.mxu1 %v8195_v2  ;;  %v5775_v63 = vor.u32 %v5774_v21, %v5770_v51  ;;  %v8201_v56 = vld [vmem:[%s10126_s5 + $0xa8] sm:$0xff]  }
 0x8a0   : > { %v7660_v62 = vpop.f32.mrb[188].mxu1  ;;  %v5605_v32 = vshrl.u32 %v5584_v1, 16  ;;  %v5554_v5 = vadd.f32 %v5524_v43, %v9321_v50  ;;  %v5608_v60 = vshll.u32 %v5584_v1, 16  ;;  %v8197_v50 = vld [vmem:[%s10126_s5 + $0xe0] sm:$0xff]   ;;  %7938 = vmatprep.subr.bf16.mxu1 %v9908_v8 }
 0x8a1   : > { %v7661_v40 = vpop.f32.mrb[189].mxu1  ;;  %v5614_v14 = vrot.slane %v5612_v18, 7  ;;  %v5571_v9 = vadd.f32 %v9841_v44, %v5555_v24  ;;  %7750 = vmatprep.subr.bf16.mxu0 %v8197_v50 }
 0x8a2   : > { %v7662_v27 = vadd.f32 %v7661_v40, %v7660_v62  ;;  %v7663_v13 = vpop.f32.mrb[190].mxu1  ;;  %v5607_v39 = vrot.slane %v5605_v32, 7  ;;  %v5570_v19 = vadd.f32 %v9841_v44, %v5554_v5  ;;  %7751 = vmatpush3.bf16.msra.mxu0 %v8198_v37 }
 0x8a3   : > { %v7664_v47 = vpop.f32.mrb[191].mxu1  ;;  %v5617_v61 = vor.u32 %v5615_v4, %v5614_v14  ;;  %v5579_v55 = vmax.f32 %v5571_v9, 0.0  ;;  %v8203_v14 = vld [vmem:[%s10126_s5 + $0xb0] sm:$0xff]  }
 0x8a4   : > { %v5456_v58 = vadd.f32 %v7662_v27, %v9836_v0  ;;  %v5610_v41 = vor.u32 %v5608_v60, %v5607_v39  ;;  %v5578_v6 = vmax.f32 %v5570_v19, 0.0  ;;  %v7936_v20 = vpop.f32.mrb[204].mxu0  ;;  %v5878_v0 = vrot.slane %v9753_v48, 1  ;;  %v8199_v48 = vld [vmem:[%s10126_s5 + $0xe8] sm:$0xff]   ;;  %v5669_v4 = vld [vmem:[#allocation2 + $0x30] sm:$0x1f] }
 0x8a5   : > { %v5664_v31 = vsel %vm8385_vm9, %v5617_v61, %v5663_v53  ;;  %v5587_v17 = vpack.c.bf16 %v5579_v55, %v5579_v55  ;;  %v5537_v34 = vpop.f32.mrb[205].mxu0  ;;  %v9891_v30 = vld [vmem:[#allocation2 + $0x10] sm:$0xff]  ;;  %7752 = vmatprep.subr.bf16.mxu0 %v8199_v48  ;;  %v5666_v19 = vld [vmem:[#allocation2 + $0x28] sm:$0x1f] }
 0x8a6   : > { %v5545_v52 = vadd.f32 %v7936_v20, %v5456_v58  ;;  %5665 = vst [vmem:[#allocation2 + $0x20] sm:$0x1f] %v5664_v31  ;;  %v5661_v15 = vsel %vm8385_vm9, %v5610_v41, %v5660_v42  ;;  %v5586_v33 = vpack.c.bf16 %v5578_v6, %v5578_v6  ;;  %v5538_v36 = vadd.f32 %v5537_v34, %v9858_v10  ;;  %v5751_v59 = vld [vmem:[#allocation2 + $0x8] sm:$0xff]  ;;  %v7937_v49 = vpop.f32.mrb[206].mxu0  ;;  %v8205_v20 = vld [vmem:[%s10126_s5 + $0xb8] sm:$0xff]  }
 0x8a7   : > { %5763 = vst.msk [vmem:[#allocation3 + $0x50] sm:$0xff] %vm295_vm4, %v9891_v30  ;;  %6002 = vst.msk [vmem:[#allocation3 + $0x18] sm:$0xff] %vm295_vm4, %v9891_v30  ;;  %v5785_v46 = vshll.u32 %v9891_v30, 16  ;;  %v5626_v10 = vshrl.u32 %v5587_v17, 16  ;;  %5911 = vrot.lane.b32.xlu0 %v5751_v59, %s8253_s12  ;;  %v5777_v54 = vshll.u32 %v5751_v59, 16  ;;  %v5540_v12 = vpop.f32.mrb[207].mxu0  ;;  %7753 = vmatpush3.bf16.msra.mxu0 %v8201_v56 }
 0x8a8   : > { %5662 = vst [vmem:[#allocation2 + $0x18] sm:$0x1f] %v5661_v15  ;;  %v5557_v23 = vadd.f32 %v5545_v52, %v9350_v57  ;;  %5762 = vst.msk [vmem:[#allocation3 + $0x28] sm:$0xff] %vm295_vm4, %v5751_v59  ;;  %v5629_v1 = vshll.u32 %v5587_v17, 16  ;;  %v5619_v43 = vshrl.u32 %v5586_v33, 16  ;;  %v5622_v11 = vshll.u32 %v5586_v33, 16  ;;  %7754 = vmatprep.subr.bf16.mxu0 %v8202_v3 }
 0x8a9   : > { %v5556_v26 = vadd.f32 %v5538_v36, %v9356_v22  ;;  %v5628_v57 = vrot.slane %v5626_v10, 7  ;;  %v5779_v18 = vrot.slane %v5777_v54, 1  ;;  %v5781_v24 = vshrl.u32 %v5751_v59, 16  ;;  %v5672_v56 = vld [vmem:[#allocation2 + $0x38] sm:$0x1f] }
 0x8aa   : > { %v5573_v29 = vadd.f32 %v9841_v44, %v5557_v23  ;;  %v5621_v62 = vrot.slane %v5619_v43, 7  ;;  %v5787_v45 = vrot.slane %v5785_v46, 1  ;;  %v5879_v2 = vrot.slane %v5751_v59, 1  ;;  %v5675_v23 = vld [vmem:[#allocation2 + $0x40] sm:$0x1f] }
 0x8ab   : > { %v5572_v35 = vadd.f32 %v9841_v44, %v5556_v26  ;;  %v5631_v32 = vor.u32 %v5629_v1, %v5628_v57  ;;  %5913 = vrot.lane.b32.xlu0 %v9891_v30, %s8253_s12  ;;  %v5780_v5 = vsel %vm587_vm10, %v5775_v63, %v5779_v18  ;;  %v5783_v40 = vor.u32 %v5781_v24, %v5779_v18  ;;  %v8204_v44 = vld [vmem:[%s10126_s5 + $0xf8] sm:$0xff]  }
 0x8ac   : > { %v5581_v22 = vmax.f32 %v5573_v29, 0.0  ;;  %v5624_v9 = vor.u32 %v5622_v11, %v5621_v62  ;;  %5837 = vrot.lane.b32.xlu1 %v5780_v5, %s8253_s12  ;;  %v5789_v13 = vshrl.u32 %v9891_v30, 16  ;;  %v5881_v39 = vrot.slane %v9891_v30, 1  ;;  %7755 = vmatpush3.bf16.msra.mxu0 %v8203_v14 }
 0x8ad   : > { %v5580_v27 = vmax.f32 %v5572_v35, 0.0  ;;  %v5670_v60 = vsel %vm8385_vm9, %v5631_v32, %v5669_v4  ;;  %v5788_v51 = vsel %vm587_vm10, %v5783_v40, %v5787_v45  ;;  %v9938_v50 = vld [vmem:[#allocation2 + $0x20] sm:$0xff]  ;;  %v5880_v61 = vsel %vm698_vm11, %v5878_v0, %v5879_v2  ;;  %7756 = vmatprep.subr.bf16.mxu0 %v8204_v44 }
 0x8ae   : > { %v5589_v47 = vpack.c.bf16 %v5581_v22, %v5581_v22  ;;  %5671 = vst [vmem:[#allocation2 + $0x30] sm:$0x1f] %v5670_v60  ;;  %v5667_v55 = vsel %vm8385_vm9, %v5624_v9, %v5666_v19  ;;  %5959 = vst.msk [vmem:[#allocation3 + $0x10] sm:$0xff] %vm295_vm4, %v5788_v51  ;;  %v5882_v37 = vsel %vm698_vm11, %v5879_v2, %v5881_v39  ;;  %v5801_v53 = vshll.u32 %v9938_v50, 16 }
 0x8af   : > { %v5588_v58 = vpack.c.bf16 %v5580_v27, %v5580_v27  ;;  %v5753_v21 = vld [vmem:[#allocation2 + $0x18] sm:$0xff]  ;;  %5765 = vst.msk [vmem:[#allocation3 + $0xa0] sm:$0xff] %vm295_vm4, %v9938_v50  ;;  %6004 = vst.msk [vmem:[#allocation3 + $0x68] sm:$0xff] %vm295_vm4, %v9938_v50  ;;  %v5791_v17 = vor.u32 %v5789_v13, %v5787_v45  ;;  %v5885_v15 = vrot.slane %v9938_v50, 1  ;;  %v5805_v57 = vshrl.u32 %v9938_v50, 16 }
 0x8b0   : > { %5903 = vst.msk [vmem:[#allocation3 + $0x8] sm:$0xff] %vm295_vm4, %v5880_v61  ;;  %5668 = vst [vmem:[#allocation2 + $0x28] sm:$0x1f] %v5667_v55  ;;  %v5640_v41 = vshrl.u32 %v5589_v47, 16  ;;  %5915 = vrot.lane.b32.xlu0 %v5753_v21, %s8253_s12  ;;  %v5793_v6 = vshll.u32 %v5753_v21, 16  ;;  %v5643_v31 = vshll.u32 %v5589_v47, 16  ;;  %5839 = vrot.lane.b32.xlu1 %v5788_v51, %s8253_s12 }
 0x8b1   : > { %5764 = vst.msk [vmem:[#allocation3 + $0x78] sm:$0xff] %vm295_vm4, %v5753_v21  ;;  %6003 = vst.msk [vmem:[#allocation3 + $0x40] sm:$0xff] %vm295_vm4, %v5753_v21  ;;  %v5633_v42 = vshrl.u32 %v5588_v58, 16  ;;  %v5797_v52 = vshrl.u32 %v5753_v21, 16  ;;  %v5883_v0 = vrot.slane %v5753_v21, 1  ;;  %7757 = vmatpush3.bf16.msra.mxu0 %v8205_v20  ;;  %v5636_v36 = vshll.u32 %v5588_v58, 16 }
 0x8b2   : > { %5904 = vst.msk [vmem:[#allocation3 + $0x30] sm:$0xff] %vm295_vm4, %v5882_v37  ;;  %v5642_v34 = vrot.slane %v5640_v41, 7  ;;  %v5795_v30 = vrot.slane %v5793_v6, 1  ;;  %v5803_v59 = vrot.slane %v5801_v53, 1 }
 0x8b3   : > { %v5635_v33 = vrot.slane %v5633_v42, 7  ;;  %v5884_v10 = vsel %vm698_vm11, %v5881_v39, %v5883_v0  ;;  %v9969_v54 = vsel %vm698_vm11, %v5883_v0, %v5885_v15 }
 0x8b4   : > { %v5645_v46 = vor.u32 %v5643_v31, %v5642_v34  ;;  %5917 = vrot.lane.b32.xlu0 %v9938_v50, %s8253_s12  ;;  %v5796_v49 = vsel %vm587_vm10, %v5791_v17, %v5795_v30  ;;  %v5799_v48 = vor.u32 %v5797_v52, %v5795_v30  ;;  %6037 = vst.msk [vmem:[#allocation3 + $0x20] sm:$0xff] %vm295_vm4, %v5884_v10  ;;  %5905 = vst.msk [vmem:[#allocation3 + $0x58] sm:$0xff] %vm295_vm4, %v5884_v10  ;;  %v8206_v17 = vld [vmem:[%s10126_s5 + $0x108] sm:$0xff]  }
 0x8b5   : > { %v5638_v63 = vor.u32 %v5636_v36, %v5635_v33  ;;  %5841 = vrot.lane.b32.xlu1 %v5796_v49, %s8253_s12  ;;  %5960 = vst.msk [vmem:[#allocation3 + $0x38] sm:$0xff] %vm295_vm4, %v5796_v49  ;;  %v5756_v43 = vld [vmem:[#allocation2 + $0x30] sm:$0xff]  ;;  %6038 = vst.msk [vmem:[#allocation3 + $0x48] sm:$0xff] %vm295_vm4, %v9969_v54  ;;  %v5807_v62 = vor.u32 %v5805_v57, %v5803_v59 }
 0x8b6   : > { %v5676_v12 = vsel %vm8385_vm9, %v5645_v46, %v5675_v23  ;;  %v5804_v1 = vsel %vm587_vm10, %v5799_v48, %v5803_v59  ;;  %5906 = vst.msk [vmem:[#allocation3 + $0x80] sm:$0xff] %vm295_vm4, %v9969_v54  ;;  %5767 = vst.msk [vmem:[#allocation3 + $0xf0] sm:$0xff] %vm295_vm4, %v5756_v43  ;;  %v5889_v29 = vrot.slane %v5756_v43, 1  ;;  %v5817_v25 = vshll.u32 %v5756_v43, 16 }
 0x8b7   : > { %5677 = vst [vmem:[#allocation2 + $0x40] sm:$0x1f] %v5676_v12  ;;  %v5673_v11 = vsel %vm8385_vm9, %v5638_v63, %v5672_v56  ;;  %5961 = vst.msk [vmem:[#allocation3 + $0x60] sm:$0xff] %vm295_vm4, %v5804_v1  ;;  %v5755_v26 = vld [vmem:[#allocation2 + $0x28] sm:$0xff]  ;;  %v5821_v4 = vshrl.u32 %v5756_v43, 16 }
 0x8b8   : > { %6006 = vst.msk [vmem:[#allocation3 + $0xb8] sm:$0xff] %vm295_vm4, %v5756_v43  ;;  %5674 = vst [vmem:[#allocation2 + $0x38] sm:$0x1f] %v5673_v11  ;;  %5970 = vrot.lane.b32.xlu0 %v5882_v37, %s8253_s12  ;;  %v5809_v18 = vshll.u32 %v5755_v26, 16  ;;  %v5887_v24 = vrot.slane %v5755_v26, 1  ;;  %v5813_v45 = vshrl.u32 %v5755_v26, 16 }
 0x8b9   : > { %5766 = vst.msk [vmem:[#allocation3 + $0xc8] sm:$0xff] %vm295_vm4, %v5755_v26  ;;  %6005 = vst.msk [vmem:[#allocation3 + $0x90] sm:$0xff] %vm295_vm4, %v5755_v26  ;;  %5843 = vrot.lane.b32.xlu1 %v5804_v1, %s8253_s12  ;;  %v5819_v5 = vrot.slane %v5817_v25, 1 }
 0x8ba   : > { %v5811_v35 = vrot.slane %v5809_v18, 1  ;;  %v5888_v2 = vsel %vm698_vm11, %v5885_v15, %v5887_v24  ;;  %v5890_v3 = vsel %vm698_vm11, %v5887_v24, %v5889_v29  ;;  %v8207_v15 = vld [vmem:[%s10126_s5 + $0x110] sm:$0xff]  }
 0x8bb   : > { %6039 = vst.msk [vmem:[#allocation3 + $0x70] sm:$0xff] %vm295_vm4, %v5888_v2  ;;  %5907 = vst.msk [vmem:[#allocation3 + $0xa8] sm:$0xff] %vm295_vm4, %v5888_v2  ;;  %v5823_v60 = vor.u32 %v5821_v4, %v5819_v5 }
 0x8bc   : > { %6040 = vst.msk [vmem:[#allocation3 + $0x98] sm:$0xff] %vm295_vm4, %v5890_v3  ;;  %5908 = vst.msk [vmem:[#allocation3 + $0xd0] sm:$0xff] %vm295_vm4, %v5890_v3  ;;  %v5812_v32 = vsel %vm587_vm10, %v5807_v62, %v5811_v35  ;;  %v5815_v22 = vor.u32 %v5813_v45, %v5811_v35 }
 0x8bd   : > { %5919 = vrot.lane.b32.xlu1 %v5755_v26, %s8253_s12  ;;  %5845 = vrot.lane.b32.xlu0 %v5812_v32, %s8253_s12  ;;  %5962 = vst.msk [vmem:[#allocation3 + $0x88] sm:$0xff] %vm295_vm4, %v5812_v32 }
 0x8be   : > { %v5820_v40 = vsel %vm587_vm10, %v5815_v22, %v5819_v5  ;;  %v5758_v14 = vld [vmem:[#allocation2 + $0x40] sm:$0xff] }
 0x8bf   : > { %5963 = vst.msk [vmem:[#allocation3 + $0xb0] sm:$0xff] %vm295_vm4, %v5820_v40  ;;  %v5757_v44 = vld [vmem:[#allocation2 + $0x38] sm:$0xff]  ;;  %6008 = vst.msk [vmem:[#allocation3 + $0x108] sm:$0xff] %vm295_vm4, %v5758_v14  ;;  %v5833_v9 = vshll.u32 %v5758_v14, 16  ;;  %v5893_v27 = vrot.slane %v5758_v14, 1  ;;  %v5943_v47 = vshrl.u32 %v5758_v14, 16 }
 0x8c0   : > { %5768 = vst.msk [vmem:[#allocation3 + $0x118] sm:$0xff] %vm295_vm4, %v5757_v44  ;;  %6007 = vst.msk [vmem:[#allocation3 + $0xe0] sm:$0xff] %vm295_vm4, %v5757_v44  ;;  %v5825_v13 = vshll.u32 %v5757_v44, 16  ;;  %v5891_v39 = vrot.slane %v5757_v44, 1  ;;  %v5829_v61 = vshrl.u32 %v5757_v44, 16 }
 0x8c1   : > { %5972 = vrot.lane.b32.xlu1 %v5884_v10, %s8253_s12  ;;  %5921 = vrot.lane.b32.xlu0 %v5756_v43, %s8253_s12  ;;  %v5835_v19 = vrot.slane %v5833_v9, 1  ;;  %v5969_v51 = vsel %vm698_vm11, %v5893_v27, %v5968_v38 }
 0x8c2   : > { %v5827_v50 = vrot.slane %v5825_v13, 1  ;;  %v5892_v55 = vsel %vm698_vm11, %v5889_v29, %v5891_v39  ;;  %v5894_v58 = vsel %vm698_vm11, %v5891_v39, %v5893_v27  ;;  %6043 = vst.msk [vmem:[#allocation3 + $0x110] sm:$0xff] %vm295_vm4, %v5969_v51 }
 0x8c3   : > { %6041 = vst.msk [vmem:[#allocation3 + $0xc0] sm:$0xff] %vm295_vm4, %v5892_v55  ;;  %5909 = vst.msk [vmem:[#allocation3 + $0xf8] sm:$0xff] %vm295_vm4, %v5892_v55  ;;  %v5945_v21 = vor.u32 %v5943_v47, %v5835_v19 }
 0x8c4   : > { %6042 = vst.msk [vmem:[#allocation3 + $0xe8] sm:$0xff] %vm295_vm4, %v5894_v58  ;;  %5910 = vst.msk [vmem:[#allocation3 + $0x120] sm:$0xff] %vm295_vm4, %v5894_v58  ;;  %v5828_v7 = vsel %vm587_vm10, %v5823_v60, %v5827_v50  ;;  %v5831_v38 = vor.u32 %v5829_v61, %v5827_v50 }
 0x8c5   : > { %5847 = vrot.lane.b32.xlu1 %v5820_v40, %s8253_s12  ;;  %5974 = vrot.lane.b32.xlu0 %v9969_v54, %s8253_s12  ;;  %5964 = vst.msk [vmem:[#allocation3 + $0xd8] sm:$0xff] %vm295_vm4, %v5828_v7  ;;  %v5950_v37 = vsel %vm587_vm10, %v5945_v21, %v9764_v16 }
 0x8c6   : > { %v5836_v53 = vsel %vm587_vm10, %v5831_v38, %v5835_v19  ;;  %5966 = vst.msk [vmem:[#allocation3 + $0x128] sm:$0xff] %vm295_vm4, %v5950_v37  ;;  %v6054_v38 = vld [vmem:[#allocation3 + $0x48] sm:$0xff] }
 0x8c7   : > { %5965 = vst.msk [vmem:[#allocation3 + $0x100] sm:$0xff] %vm295_vm4, %v5836_v53 }
 0x8c9   : > { %5923 = vrot.lane.b32.xlu1 %v5757_v44, %s8253_s12  ;;  %5849 = vrot.lane.b32.xlu0 %v5828_v7, %s8253_s12 }
 0x8cd   : > { %5976 = vrot.lane.b32.xlu1 %v5888_v2, %s8253_s12  ;;  %5925 = vrot.lane.b32.xlu0 %v5758_v14, %s8253_s12 }
 0x8d1   : > { %5851 = vrot.lane.b32.xlu1 %v5836_v53, %s8253_s12  ;;  %5978 = vrot.lane.b32.xlu0 %v5890_v3, %s8253_s12 }
 0x8d5   : > { %5980 = vrot.lane.b32.xlu1 %v5892_v55, %s8253_s12  ;;  %6018 = vrot.lane.b32.xlu0 %v5950_v37, %s8253_s12  ;;  %v6059_v37 = vld [vmem:[#allocation3 + $0x70] sm:$0xff] }
 0x8d9   : > { %5982 = vrot.lane.b32.xlu1 %v5894_v58, %s8253_s12  ;;  %6020 = vrot.lane.b32.xlu0 %v9800_v28, %s8253_s12  ;;  %v6049_v58 = vld [vmem:[#allocation3 + $0x20] sm:$0xff] }
 0x8dd   : > { %5984 = vrot.lane.b32.xlu1 %v5969_v51, %s8253_s12 }
 0x919   : > { %v5912_v16 = vpop.permute.xlu0 %5911 }
 0x91a   : > { %5935 = vst.msk [vmem:[#allocation3 + $0x8] sm:$0xff] %vm680_vm12, %v5912_v16  ;;  %v6064_v16 = vld [vmem:[#allocation3 + $0x98] sm:$0xff] }
 0x91d   : > { %v5914_v41 = vpop.permute.xlu0 %5913 }
 0x91e   : > { %5936 = vst.msk [vmem:[#allocation3 + $0x30] sm:$0xff] %vm680_vm12, %v5914_v41  ;;  %v5838_v6 = vpop.permute.xlu1 %5837  ;;  %v6069_v41 = vld [vmem:[#allocation3 + $0xc0] sm:$0xff] }
 0x91f   : > { %5861 = vst.msk [vmem:[#allocation3] sm:$0xff] %vm680_vm12, %v5838_v6  ;;  %v6074_v6 = vld [vmem:[#allocation3 + $0xe8] sm:$0xff] }
 0x921   : > { %v6046_v31 = vld [vmem:[#allocation3 + $0x8] sm:$0xff] }
 0x922   : > { %v5916_v20 = vpop.permute.xlu0 %5915  ;;  %6357 = vmatprep.mubr.bf16.mxu1 %v6046_v31  ;;  %v5840_v42 = vpop.permute.xlu1 %5839  ;;  %v6084_v31 = vld [vmem:[#allocation3 + $0x138] sm:$0xff] }
 0x923   : > { %5937 = vst.msk [vmem:[#allocation3 + $0x58] sm:$0xff] %vm680_vm12, %v5916_v20  ;;  %5862 = vst.msk [vmem:[#allocation3 + $0x28] sm:$0xff] %vm680_vm12, %v5840_v42  ;;  %v6079_v20 = vld [vmem:[#allocation3 + $0x110] sm:$0xff] }
 0x925   : > { %v6051_v30 = vld [vmem:[#allocation3 + $0x30] sm:$0xff] }
 0x926   : > { %v5918_v28 = vpop.permute.xlu0 %5917  ;;  %v6045_v34 = vld [vmem:[#allocation3] sm:$0xff] }
 0x927   : > { %5938 = vst.msk [vmem:[#allocation3 + $0x80] sm:$0xff] %vm680_vm12, %v5918_v28  ;;  %v5842_v52 = vpop.permute.xlu1 %5841  ;;  %6358 = vmatmul.mubr.bf16.vlgmr.msra.gmra.mrb[192].mxu1 %v6045_v34 }
 0x928   : > { %5863 = vst.msk [vmem:[#allocation3 + $0x50] sm:$0xff] %vm680_vm12, %v5842_v52  ;;  %6024 = vst.msk [vmem:[#allocation3 + $0x18] sm:$0xff] %vm680_vm12, %v5842_v52  ;;  %7939 = vmatpush3.bf16.msra.mxu1 %v9908_v8  ;;  %6364 = vmatprep.mubr.bf16.mxu1 %v6051_v30  ;;  %v8208_v8 = vld [vmem:[%s10126_s5 + $0x118] sm:$0xff]  }
 0x929   : > { %7940 = vmatprep.subr.bf16.mxu1 %v8206_v17 }
 0x92a   : > { %v5971_v0 = vpop.permute.xlu0 %5970  ;;  %v6050_v46 = vld [vmem:[#allocation3 + $0x28] sm:$0xff]  ;;  %v6056_v48 = vld [vmem:[#allocation3 + $0x58] sm:$0xff] }
 0x92b   : > { %5994 = vst.msk [vmem:[#allocation3 + $0x10] sm:$0xff] %vm680_vm12, %v5971_v0  ;;  %v5844_v33 = vpop.permute.xlu1 %5843 }
 0x92c   : > { %5864 = vst.msk [vmem:[#allocation3 + $0x78] sm:$0xff] %vm680_vm12, %v5844_v33  ;;  %6025 = vst.msk [vmem:[#allocation3 + $0x40] sm:$0xff] %vm680_vm12, %v5844_v33  ;;  %7941 = vmatpush3.bf16.msra.mxu1 %v8206_v17 }
 0x92d   : > { %7942 = vmatprep.subr.bf16.mxu1 %v8207_v15 }
 0x92e   : > { %v6061_v43 = vld [vmem:[#allocation3 + $0x80] sm:$0xff] }
 0x92f   : > { %v5920_v36 = vpop.permute.xlu1 %5919  ;;  %v5846_v59 = vpop.permute.xlu0 %5845  ;;  %v6048_v49 = vld [vmem:[#allocation3 + $0x18] sm:$0xff]  ;;  %6365 = vmatmul.mubr.bf16.gmra.mrb[196].mxu1 %v6050_v46  ;;  %v6055_v1 = vld [vmem:[#allocation3 + $0x50] sm:$0xff] }
 0x930   : > { %5939 = vst.msk [vmem:[#allocation3 + $0xa8] sm:$0xff] %vm680_vm12, %v5920_v36  ;;  %5865 = vst.msk [vmem:[#allocation3 + $0xa0] sm:$0xff] %vm680_vm12, %v5846_v59  ;;  %6446 = vmatprep.mubr.bf16.mxu0 %v6048_v49  ;;  %6371 = vmatprep.mubr.bf16.mxu1 %v6056_v48 }
 0x931   : > { %6026 = vst.msk [vmem:[#allocation3 + $0x68] sm:$0xff] %vm680_vm12, %v5846_v59  ;;  %7943 = vmatpush3.bf16.msra.mxu1 %v8207_v15 }
 0x932   : > { %v6047_v10 = vld [vmem:[#allocation3 + $0x10] sm:$0xff]  ;;  %7944 = vmatprep.subr.bf16.mxu1 %v8208_v8 }
 0x933   : > { %6447 = vmatmul.mubr.bf16.vlgmr.msra.gmra.mrb[208].mxu0 %v6047_v10  ;;  %v5973_v23 = vpop.permute.xlu1 %5972  ;;  %v5922_v63 = vpop.permute.xlu0 %5921  ;;  %v6053_v54 = vld [vmem:[#allocation3 + $0x40] sm:$0xff]  ;;  %v6060_v24 = vld [vmem:[#allocation3 + $0x78] sm:$0xff] }
 0x934   : > { %5995 = vst.msk [vmem:[#allocation3 + $0x38] sm:$0xff] %vm680_vm12, %v5973_v23  ;;  %5940 = vst.msk [vmem:[#allocation3 + $0xd0] sm:$0xff] %vm680_vm12, %v5922_v63  ;;  %6453 = vmatprep.mubr.bf16.mxu0 %v6053_v54 }
 0x935   : > { %7945 = vmatpush3.bf16.msra.mxu1 %v8208_v8 }
 0x937   : > { %v5848_v12 = vpop.permute.xlu1 %5847  ;;  %v5975_v56 = vpop.permute.xlu0 %5974  ;;  %6372 = vmatmul.mubr.bf16.gmra.mrb[200].mxu1 %v6055_v1  ;;  %v6066_v62 = vld [vmem:[#allocation3 + $0xa8] sm:$0xff]  ;;  %v6065_v5 = vld [vmem:[#allocation3 + $0xa0] sm:$0xff] }
 0x938   : > { %5866 = vst.msk [vmem:[#allocation3 + $0xc8] sm:$0xff] %vm680_vm12, %v5848_v12  ;;  %6027 = vst.msk [vmem:[#allocation3 + $0x90] sm:$0xff] %vm680_vm12, %v5848_v12  ;;  %6378 = vmatprep.mubr.bf16.mxu1 %v6061_v43  ;;  %v6058_v29 = vld [vmem:[#allocation3 + $0x68] sm:$0xff] }
 0x939   : > { %5996 = vst.msk [vmem:[#allocation3 + $0x60] sm:$0xff] %vm680_vm12, %v5975_v56 }
 0x93b   : > { %v5924_v11 = vpop.permute.xlu1 %5923  ;;  %v5850_v26 = vpop.permute.xlu0 %5849  ;;  %v6052_v57 = vld [vmem:[#allocation3 + $0x38] sm:$0xff]  ;;  %v6071_v40 = vld [vmem:[#allocation3 + $0xd0] sm:$0xff] }
 0x93c   : > { %5941 = vst.msk [vmem:[#allocation3 + $0xf8] sm:$0xff] %vm680_vm12, %v5924_v11  ;;  %5867 = vst.msk [vmem:[#allocation3 + $0xf0] sm:$0xff] %vm680_vm12, %v5850_v26  ;;  %6454 = vmatmul.mubr.bf16.gmra.mrb[212].mxu0 %v6052_v57 }
 0x93d   : > { %6028 = vst.msk [vmem:[#allocation3 + $0xb8] sm:$0xff] %vm680_vm12, %v5850_v26  ;;  %6460 = vmatprep.mubr.bf16.mxu0 %v6058_v29 }
 0x93f   : > { %v5977_v18 = vpop.permute.xlu1 %5976  ;;  %v5926_v25 = vpop.permute.xlu0 %5925  ;;  %6379 = vmatmul.mubr.bf16.gmra.mrb[204].mxu1 %v6060_v24  ;;  %v6063_v3 = vld [vmem:[#allocation3 + $0x90] sm:$0xff]  ;;  %v6070_v13 = vld [vmem:[#allocation3 + $0xc8] sm:$0xff] }
 0x940   : > { %5997 = vst.msk [vmem:[#allocation3 + $0x88] sm:$0xff] %vm680_vm12, %v5977_v18  ;;  %5942 = vst.msk [vmem:[#allocation3 + $0x120] sm:$0xff] %vm680_vm12, %v5926_v25  ;;  %6385 = vmatprep.mubr.bf16.mxu1 %v6066_v62  ;;  %v6057_v2 = vld [vmem:[#allocation3 + $0x60] sm:$0xff] }
 0x943   : > { %v5852_v35 = vpop.permute.xlu1 %5851  ;;  %v5979_v45 = vpop.permute.xlu0 %5978  ;;  %v6076_v39 = vld [vmem:[#allocation3 + $0xf8] sm:$0xff]  ;;  %v6075_v47 = vld [vmem:[#allocation3 + $0xf0] sm:$0xff] }
 0x944   : > { %5868 = vst.msk [vmem:[#allocation3 + $0x118] sm:$0xff] %vm680_vm12, %v5852_v35  ;;  %6029 = vst.msk [vmem:[#allocation3 + $0xe0] sm:$0xff] %vm680_vm12, %v5852_v35  ;;  %6461 = vmatmul.mubr.bf16.gmra.mrb[216].mxu0 %v6057_v2  ;;  %v6068_v9 = vld [vmem:[#allocation3 + $0xb8] sm:$0xff] }
 0x945   : > { %5998 = vst.msk [vmem:[#allocation3 + $0xb0] sm:$0xff] %vm680_vm12, %v5979_v45  ;;  %6467 = vmatprep.mubr.bf16.mxu0 %v6063_v3 }
 0x947   : > { %v5981_v32 = vpop.permute.xlu1 %5980  ;;  %v6019_v22 = vpop.permute.xlu0 %6018  ;;  %6386 = vmatmul.mubr.bf16.gmra.mrb[208].mxu1 %v6065_v5  ;;  %v6062_v44 = vld [vmem:[#allocation3 + $0x88] sm:$0xff]  ;;  %v6081_v51 = vld [vmem:[#allocation3 + $0x120] sm:$0xff] }
 0x948   : > { %5999 = vst.msk [vmem:[#allocation3 + $0xd8] sm:$0xff] %vm680_vm12, %v5981_v32  ;;  %6030 = vst.msk [vmem:[#allocation3 + $0x108] sm:$0xff] %vm680_vm12, %v6019_v22  ;;  %6392 = vmatprep.mubr.bf16.mxu1 %v6071_v40 }
 0x94b   : > { %v5983_v14 = vpop.permute.xlu1 %5982  ;;  %v6021_v4 = vpop.permute.xlu0 %6020  ;;  %v6073_v19 = vld [vmem:[#allocation3 + $0xe0] sm:$0xff]  ;;  %v6080_v55 = vld [vmem:[#allocation3 + $0x118] sm:$0xff] }
 0x94c   : > { %6000 = vst.msk [vmem:[#allocation3 + $0x100] sm:$0xff] %vm680_vm12, %v5983_v14  ;;  %6468 = vmatmul.mubr.bf16.gmra.mrb[220].mxu0 %v6062_v44  ;;  %6031 = vst.msk [vmem:[#allocation3 + $0x130] sm:$0xff] %vm680_vm12, %v6021_v4  ;;  %v6067_v60 = vld [vmem:[#allocation3 + $0xb0] sm:$0xff] }
 0x94d   : > { %6474 = vmatprep.mubr.bf16.mxu0 %v6068_v9 }
 0x94f   : > { %v5985_v27 = vpop.permute.xlu1 %5984  ;;  %6393 = vmatmul.mubr.bf16.gmra.mrb[212].mxu1 %v6070_v13  ;;  %v6072_v50 = vld [vmem:[#allocation3 + $0xd8] sm:$0xff]  ;;  %v6078_v61 = vld [vmem:[#allocation3 + $0x108] sm:$0xff] }
 0x950   : > { %6001 = vst.msk [vmem:[#allocation3 + $0x128] sm:$0xff] %vm680_vm12, %v5985_v27  ;;  %6399 = vmatprep.mubr.bf16.mxu1 %v6076_v39 }
 0x953   : > { %v6083_v21 = vld [vmem:[#allocation3 + $0x130] sm:$0xff]  ;;  %v6077_v7 = vld [vmem:[#allocation3 + $0x100] sm:$0xff] }
 0x954   : > { %6475 = vmatmul.mubr.bf16.gmra.mrb[224].mxu0 %v6067_v60 }
 0x955   : > { %6481 = vmatprep.mubr.bf16.mxu0 %v6073_v19 }
 0x957   : > { %6400 = vmatmul.mubr.bf16.gmra.mrb[216].mxu1 %v6075_v47  ;;  %v6082_v53 = vld [vmem:[#allocation3 + $0x128] sm:$0xff] }
 0x958   : > { %6406 = vmatprep.mubr.bf16.mxu1 %v6081_v51 }
 0x95c   : > { %6482 = vmatmul.mubr.bf16.gmra.mrb[228].mxu0 %v6072_v50 }
 0x95d   : > { %6488 = vmatprep.mubr.bf16.mxu0 %v6078_v61 }
 0x95f   : > { %6407 = vmatmul.mubr.bf16.gmra.mrb[220].mxu1 %v6080_v55 }
 0x960   : > { %7946 = vmatprep.mubr.msk.bf16.mxu1 %vm295_vm4, %v6049_v58 }
 0x964   : > { %6489 = vmatmul.mubr.bf16.gmra.mrb[232].mxu0 %v6077_v7 }
 0x965   : > { %6495 = vmatprep.mubr.bf16.mxu0 %v6083_v21 }
 0x967   : > { %7947 = vmatmul.mubr.msk.bf16.vlgmr.msra.gmra.mrb[224].mxu1 %vm295_vm4, %v6054_v38 }
 0x968   : > { %7950 = vmatprep.mubr.msk.bf16.mxu1 %vm295_vm4, %v6059_v37 }
 0x96c   : > { %6496 = vmatmul.mubr.bf16.gmra.mrb[236].mxu0 %v6082_v53 }
 0x96f   : > { %7951 = vmatmul.mubr.msk.bf16.gmra.mrb[228].mxu1 %vm295_vm4, %v6064_v16 }
 0x970   : > { %7954 = vmatprep.mubr.msk.bf16.mxu1 %vm295_vm4, %v6069_v41 }
 0x977   : > { %7955 = vmatmul.mubr.msk.bf16.gmra.mrb[232].mxu1 %vm295_vm4, %v6074_v6 }
 0x978   : > { %7958 = vmatprep.mubr.msk.bf16.mxu1 %vm295_vm4, %v6079_v20 }
 0x97f   : > { %7959 = vmatmul.mubr.msk.bf16.gmra.mrb[236].mxu1 %vm295_vm4, %v6084_v31 }
 0x9fa   : > { %v7694_v42 = vpop.f32.mrb[192].mxu1 }
 0x9fb   : > { %v7695_v28 = vpop.f32.mrb[193].mxu1 }
 0x9fc   : > { %v7696_v17 = vadd.f32 %v7695_v28, %v7694_v42  ;;  %v7697_v52 = vpop.f32.mrb[194].mxu1 }
 0x9fd   : > { %v7698_v34 = vpop.f32.mrb[195].mxu1 }
 0xa02   : > { %v7700_v30 = vpop.f32.mrb[196].mxu1 }
 0xa03   : > { %v7701_v0 = vpop.f32.mrb[197].mxu1 }
 0xa04   : > { %v7702_v15 = vadd.f32 %v7701_v0, %v7700_v30  ;;  %v7703_v33 = vpop.f32.mrb[198].mxu1 }
 0xa05   : > { %v7704_v8 = vpop.f32.mrb[199].mxu1 }
 0xa06   : > { %v7758_v36 = vpop.f32.mrb[208].mxu0 }
 0xa07   : > { %v7759_v59 = vpop.f32.mrb[209].mxu0 }
 0xa08   : > { %v7760_v46 = vadd.f32 %v7759_v59, %v7758_v36  ;;  %v7761_v49 = vpop.f32.mrb[210].mxu0 }
 0xa09   : > { %v7762_v48 = vpop.f32.mrb[211].mxu0 }
 0xa0a   : > { %v10087_v10 = vadd.f32 %v7760_v46, %v7696_v17  ;;  %v7706_v23 = vpop.f32.mrb[200].mxu1 }
 0xa0b   : > { %v7707_v63 = vpop.f32.mrb[201].mxu1 }
 0xa0c   : > { %v7708_v54 = vadd.f32 %v7707_v63, %v7706_v23  ;;  %v7709_v12 = vpop.f32.mrb[202].mxu1 }
 0xa0d   : > { %v7710_v56 = vpop.f32.mrb[203].mxu1  ;;  %v6973_v12 = vld [vmem:[%s10127_s6] ss:$0 sm:$0xff] }
 0xa0f   : > { %v7764_v1 = vpop.f32.mrb[212].mxu0 }
 0xa10   : > { %v7765_v43 = vpop.f32.mrb[213].mxu0 }
 0xa11   : > { %v7766_v11 = vadd.f32 %v7765_v43, %v7764_v1  ;;  %v7767_v26 = vpop.f32.mrb[214].mxu0 }
 0xa12   : > { %v7768_v57 = vpop.f32.mrb[215].mxu0  ;;  %v7712_v29 = vpop.f32.mrb[204].mxu1 }
 0xa13   : > { %v6456_v18 = vadd.f32 %v7766_v11, %v7702_v15  ;;  %v7713_v25 = vpop.f32.mrb[205].mxu1 }
 0xa14   : > { %v7714_v24 = vadd.f32 %v7713_v25, %v7712_v29  ;;  %v7715_v62 = vpop.f32.mrb[206].mxu1 }
 0xa15   : > { %v7716_v35 = vpop.f32.mrb[207].mxu1 }
 0xa17   : > { %v7770_v45 = vpop.f32.mrb[216].mxu0 }
 0xa18   : > { %v7771_v2 = vpop.f32.mrb[217].mxu0 }
 0xa19   : > { %v7772_v3 = vadd.f32 %v7771_v2, %v7770_v45  ;;  %v7773_v32 = vpop.f32.mrb[218].mxu0 }
 0xa1a   : > { %v7774_v22 = vpop.f32.mrb[219].mxu0  ;;  %v7718_v5 = vpop.f32.mrb[208].mxu1 }
 0xa1b   : > { %v10089_v40 = vadd.f32 %v7772_v3, %v7708_v54  ;;  %v7719_v14 = vpop.f32.mrb[209].mxu1 }
 0xa1c   : > { %v7720_v44 = vadd.f32 %v7719_v14, %v7718_v5  ;;  %v7721_v4 = vpop.f32.mrb[210].mxu1 }
 0xa1d   : > { %v7722_v9 = vpop.f32.mrb[211].mxu1 }
 0xa1f   : > { %v7776_v27 = vpop.f32.mrb[220].mxu0 }
 0xa20   : > { %v7777_v13 = vpop.f32.mrb[221].mxu0 }
 0xa21   : > { %v7778_v39 = vadd.f32 %v7777_v13, %v7776_v27  ;;  %v7779_v60 = vpop.f32.mrb[222].mxu0 }
 0xa22   : > { %v7780_v19 = vpop.f32.mrb[223].mxu0  ;;  %v7724_v47 = vpop.f32.mrb[212].mxu1 }
 0xa23   : > { %v6470_v51 = vadd.f32 %v7778_v39, %v7714_v24  ;;  %v7725_v50 = vpop.f32.mrb[213].mxu1 }
 0xa24   : > { %v7726_v61 = vadd.f32 %v7725_v50, %v7724_v47  ;;  %v7727_v55 = vpop.f32.mrb[214].mxu1 }
 0xa25   : > { %v7728_v58 = vpop.f32.mrb[215].mxu1 }
 0xa27   : > { %v7782_v21 = vpop.f32.mrb[224].mxu0 }
 0xa28   : > { %v7783_v7 = vpop.f32.mrb[225].mxu0 }
 0xa29   : > { %v7784_v38 = vadd.f32 %v7783_v7, %v7782_v21  ;;  %v7785_v37 = vpop.f32.mrb[226].mxu0 }
 0xa2a   : > { %v7786_v53 = vpop.f32.mrb[227].mxu0  ;;  %v7730_v16 = vpop.f32.mrb[216].mxu1 }
 0xa2b   : > { %v6477_v41 = vadd.f32 %v7784_v38, %v7720_v44  ;;  %v7731_v6 = vpop.f32.mrb[217].mxu1 }
 0xa2c   : > { %v7732_v20 = vadd.f32 %v7731_v6, %v7730_v16  ;;  %v7733_v31 = vpop.f32.mrb[218].mxu1 }
 0xa2d   : > { %v7734_v42 = vpop.f32.mrb[219].mxu1 }
 0xa2f   : > { %v7788_v28 = vpop.f32.mrb[228].mxu0 }
 0xa30   : > { %v7789_v17 = vpop.f32.mrb[229].mxu0 }
 0xa31   : > { %v7790_v52 = vadd.f32 %v7789_v17, %v7788_v28  ;;  %v7791_v34 = vpop.f32.mrb[230].mxu0 }
 0xa32   : > { %v7792_v30 = vpop.f32.mrb[231].mxu0  ;;  %v7736_v0 = vpop.f32.mrb[220].mxu1 }
 0xa33   : > { %v6484_v15 = vadd.f32 %v7790_v52, %v7726_v61  ;;  %v7737_v33 = vpop.f32.mrb[221].mxu1 }
 0xa34   : > { %v7738_v8 = vadd.f32 %v7737_v33, %v7736_v0  ;;  %v7739_v36 = vpop.f32.mrb[222].mxu1 }
 0xa35   : > { %v7740_v59 = vpop.f32.mrb[223].mxu1 }
 0xa37   : > { %v7794_v46 = vpop.f32.mrb[232].mxu0 }
 0xa38   : > { %v7795_v49 = vpop.f32.mrb[233].mxu0 }
 0xa39   : > { %v7796_v48 = vadd.f32 %v7795_v49, %v7794_v46  ;;  %v7797_v23 = vpop.f32.mrb[234].mxu0 }
 0xa3a   : > { %v7798_v63 = vpop.f32.mrb[235].mxu0  ;;  %v7948_v54 = vpop.f32.mrb[224].mxu1 }
 0xa3b   : > { %v6491_v56 = vadd.f32 %v7796_v48, %v7732_v20  ;;  %v6545_v1 = vadd.f32 %v7948_v54, %v6456_v18  ;;  %v6537_v43 = vpop.f32.mrb[225].mxu1 }
 0xa3c   : > { %v6538_v11 = vadd.f32 %v6537_v43, %v10087_v10  ;;  %v7949_v26 = vpop.f32.mrb[226].mxu1 }
 0xa3d   : > { %v6600_v57 = vadd.f32 %v6973_v12, %v6545_v1  ;;  %v6540_v29 = vpop.f32.mrb[227].mxu1 }
 0xa3e   : > { %v6599_v25 = vadd.f32 %v6973_v12, %v6538_v11 }
 0xa3f   : > { %v7800_v24 = vpop.f32.mrb[236].mxu0  ;;  %6608 = vst.msk [vmem:[%s10098_s21 + $0x8] sm:$0xff] %vm295_vm4, %v6600_v57 }
 0xa40   : > { %v7801_v18 = vpop.f32.mrb[237].mxu0  ;;  %6607 = vst.msk [vmem:[%s10098_s21] sm:$0xff] %vm295_vm4, %v6599_v25 }
 0xa41   : > { %v7802_v62 = vadd.f32 %v7801_v18, %v7800_v24  ;;  %v7803_v35 = vpop.f32.mrb[238].mxu0 }
 0xa42   : > { %v7804_v45 = vpop.f32.mrb[239].mxu0  ;;  %v7952_v2 = vpop.f32.mrb[228].mxu1 }
 0xa43   : > { %v6498_v3 = vadd.f32 %v7802_v62, %v7738_v8  ;;  %v6559_v32 = vadd.f32 %v7952_v2, %v6470_v51  ;;  %v6551_v22 = vpop.f32.mrb[229].mxu1 }
 0xa44   : > { %v6552_v10 = vadd.f32 %v6551_v22, %v10089_v40  ;;  %v7953_v5 = vpop.f32.mrb[230].mxu1 }
 0xa45   : > { %v6602_v14 = vadd.f32 %v6973_v12, %v6559_v32  ;;  %v6554_v44 = vpop.f32.mrb[231].mxu1 }
 0xa46   : > { %v6601_v4 = vadd.f32 %v6973_v12, %v6552_v10 }
 0xa47   : > { %6610 = vst.msk [vmem:[%s10098_s21 + $0x18] sm:$0xff] %vm295_vm4, %v6602_v14 }
 0xa48   : > { %6609 = vst.msk [vmem:[%s10098_s21 + $0x10] sm:$0xff] %vm295_vm4, %v6601_v4 }
 0xa4a   : > { %v7956_v9 = vpop.f32.mrb[232].mxu1 }
 0xa4b   : > { %v6573_v27 = vadd.f32 %v7956_v9, %v6484_v15  ;;  %v6565_v13 = vpop.f32.mrb[233].mxu1 }
 0xa4c   : > { %v6566_v39 = vadd.f32 %v6565_v13, %v6477_v41  ;;  %v7957_v60 = vpop.f32.mrb[234].mxu1 }
 0xa4d   : > { %v6604_v19 = vadd.f32 %v6973_v12, %v6573_v27  ;;  %v6568_v47 = vpop.f32.mrb[235].mxu1 }
 0xa4e   : > { %v6603_v51 = vadd.f32 %v6973_v12, %v6566_v39 }
 0xa4f   : > { %6612 = vst.msk [vmem:[%s10098_s21 + $0x28] sm:$0xff] %vm295_vm4, %v6604_v19 }
 0xa50   : > { %6611 = vst.msk [vmem:[%s10098_s21 + $0x20] sm:$0xff] %vm295_vm4, %v6603_v51 }
 0xa52   : > { %v7960_v40 = vpop.f32.mrb[236].mxu1 }
 0xa53   : > { %v6587_v50 = vadd.f32 %v7960_v40, %v6498_v3  ;;  %v6579_v61 = vpop.f32.mrb[237].mxu1 }
 0xa54   : > { %v6580_v55 = vadd.f32 %v6579_v61, %v6491_v56  ;;  %v7961_v58 = vpop.f32.mrb[238].mxu1 }
 0xa55   : > { %v6606_v21 = vadd.f32 %v6973_v12, %v6587_v50  ;;  %v6582_v7 = vpop.f32.mrb[239].mxu1 }
 0xa56   : > { %v6605_v38 = vadd.f32 %v6973_v12, %v6580_v55 }
 0xa57   : > { %6614 = vst.msk [vmem:[%s10098_s21 + $0x38] sm:$0xff] %vm295_vm4, %v6606_v21 }
 0xa58   : > { %6613 = vst.msk [vmem:[%s10098_s21 + $0x30] sm:$0xff] %vm295_vm4, %v6605_v38 }
 0xa59 PF: > { %s18_s24 = sadd.s32 1, %s8247_s24  }
 0xa5a   : > { %p15_p3 = scmp.ge.s32.totalorder %s18_s24, 4  }
 0xa5c   :  { %17 = sbr.rel (!%p15_p3) target bundleno = 1 (0x1), region = 91 }
 0xa63   :  { %6636 = vsyncpa [#allocation5], 1 }
 0xa64   :  { %6638 = vsyncpa [#allocation5 + $0x1], 1 }

</bundles_post_ra>
